<compile_context>
chip_gen: v7x
topology: tpu7x:2x2x1
jax: 0.10.0
libtpu: 0.0.40
codegen_flags: <defaults>
</compile_context>

<pallas_src>
import functools

import jax
import jax.numpy as jnp
import numpy as np
from jax.experimental import pallas as pl
from jax.experimental.pallas import tpu as pltpu


# ------------------------------ fused kernel ------------------------------- #

def _inception_fused_kernel(
    x_ref, wpw_ref, bpw_ref,
    w2_ref, b2_ref, w3_ref, b3_ref, w4_ref, b4_ref,
    scale_ref, shift_ref,
    o_ref,
    pad_ref, col_ref, ybuf_ref,
    *, H, W, Cin, c1, c2, c3, c4, dmax):
    M = H * W
    Ct = c1 + c2 + c3 + c4

    # ---- all four 1x1 convs as ONE matmul (weights concatenated on Cout) ----
    xf = x_ref[0].reshape(M, Cin)
    p = jnp.dot(xf, wpw_ref[...], preferred_element_type=jnp.float32)
    p = jnp.maximum(p + bpw_ref[0][None, :], 0.0)          # (M, c1+c2+c3+c4)

    # Zero the halo scratch once per grid step; the halo region is never
    # written afterwards, so it stays zero for every branch.
    pad_ref[...] = jnp.zeros_like(pad_ref)

    def dilated_branch(act, w9_ref, b_ref, d, c):
        # act: (M, c) relu'd 1x1 output.  3x3 'same' conv with dilation d + ReLU
        # computed as im2col (K = 9*c) -> a single MXU matmul instead of 9 dots.
        pad_ref[dmax:dmax + H, dmax:dmax + W, 0:c] = act.reshape(H, W, c)
        for kh in range(3):
            for kw in range(3):
                t = kh * 3 + kw
                r0 = dmax + (kh - 1) * d
                q0 = dmax + (kw - 1) * d
                win = pad_ref[r0:r0 + H, q0:q0 + W, 0:c]
                col_ref[:, t * c:(t + 1) * c] = win.reshape(M, c)
        acc = jnp.dot(col_ref[:, 0:9 * c], w9_ref[...],
                      preferred_element_type=jnp.float32)
        return jnp.maximum(acc + b_ref[0][None, :], 0.0)    # (M, c)

    # Assemble the channel-concatenated result directly in VMEM (no HBM concat).
    ybuf_ref[:, 0:c1] = p[:, 0:c1]
    ybuf_ref[:, c1:c1 + c2] = dilated_branch(
        p[:, c1:c1 + c2], w2_ref, b2_ref, 1, c2)
    ybuf_ref[:, c1 + c2:c1 + c2 + c3] = dilated_branch(
        p[:, c1 + c2:c1 + c2 + c3], w3_ref, b3_ref, 2, c3)
    ybuf_ref[:, c1 + c2 + c3:Ct] = dilated_branch(
        p[:, c1 + c2 + c3:Ct], w4_ref, b4_ref, 3, c4)

    # ---- inference BatchNorm affine + 2x2/2 max-pool, fused epilogue ----
    # (BN kept as an explicit affine rather than folded into the conv weights so
    #  semantics stay exact even for negative gamma: relu(z)*s == relu(z*s) only
    #  holds for s >= 0.)
    y = ybuf_ref[...] * scale_ref[0][None, :] + shift_ref[0][None, :]
    y = y.reshape(H // 2, 2, W // 2, 2, Ct)
    y = jnp.max(y, axis=3)
    y = jnp.max(y, axis=1)
    o_ref[0] = y.astype(o_ref.dtype)


def inception_layer(x_nchw, p, eps=1e-5):
    # TODO(synk): BatchNorm is evaluated in inference mode (running stats);
    # training-mode batch statistics / running-stat updates are not reproduced.
    x = jnp.transpose(x_nchw, (0, 2, 3, 1)).astype(jnp.float32)  # NCHW -> NHWC
    N, H, W, Cin = x.shape
    c1 = p['w1'].shape[1]
    c2 = p['w2b'].shape[-1]
    c3 = p['w3b'].shape[-1]
    c4 = p['w4b'].shape[-1]
    Ct = c1 + c2 + c3 + c4
    dmax = 3
    cmax = max(c2, c3, c4)

    # Merged 1x1 weights/bias; BN folded to a single per-channel affine.
    w_pw = jnp.concatenate([p['w1'], p['w2a'], p['w3a'], p['w4a']], axis=1)
    b_pw = jnp.concatenate([p['b1'], p['b2a'], p['b3a'], p['b4a']])
    scale = p['gamma'] * jax.lax.rsqrt(p['var'] + eps)
    shift = p['beta'] - p['mean'] * scale
    w2 = p['w2b'].reshape(9 * c2, c2)   # (kh,kw,ci,co) -> im2col K ordering
    w3 = p['w3b'].reshape(9 * c3, c3)
    w4 = p['w4b'].reshape(9 * c4, c4)

    kern = functools.partial(_inception_fused_kernel, H=H, W=W, Cin=Cin,
                             c1=c1, c2=c2, c3=c3, c4=c4, dmax=dmax)
    rep2 = lambda n: (0, 0)
    out = pl.pallas_call(
        kern,
        out_shape=jax.ShapeDtypeStruct((N, H // 2, W // 2, Ct), x.dtype),
        grid=(N,),
        in_specs=[
            pl.BlockSpec((1, H, W, Cin), lambda n: (n, 0, 0, 0)),
            pl.BlockSpec((Cin, Ct), rep2),
            pl.BlockSpec((1, Ct), rep2),
            pl.BlockSpec((9 * c2, c2), rep2),
            pl.BlockSpec((1, c2), rep2),
            pl.BlockSpec((9 * c3, c3), rep2),
            pl.BlockSpec((1, c3), rep2),
            pl.BlockSpec((9 * c4, c4), rep2),
            pl.BlockSpec((1, c4), rep2),
            pl.BlockSpec((1, Ct), rep2),
            pl.BlockSpec((1, Ct), rep2),
        ],
        out_specs=pl.BlockSpec((1, H // 2, W // 2, Ct), lambda n: (n, 0, 0, 0)),
        scratch_shapes=[
            pltpu.VMEM((H + 2 * dmax, W + 2 * dmax, cmax), jnp.float32),  # halo
            pltpu.VMEM((H * W, 9 * cmax), jnp.float32),                   # im2col
            pltpu.VMEM((H * W, Ct), jnp.float32),                         # concat
        ],
        compiler_params=pltpu.CompilerParams(
            dimension_semantics=("parallel",),
            vmem_limit_bytes=32 * 1024 * 1024),
    )(x, w_pw, b_pw.reshape(1, Ct),
      w2, p['b2b'].reshape(1, c2),
      w3, p['b3b'].reshape(1, c3),
      w4, p['b4b'].reshape(1, c4),
      scale.reshape(1, Ct), shift.reshape(1, Ct))
    return jnp.transpose(out, (0, 3, 1, 2))                       # NHWC -> NCHW


# ------------------------------ params & ref -------------------------------- #

def init_params(key, in_ch, c1, c2, c3, c4):
    """Deterministic synthetic parameters (shapes follow the PyTorch __init__)."""
    ks = jax.random.split(key, 18)

    def w_pt(k, co, ci, kh, kw):      # PyTorch conv weight layout (Cout,Cin,kh,kw)
        return 0.1 * jax.random.normal(k, (co, ci, kh, kw), jnp.float32)

    def b_pt(k, co):
        return 0.1 * jax.random.normal(k, (co,), jnp.float32)

    p = {}
    p['w1'] = w_pt(ks[0], c1, in_ch, 1, 1)[:, :, 0, 0].T          # (Cin, Cout)
    p['b1'] = b_pt(ks[1], c1)
    p['w2a'] = w_pt(ks[2], c2, in_ch, 1, 1)[:, :, 0, 0].T
    p['b2a'] = b_pt(ks[3], c2)
    p['w2b'] = jnp.transpose(w_pt(ks[4], c2, c2, 3, 3), (2, 3, 1, 0))   # HWIO
    p['b2b'] = b_pt(ks[5], c2)
    p['w3a'] = w_pt(ks[6], c3, in_ch, 1, 1)[:, :, 0, 0].T
    p['b3a'] = b_pt(ks[7], c3)
    p['w3b'] = jnp.transpose(w_pt(ks[8], c3, c3, 3, 3), (2, 3, 1, 0))
    p['b3b'] = b_pt(ks[9], c3)
    p['w4a'] = w_pt(ks[10], c4, in_ch, 1, 1)[:, :, 0, 0].T
    p['b4a'] = b_pt(ks[11], c4)
    p['w4b'] = jnp.transpose(w_pt(ks[12], c4, c4, 3, 3), (2, 3, 1, 0))
    p['b4b'] = b_pt(ks[13], c4)
    ct = c1 + c2 + c3 + c4
    p['gamma'] = jax.random.uniform(ks[14], (ct,), jnp.float32, 0.5, 1.5)
    p['beta'] = 0.1 * jax.random.normal(ks[15], (ct,), jnp.float32)
    p['mean'] = 0.1 * jax.random.normal(ks[16], (ct,), jnp.float32)
    p['var'] = jax.random.uniform(ks[17], (ct,), jnp.float32, 0.5, 1.5)
    return p


def ref_forward(x_nchw, p, eps=1e-5):
    """Pure-JAX reference (same inference-mode BN semantics)."""
    x = jnp.transpose(x_nchw, (0, 2, 3, 1))

    def pw(x, w, b):
        return jax.nn.relu(jnp.einsum('nhwc,co->nhwo', x, w) + b)

    def dil(x, w, b, d):
        out = jax.lax.conv_general_dilated(
            x, w, window_strides=(1, 1), padding=[(d, d), (d, d)],
            rhs_dilation=(d, d), dimension_numbers=('NHWC', 'HWIO', 'NHWC'))
        return jax.nn.relu(out + b)

    x1 = pw(x, p['w1'], p['b1'])
    x2 = dil(pw(x, p['w2a'], p['b2a']), p['w2b'], p['b2b'], 1)
    x3 = dil(pw(x, p['w3a'], p['b3a']), p['w3b'], p['b3b'], 2)
    x4 = dil(pw(x, p['w4a'], p['b4a']), p['w4b'], p['b4b'], 3)
    y = jnp.concatenate([x1, x2, x3, x4], axis=-1)
    y = (y - p['mean']) / jnp.sqrt(p['var'] + eps) * p['gamma'] + p['beta']
    N, H, W, C = y.shape
    y = y.reshape(N, H // 2, 2, W // 2, 2, C).max(axis=(2, 4))
    return jnp.transpose(y, (0, 3, 1, 2))


if __name__ == "__main__":
    key = jax.random.PRNGKey(0)
    kx, kp = jax.random.split(key)

    in_ch, c1, c2, c3, c4 = 4, 2, 4, 4, 2
    x = jax.random.normal(kx, (2, in_ch, 16, 16), jnp.float32)   # NCHW like PyTorch
    params = init_params(kp, in_ch, c1, c2, c3, c4)

    out = jax.block_until_ready(jax.jit(inception_layer)(x, params))
    assert out.shape == (2, c1 + c2 + c3 + c4, 8, 8), out.shape

    ref = jax.block_until_ready(ref_forward(x, params))
    np.testing.assert_allclose(np.asarray(out), np.asarray(ref),
                               rtol=2e-3, atol=2e-3)
    print("KERNEL_OK")
</pallas_src>

<mosaic_0001>
module attributes {stable_mosaic.version = 11 : i64} {
  func.func @_inception_fused_kernel(%arg0: i32, %arg1: memref<1x16x16x4xf32, #tpu.memory_space<vmem>>, %arg2: memref<4x12xf32, #tpu.memory_space<vmem>>, %arg3: memref<1x12xf32, #tpu.memory_space<vmem>>, %arg4: memref<36x4xf32, #tpu.memory_space<vmem>>, %arg5: memref<1x4xf32, #tpu.memory_space<vmem>>, %arg6: memref<36x4xf32, #tpu.memory_space<vmem>>, %arg7: memref<1x4xf32, #tpu.memory_space<vmem>>, %arg8: memref<18x2xf32, #tpu.memory_space<vmem>>, %arg9: memref<1x2xf32, #tpu.memory_space<vmem>>, %arg10: memref<1x12xf32, #tpu.memory_space<vmem>>, %arg11: memref<1x12xf32, #tpu.memory_space<vmem>>, %arg12: memref<1x8x8x12xf32, #tpu.memory_space<vmem>>, %arg13: memref<22x22x4xf32, #tpu.memory_space<vmem>>, %arg14: memref<256x36xf32, #tpu.memory_space<vmem>>, %arg15: memref<256x12xf32, #tpu.memory_space<vmem>>) attributes {dimension_semantics = [#tpu.dimension_semantics<parallel>], iteration_bounds = array<i64: 2>, scalar_prefetch = 0 : i64, scratch_operands = 3 : i64, tpu.core_type = #tpu.core_type<tc>, window_params = [{transform_indices = @transform_0, window_bounds = array<i64: 1, 16, 16, 4>}, {pipeline_mode = #tpu.pipeline_mode<synchronous>, transform_indices = @transform_1, window_bounds = array<i64: 4, 12>}, {pipeline_mode = #tpu.pipeline_mode<synchronous>, transform_indices = @transform_2, window_bounds = array<i64: 1, 12>}, {pipeline_mode = #tpu.pipeline_mode<synchronous>, transform_indices = @transform_3, window_bounds = array<i64: 36, 4>}, {pipeline_mode = #tpu.pipeline_mode<synchronous>, transform_indices = @transform_4, window_bounds = array<i64: 1, 4>}, {pipeline_mode = #tpu.pipeline_mode<synchronous>, transform_indices = @transform_5, window_bounds = array<i64: 36, 4>}, {pipeline_mode = #tpu.pipeline_mode<synchronous>, transform_indices = @transform_6, window_bounds = array<i64: 1, 4>}, {pipeline_mode = #tpu.pipeline_mode<synchronous>, transform_indices = @transform_7, window_bounds = array<i64: 18, 2>}, {pipeline_mode = #tpu.pipeline_mode<synchronous>, transform_indices = @transform_8, window_bounds = array<i64: 1, 2>}, {pipeline_mode = #tpu.pipeline_mode<synchronous>, transform_indices = @transform_9, window_bounds = array<i64: 1, 12>}, {pipeline_mode = #tpu.pipeline_mode<synchronous>, transform_indices = @transform_10, window_bounds = array<i64: 1, 12>}, {transform_indices = @transform_11, window_bounds = array<i64: 1, 8, 8, 12>}]} {
    %c0 = arith.constant 0 : index
    %c0_0 = arith.constant 0 : index
    %c0_1 = arith.constant 0 : index
    %c0_2 = arith.constant 0 : index
    %0 = vector.load %arg1[%c0, %c0_0, %c0_1, %c0_2] : memref<1x16x16x4xf32, #tpu.memory_space<vmem>>, vector<1x16x16x4xf32>
    %1 = vector.shape_cast %0 : vector<1x16x16x4xf32> to vector<16x16x4xf32>
    %2 = vector.shape_cast %1 : vector<16x16x4xf32> to vector<256x4xf32>
    %c0_3 = arith.constant 0 : index
    %c0_4 = arith.constant 0 : index
    %3 = vector.load %arg2[%c0_3, %c0_4] : memref<4x12xf32, #tpu.memory_space<vmem>>, vector<4x12xf32>
    %cst = arith.constant dense<0.000000e+00> : vector<256x12xf32>
    %4 = tpu.matmul %2, %3, %cst {dimension_numbers = #tpu.dot_dimension_numbers<[1], [0], [0], [1], [0, 0, 1, 1], [], []>} : vector<256x4xf32>, vector<4x12xf32>, vector<256x12xf32> -> vector<256x12xf32>
    %c0_5 = arith.constant 0 : index
    %c0_6 = arith.constant 0 : index
    %5 = vector.load %arg3[%c0_5, %c0_6] : memref<1x12xf32, #tpu.memory_space<vmem>>, vector<1x12xf32>
    %6 = vector.shape_cast %5 : vector<1x12xf32> to vector<12xf32>
    %7 = vector.shape_cast %6 : vector<12xf32> to vector<1x12xf32>
    %8 = vector.broadcast %7 : vector<1x12xf32> to vector<256x12xf32>
    %9 = arith.addf %4, %8 : vector<256x12xf32>
    %cst_7 = arith.constant 0.000000e+00 : f32
    %10 = vector.broadcast %cst_7 : f32 to vector<256x12xf32>
    %11 = arith.maximumf %9, %10 : vector<256x12xf32>
    %cst_8 = arith.constant 0.000000e+00 : f32
    %12 = vector.broadcast %cst_8 : f32 to vector<22x22x4xf32>
    %c0_9 = arith.constant 0 : index
    %c0_10 = arith.constant 0 : index
    %c0_11 = arith.constant 0 : index
    %13 = vector.load %arg13[%c0_9, %c0_10, %c0_11] : memref<22x22x4xf32, #tpu.memory_space<vmem>>, vector<22x22x4xf32>
    tpu.vector_store %arg13[%c0_9, %c0_10, %c0_11], %12 {strides = array<i32>} : memref<22x22x4xf32, #tpu.memory_space<vmem>>, vector<22x22x4xf32>,
    %14 = vector.extract_strided_slice %11 {offsets = [0, 0], sizes = [256, 2], strides = [1, 1]} : vector<256x12xf32> to vector<256x2xf32>
    %c0_12 = arith.constant 0 : index
    %c0_13 = arith.constant 0 : index
    %15 = vector.load %arg15[%c0_12, %c0_13] : memref<256x12xf32, #tpu.memory_space<vmem>>, vector<256x2xf32>
    tpu.vector_store %arg15[%c0_12, %c0_13], %14 {strides = array<i32>} : memref<256x12xf32, #tpu.memory_space<vmem>>, vector<256x2xf32>,
    %16 = vector.extract_strided_slice %11 {offsets = [0, 2], sizes = [256, 4], strides = [1, 1]} : vector<256x12xf32> to vector<256x4xf32>
    %17 = vector.shape_cast %16 : vector<256x4xf32> to vector<16x16x4xf32>
    %c3 = arith.constant 3 : index
    %c3_14 = arith.constant 3 : index
    %c0_15 = arith.constant 0 : index
    %18 = vector.load %arg13[%c3, %c3_14, %c0_15] : memref<22x22x4xf32, #tpu.memory_space<vmem>>, vector<16x16x4xf32>
    tpu.vector_store %arg13[%c3, %c3_14, %c0_15], %17 {strides = array<i32>} : memref<22x22x4xf32, #tpu.memory_space<vmem>>, vector<16x16x4xf32>,
    %c2 = arith.constant 2 : index
    %c2_16 = arith.constant 2 : index
    %c0_17 = arith.constant 0 : index
    %19 = vector.load %arg13[%c2, %c2_16, %c0_17] : memref<22x22x4xf32, #tpu.memory_space<vmem>>, vector<16x16x4xf32>
    %20 = vector.shape_cast %19 : vector<16x16x4xf32> to vector<256x4xf32>
    %c0_18 = arith.constant 0 : index
    %c0_19 = arith.constant 0 : index
    %21 = vector.load %arg14[%c0_18, %c0_19] : memref<256x36xf32, #tpu.memory_space<vmem>>, vector<256x4xf32>
    tpu.vector_store %arg14[%c0_18, %c0_19], %20 {strides = array<i32>} : memref<256x36xf32, #tpu.memory_space<vmem>>, vector<256x4xf32>,
    %c2_20 = arith.constant 2 : index
    %c3_21 = arith.constant 3 : index
    %c0_22 = arith.constant 0 : index
    %22 = vector.load %arg13[%c2_20, %c3_21, %c0_22] : memref<22x22x4xf32, #tpu.memory_space<vmem>>, vector<16x16x4xf32>
    %23 = vector.shape_cast %22 : vector<16x16x4xf32> to vector<256x4xf32>
    %c0_23 = arith.constant 0 : index
    %c4 = arith.constant 4 : index
    %24 = vector.load %arg14[%c0_23, %c4] : memref<256x36xf32, #tpu.memory_space<vmem>>, vector<256x4xf32>
    tpu.vector_store %arg14[%c0_23, %c4], %23 {strides = array<i32>} : memref<256x36xf32, #tpu.memory_space<vmem>>, vector<256x4xf32>,
    %c2_24 = arith.constant 2 : index
    %c4_25 = arith.constant 4 : index
    %c0_26 = arith.constant 0 : index
    %25 = vector.load %arg13[%c2_24, %c4_25, %c0_26] : memref<22x22x4xf32, #tpu.memory_space<vmem>>, vector<16x16x4xf32>
    %26 = vector.shape_cast %25 : vector<16x16x4xf32> to vector<256x4xf32>
    %c0_27 = arith.constant 0 : index
    %c8 = arith.constant 8 : index
    %27 = vector.load %arg14[%c0_27, %c8] : memref<256x36xf32, #tpu.memory_space<vmem>>, vector<256x4xf32>
    tpu.vector_store %arg14[%c0_27, %c8], %26 {strides = array<i32>} : memref<256x36xf32, #tpu.memory_space<vmem>>, vector<256x4xf32>,
    %c3_28 = arith.constant 3 : index
    %c2_29 = arith.constant 2 : index
    %c0_30 = arith.constant 0 : index
    %28 = vector.load %arg13[%c3_28, %c2_29, %c0_30] : memref<22x22x4xf32, #tpu.memory_space<vmem>>, vector<16x16x4xf32>
    %29 = vector.shape_cast %28 : vector<16x16x4xf32> to vector<256x4xf32>
    %c0_31 = arith.constant 0 : index
    %c12 = arith.constant 12 : index
    %30 = vector.load %arg14[%c0_31, %c12] : memref<256x36xf32, #tpu.memory_space<vmem>>, vector<256x4xf32>
    tpu.vector_store %arg14[%c0_31, %c12], %29 {strides = array<i32>} : memref<256x36xf32, #tpu.memory_space<vmem>>, vector<256x4xf32>,
    %c3_32 = arith.constant 3 : index
    %c3_33 = arith.constant 3 : index
    %c0_34 = arith.constant 0 : index
    %31 = vector.load %arg13[%c3_32, %c3_33, %c0_34] : memref<22x22x4xf32, #tpu.memory_space<vmem>>, vector<16x16x4xf32>
    %32 = vector.shape_cast %31 : vector<16x16x4xf32> to vector<256x4xf32>
    %c0_35 = arith.constant 0 : index
    %c16 = arith.constant 16 : index
    %33 = vector.load %arg14[%c0_35, %c16] : memref<256x36xf32, #tpu.memory_space<vmem>>, vector<256x4xf32>
    tpu.vector_store %arg14[%c0_35, %c16], %32 {strides = array<i32>} : memref<256x36xf32, #tpu.memory_space<vmem>>, vector<256x4xf32>,
    %c3_36 = arith.constant 3 : index
    %c4_37 = arith.constant 4 : index
    %c0_38 = arith.constant 0 : index
    %34 = vector.load %arg13[%c3_36, %c4_37, %c0_38] : memref<22x22x4xf32, #tpu.memory_space<vmem>>, vector<16x16x4xf32>
    %35 = vector.shape_cast %34 : vector<16x16x4xf32> to vector<256x4xf32>
    %c0_39 = arith.constant 0 : index
    %c20 = arith.constant 20 : index
    %36 = vector.load %arg14[%c0_39, %c20] : memref<256x36xf32, #tpu.memory_space<vmem>>, vector<256x4xf32>
    tpu.vector_store %arg14[%c0_39, %c20], %35 {strides = array<i32>} : memref<256x36xf32, #tpu.memory_space<vmem>>, vector<256x4xf32>,
    %c4_40 = arith.constant 4 : index
    %c2_41 = arith.constant 2 : index
    %c0_42 = arith.constant 0 : index
    %37 = vector.load %arg13[%c4_40, %c2_41, %c0_42] : memref<22x22x4xf32, #tpu.memory_space<vmem>>, vector<16x16x4xf32>
    %38 = vector.shape_cast %37 : vector<16x16x4xf32> to vector<256x4xf32>
    %c0_43 = arith.constant 0 : index
    %c24 = arith.constant 24 : index
    %39 = vector.load %arg14[%c0_43, %c24] : memref<256x36xf32, #tpu.memory_space<vmem>>, vector<256x4xf32>
    tpu.vector_store %arg14[%c0_43, %c24], %38 {strides = array<i32>} : memref<256x36xf32, #tpu.memory_space<vmem>>, vector<256x4xf32>,
    %c4_44 = arith.constant 4 : index
    %c3_45 = arith.constant 3 : index
    %c0_46 = arith.constant 0 : index
    %40 = vector.load %arg13[%c4_44, %c3_45, %c0_46] : memref<22x22x4xf32, #tpu.memory_space<vmem>>, vector<16x16x4xf32>
    %41 = vector.shape_cast %40 : vector<16x16x4xf32> to vector<256x4xf32>
    %c0_47 = arith.constant 0 : index
    %c28 = arith.constant 28 : index
    %42 = vector.load %arg14[%c0_47, %c28] : memref<256x36xf32, #tpu.memory_space<vmem>>, vector<256x4xf32>
    tpu.vector_store %arg14[%c0_47, %c28], %41 {strides = array<i32>} : memref<256x36xf32, #tpu.memory_space<vmem>>, vector<256x4xf32>,
    %c4_48 = arith.constant 4 : index
    %c4_49 = arith.constant 4 : index
    %c0_50 = arith.constant 0 : index
    %43 = vector.load %arg13[%c4_48, %c4_49, %c0_50] : memref<22x22x4xf32, #tpu.memory_space<vmem>>, vector<16x16x4xf32>
    %44 = vector.shape_cast %43 : vector<16x16x4xf32> to vector<256x4xf32>
    %c0_51 = arith.constant 0 : index
    %c32 = arith.constant 32 : index
    %45 = vector.load %arg14[%c0_51, %c32] : memref<256x36xf32, #tpu.memory_space<vmem>>, vector<256x4xf32>
    tpu.vector_store %arg14[%c0_51, %c32], %44 {strides = array<i32>} : memref<256x36xf32, #tpu.memory_space<vmem>>, vector<256x4xf32>,
    %c0_52 = arith.constant 0 : index
    %c0_53 = arith.constant 0 : index
    %46 = vector.load %arg14[%c0_52, %c0_53] : memref<256x36xf32, #tpu.memory_space<vmem>>, vector<256x36xf32>
    %c0_54 = arith.constant 0 : index
    %c0_55 = arith.constant 0 : index
    %47 = vector.load %arg4[%c0_54, %c0_55] : memref<36x4xf32, #tpu.memory_space<vmem>>, vector<36x4xf32>
    %cst_56 = arith.constant dense<0.000000e+00> : vector<256x4xf32>
    %48 = tpu.matmul %46, %47, %cst_56 {dimension_numbers = #tpu.dot_dimension_numbers<[1], [0], [0], [1], [0, 0, 1, 1], [], []>} : vector<256x36xf32>, vector<36x4xf32>, vector<256x4xf32> -> vector<256x4xf32>
    %c0_57 = arith.constant 0 : index
    %c0_58 = arith.constant 0 : index
    %49 = vector.load %arg5[%c0_57, %c0_58] : memref<1x4xf32, #tpu.memory_space<vmem>>, vector<1x4xf32>
    %50 = vector.shape_cast %49 : vector<1x4xf32> to vector<4xf32>
    %51 = vector.shape_cast %50 : vector<4xf32> to vector<1x4xf32>
    %52 = vector.broadcast %51 : vector<1x4xf32> to vector<256x4xf32>
    %53 = arith.addf %48, %52 : vector<256x4xf32>
    %cst_59 = arith.constant 0.000000e+00 : f32
    %54 = vector.broadcast %cst_59 : f32 to vector<256x4xf32>
    %55 = arith.maximumf %53, %54 : vector<256x4xf32>
    %c0_60 = arith.constant 0 : index
    %c2_61 = arith.constant 2 : index
    %56 = vector.load %arg15[%c0_60, %c2_61] : memref<256x12xf32, #tpu.memory_space<vmem>>, vector<256x4xf32>
    tpu.vector_store %arg15[%c0_60, %c2_61], %55 {strides = array<i32>} : memref<256x12xf32, #tpu.memory_space<vmem>>, vector<256x4xf32>,
    %57 = vector.extract_strided_slice %11 {offsets = [0, 6], sizes = [256, 4], strides = [1, 1]} : vector<256x12xf32> to vector<256x4xf32>
    %58 = vector.shape_cast %57 : vector<256x4xf32> to vector<16x16x4xf32>
    %c3_62 = arith.constant 3 : index
    %c3_63 = arith.constant 3 : index
    %c0_64 = arith.constant 0 : index
    %59 = vector.load %arg13[%c3_62, %c3_63, %c0_64] : memref<22x22x4xf32, #tpu.memory_space<vmem>>, vector<16x16x4xf32>
    tpu.vector_store %arg13[%c3_62, %c3_63, %c0_64], %58 {strides = array<i32>} : memref<22x22x4xf32, #tpu.memory_space<vmem>>, vector<16x16x4xf32>,
    %c1 = arith.constant 1 : index
    %c1_65 = arith.constant 1 : index
    %c0_66 = arith.constant 0 : index
    %60 = vector.load %arg13[%c1, %c1_65, %c0_66] : memref<22x22x4xf32, #tpu.memory_space<vmem>>, vector<16x16x4xf32>
    %61 = vector.shape_cast %60 : vector<16x16x4xf32> to vector<256x4xf32>
    %c0_67 = arith.constant 0 : index
    %c0_68 = arith.constant 0 : index
    %62 = vector.load %arg14[%c0_67, %c0_68] : memref<256x36xf32, #tpu.memory_space<vmem>>, vector<256x4xf32>
    tpu.vector_store %arg14[%c0_67, %c0_68], %61 {strides = array<i32>} : memref<256x36xf32, #tpu.memory_space<vmem>>, vector<256x4xf32>,
    %c1_69 = arith.constant 1 : index
    %c3_70 = arith.constant 3 : index
    %c0_71 = arith.constant 0 : index
    %63 = vector.load %arg13[%c1_69, %c3_70, %c0_71] : memref<22x22x4xf32, #tpu.memory_space<vmem>>, vector<16x16x4xf32>
    %64 = vector.shape_cast %63 : vector<16x16x4xf32> to vector<256x4xf32>
    %c0_72 = arith.constant 0 : index
    %c4_73 = arith.constant 4 : index
    %65 = vector.load %arg14[%c0_72, %c4_73] : memref<256x36xf32, #tpu.memory_space<vmem>>, vector<256x4xf32>
    tpu.vector_store %arg14[%c0_72, %c4_73], %64 {strides = array<i32>} : memref<256x36xf32, #tpu.memory_space<vmem>>, vector<256x4xf32>,
    %c1_74 = arith.constant 1 : index
    %c5 = arith.constant 5 : index
    %c0_75 = arith.constant 0 : index
    %66 = vector.load %arg13[%c1_74, %c5, %c0_75] : memref<22x22x4xf32, #tpu.memory_space<vmem>>, vector<16x16x4xf32>
    %67 = vector.shape_cast %66 : vector<16x16x4xf32> to vector<256x4xf32>
    %c0_76 = arith.constant 0 : index
    %c8_77 = arith.constant 8 : index
    %68 = vector.load %arg14[%c0_76, %c8_77] : memref<256x36xf32, #tpu.memory_space<vmem>>, vector<256x4xf32>
    tpu.vector_store %arg14[%c0_76, %c8_77], %67 {strides = array<i32>} : memref<256x36xf32, #tpu.memory_space<vmem>>, vector<256x4xf32>,
    %c3_78 = arith.constant 3 : index
    %c1_79 = arith.constant 1 : index
    %c0_80 = arith.constant 0 : index
    %69 = vector.load %arg13[%c3_78, %c1_79, %c0_80] : memref<22x22x4xf32, #tpu.memory_space<vmem>>, vector<16x16x4xf32>
    %70 = vector.shape_cast %69 : vector<16x16x4xf32> to vector<256x4xf32>
    %c0_81 = arith.constant 0 : index
    %c12_82 = arith.constant 12 : index
    %71 = vector.load %arg14[%c0_81, %c12_82] : memref<256x36xf32, #tpu.memory_space<vmem>>, vector<256x4xf32>
    tpu.vector_store %arg14[%c0_81, %c12_82], %70 {strides = array<i32>} : memref<256x36xf32, #tpu.memory_space<vmem>>, vector<256x4xf32>,
    %c3_83 = arith.constant 3 : index
    %c3_84 = arith.constant 3 : index
    %c0_85 = arith.constant 0 : index
    %72 = vector.load %arg13[%c3_83, %c3_84, %c0_85] : memref<22x22x4xf32, #tpu.memory_space<vmem>>, vector<16x16x4xf32>
    %73 = vector.shape_cast %72 : vector<16x16x4xf32> to vector<256x4xf32>
    %c0_86 = arith.constant 0 : index
    %c16_87 = arith.constant 16 : index
    %74 = vector.load %arg14[%c0_86, %c16_87] : memref<256x36xf32, #tpu.memory_space<vmem>>, vector<256x4xf32>
    tpu.vector_store %arg14[%c0_86, %c16_87], %73 {strides = array<i32>} : memref<256x36xf32, #tpu.memory_space<vmem>>, vector<256x4xf32>,
    %c3_88 = arith.constant 3 : index
    %c5_89 = arith.constant 5 : index
    %c0_90 = arith.constant 0 : index
    %75 = vector.load %arg13[%c3_88, %c5_89, %c0_90] : memref<22x22x4xf32, #tpu.memory_space<vmem>>, vector<16x16x4xf32>
    %76 = vector.shape_cast %75 : vector<16x16x4xf32> to vector<256x4xf32>
    %c0_91 = arith.constant 0 : index
    %c20_92 = arith.constant 20 : index
    %77 = vector.load %arg14[%c0_91, %c20_92] : memref<256x36xf32, #tpu.memory_space<vmem>>, vector<256x4xf32>
    tpu.vector_store %arg14[%c0_91, %c20_92], %76 {strides = array<i32>} : memref<256x36xf32, #tpu.memory_space<vmem>>, vector<256x4xf32>,
    %c5_93 = arith.constant 5 : index
    %c1_94 = arith.constant 1 : index
    %c0_95 = arith.constant 0 : index
    %78 = vector.load %arg13[%c5_93, %c1_94, %c0_95] : memref<22x22x4xf32, #tpu.memory_space<vmem>>, vector<16x16x4xf32>
    %79 = vector.shape_cast %78 : vector<16x16x4xf32> to vector<256x4xf32>
    %c0_96 = arith.constant 0 : index
    %c24_97 = arith.constant 24 : index
    %80 = vector.load %arg14[%c0_96, %c24_97] : memref<256x36xf32, #tpu.memory_space<vmem>>, vector<256x4xf32>
    tpu.vector_store %arg14[%c0_96, %c24_97], %79 {strides = array<i32>} : memref<256x36xf32, #tpu.memory_space<vmem>>, vector<256x4xf32>,
    %c5_98 = arith.constant 5 : index
    %c3_99 = arith.constant 3 : index
    %c0_100 = arith.constant 0 : index
    %81 = vector.load %arg13[%c5_98, %c3_99, %c0_100] : memref<22x22x4xf32, #tpu.memory_space<vmem>>, vector<16x16x4xf32>
    %82 = vector.shape_cast %81 : vector<16x16x4xf32> to vector<256x4xf32>
    %c0_101 = arith.constant 0 : index
    %c28_102 = arith.constant 28 : index
    %83 = vector.load %arg14[%c0_101, %c28_102] : memref<256x36xf32, #tpu.memory_space<vmem>>, vector<256x4xf32>
    tpu.vector_store %arg14[%c0_101, %c28_102], %82 {strides = array<i32>} : memref<256x36xf32, #tpu.memory_space<vmem>>, vector<256x4xf32>,
    %c5_103 = arith.constant 5 : index
    %c5_104 = arith.constant 5 : index
    %c0_105 = arith.constant 0 : index
    %84 = vector.load %arg13[%c5_103, %c5_104, %c0_105] : memref<22x22x4xf32, #tpu.memory_space<vmem>>, vector<16x16x4xf32>
    %85 = vector.shape_cast %84 : vector<16x16x4xf32> to vector<256x4xf32>
    %c0_106 = arith.constant 0 : index
    %c32_107 = arith.constant 32 : index
    %86 = vector.load %arg14[%c0_106, %c32_107] : memref<256x36xf32, #tpu.memory_space<vmem>>, vector<256x4xf32>
    tpu.vector_store %arg14[%c0_106, %c32_107], %85 {strides = array<i32>} : memref<256x36xf32, #tpu.memory_space<vmem>>, vector<256x4xf32>,
    %c0_108 = arith.constant 0 : index
    %c0_109 = arith.constant 0 : index
    %87 = vector.load %arg14[%c0_108, %c0_109] : memref<256x36xf32, #tpu.memory_space<vmem>>, vector<256x36xf32>
    %c0_110 = arith.constant 0 : index
    %c0_111 = arith.constant 0 : index
    %88 = vector.load %arg6[%c0_110, %c0_111] : memref<36x4xf32, #tpu.memory_space<vmem>>, vector<36x4xf32>
    %cst_112 = arith.constant dense<0.000000e+00> : vector<256x4xf32>
    %89 = tpu.matmul %87, %88, %cst_112 {dimension_numbers = #tpu.dot_dimension_numbers<[1], [0], [0], [1], [0, 0, 1, 1], [], []>} : vector<256x36xf32>, vector<36x4xf32>, vector<256x4xf32> -> vector<256x4xf32>
    %c0_113 = arith.constant 0 : index
    %c0_114 = arith.constant 0 : index
    %90 = vector.load %arg7[%c0_113, %c0_114] : memref<1x4xf32, #tpu.memory_space<vmem>>, vector<1x4xf32>
    %91 = vector.shape_cast %90 : vector<1x4xf32> to vector<4xf32>
    %92 = vector.shape_cast %91 : vector<4xf32> to vector<1x4xf32>
    %93 = vector.broadcast %92 : vector<1x4xf32> to vector<256x4xf32>
    %94 = arith.addf %89, %93 : vector<256x4xf32>
    %cst_115 = arith.constant 0.000000e+00 : f32
    %95 = vector.broadcast %cst_115 : f32 to vector<256x4xf32>
    %96 = arith.maximumf %94, %95 : vector<256x4xf32>
    %c0_116 = arith.constant 0 : index
    %c6 = arith.constant 6 : index
    %97 = vector.load %arg15[%c0_116, %c6] : memref<256x12xf32, #tpu.memory_space<vmem>>, vector<256x4xf32>
    tpu.vector_store %arg15[%c0_116, %c6], %96 {strides = array<i32>} : memref<256x12xf32, #tpu.memory_space<vmem>>, vector<256x4xf32>,
    %98 = vector.extract_strided_slice %11 {offsets = [0, 10], sizes = [256, 2], strides = [1, 1]} : vector<256x12xf32> to vector<256x2xf32>
    %99 = vector.shape_cast %98 : vector<256x2xf32> to vector<16x16x2xf32>
    %c3_117 = arith.constant 3 : index
    %c3_118 = arith.constant 3 : index
    %c0_119 = arith.constant 0 : index
    %100 = vector.load %arg13[%c3_117, %c3_118, %c0_119] : memref<22x22x4xf32, #tpu.memory_space<vmem>>, vector<16x16x2xf32>
    tpu.vector_store %arg13[%c3_117, %c3_118, %c0_119], %99 {strides = array<i32>} : memref<22x22x4xf32, #tpu.memory_space<vmem>>, vector<16x16x2xf32>,
    %c0_120 = arith.constant 0 : index
    %c0_121 = arith.constant 0 : index
    %c0_122 = arith.constant 0 : index
    %101 = vector.load %arg13[%c0_120, %c0_121, %c0_122] : memref<22x22x4xf32, #tpu.memory_space<vmem>>, vector<16x16x2xf32>
    %102 = vector.shape_cast %101 : vector<16x16x2xf32> to vector<256x2xf32>
    %c0_123 = arith.constant 0 : index
    %c0_124 = arith.constant 0 : index
    %103 = vector.load %arg14[%c0_123, %c0_124] : memref<256x36xf32, #tpu.memory_space<vmem>>, vector<256x2xf32>
    tpu.vector_store %arg14[%c0_123, %c0_124], %102 {strides = array<i32>} : memref<256x36xf32, #tpu.memory_space<vmem>>, vector<256x2xf32>,
    %c0_125 = arith.constant 0 : index
    %c3_126 = arith.constant 3 : index
    %c0_127 = arith.constant 0 : index
    %104 = vector.load %arg13[%c0_125, %c3_126, %c0_127] : memref<22x22x4xf32, #tpu.memory_space<vmem>>, vector<16x16x2xf32>
    %105 = vector.shape_cast %104 : vector<16x16x2xf32> to vector<256x2xf32>
    %c0_128 = arith.constant 0 : index
    %c2_129 = arith.constant 2 : index
    %106 = vector.load %arg14[%c0_128, %c2_129] : memref<256x36xf32, #tpu.memory_space<vmem>>, vector<256x2xf32>
    tpu.vector_store %arg14[%c0_128, %c2_129], %105 {strides = array<i32>} : memref<256x36xf32, #tpu.memory_space<vmem>>, vector<256x2xf32>,
    %c0_130 = arith.constant 0 : index
    %c6_131 = arith.constant 6 : index
    %c0_132 = arith.constant 0 : index
    %107 = vector.load %arg13[%c0_130, %c6_131, %c0_132] : memref<22x22x4xf32, #tpu.memory_space<vmem>>, vector<16x16x2xf32>
    %108 = vector.shape_cast %107 : vector<16x16x2xf32> to vector<256x2xf32>
    %c0_133 = arith.constant 0 : index
    %c4_134 = arith.constant 4 : index
    %109 = vector.load %arg14[%c0_133, %c4_134] : memref<256x36xf32, #tpu.memory_space<vmem>>, vector<256x2xf32>
    tpu.vector_store %arg14[%c0_133, %c4_134], %108 {strides = array<i32>} : memref<256x36xf32, #tpu.memory_space<vmem>>, vector<256x2xf32>,
    %c3_135 = arith.constant 3 : index
    %c0_136 = arith.constant 0 : index
    %c0_137 = arith.constant 0 : index
    %110 = vector.load %arg13[%c3_135, %c0_136, %c0_137] : memref<22x22x4xf32, #tpu.memory_space<vmem>>, vector<16x16x2xf32>
    %111 = vector.shape_cast %110 : vector<16x16x2xf32> to vector<256x2xf32>
    %c0_138 = arith.constant 0 : index
    %c6_139 = arith.constant 6 : index
    %112 = vector.load %arg14[%c0_138, %c6_139] : memref<256x36xf32, #tpu.memory_space<vmem>>, vector<256x2xf32>
    tpu.vector_store %arg14[%c0_138, %c6_139], %111 {strides = array<i32>} : memref<256x36xf32, #tpu.memory_space<vmem>>, vector<256x2xf32>,
    %c3_140 = arith.constant 3 : index
    %c3_141 = arith.constant 3 : index
    %c0_142 = arith.constant 0 : index
    %113 = vector.load %arg13[%c3_140, %c3_141, %c0_142] : memref<22x22x4xf32, #tpu.memory_space<vmem>>, vector<16x16x2xf32>
    %114 = vector.shape_cast %113 : vector<16x16x2xf32> to vector<256x2xf32>
    %c0_143 = arith.constant 0 : index
    %c8_144 = arith.constant 8 : index
    %115 = vector.load %arg14[%c0_143, %c8_144] : memref<256x36xf32, #tpu.memory_space<vmem>>, vector<256x2xf32>
    tpu.vector_store %arg14[%c0_143, %c8_144], %114 {strides = array<i32>} : memref<256x36xf32, #tpu.memory_space<vmem>>, vector<256x2xf32>,
    %c3_145 = arith.constant 3 : index
    %c6_146 = arith.constant 6 : index
    %c0_147 = arith.constant 0 : index
    %116 = vector.load %arg13[%c3_145, %c6_146, %c0_147] : memref<22x22x4xf32, #tpu.memory_space<vmem>>, vector<16x16x2xf32>
    %117 = vector.shape_cast %116 : vector<16x16x2xf32> to vector<256x2xf32>
    %c0_148 = arith.constant 0 : index
    %c10 = arith.constant 10 : index
    %118 = vector.load %arg14[%c0_148, %c10] : memref<256x36xf32, #tpu.memory_space<vmem>>, vector<256x2xf32>
    tpu.vector_store %arg14[%c0_148, %c10], %117 {strides = array<i32>} : memref<256x36xf32, #tpu.memory_space<vmem>>, vector<256x2xf32>,
    %c6_149 = arith.constant 6 : index
    %c0_150 = arith.constant 0 : index
    %c0_151 = arith.constant 0 : index
    %119 = vector.load %arg13[%c6_149, %c0_150, %c0_151] : memref<22x22x4xf32, #tpu.memory_space<vmem>>, vector<16x16x2xf32>
    %120 = vector.shape_cast %119 : vector<16x16x2xf32> to vector<256x2xf32>
    %c0_152 = arith.constant 0 : index
    %c12_153 = arith.constant 12 : index
    %121 = vector.load %arg14[%c0_152, %c12_153] : memref<256x36xf32, #tpu.memory_space<vmem>>, vector<256x2xf32>
    tpu.vector_store %arg14[%c0_152, %c12_153], %120 {strides = array<i32>} : memref<256x36xf32, #tpu.memory_space<vmem>>, vector<256x2xf32>,
    %c6_154 = arith.constant 6 : index
    %c3_155 = arith.constant 3 : index
    %c0_156 = arith.constant 0 : index
    %122 = vector.load %arg13[%c6_154, %c3_155, %c0_156] : memref<22x22x4xf32, #tpu.memory_space<vmem>>, vector<16x16x2xf32>
    %123 = vector.shape_cast %122 : vector<16x16x2xf32> to vector<256x2xf32>
    %c0_157 = arith.constant 0 : index
    %c14 = arith.constant 14 : index
    %124 = vector.load %arg14[%c0_157, %c14] : memref<256x36xf32, #tpu.memory_space<vmem>>, vector<256x2xf32>
    tpu.vector_store %arg14[%c0_157, %c14], %123 {strides = array<i32>} : memref<256x36xf32, #tpu.memory_space<vmem>>, vector<256x2xf32>,
    %c6_158 = arith.constant 6 : index
    %c6_159 = arith.constant 6 : index
    %c0_160 = arith.constant 0 : index
    %125 = vector.load %arg13[%c6_158, %c6_159, %c0_160] : memref<22x22x4xf32, #tpu.memory_space<vmem>>, vector<16x16x2xf32>
    %126 = vector.shape_cast %125 : vector<16x16x2xf32> to vector<256x2xf32>
    %c0_161 = arith.constant 0 : index
    %c16_162 = arith.constant 16 : index
    %127 = vector.load %arg14[%c0_161, %c16_162] : memref<256x36xf32, #tpu.memory_space<vmem>>, vector<256x2xf32>
    tpu.vector_store %arg14[%c0_161, %c16_162], %126 {strides = array<i32>} : memref<256x36xf32, #tpu.memory_space<vmem>>, vector<256x2xf32>,
    %c0_163 = arith.constant 0 : index
    %c0_164 = arith.constant 0 : index
    %128 = vector.load %arg14[%c0_163, %c0_164] : memref<256x36xf32, #tpu.memory_space<vmem>>, vector<256x18xf32>
    %c0_165 = arith.constant 0 : index
    %c0_166 = arith.constant 0 : index
    %129 = vector.load %arg8[%c0_165, %c0_166] : memref<18x2xf32, #tpu.memory_space<vmem>>, vector<18x2xf32>
    %cst_167 = arith.constant dense<0.000000e+00> : vector<256x2xf32>
    %130 = tpu.matmul %128, %129, %cst_167 {dimension_numbers = #tpu.dot_dimension_numbers<[1], [0], [0], [1], [0, 0, 1, 1], [], []>} : vector<256x18xf32>, vector<18x2xf32>, vector<256x2xf32> -> vector<256x2xf32>
    %c0_168 = arith.constant 0 : index
    %c0_169 = arith.constant 0 : index
    %131 = vector.load %arg9[%c0_168, %c0_169] : memref<1x2xf32, #tpu.memory_space<vmem>>, vector<1x2xf32>
    %132 = vector.shape_cast %131 : vector<1x2xf32> to vector<2xf32>
    %133 = vector.shape_cast %132 : vector<2xf32> to vector<1x2xf32>
    %134 = vector.broadcast %133 : vector<1x2xf32> to vector<256x2xf32>
    %135 = arith.addf %130, %134 : vector<256x2xf32>
    %cst_170 = arith.constant 0.000000e+00 : f32
    %136 = vector.broadcast %cst_170 : f32 to vector<256x2xf32>
    %137 = arith.maximumf %135, %136 : vector<256x2xf32>
    %c0_171 = arith.constant 0 : index
    %c10_172 = arith.constant 10 : index
    %138 = vector.load %arg15[%c0_171, %c10_172] : memref<256x12xf32, #tpu.memory_space<vmem>>, vector<256x2xf32>
    tpu.vector_store %arg15[%c0_171, %c10_172], %137 {strides = array<i32>} : memref<256x12xf32, #tpu.memory_space<vmem>>, vector<256x2xf32>,
    %c0_173 = arith.constant 0 : index
    %c0_174 = arith.constant 0 : index
    %139 = vector.load %arg15[%c0_173, %c0_174] : memref<256x12xf32, #tpu.memory_space<vmem>>, vector<256x12xf32>
    %c0_175 = arith.constant 0 : index
    %c0_176 = arith.constant 0 : index
    %140 = vector.load %arg10[%c0_175, %c0_176] : memref<1x12xf32, #tpu.memory_space<vmem>>, vector<1x12xf32>
    %141 = vector.shape_cast %140 : vector<1x12xf32> to vector<12xf32>
    %142 = vector.shape_cast %141 : vector<12xf32> to vector<1x12xf32>
    %143 = vector.broadcast %142 : vector<1x12xf32> to vector<256x12xf32>
    %144 = arith.mulf %139, %143 : vector<256x12xf32>
    %c0_177 = arith.constant 0 : index
    %c0_178 = arith.constant 0 : index
    %145 = vector.load %arg11[%c0_177, %c0_178] : memref<1x12xf32, #tpu.memory_space<vmem>>, vector<1x12xf32>
    %146 = vector.shape_cast %145 : vector<1x12xf32> to vector<12xf32>
    %147 = vector.shape_cast %146 : vector<12xf32> to vector<1x12xf32>
    %148 = vector.broadcast %147 : vector<1x12xf32> to vector<256x12xf32>
    %149 = arith.addf %144, %148 : vector<256x12xf32>
    %150 = vector.shape_cast %149 : vector<256x12xf32> to vector<8x2x8x2x12xf32>
    %cst_179 = arith.constant dense<0xFF800000> : vector<8x2x8x12xf32>
    %151 = vector.multi_reduction <maximumf>, %150, %cst_179 [3] : vector<8x2x8x2x12xf32> to vector<8x2x8x12xf32>
    %cst_180 = arith.constant dense<0xFF800000> : vector<8x8x12xf32>
    %152 = vector.multi_reduction <maximumf>, %151, %cst_180 [1] : vector<8x2x8x12xf32> to vector<8x8x12xf32>
    %c0_181 = arith.constant 0 : index
    %c0_182 = arith.constant 0 : index
    %c0_183 = arith.constant 0 : index
    %c0_184 = arith.constant 0 : index
    %153 = vector.load %arg12[%c0_181, %c0_182, %c0_183, %c0_184] : memref<1x8x8x12xf32, #tpu.memory_space<vmem>>, vector<1x8x8x12xf32>
    %154 = vector.shape_cast %153 : vector<1x8x8x12xf32> to vector<8x8x12xf32>
    %155 = vector.shape_cast %152 : vector<8x8x12xf32> to vector<1x8x8x12xf32>
    tpu.vector_store %arg12[%c0_181, %c0_182, %c0_183, %c0_184], %155 {strides = array<i32>} : memref<1x8x8x12xf32, #tpu.memory_space<vmem>>, vector<1x8x8x12xf32>,
    return
  }
  func.func @transform_0(%arg0: i32) -> (i32, i32, i32, i32) {
    %c0_i32 = arith.constant 0 : i32
    %c0_i32_0 = arith.constant 0 : i32
    %c0_i32_1 = arith.constant 0 : i32
    %c0_i32_2 = arith.constant 0 : i32
    return %arg0, %c0_i32, %c0_i32_0, %c0_i32_1 : i32, i32, i32, i32
  }
  func.func @transform_1(%arg0: i32) -> (i32, i32) {
    %c0_i32 = arith.constant 0 : i32
    %c0_i32_0 = arith.constant 0 : i32
    %c0_i32_1 = arith.constant 0 : i32
    return %c0_i32, %c0_i32_0 : i32, i32
  }
  func.func @transform_2(%arg0: i32) -> (i32, i32) {
    %c0_i32 = arith.constant 0 : i32
    %c0_i32_0 = arith.constant 0 : i32
    %c0_i32_1 = arith.constant 0 : i32
    return %c0_i32, %c0_i32_0 : i32, i32
  }
  func.func @transform_3(%arg0: i32) -> (i32, i32) {
    %c0_i32 = arith.constant 0 : i32
    %c0_i32_0 = arith.constant 0 : i32
    %c0_i32_1 = arith.constant 0 : i32
    return %c0_i32, %c0_i32_0 : i32, i32
  }
  func.func @transform_4(%arg0: i32) -> (i32, i32) {
    %c0_i32 = arith.constant 0 : i32
    %c0_i32_0 = arith.constant 0 : i32
    %c0_i32_1 = arith.constant 0 : i32
    return %c0_i32, %c0_i32_0 : i32, i32
  }
  func.func @transform_5(%arg0: i32) -> (i32, i32) {
    %c0_i32 = arith.constant 0 : i32
    %c0_i32_0 = arith.constant 0 : i32
    %c0_i32_1 = arith.constant 0 : i32
    return %c0_i32, %c0_i32_0 : i32, i32
  }
  func.func @transform_6(%arg0: i32) -> (i32, i32) {
    %c0_i32 = arith.constant 0 : i32
    %c0_i32_0 = arith.constant 0 : i32
    %c0_i32_1 = arith.constant 0 : i32
    return %c0_i32, %c0_i32_0 : i32, i32
  }
  func.func @transform_7(%arg0: i32) -> (i32, i32) {
    %c0_i32 = arith.constant 0 : i32
    %c0_i32_0 = arith.constant 0 : i32
    %c0_i32_1 = arith.constant 0 : i32
    return %c0_i32, %c0_i32_0 : i32, i32
  }
  func.func @transform_8(%arg0: i32) -> (i32, i32) {
    %c0_i32 = arith.constant 0 : i32
    %c0_i32_0 = arith.constant 0 : i32
    %c0_i32_1 = arith.constant 0 : i32
    return %c0_i32, %c0_i32_0 : i32, i32
  }
  func.func @transform_9(%arg0: i32) -> (i32, i32) {
    %c0_i32 = arith.constant 0 : i32
    %c0_i32_0 = arith.constant 0 : i32
    %c0_i32_1 = arith.constant 0 : i32
    return %c0_i32, %c0_i32_0 : i32, i32
  }
  func.func @transform_10(%arg0: i32) -> (i32, i32) {
    %c0_i32 = arith.constant 0 : i32
    %c0_i32_0 = arith.constant 0 : i32
    %c0_i32_1 = arith.constant 0 : i32
    return %c0_i32, %c0_i32_0 : i32, i32
  }
  func.func @transform_11(%arg0: i32) -> (i32, i32, i32, i32) {
    %c0_i32 = arith.constant 0 : i32
    %c0_i32_0 = arith.constant 0 : i32
    %c0_i32_1 = arith.constant 0 : i32
    %c0_i32_2 = arith.constant 0 : i32
    return %arg0, %c0_i32, %c0_i32_0, %c0_i32_1 : i32, i32, i32, i32
  }
}

</mosaic_0001>

<bundles_post_ra>
// kernel: inception_layer.1
= control target key start
LH: loop header
LB: loop body
LE: loop exit
PB: predicated region body
PF: predicated region fallthrough
CT: control target
= control target key end

     0   :  { %s15675_s0 = inlined_call_operand.vmem [shape: f32[2,16,16,4], index: 0, kind: input, shape index: {}]   ;;  %s15676_s1 = inlined_call_operand.vmem [shape: f32[4,12], index: 1, kind: input, shape index: {}]   ;;  %s15677_s2 = inlined_call_operand.vmem [shape: f32[1,12], index: 2, kind: input, shape index: {}]   ;;  %s15678_s3 = inlined_call_operand.vmem [shape: f32[36,4], index: 3, kind: input, shape index: {}]   ;;  %s15679_s4 = inlined_call_operand.vmem [shape: f32[1,4], index: 4, kind: input, shape index: {}]   ;;  %s15680_s5 = inlined_call_operand.vmem [shape: f32[36,4], index: 5, kind: input, shape index: {}]   ;;  %s15681_s6 = inlined_call_operand.vmem [shape: f32[1,4], index: 6, kind: input, shape index: {}]   ;;  %s15682_s7 = inlined_call_operand.vmem [shape: f32[18,2], index: 7, kind: input, shape index: {}]   ;;  %s15683_s8 = inlined_call_operand.vmem [shape: f32[1,2], index: 8, kind: input, shape index: {}]   ;;  %s15684_s9 = inlined_call_operand.vmem [shape: f32[1,12], index: 9, kind: input, shape index: {}]   ;;  %s15685_s10 = inlined_call_operand.vmem [shape: f32[1,12], index: 10, kind: input, shape index: {}]   ;;  %s15686_s11 = inlined_call_operand.hbm [shape: f32[2,8,8,12], index: 11, kind: output, shape index: {}]  }
   0x1   :  { %15812 = sst [smem:[#allocation71_spill]] %s15675_s0 }
   0x2   :  { %16 = vsyncpa [#allocation6], 0 }
   0x3   :  { %18 = vsyncpa [#allocation6 + $0x1], 0  ;;  %s10669_s17 = smov 0   ;;  %s10671_s18 = smov 0  }
   0x4   :  { %s10673_s19 = smov 0   ;;  %s10675_s20 = smov 0  }
   0x5 LB: > { %s10690_s21 = sadd.s32 4294967295, %s10588_s20   ;;  %s9927_s22 = sadd.s32 4294967294, %s10588_s20   ;;  %s10588_s20 = sphi %s10675_s20, %s16095_s20   ;;  %s10584_s19 = sphi %s10673_s19, %s16094_s19   ;;  %s10580_s18 = sphi %s10671_s18, %s16093_s18   ;;  %s10576_s17 = sphi %s10669_s17, %s16092_s17  }
   0x6   : > { %s10694_s23 = sadd.s32 1, %s10588_s20   ;;  %s267_s24 = sadd.s32 1, %s10584_s19 }
   0x7   : > { %s264_s25 = ssub.s32 %s10588_s20, %s10694_s23  ;;  %p277_p0 = scmp.ne.s32.totalorder %s10584_s19, %s10580_s18 }
   0x8   : > { %p265_p1 = scmp.eq.s32.totalorder %s264_s25, 0  ;;  %p278_p2 = scmp.eq.s32.totalorder %s10690_s21, 1 }
   0x9   : > { %p283_p3 = scmp.ne.s32.totalorder %s10580_s18, %s10576_s17  ;;  %p284_p4 = scmp.eq.s32.totalorder %s9927_s22, 1 }
   0xa   : > { %s10705_s26 = scalar_select %p265_p1, %s10584_s19, %s267_s24  }
   0xb   : > { %p10707_p5 = por %p278_p2, %p277_p0  ;;  %p10711_p6 = por %p284_p4, %p283_p3 }
   0xc   : > { %p9930_p7 = scmp.ge.s32.totalorder %s10588_s20, 1  ;;  %p340_p8 = scmp.lt.s32.totalorder %s10588_s20, 3 }
   0xe   : > { %p341_p9 = pnand %p9930_p7, %p340_p8 }
  0x10   : > { %344 = sbr.rel (%p341_p9) target bundleno = 3403 (0xd4b), region = 64 }
  0x17   : > { %v417_v0 = vld [vmem:[%s15676_s1] sm:$0xf]  ;;  %vm522_vm0 = vcmask 1043456   ;;  %p380_p10 = scmp.lt.s32.totalorder %s10690_s21, 1  ;;  %vm425_vm1 = vcmask 31744   ;;  %v10590_v1 = vmov 0.0  }
  0x18   : > { %10221 = vmatprep.subr.msk.mxu0 %vm522_vm0, %v417_v0  ;;  %790 = vst.msk [vmem:[#allocation2 + $0x30] sm:$0xff] %vm425_vm1, %v10590_v1  ;;  %791 = vst.msk [vmem:[#allocation2 + $0x38] sm:$0xff] %vm425_vm1, %v10590_v1  ;;  %s15815_s0 = sld [smem:[#allocation71_spill]]  ;;  %s10591_s22 = smov 4   ;;  %vm785_vm2 = vcmask 29696   ;;  %vm1269_vm3 = vcmask 64544  }
  0x19   : > { %783 = vst.msk [vmem:[#allocation2] sm:$0xff] %vm425_vm1, %v10590_v1  ;;  %784 = vst.msk [vmem:[#allocation2 + $0x8] sm:$0xff] %vm425_vm1, %v10590_v1  ;;  %10222 = vmatpush3.msk.msra.mxu0 %vm522_vm0, %v417_v0  ;;  %s381_s12 = scalar_select %p380_p10, %s10690_s21, 1  ;;  %vm1462_vm4 = vcmask 97344   ;;  %v10938_v42 = vld [vmem:[%s15677_s2] ss:$0 sm:$0xff] }
  0x1a   : > { %787 = vst.msk [vmem:[#allocation2 + $0x18] sm:$0xff] %vm425_vm1, %v10590_v1  ;;  %788 = vst.msk [vmem:[#allocation2 + $0x20] sm:$0xff] %vm425_vm1, %v10590_v1  ;;  %s15745_s24 = smov 8   ;;  %vm850_vm5 = vcmask 15360   ;;  %s10593_s30 = smov 126   ;;  %vm1655_vm6 = vcmask 130144  }
  0x1b   : > { %793 = vst.msk [vmem:[#allocation2 + $0x48] sm:$0xff] %vm425_vm1, %v10590_v1  ;;  %794 = vst.msk [vmem:[#allocation2 + $0x50] sm:$0xff] %vm425_vm1, %v10590_v1  ;;  %s10077_s13 = sshll.u32 %s381_s12, 8  ;;  %s15723_s12 = smov 16   ;;  %vm1848_vm7 = vcmask 162944   ;;  %vm2041_vm8 = vcmask 195744  }
  0x1c   : > { %796 = vst.msk [vmem:[#allocation2 + $0x60] sm:$0xff] %vm425_vm1, %v10590_v1  ;;  %797 = vst.msk [vmem:[#allocation2 + $0x68] sm:$0xff] %vm425_vm1, %v10590_v1  ;;  %s15743_s14 = smov 12   ;;  %s15719_s15 = smov 24   ;;  %vm2235_vm9 = vcmask 228544   ;;  %vm2428_vm10 = vcmask 261344  }
  0x1d   : > { %799 = vst.msk [vmem:[#allocation2 + $0x78] sm:$0xff] %vm425_vm1, %v10590_v1  ;;  %800 = vst.msk [vmem:[#allocation2 + $0x80] sm:$0xff] %vm425_vm1, %v10590_v1  ;;  %vm2621_vm11 = vcmask 294144   ;;  %vm2698_vm12 = vcmask 293888   ;;  %vm3183_vm13 = vcmask 48144   ;;  %s15870_s25 = smov 24  }
  0x1e   : > { %802 = vst.msk [vmem:[#allocation2 + $0x90] sm:$0xff] %vm425_vm1, %v10590_v1  ;;  %803 = vst.msk [vmem:[#allocation2 + $0x98] sm:$0xff] %vm425_vm1, %v10590_v1  ;;  %s10817_s16 = scalar_lea.vmem %s15815_s0, %s10077_s13  ;;  %s15721_s13 = smov 20   ;;  %vm5474_vm14 = vcmask 80944   ;;  %vm5859_vm15 = vcmask 31760  }
  0x1f   : > { %805 = vst.msk [vmem:[#allocation2 + $0xa8] sm:$0xff] %vm425_vm1, %v10590_v1  ;;  %806 = vst.msk [vmem:[#allocation2 + $0xb0] sm:$0xff] %vm425_vm1, %v10590_v1  ;;  %v385_v2 = vld [vmem:[%s10817_s16] sm:$0xff]  ;;  %v386_v3 = vld [vmem:[%s10817_s16 + $0x8] sm:$0xff]  ;;  %s15912_s29 = smov 12  }
  0x20   : > { %808 = vst.msk [vmem:[#allocation2 + $0xc0] sm:$0xff] %vm425_vm1, %v10590_v1  ;;  %809 = vst.msk [vmem:[#allocation2 + $0xc8] sm:$0xff] %vm425_vm1, %v10590_v1  ;;  %v387_v4 = vld [vmem:[%s10817_s16 + $0x10] sm:$0xff]  ;;  %10223 = vmatprep.mubr.msk.f32.mxu0 %vm425_vm1, %v385_v2  ;;  %v388_v5 = vld [vmem:[%s10817_s16 + $0x18] sm:$0xff] }
  0x21   : > { %811 = vst.msk [vmem:[#allocation2 + $0xd8] sm:$0xff] %vm425_vm1, %v10590_v1  ;;  %812 = vst.msk [vmem:[#allocation2 + $0xe0] sm:$0xff] %vm425_vm1, %v10590_v1  ;;  %10224 = vmatmul.mubr.msk.f32.vlgmr.msra.gmra.mrb[0].mxu0 %vm425_vm1, %v386_v3  ;;  %v389_v6 = vld [vmem:[%s10817_s16 + $0x20] sm:$0xff]  ;;  %v390_v7 = vld [vmem:[%s10817_s16 + $0x28] sm:$0xff] }
  0x22   : > { %814 = vst.msk [vmem:[#allocation2 + $0xf0] sm:$0xff] %vm425_vm1, %v10590_v1  ;;  %815 = vst.msk [vmem:[#allocation2 + $0xf8] sm:$0xff] %vm425_vm1, %v10590_v1  ;;  %10226 = vmatprep.mubr.msk.f32.mxu0 %vm425_vm1, %v387_v4  ;;  %v391_v8 = vld [vmem:[%s10817_s16 + $0x30] sm:$0xff]  ;;  %v392_v10 = vld [vmem:[%s10817_s16 + $0x38] sm:$0xff] }
  0x23   : > { %817 = vst.msk [vmem:[#allocation2 + $0x108] sm:$0xff] %vm425_vm1, %v10590_v1  ;;  %818 = vst.msk [vmem:[#allocation2 + $0x110] sm:$0xff] %vm425_vm1, %v10590_v1  ;;  %v1109_v9 = vld [vmem:[#allocation2 + $0x33] sm:$0xff]  ;;  %v393_v11 = vld [vmem:[%s10817_s16 + $0x40] sm:$0xff] }
  0x24   : > { %820 = vst.msk [vmem:[#allocation2 + $0x120] sm:$0xff] %vm425_vm1, %v10590_v1  ;;  %821 = vst.msk [vmem:[#allocation2 + $0x128] sm:$0xff] %vm425_vm1, %v10590_v1  ;;  %1173 = vrot.lane.b32.xlu0 %v1109_v9, %s10591_s22  ;;  %v394_v12 = vld [vmem:[%s10817_s16 + $0x48] sm:$0xff]  ;;  %v395_v13 = vld [vmem:[%s10817_s16 + $0x50] sm:$0xff] }
  0x25   : > { %823 = vst.msk [vmem:[#allocation2 + $0x138] sm:$0xff] %vm425_vm1, %v10590_v1  ;;  %824 = vst.msk [vmem:[#allocation2 + $0x140] sm:$0xff] %vm425_vm1, %v10590_v1  ;;  %10227 = vmatmul.mubr.msk.f32.gmra.mrb[2].mxu0 %vm425_vm1, %v388_v5  ;;  %v396_v14 = vld [vmem:[%s10817_s16 + $0x58] sm:$0xff]  ;;  %v397_v15 = vld [vmem:[%s10817_s16 + $0x60] sm:$0xff] }
  0x26   : > { %826 = vst.msk [vmem:[#allocation2 + $0x150] sm:$0xff] %vm425_vm1, %v10590_v1  ;;  %827 = vst.msk [vmem:[#allocation2 + $0x158] sm:$0xff] %vm425_vm1, %v10590_v1  ;;  %10229 = vmatprep.mubr.msk.f32.mxu0 %vm425_vm1, %v389_v6  ;;  %v398_v16 = vld [vmem:[%s10817_s16 + $0x68] sm:$0xff]  ;;  %v399_v17 = vld [vmem:[%s10817_s16 + $0x70] sm:$0xff] }
  0x27   : > { %829 = vst.msk [vmem:[#allocation2 + $0x168] sm:$0xff] %vm425_vm1, %v10590_v1  ;;  %830 = vst.msk [vmem:[#allocation2 + $0x170] sm:$0xff] %vm425_vm1, %v10590_v1  ;;  %v400_v18 = vld [vmem:[%s10817_s16 + $0x78] sm:$0xff]  ;;  %v401_v19 = vld [vmem:[%s10817_s16 + $0x80] sm:$0xff] }
  0x28   : > { %832 = vst.msk [vmem:[#allocation2 + $0x180] sm:$0xff] %vm425_vm1, %v10590_v1  ;;  %833 = vst.msk [vmem:[#allocation2 + $0x188] sm:$0xff] %vm425_vm1, %v10590_v1  ;;  %v402_v20 = vld [vmem:[%s10817_s16 + $0x88] sm:$0xff]  ;;  %v403_v21 = vld [vmem:[%s10817_s16 + $0x90] sm:$0xff] }
  0x29   : > { %835 = vst.msk [vmem:[#allocation2 + $0x198] sm:$0xff] %vm425_vm1, %v10590_v1  ;;  %836 = vst.msk [vmem:[#allocation2 + $0x1a0] sm:$0xff] %vm425_vm1, %v10590_v1  ;;  %10230 = vmatmul.mubr.msk.f32.gmra.mrb[4].mxu0 %vm425_vm1, %v390_v7  ;;  %v404_v22 = vld [vmem:[%s10817_s16 + $0x98] sm:$0xff]  ;;  %v405_v23 = vld [vmem:[%s10817_s16 + $0xa0] sm:$0xff] }
  0x2a   : > { %838 = vst.msk [vmem:[#allocation2 + $0x1b0] sm:$0xff] %vm425_vm1, %v10590_v1  ;;  %839 = vst.msk [vmem:[#allocation2 + $0x1b8] sm:$0xff] %vm425_vm1, %v10590_v1  ;;  %10232 = vmatprep.mubr.msk.f32.mxu0 %vm425_vm1, %v391_v8  ;;  %v406_v24 = vld [vmem:[%s10817_s16 + $0xa8] sm:$0xff]  ;;  %v407_v25 = vld [vmem:[%s10817_s16 + $0xb0] sm:$0xff] }
  0x2b   : > { %841 = vst.msk [vmem:[#allocation2 + $0x1c8] sm:$0xff] %vm425_vm1, %v10590_v1  ;;  %842 = vst.msk [vmem:[#allocation2 + $0x1d0] sm:$0xff] %vm425_vm1, %v10590_v1  ;;  %v408_v26 = vld [vmem:[%s10817_s16 + $0xb8] sm:$0xff]  ;;  %v409_v27 = vld [vmem:[%s10817_s16 + $0xc0] sm:$0xff] }
  0x2c   : > { %844 = vst.msk [vmem:[#allocation2 + $0x1e0] sm:$0xff] %vm425_vm1, %v10590_v1  ;;  %845 = vst.msk [vmem:[#allocation2 + $0x1e8] sm:$0xff] %vm425_vm1, %v10590_v1  ;;  %v410_v28 = vld [vmem:[%s10817_s16 + $0xc8] sm:$0xff]  ;;  %v411_v29 = vld [vmem:[%s10817_s16 + $0xd0] sm:$0xff] }
  0x2d   : > { %847 = vst.msk [vmem:[#allocation2 + $0x1f8] sm:$0xff] %vm425_vm1, %v10590_v1  ;;  %848 = vst.msk [vmem:[#allocation2 + $0x200] sm:$0xff] %vm425_vm1, %v10590_v1  ;;  %10233 = vmatmul.mubr.msk.f32.gmra.mrb[6].mxu0 %vm425_vm1, %v392_v10  ;;  %v412_v30 = vld [vmem:[%s10817_s16 + $0xd8] sm:$0xff]  ;;  %v413_v31 = vld [vmem:[%s10817_s16 + $0xe0] sm:$0xff] }
  0x2e   : > { %10235 = vmatprep.mubr.msk.f32.mxu0 %vm425_vm1, %v393_v11  ;;  %v414_v32 = vld [vmem:[%s10817_s16 + $0xe8] sm:$0xff]  ;;  %v415_v33 = vld [vmem:[%s10817_s16 + $0xf0] sm:$0xff]  ;;  %v416_v34 = vld [vmem:[%s10817_s16 + $0xf8] sm:$0xff]  ;;  %792 = vst.msk [vmem:[#allocation2 + $0x40] sm:$0x3f] %vm785_vm2, %v10590_v1  ;;  %s10598_s16 = smov 28  }
  0x2f   : > { %v1302_v35 = vld [vmem:[#allocation2 + $0x34] sm:$0xff]  ;;  %786 = vst.msk [vmem:[#allocation2 + $0x10] sm:$0x3f] %vm785_vm2, %v10590_v1  ;;  %789 = vst.msk [vmem:[#allocation2 + $0x28] sm:$0x3f] %vm785_vm2, %v10590_v1 }
  0x30   : > { %1366 = vrot.lane.b32.xlu0 %v1302_v35, %s15745_s24  ;;  %795 = vst.msk [vmem:[#allocation2 + $0x58] sm:$0x3f] %vm785_vm2, %v10590_v1  ;;  %798 = vst.msk [vmem:[#allocation2 + $0x70] sm:$0x3f] %vm785_vm2, %v10590_v1  ;;  %v1045_v39 = vld [vmem:[#allocation2 + $0x32] sm:$0xff] }
  0x31   : > { %10236 = vmatmul.mubr.msk.f32.gmra.mrb[8].mxu0 %vm425_vm1, %v394_v12  ;;  %801 = vst.msk [vmem:[#allocation2 + $0x88] sm:$0x3f] %vm785_vm2, %v10590_v1  ;;  %804 = vst.msk [vmem:[#allocation2 + $0xa0] sm:$0x3f] %vm785_vm2, %v10590_v1 }
  0x32   : > { %10238 = vmatprep.mubr.msk.f32.mxu0 %vm425_vm1, %v395_v13  ;;  %807 = vst.msk [vmem:[#allocation2 + $0xb8] sm:$0x3f] %vm785_vm2, %v10590_v1  ;;  %810 = vst.msk [vmem:[#allocation2 + $0xd0] sm:$0x3f] %vm785_vm2, %v10590_v1 }
  0x33   : > { %813 = vst.msk [vmem:[#allocation2 + $0xe8] sm:$0x3f] %vm785_vm2, %v10590_v1  ;;  %816 = vst.msk [vmem:[#allocation2 + $0x100] sm:$0x3f] %vm785_vm2, %v10590_v1 }
  0x34   : > { %819 = vst.msk [vmem:[#allocation2 + $0x118] sm:$0x3f] %vm785_vm2, %v10590_v1  ;;  %822 = vst.msk [vmem:[#allocation2 + $0x130] sm:$0x3f] %vm785_vm2, %v10590_v1 }
  0x35   : > { %10239 = vmatmul.mubr.msk.f32.gmra.mrb[10].mxu0 %vm425_vm1, %v396_v14  ;;  %825 = vst.msk [vmem:[#allocation2 + $0x148] sm:$0x3f] %vm785_vm2, %v10590_v1  ;;  %828 = vst.msk [vmem:[#allocation2 + $0x160] sm:$0x3f] %vm785_vm2, %v10590_v1  ;;  %v1110_v36 = vld [vmem:[#allocation2 + $0x3b] sm:$0xff] }
  0x36   : > { %10241 = vmatprep.mubr.msk.f32.mxu0 %vm425_vm1, %v397_v15  ;;  %831 = vst.msk [vmem:[#allocation2 + $0x178] sm:$0x3f] %vm785_vm2, %v10590_v1  ;;  %834 = vst.msk [vmem:[#allocation2 + $0x190] sm:$0x3f] %vm785_vm2, %v10590_v1  ;;  %1175 = vrot.lane.b32.xlu1 %v1110_v36, %s10591_s22  ;;  %v1303_v37 = vld [vmem:[#allocation2 + $0x3c] sm:$0xff] }
  0x37   : > { %837 = vst.msk [vmem:[#allocation2 + $0x1a8] sm:$0x3f] %vm785_vm2, %v10590_v1  ;;  %840 = vst.msk [vmem:[#allocation2 + $0x1c0] sm:$0x3f] %vm785_vm2, %v10590_v1  ;;  %v1046_v41 = vld [vmem:[#allocation2 + $0x3a] sm:$0xff] }
  0x38   : > { %843 = vst.msk [vmem:[#allocation2 + $0x1d8] sm:$0x3f] %vm785_vm2, %v10590_v1  ;;  %846 = vst.msk [vmem:[#allocation2 + $0x1f0] sm:$0x3f] %vm785_vm2, %v10590_v1 }
  0x39   : > { %10242 = vmatmul.mubr.msk.f32.gmra.mrb[12].mxu0 %vm425_vm1, %v398_v16  ;;  %849 = vst.msk [vmem:[#allocation2 + $0x208] sm:$0x3f] %vm785_vm2, %v10590_v1  ;;  %vm6245_vm2 = vcmask 64560  }
  0x3a   : > { %10244 = vmatprep.mubr.msk.f32.mxu0 %vm425_vm1, %v399_v17  ;;  %1368 = vrot.lane.b32.xlu1 %v1303_v37, %s15745_s24  ;;  %1077 = vst.msk [vmem:[#allocation3] sm:$0xff] %vm425_vm1, %v1045_v39  ;;  %1078 = vst.msk [vmem:[#allocation3 + $0x8] sm:$0xff] %vm425_vm1, %v1046_v41 }
  0x3d   : > { %10245 = vmatmul.mubr.msk.f32.gmra.mrb[14].mxu0 %vm425_vm1, %v400_v18 }
  0x3e   : > { %10247 = vmatprep.mubr.msk.f32.mxu0 %vm425_vm1, %v401_v19 }
  0x41   : > { %10248 = vmatmul.mubr.msk.f32.gmra.mrb[16].mxu0 %vm425_vm1, %v402_v20 }
  0x42   : > { %10250 = vmatprep.mubr.msk.f32.mxu0 %vm425_vm1, %v403_v21 }
  0x45   : > { %10251 = vmatmul.mubr.msk.f32.gmra.mrb[18].mxu0 %vm425_vm1, %v404_v22 }
  0x46   : > { %10253 = vmatprep.mubr.msk.f32.mxu0 %vm425_vm1, %v405_v23 }
  0x49   : > { %10254 = vmatmul.mubr.msk.f32.gmra.mrb[20].mxu0 %vm425_vm1, %v406_v24 }
  0x4a   : > { %10256 = vmatprep.mubr.msk.f32.mxu0 %vm425_vm1, %v407_v25 }
  0x4d   : > { %10257 = vmatmul.mubr.msk.f32.gmra.mrb[22].mxu0 %vm425_vm1, %v408_v26 }
  0x4e   : > { %10259 = vmatprep.mubr.msk.f32.mxu0 %vm425_vm1, %v409_v27 }
  0x51   : > { %10260 = vmatmul.mubr.msk.f32.gmra.mrb[24].mxu0 %vm425_vm1, %v410_v28 }
  0x52   : > { %10262 = vmatprep.mubr.msk.f32.mxu0 %vm425_vm1, %v411_v29 }
  0x55   : > { %10263 = vmatmul.mubr.msk.f32.gmra.mrb[26].mxu0 %vm425_vm1, %v412_v30 }
  0x56   : > { %10265 = vmatprep.mubr.msk.f32.mxu0 %vm425_vm1, %v413_v31 }
  0x59   : > { %10266 = vmatmul.mubr.msk.f32.gmra.mrb[28].mxu0 %vm425_vm1, %v414_v32 }
  0x5a   : > { %10268 = vmatprep.mubr.msk.f32.mxu0 %vm425_vm1, %v415_v33 }
  0x5d   : > { %10269 = vmatmul.mubr.msk.f32.gmra.mrb[30].mxu0 %vm425_vm1, %v416_v34 }
  0x96   : > { %v1174_v38 = vpop.permute.xlu0 %1173 }
  0x97   : > { %1270 = vst.msk [vmem:[#allocation3] sm:$0xff] %vm1269_vm3, %v1174_v38 }
  0xa2   : > { %v1367_v40 = vpop.permute.xlu0 %1366 }
  0xa3   : > { %1463 = vst.msk [vmem:[#allocation3] sm:$0xff] %vm1462_vm4, %v1367_v40 }
  0xa8   : > { %v1176_v43 = vpop.permute.xlu1 %1175 }
  0xa9   : > { %1271 = vst.msk [vmem:[#allocation3 + $0x8] sm:$0xff] %vm1269_vm3, %v1176_v43 }
  0xac   : > { %v1369_v49 = vpop.permute.xlu1 %1368 }
  0xad   : > { %1464 = vst.msk [vmem:[#allocation3 + $0x8] sm:$0xff] %vm1462_vm4, %v1369_v49 }
  0xf4   : > { %v10225_v44 = vpop.f32.mrb[0].mxu0 }
  0xf5   : > { %v598_v45 = vadd.f32 %v10225_v44, %v10938_v42  ;;  %v592_v46 = vpop.f32.mrb[1].mxu0 }
  0xf6   : > { %v593_v47 = vadd.f32 %v10938_v42, %v592_v46 }
  0xf7   : > { %v10943_v48 = vmax.f32 %v598_v45, 0.0 }
  0xf8   : > { %v10945_v50 = vmax.f32 %v593_v47, 0.0  ;;  %v10228_v51 = vpop.f32.mrb[2].mxu0 }
  0xf9   : > { %15816 = vst [vmem:[#allocation8_spill] sm:$0xff] %v10943_v48  ;;  %917 = vrot.lane.b32.xlu0 %v10943_v48, %s10593_s30  ;;  %v608_v52 = vadd.f32 %v10228_v51, %v10938_v42  ;;  %v602_v53 = vpop.f32.mrb[3].mxu0  ;;  %852 = vst.msk [vmem:[#allocation4 + $0x8] sm:$0xff] %vm850_vm5, %v10943_v48 }
  0xfa   : > { %15817 = vst [vmem:[#allocation9_spill] sm:$0xff] %v10945_v50  ;;  %v603_v54 = vadd.f32 %v10938_v42, %v602_v53  ;;  %851 = vst.msk [vmem:[#allocation4] sm:$0xff] %vm850_vm5, %v10945_v50 }
  0xfb   : > { %v10956_v55 = vmax.f32 %v608_v52, 0.0 }
  0xfc   : > { %v10958_v56 = vmax.f32 %v603_v54, 0.0  ;;  %v10231_v57 = vpop.f32.mrb[4].mxu0 }
  0xfd   : > { %15818 = vst [vmem:[#allocation10_spill] sm:$0xff] %v10956_v55  ;;  %915 = vrot.lane.b32.xlu0 %v10945_v50, %s10593_s30  ;;  %921 = vrot.lane.b32.xlu1 %v10956_v55, %s10593_s30  ;;  %v618_v58 = vadd.f32 %v10231_v57, %v10938_v42  ;;  %v612_v59 = vpop.f32.mrb[5].mxu0  ;;  %854 = vst.msk [vmem:[#allocation4 + $0x18] sm:$0xff] %vm850_vm5, %v10956_v55 }
  0xfe   : > { %15819 = vst [vmem:[#allocation11_spill] sm:$0xff] %v10958_v56  ;;  %v613_v60 = vadd.f32 %v10938_v42, %v612_v59  ;;  %853 = vst.msk [vmem:[#allocation4 + $0x10] sm:$0xff] %vm850_vm5, %v10958_v56 }
  0xff   : > { %v10970_v61 = vmax.f32 %v618_v58, 0.0 }
 0x100   : > { %v10972_v62 = vmax.f32 %v613_v60, 0.0  ;;  %v10234_v63 = vpop.f32.mrb[6].mxu0 }
 0x101   : > { %15820 = vst [vmem:[#allocation12_spill] sm:$0xff] %v10970_v61  ;;  %919 = vrot.lane.b32.xlu1 %v10958_v56, %s10593_s30  ;;  %v628_v0 = vadd.f32 %v10234_v63, %v10938_v42  ;;  %v622_v1 = vpop.f32.mrb[7].mxu0  ;;  %856 = vst.msk [vmem:[#allocation4 + $0x28] sm:$0xff] %vm850_vm5, %v10970_v61 }
 0x102   : > { %15821 = vst [vmem:[#allocation13_spill] sm:$0xff] %v10972_v62  ;;  %923 = vrot.lane.b32.xlu0 %v10972_v62, %s10593_s30  ;;  %v623_v2 = vadd.f32 %v10938_v42, %v622_v1  ;;  %855 = vst.msk [vmem:[#allocation4 + $0x20] sm:$0xff] %vm850_vm5, %v10972_v62 }
 0x103   : > { %v10984_v3 = vmax.f32 %v628_v0, 0.0 }
 0x104   : > { %v10986_v4 = vmax.f32 %v623_v2, 0.0  ;;  %v10237_v5 = vpop.f32.mrb[8].mxu0 }
 0x105   : > { %15822 = vst [vmem:[#allocation14_spill] sm:$0xff] %v10984_v3  ;;  %925 = vrot.lane.b32.xlu1 %v10970_v61, %s10593_s30  ;;  %v638_v6 = vadd.f32 %v10237_v5, %v10938_v42  ;;  %v632_v7 = vpop.f32.mrb[9].mxu0  ;;  %858 = vst.msk [vmem:[#allocation4 + $0x38] sm:$0xff] %vm850_vm5, %v10984_v3 }
 0x106   : > { %15823 = vst [vmem:[#allocation15_spill] sm:$0xff] %v10986_v4  ;;  %927 = vrot.lane.b32.xlu0 %v10986_v4, %s10593_s30  ;;  %v633_v8 = vadd.f32 %v10938_v42, %v632_v7  ;;  %857 = vst.msk [vmem:[#allocation4 + $0x30] sm:$0xff] %vm850_vm5, %v10986_v4 }
 0x107   : > { %v10998_v9 = vmax.f32 %v638_v6, 0.0 }
 0x108   : > { %v11000_v10 = vmax.f32 %v633_v8, 0.0  ;;  %v10240_v11 = vpop.f32.mrb[10].mxu0 }
 0x109   : > { %15824 = vst [vmem:[#allocation16_spill] sm:$0xff] %v10998_v9  ;;  %929 = vrot.lane.b32.xlu1 %v10984_v3, %s10593_s30  ;;  %v648_v12 = vadd.f32 %v10240_v11, %v10938_v42  ;;  %v642_v13 = vpop.f32.mrb[11].mxu0  ;;  %860 = vst.msk [vmem:[#allocation4 + $0x48] sm:$0xff] %vm850_vm5, %v10998_v9 }
 0x10a   : > { %15825 = vst [vmem:[#allocation17_spill] sm:$0xff] %v11000_v10  ;;  %v643_v14 = vadd.f32 %v10938_v42, %v642_v13  ;;  %931 = vrot.lane.b32.xlu0 %v11000_v10, %s10593_s30  ;;  %859 = vst.msk [vmem:[#allocation4 + $0x40] sm:$0xff] %vm850_vm5, %v11000_v10 }
 0x10b   : > { %v11012_v15 = vmax.f32 %v648_v12, 0.0 }
 0x10c   : > { %v11014_v16 = vmax.f32 %v643_v14, 0.0  ;;  %v10243_v17 = vpop.f32.mrb[12].mxu0 }
 0x10d   : > { %15826 = vst [vmem:[#allocation18_spill] sm:$0xff] %v11012_v15  ;;  %933 = vrot.lane.b32.xlu1 %v10998_v9, %s10593_s30  ;;  %v658_v18 = vadd.f32 %v10243_v17, %v10938_v42  ;;  %v652_v19 = vpop.f32.mrb[13].mxu0  ;;  %862 = vst.msk [vmem:[#allocation4 + $0x58] sm:$0xff] %vm850_vm5, %v11012_v15 }
 0x10e   : > { %15827 = vst [vmem:[#allocation19_spill] sm:$0xff] %v11014_v16  ;;  %v653_v20 = vadd.f32 %v10938_v42, %v652_v19  ;;  %935 = vrot.lane.b32.xlu0 %v11014_v16, %s10593_s30  ;;  %861 = vst.msk [vmem:[#allocation4 + $0x50] sm:$0xff] %vm850_vm5, %v11014_v16 }
 0x10f   : > { %v11026_v21 = vmax.f32 %v658_v18, 0.0 }
 0x110   : > { %v11028_v22 = vmax.f32 %v653_v20, 0.0  ;;  %v10246_v23 = vpop.f32.mrb[14].mxu0 }
 0x111   : > { %15828 = vst [vmem:[#allocation20_spill] sm:$0xff] %v11026_v21  ;;  %937 = vrot.lane.b32.xlu1 %v11012_v15, %s10593_s30  ;;  %v668_v24 = vadd.f32 %v10246_v23, %v10938_v42  ;;  %v662_v25 = vpop.f32.mrb[15].mxu0  ;;  %864 = vst.msk [vmem:[#allocation4 + $0x68] sm:$0xff] %vm850_vm5, %v11026_v21 }
 0x112   : > { %15829 = vst [vmem:[#allocation21_spill] sm:$0xff] %v11028_v22  ;;  %v663_v26 = vadd.f32 %v10938_v42, %v662_v25  ;;  %939 = vrot.lane.b32.xlu0 %v11028_v22, %s10593_s30  ;;  %863 = vst.msk [vmem:[#allocation4 + $0x60] sm:$0xff] %vm850_vm5, %v11028_v22 }
 0x113   : > { %v11040_v27 = vmax.f32 %v668_v24, 0.0 }
 0x114   : > { %v11042_v28 = vmax.f32 %v663_v26, 0.0  ;;  %v10249_v29 = vpop.f32.mrb[16].mxu0 }
 0x115   : > { %15830 = vst [vmem:[#allocation22_spill] sm:$0xff] %v11040_v27  ;;  %941 = vrot.lane.b32.xlu1 %v11026_v21, %s10593_s30  ;;  %v678_v30 = vadd.f32 %v10249_v29, %v10938_v42  ;;  %v672_v31 = vpop.f32.mrb[17].mxu0  ;;  %866 = vst.msk [vmem:[#allocation4 + $0x78] sm:$0xff] %vm850_vm5, %v11040_v27 }
 0x116   : > { %15831 = vst [vmem:[#allocation23_spill] sm:$0xff] %v11042_v28  ;;  %v673_v32 = vadd.f32 %v10938_v42, %v672_v31  ;;  %943 = vrot.lane.b32.xlu0 %v11042_v28, %s10593_s30  ;;  %865 = vst.msk [vmem:[#allocation4 + $0x70] sm:$0xff] %vm850_vm5, %v11042_v28 }
 0x117   : > { %v11054_v33 = vmax.f32 %v678_v30, 0.0 }
 0x118   : > { %v11056_v34 = vmax.f32 %v673_v32, 0.0  ;;  %v10252_v35 = vpop.f32.mrb[18].mxu0 }
 0x119   : > { %15832 = vst [vmem:[#allocation24_spill] sm:$0xff] %v11054_v33  ;;  %945 = vrot.lane.b32.xlu1 %v11040_v27, %s10593_s30  ;;  %v688_v36 = vadd.f32 %v10252_v35, %v10938_v42  ;;  %v682_v37 = vpop.f32.mrb[19].mxu0  ;;  %868 = vst.msk [vmem:[#allocation4 + $0x88] sm:$0xff] %vm850_vm5, %v11054_v33 }
 0x11a   : > { %15833 = vst [vmem:[#allocation25_spill] sm:$0xff] %v11056_v34  ;;  %v683_v38 = vadd.f32 %v10938_v42, %v682_v37  ;;  %947 = vrot.lane.b32.xlu0 %v11056_v34, %s10593_s30  ;;  %867 = vst.msk [vmem:[#allocation4 + $0x80] sm:$0xff] %vm850_vm5, %v11056_v34 }
 0x11b   : > { %v11068_v39 = vmax.f32 %v688_v36, 0.0 }
 0x11c   : > { %v11070_v40 = vmax.f32 %v683_v38, 0.0  ;;  %v10255_v41 = vpop.f32.mrb[20].mxu0 }
 0x11d   : > { %15834 = vst [vmem:[#allocation26_spill] sm:$0xff] %v11068_v39  ;;  %949 = vrot.lane.b32.xlu1 %v11054_v33, %s10593_s30  ;;  %v698_v43 = vadd.f32 %v10255_v41, %v10938_v42  ;;  %v692_v44 = vpop.f32.mrb[21].mxu0  ;;  %870 = vst.msk [vmem:[#allocation4 + $0x98] sm:$0xff] %vm850_vm5, %v11068_v39 }
 0x11e   : > { %15835 = vst [vmem:[#allocation27_spill] sm:$0xff] %v11070_v40  ;;  %v693_v45 = vadd.f32 %v10938_v42, %v692_v44  ;;  %951 = vrot.lane.b32.xlu0 %v11070_v40, %s10593_s30  ;;  %869 = vst.msk [vmem:[#allocation4 + $0x90] sm:$0xff] %vm850_vm5, %v11070_v40 }
 0x11f   : > { %v11082_v46 = vmax.f32 %v698_v43, 0.0 }
 0x120   : > { %v11084_v47 = vmax.f32 %v693_v45, 0.0  ;;  %v10258_v49 = vpop.f32.mrb[22].mxu0 }
 0x121   : > { %15836 = vst [vmem:[#allocation28_spill] sm:$0xff] %v11082_v46  ;;  %953 = vrot.lane.b32.xlu1 %v11068_v39, %s10593_s30  ;;  %v708_v51 = vadd.f32 %v10258_v49, %v10938_v42  ;;  %v702_v52 = vpop.f32.mrb[23].mxu0  ;;  %872 = vst.msk [vmem:[#allocation4 + $0xa8] sm:$0xff] %vm850_vm5, %v11082_v46 }
 0x122   : > { %15837 = vst [vmem:[#allocation29_spill] sm:$0xff] %v11084_v47  ;;  %v703_v53 = vadd.f32 %v10938_v42, %v702_v52  ;;  %955 = vrot.lane.b32.xlu0 %v11084_v47, %s10593_s30  ;;  %871 = vst.msk [vmem:[#allocation4 + $0xa0] sm:$0xff] %vm850_vm5, %v11084_v47 }
 0x123   : > { %v11096_v54 = vmax.f32 %v708_v51, 0.0 }
 0x124   : > { %v11098_v57 = vmax.f32 %v703_v53, 0.0  ;;  %v10261_v58 = vpop.f32.mrb[24].mxu0 }
 0x125   : > { %15838 = vst [vmem:[#allocation30_spill] sm:$0xff] %v11096_v54  ;;  %957 = vrot.lane.b32.xlu1 %v11082_v46, %s10593_s30  ;;  %v718_v59 = vadd.f32 %v10261_v58, %v10938_v42  ;;  %v712_v60 = vpop.f32.mrb[25].mxu0  ;;  %874 = vst.msk [vmem:[#allocation4 + $0xb8] sm:$0xff] %vm850_vm5, %v11096_v54 }
 0x126   : > { %15839 = vst [vmem:[#allocation31_spill] sm:$0xff] %v11098_v57  ;;  %v713_v63 = vadd.f32 %v10938_v42, %v712_v60  ;;  %959 = vrot.lane.b32.xlu0 %v11098_v57, %s10593_s30  ;;  %873 = vst.msk [vmem:[#allocation4 + $0xb0] sm:$0xff] %vm850_vm5, %v11098_v57 }
 0x127   : > { %v11110_v0 = vmax.f32 %v718_v59, 0.0 }
 0x128   : > { %v11112_v1 = vmax.f32 %v713_v63, 0.0  ;;  %v10264_v2 = vpop.f32.mrb[26].mxu0 }
 0x129   : > { %15840 = vst [vmem:[#allocation32_spill] sm:$0xff] %v11110_v0  ;;  %961 = vrot.lane.b32.xlu1 %v11096_v54, %s10593_s30  ;;  %v728_v5 = vadd.f32 %v10264_v2, %v10938_v42  ;;  %v722_v6 = vpop.f32.mrb[27].mxu0  ;;  %876 = vst.msk [vmem:[#allocation4 + $0xc8] sm:$0xff] %vm850_vm5, %v11110_v0 }
 0x12a   : > { %15841 = vst [vmem:[#allocation33_spill] sm:$0xff] %v11112_v1  ;;  %v723_v7 = vadd.f32 %v10938_v42, %v722_v6  ;;  %963 = vrot.lane.b32.xlu0 %v11112_v1, %s10593_s30  ;;  %875 = vst.msk [vmem:[#allocation4 + $0xc0] sm:$0xff] %vm850_vm5, %v11112_v1 }
 0x12b   : > { %v11124_v8 = vmax.f32 %v728_v5, 0.0 }
 0x12c   : > { %v11126_v11 = vmax.f32 %v723_v7, 0.0  ;;  %v10267_v12 = vpop.f32.mrb[28].mxu0 }
 0x12d   : > { %15842 = vst [vmem:[#allocation34_spill] sm:$0xff] %v11124_v8  ;;  %965 = vrot.lane.b32.xlu1 %v11110_v0, %s10593_s30  ;;  %v738_v13 = vadd.f32 %v10267_v12, %v10938_v42  ;;  %v732_v14 = vpop.f32.mrb[29].mxu0  ;;  %878 = vst.msk [vmem:[#allocation4 + $0xd8] sm:$0xff] %vm850_vm5, %v11124_v8 }
 0x12e   : > { %15843 = vst [vmem:[#allocation35_spill] sm:$0xff] %v11126_v11  ;;  %v733_v17 = vadd.f32 %v10938_v42, %v732_v14  ;;  %967 = vrot.lane.b32.xlu0 %v11126_v11, %s10593_s30  ;;  %877 = vst.msk [vmem:[#allocation4 + $0xd0] sm:$0xff] %vm850_vm5, %v11126_v11 }
 0x12f   : > { %v11138_v18 = vmax.f32 %v738_v13, 0.0 }
 0x130   : > { %v11140_v19 = vmax.f32 %v733_v17, 0.0  ;;  %v10270_v20 = vpop.f32.mrb[30].mxu0 }
 0x131   : > { %15844 = vst [vmem:[#allocation36_spill] sm:$0xff] %v11138_v18  ;;  %969 = vrot.lane.b32.xlu1 %v11124_v8, %s10593_s30  ;;  %v748_v23 = vadd.f32 %v10270_v20, %v10938_v42  ;;  %v742_v24 = vpop.f32.mrb[31].mxu0  ;;  %880 = vst.msk [vmem:[#allocation4 + $0xe8] sm:$0xff] %vm850_vm5, %v11138_v18 }
 0x132   : > { %15845 = vst [vmem:[#allocation37_spill] sm:$0xff] %v11140_v19  ;;  %v743_v25 = vadd.f32 %v10938_v42, %v742_v24  ;;  %971 = vrot.lane.b32.xlu0 %v11140_v19, %s10593_s30  ;;  %879 = vst.msk [vmem:[#allocation4 + $0xe0] sm:$0xff] %vm850_vm5, %v11140_v19 }
 0x133   : > { %v11152_v26 = vmax.f32 %v748_v23, 0.0 }
 0x134   : > { %v11154_v29 = vmax.f32 %v743_v25, 0.0 }
 0x135   : > { %15846 = vst [vmem:[#allocation38_spill] sm:$0xff] %v11152_v26  ;;  %973 = vrot.lane.b32.xlu1 %v11138_v18, %s10593_s30  ;;  %882 = vst.msk [vmem:[#allocation4 + $0xf8] sm:$0xff] %vm850_vm5, %v11152_v26 }
 0x136   : > { %15847 = vst [vmem:[#allocation39_spill] sm:$0xff] %v11154_v29  ;;  %975 = vrot.lane.b32.xlu0 %v11154_v29, %s10593_s30  ;;  %881 = vst.msk [vmem:[#allocation4 + $0xf0] sm:$0xff] %vm850_vm5, %v11154_v29 }
 0x139   : > { %977 = vrot.lane.b32.xlu1 %v11152_v26, %s10593_s30  ;;  %s10600_s30 = smov 122  }
 0x16b   : > { %v918_v42 = vpop.permute.xlu0 %917 }
 0x16c   : > { %1013 = vst.msk [vmem:[#allocation2 + $0x53] sm:$0xff] %vm425_vm1, %v918_v42 }
 0x16f   : > { %v916_v30 = vpop.permute.xlu0 %915  ;;  %v922_v31 = vpop.permute.xlu1 %921 }
 0x170   : > { %1012 = vst.msk [vmem:[#allocation2 + $0x4b] sm:$0xff] %vm425_vm1, %v916_v30  ;;  %1015 = vst.msk [vmem:[#allocation2 + $0x6b] sm:$0xff] %vm425_vm1, %v922_v31 }
 0x173   : > { %v1112_v32 = vld [vmem:[#allocation2 + $0x53] sm:$0xff]  ;;  %v920_v35 = vpop.permute.xlu1 %919 }
 0x174   : > { %1179 = vrot.lane.b32.xlu1 %v1112_v32, %s10591_s22  ;;  %1014 = vst.msk [vmem:[#allocation2 + $0x63] sm:$0xff] %vm425_vm1, %v920_v35  ;;  %v924_v36 = vpop.permute.xlu0 %923  ;;  %v1305_v37 = vld [vmem:[#allocation2 + $0x54] sm:$0xff] }
 0x175   : > { %1016 = vst.msk [vmem:[#allocation2 + $0x7b] sm:$0xff] %vm425_vm1, %v924_v36 }
 0x177   : > { %v1111_v38 = vld [vmem:[#allocation2 + $0x4b] sm:$0xff]  ;;  %v926_v43 = vpop.permute.xlu1 %925 }
 0x178   : > { %v1495_v41 = vld [vmem:[#allocation2 + $0x4a] sm:$0xff]  ;;  %1372 = vrot.lane.b32.xlu1 %v1305_v37, %s15745_s24  ;;  %1177 = vrot.lane.b32.xlu0 %v1111_v38, %s10591_s22  ;;  %v1496_v44 = vld [vmem:[#allocation2 + $0x52] sm:$0xff]  ;;  %1017 = vst.msk [vmem:[#allocation2 + $0x83] sm:$0xff] %vm425_vm1, %v926_v43  ;;  %v928_v45 = vpop.permute.xlu0 %927 }
 0x179   : > { %1079 = vst.msk [vmem:[#allocation3 + $0x10] sm:$0xff] %vm425_vm1, %v1495_v41  ;;  %1018 = vst.msk [vmem:[#allocation2 + $0x93] sm:$0xff] %vm425_vm1, %v928_v45  ;;  %v1304_v49 = vld [vmem:[#allocation2 + $0x4c] sm:$0xff] }
 0x17a   : > { %1080 = vst.msk [vmem:[#allocation3 + $0x18] sm:$0xff] %vm425_vm1, %v1496_v44  ;;  %v1114_v14 = vld [vmem:[#allocation2 + $0x6b] sm:$0xff] }
 0x17b   : > { %v11178_v51 = vld [vmem:[#allocation2 + $0x62] sm:$0xff]  ;;  %v930_v52 = vpop.permute.xlu1 %929  ;;  %v11182_v53 = vld [vmem:[#allocation2 + $0x6a] sm:$0xff] }
 0x17c   : > { %1754 = vrot.lane.b32.xlu1 %v1112_v32, %s15723_s12  ;;  %1370 = vrot.lane.b32.xlu0 %v1304_v49, %s15745_s24  ;;  %v11184_v58 = vld [vmem:[#allocation2 + $0x7a] sm:$0xff]  ;;  %1019 = vst.msk [vmem:[#allocation2 + $0x9b] sm:$0xff] %vm425_vm1, %v930_v52  ;;  %v932_v59 = vpop.permute.xlu0 %931  ;;  %1081 = vst.msk [vmem:[#allocation3 + $0x20] sm:$0xff] %vm425_vm1, %v11178_v51  ;;  %v1307_v25 = vld [vmem:[#allocation2 + $0x6c] sm:$0xff] }
 0x17d   : > { %1020 = vst.msk [vmem:[#allocation2 + $0xab] sm:$0xff] %vm425_vm1, %v932_v59  ;;  %1082 = vst.msk [vmem:[#allocation3 + $0x28] sm:$0xff] %vm425_vm1, %v11182_v53  ;;  %v1113_v42 = vld [vmem:[#allocation2 + $0x63] sm:$0xff] }
 0x17e   : > { %1083 = vst.msk [vmem:[#allocation3 + $0x30] sm:$0xff] %vm425_vm1, %v11184_v58  ;;  %v1306_v36 = vld [vmem:[#allocation2 + $0x64] sm:$0xff] }
 0x17f   : > { %v934_v60 = vpop.permute.xlu1 %933  ;;  %v11196_v63 = vld [vmem:[#allocation2 + $0x82] sm:$0xff] }
 0x180   : > { %1947 = vrot.lane.b32.xlu1 %v1305_v37, %s15721_s13  ;;  %1559 = vrot.lane.b32.xlu0 %v1495_v41, %s15743_s14  ;;  %1021 = vst.msk [vmem:[#allocation2 + $0xb3] sm:$0xff] %vm425_vm1, %v934_v60  ;;  %v936_v2 = vpop.permute.xlu0 %935  ;;  %v11199_v5 = vld [vmem:[#allocation2 + $0x92] sm:$0xff]  ;;  %1084 = vst.msk [vmem:[#allocation3 + $0x38] sm:$0xff] %vm425_vm1, %v11196_v63 }
 0x181   : > { %1022 = vst.msk [vmem:[#allocation2 + $0xc3] sm:$0xff] %vm425_vm1, %v936_v2  ;;  %1085 = vst.msk [vmem:[#allocation3 + $0x40] sm:$0xff] %vm425_vm1, %v11199_v5 }
 0x183   : > { %v938_v6 = vpop.permute.xlu1 %937  ;;  %v11209_v12 = vld [vmem:[#allocation2 + $0x9a] sm:$0xff] }
 0x184   : > { %1561 = vrot.lane.b32.xlu1 %v1496_v44, %s15743_s14  ;;  %1752 = vrot.lane.b32.xlu0 %v1111_v38, %s15723_s12  ;;  %1023 = vst.msk [vmem:[#allocation2 + $0xcb] sm:$0xff] %vm425_vm1, %v938_v6  ;;  %v940_v7 = vpop.permute.xlu0 %939  ;;  %v11211_v13 = vld [vmem:[#allocation2 + $0xaa] sm:$0xff]  ;;  %1086 = vst.msk [vmem:[#allocation3 + $0x48] sm:$0xff] %vm425_vm1, %v11209_v12 }
 0x185   : > { %1024 = vst.msk [vmem:[#allocation2 + $0xdb] sm:$0xff] %vm425_vm1, %v940_v7  ;;  %1087 = vst.msk [vmem:[#allocation3 + $0x50] sm:$0xff] %vm425_vm1, %v11211_v13 }
 0x187   : > { %v942_v17 = vpop.permute.xlu1 %941  ;;  %v11221_v23 = vld [vmem:[#allocation2 + $0xb2] sm:$0xff] }
 0x188   : > { %1183 = vrot.lane.b32.xlu1 %v1114_v14, %s10591_s22  ;;  %1945 = vrot.lane.b32.xlu0 %v1304_v49, %s15721_s13  ;;  %1025 = vst.msk [vmem:[#allocation2 + $0xe3] sm:$0xff] %vm425_vm1, %v942_v17  ;;  %v944_v20 = vpop.permute.xlu0 %943  ;;  %v11223_v24 = vld [vmem:[#allocation2 + $0xc2] sm:$0xff]  ;;  %1088 = vst.msk [vmem:[#allocation3 + $0x58] sm:$0xff] %vm425_vm1, %v11221_v23 }
 0x189   : > { %1026 = vst.msk [vmem:[#allocation2 + $0xf3] sm:$0xff] %vm425_vm1, %v944_v20  ;;  %1089 = vst.msk [vmem:[#allocation3 + $0x60] sm:$0xff] %vm425_vm1, %v11223_v24 }
 0x18b   : > { %v946_v30 = vpop.permute.xlu1 %945  ;;  %v11233_v32 = vld [vmem:[#allocation2 + $0xca] sm:$0xff] }
 0x18c   : > { %1376 = vrot.lane.b32.xlu1 %v1307_v25, %s15745_s24  ;;  %1181 = vrot.lane.b32.xlu0 %v1113_v42, %s10591_s22  ;;  %1027 = vst.msk [vmem:[#allocation2 + $0xfb] sm:$0xff] %vm425_vm1, %v946_v30  ;;  %v948_v31 = vpop.permute.xlu0 %947  ;;  %v11235_v35 = vld [vmem:[#allocation2 + $0xda] sm:$0xff]  ;;  %1090 = vst.msk [vmem:[#allocation3 + $0x68] sm:$0xff] %vm425_vm1, %v11233_v32 }
 0x18d   : > { %1028 = vst.msk [vmem:[#allocation2 + $0x10b] sm:$0xff] %vm425_vm1, %v948_v31  ;;  %1091 = vst.msk [vmem:[#allocation3 + $0x70] sm:$0xff] %vm425_vm1, %v11235_v35 }
 0x18f   : > { %v950_v37 = vpop.permute.xlu1 %949  ;;  %v11245_v41 = vld [vmem:[#allocation2 + $0xe2] sm:$0xff] }
 0x190   : > { %1758 = vrot.lane.b32.xlu1 %v1114_v14, %s15723_s12  ;;  %1374 = vrot.lane.b32.xlu0 %v1306_v36, %s15745_s24  ;;  %1029 = vst.msk [vmem:[#allocation2 + $0x113] sm:$0xff] %vm425_vm1, %v950_v37  ;;  %v952_v38 = vpop.permute.xlu0 %951  ;;  %v11247_v43 = vld [vmem:[#allocation2 + $0xf2] sm:$0xff]  ;;  %1092 = vst.msk [vmem:[#allocation3 + $0x78] sm:$0xff] %vm425_vm1, %v11245_v41  ;;  %v1115_v37 = vld [vmem:[#allocation2 + $0x7b] sm:$0xff] }
 0x191   : > { %1030 = vst.msk [vmem:[#allocation2 + $0x123] sm:$0xff] %vm425_vm1, %v952_v38  ;;  %1093 = vst.msk [vmem:[#allocation3 + $0x80] sm:$0xff] %vm425_vm1, %v11247_v43 }
 0x193   : > { %v954_v44 = vpop.permute.xlu1 %953  ;;  %v11258_v49 = vld [vmem:[#allocation2 + $0xfa] sm:$0xff] }
 0x194   : > { %1951 = vrot.lane.b32.xlu1 %v1307_v25, %s15721_s13  ;;  %1563 = vrot.lane.b32.xlu0 %v11178_v51, %s15743_s14  ;;  %1031 = vst.msk [vmem:[#allocation2 + $0x12b] sm:$0xff] %vm425_vm1, %v954_v44  ;;  %v956_v45 = vpop.permute.xlu0 %955  ;;  %v11260_v52 = vld [vmem:[#allocation2 + $0x10a] sm:$0xff]  ;;  %1094 = vst.msk [vmem:[#allocation3 + $0x88] sm:$0xff] %vm425_vm1, %v11258_v49 }
 0x195   : > { %1032 = vst.msk [vmem:[#allocation2 + $0x13b] sm:$0xff] %vm425_vm1, %v956_v45  ;;  %1095 = vst.msk [vmem:[#allocation3 + $0x90] sm:$0xff] %vm425_vm1, %v11260_v52  ;;  %v1116_v25 = vld [vmem:[#allocation2 + $0x83] sm:$0xff] }
 0x197   : > { %v958_v59 = vpop.permute.xlu1 %957  ;;  %v11271_v2 = vld [vmem:[#allocation2 + $0x112] sm:$0xff] }
 0x198   : > { %1565 = vrot.lane.b32.xlu1 %v11182_v53, %s15743_s14  ;;  %1756 = vrot.lane.b32.xlu0 %v1113_v42, %s15723_s12  ;;  %1033 = vst.msk [vmem:[#allocation2 + $0x143] sm:$0xff] %vm425_vm1, %v958_v59  ;;  %v960_v60 = vpop.permute.xlu0 %959  ;;  %v11273_v6 = vld [vmem:[#allocation2 + $0x122] sm:$0xff]  ;;  %1096 = vst.msk [vmem:[#allocation3 + $0x98] sm:$0xff] %vm425_vm1, %v11271_v2 }
 0x199   : > { %1034 = vst.msk [vmem:[#allocation2 + $0x153] sm:$0xff] %vm425_vm1, %v960_v60  ;;  %1097 = vst.msk [vmem:[#allocation3 + $0xa0] sm:$0xff] %vm425_vm1, %v11273_v6  ;;  %v1308_v59 = vld [vmem:[#allocation2 + $0x7c] sm:$0xff] }
 0x19b   : > { %v962_v7 = vpop.permute.xlu1 %961  ;;  %v11284_v17 = vld [vmem:[#allocation2 + $0x12a] sm:$0xff] }
 0x19c   : > { %2141 = vrot.lane.b32.xlu1 %v11182_v53, %s15719_s15  ;;  %1949 = vrot.lane.b32.xlu0 %v1306_v36, %s15721_s13  ;;  %1035 = vst.msk [vmem:[#allocation2 + $0x15b] sm:$0xff] %vm425_vm1, %v962_v7  ;;  %v964_v14 = vpop.permute.xlu0 %963  ;;  %v11286_v20 = vld [vmem:[#allocation2 + $0x13a] sm:$0xff]  ;;  %1098 = vst.msk [vmem:[#allocation3 + $0xa8] sm:$0xff] %vm425_vm1, %v11284_v17  ;;  %v1309_v36 = vld [vmem:[#allocation2 + $0x84] sm:$0xff] }
 0x19d   : > { %1036 = vst.msk [vmem:[#allocation2 + $0x16b] sm:$0xff] %vm425_vm1, %v964_v14  ;;  %1099 = vst.msk [vmem:[#allocation3 + $0xb0] sm:$0xff] %vm425_vm1, %v11286_v20 }
 0x19f   : > { %v966_v42 = vpop.permute.xlu1 %965  ;;  %v11297_v30 = vld [vmem:[#allocation2 + $0x142] sm:$0xff] }
 0x1a0   : > { %1187 = vrot.lane.b32.xlu1 %v1116_v25, %s10591_s22  ;;  %2139 = vrot.lane.b32.xlu0 %v11178_v51, %s15719_s15  ;;  %1037 = vst.msk [vmem:[#allocation2 + $0x173] sm:$0xff] %vm425_vm1, %v966_v42  ;;  %v968_v53 = vpop.permute.xlu0 %967  ;;  %v11299_v31 = vld [vmem:[#allocation2 + $0x152] sm:$0xff]  ;;  %1100 = vst.msk [vmem:[#allocation3 + $0xb8] sm:$0xff] %vm425_vm1, %v11297_v30 }
 0x1a1   : > { %1038 = vst.msk [vmem:[#allocation2 + $0x183] sm:$0xff] %vm425_vm1, %v968_v53  ;;  %1101 = vst.msk [vmem:[#allocation3 + $0xc0] sm:$0xff] %vm425_vm1, %v11299_v31 }
 0x1a3   : > { %v970_v38 = vpop.permute.xlu1 %969  ;;  %v11309_v44 = vld [vmem:[#allocation2 + $0x15a] sm:$0xff] }
 0x1a4   : > { %1380 = vrot.lane.b32.xlu1 %v1309_v36, %s15745_s24  ;;  %1185 = vrot.lane.b32.xlu0 %v1115_v37, %s10591_s22  ;;  %1039 = vst.msk [vmem:[#allocation2 + $0x18b] sm:$0xff] %vm425_vm1, %v970_v38  ;;  %v972_v51 = vpop.permute.xlu0 %971  ;;  %v11311_v45 = vld [vmem:[#allocation2 + $0x16a] sm:$0xff]  ;;  %1102 = vst.msk [vmem:[#allocation3 + $0xc8] sm:$0xff] %vm425_vm1, %v11309_v44 }
 0x1a5   : > { %1040 = vst.msk [vmem:[#allocation2 + $0x19b] sm:$0xff] %vm425_vm1, %v972_v51  ;;  %1103 = vst.msk [vmem:[#allocation3 + $0xd0] sm:$0xff] %vm425_vm1, %v11311_v45  ;;  %v1118_v51 = vld [vmem:[#allocation2 + $0x9b] sm:$0xff] }
 0x1a7   : > { %v974_v60 = vpop.permute.xlu1 %973  ;;  %v11321_v14 = vld [vmem:[#allocation2 + $0x172] sm:$0xff] }
 0x1a8   : > { %1762 = vrot.lane.b32.xlu1 %v1116_v25, %s15723_s12  ;;  %1378 = vrot.lane.b32.xlu0 %v1308_v59, %s15745_s24  ;;  %1041 = vst.msk [vmem:[#allocation2 + $0x1a3] sm:$0xff] %vm425_vm1, %v974_v60  ;;  %v976_v7 = vpop.permute.xlu0 %975  ;;  %v11323_v42 = vld [vmem:[#allocation2 + $0x182] sm:$0xff]  ;;  %1104 = vst.msk [vmem:[#allocation3 + $0xd8] sm:$0xff] %vm425_vm1, %v11321_v14 }
 0x1a9   : > { %1042 = vst.msk [vmem:[#allocation2 + $0x1b3] sm:$0xff] %vm425_vm1, %v976_v7  ;;  %1105 = vst.msk [vmem:[#allocation3 + $0xe0] sm:$0xff] %vm425_vm1, %v11323_v42  ;;  %v1311_v60 = vld [vmem:[#allocation2 + $0x9c] sm:$0xff]  ;;  %v1117_v7 = vld [vmem:[#allocation2 + $0x93] sm:$0xff] }
 0x1aa   : > { %v11643_v26 = vld [vmem:[#allocation2 + $0x183] sm:$0xff] }
 0x1ab   : > { %v978_v53 = vpop.permute.xlu1 %977  ;;  %v11334_v25 = vld [vmem:[#allocation2 + $0x18a] sm:$0xff] }
 0x1ac   : > { %1955 = vrot.lane.b32.xlu1 %v1309_v36, %s15721_s13  ;;  %1567 = vrot.lane.b32.xlu0 %v11184_v58, %s15743_s14  ;;  %1043 = vst.msk [vmem:[#allocation2 + $0x1bb] sm:$0xff] %vm425_vm1, %v978_v53  ;;  %v11336_v38 = vld [vmem:[#allocation2 + $0x19a] sm:$0xff]  ;;  %1106 = vst.msk [vmem:[#allocation3 + $0xe8] sm:$0xff] %vm425_vm1, %v11334_v25  ;;  %v1312_v53 = vld [vmem:[#allocation2 + $0xac] sm:$0xff] }
 0x1ad   : > { %1107 = vst.msk [vmem:[#allocation3 + $0xf0] sm:$0xff] %vm425_vm1, %v11336_v38  ;;  %v11641_v19 = vld [vmem:[#allocation2 + $0x18c] sm:$0xff]  ;;  %v11651_v18 = vld [vmem:[#allocation2 + $0x184] sm:$0xff]  ;;  %v11682_v8 = vld [vmem:[#allocation2 + $0x19b] sm:$0xff] }
 0x1af   : > { %v11345_v36 = vld [vmem:[#allocation2 + $0x1a2] sm:$0xff] }
 0x1b0   : > { %1569 = vrot.lane.b32.xlu1 %v11196_v63, %s15743_s14  ;;  %1760 = vrot.lane.b32.xlu0 %v1115_v37, %s15723_s12  ;;  %1108 = vst.msk [vmem:[#allocation3 + $0xf8] sm:$0xff] %vm425_vm1, %v11345_v36  ;;  %v1310_v37 = vld [vmem:[#allocation2 + $0x94] sm:$0xff]  ;;  %v11689_v57 = vld [vmem:[#allocation2 + $0x19c] sm:$0xff] }
 0x1b1   : > { %v11720_v54 = vld [vmem:[#allocation2 + $0x1b2] sm:$0xff] }
 0x1b2   : > { %v11727_v46 = vld [vmem:[#allocation2 + $0x1b3] sm:$0xff] }
 0x1b3   : > { %v1526_v40 = vld [vmem:[#allocation2 + $0x1ba] sm:$0xff] }
 0x1b4   : > { %2145 = vrot.lane.b32.xlu1 %v11196_v63, %s15719_s15  ;;  %1953 = vrot.lane.b32.xlu0 %v1308_v59, %s15721_s13  ;;  %v1313_v63 = vld [vmem:[#allocation2 + $0xb4] sm:$0xff]  ;;  %v1119_v59 = vld [vmem:[#allocation2 + $0xab] sm:$0xff] }
 0x1b5   : > { %v11734_v39 = vld [vmem:[#allocation2 + $0x1b4] sm:$0xff] }
 0x1b8   : > { %1191 = vrot.lane.b32.xlu1 %v1118_v51, %s10591_s22  ;;  %2143 = vrot.lane.b32.xlu0 %v11184_v58, %s15719_s15  ;;  %v1120_v58 = vld [vmem:[#allocation2 + $0xb3] sm:$0xff] }
 0x1bc   : > { %1384 = vrot.lane.b32.xlu1 %v1311_v60, %s15745_s24  ;;  %1189 = vrot.lane.b32.xlu0 %v1117_v7, %s10591_s22 }
 0x1c0   : > { %1766 = vrot.lane.b32.xlu1 %v1118_v51, %s15723_s12  ;;  %1382 = vrot.lane.b32.xlu0 %v1310_v37, %s15745_s24 }
 0x1c4   : > { %1959 = vrot.lane.b32.xlu1 %v1311_v60, %s15721_s13  ;;  %1571 = vrot.lane.b32.xlu0 %v11199_v5, %s15743_s14 }
 0x1c8   : > { %1573 = vrot.lane.b32.xlu1 %v11209_v12, %s15743_s14  ;;  %1764 = vrot.lane.b32.xlu0 %v1117_v7, %s15723_s12  ;;  %v1315_v7 = vld [vmem:[#allocation2 + $0xcc] sm:$0xff] }
 0x1cc   : > { %2149 = vrot.lane.b32.xlu1 %v11209_v12, %s15719_s15  ;;  %1957 = vrot.lane.b32.xlu0 %v1310_v37, %s15721_s13  ;;  %v1122_v12 = vld [vmem:[#allocation2 + $0xcb] sm:$0xff]  ;;  %v1121_v37 = vld [vmem:[#allocation2 + $0xc3] sm:$0xff] }
 0x1d0   : > { %1195 = vrot.lane.b32.xlu1 %v1120_v58, %s10591_s22  ;;  %2147 = vrot.lane.b32.xlu0 %v11199_v5, %s15719_s15 }
 0x1d4   : > { %1388 = vrot.lane.b32.xlu1 %v1313_v63, %s15745_s24  ;;  %1193 = vrot.lane.b32.xlu0 %v1119_v59, %s10591_s22 }
 0x1d8   : > { %1770 = vrot.lane.b32.xlu1 %v1120_v58, %s15723_s12  ;;  %1386 = vrot.lane.b32.xlu0 %v1312_v53, %s15745_s24 }
 0x1dc   : > { %1963 = vrot.lane.b32.xlu1 %v1313_v63, %s15721_s13  ;;  %1575 = vrot.lane.b32.xlu0 %v11211_v13, %s15743_s14  ;;  %v1314_v63 = vld [vmem:[#allocation2 + $0xc4] sm:$0xff] }
 0x1e0   : > { %1577 = vrot.lane.b32.xlu1 %v11221_v23, %s15743_s14  ;;  %1768 = vrot.lane.b32.xlu0 %v1119_v59, %s15723_s12 }
 0x1e4   : > { %2153 = vrot.lane.b32.xlu1 %v11221_v23, %s15719_s15  ;;  %1961 = vrot.lane.b32.xlu0 %v1312_v53, %s15721_s13 }
 0x1e6   : > { %v1180_v5 = vpop.permute.xlu1 %1179 }
 0x1e7   : > { %1273 = vst.msk [vmem:[#allocation3 + $0x18] sm:$0xff] %vm1269_vm3, %v1180_v5 }
 0x1e8   : > { %1199 = vrot.lane.b32.xlu1 %v1122_v12, %s10591_s22  ;;  %2151 = vrot.lane.b32.xlu0 %v11211_v13, %s15719_s15 }
 0x1ea   : > { %v1373_v51 = vpop.permute.xlu1 %1372  ;;  %v1178_v60 = vpop.permute.xlu0 %1177 }
 0x1eb   : > { %1466 = vst.msk [vmem:[#allocation3 + $0x18] sm:$0xff] %vm1462_vm4, %v1373_v51 }
 0x1ec   : > { %1272 = vst.msk [vmem:[#allocation3 + $0x10] sm:$0xff] %vm1269_vm3, %v1178_v60  ;;  %1392 = vrot.lane.b32.xlu1 %v1315_v7, %s15745_s24  ;;  %1197 = vrot.lane.b32.xlu0 %v1121_v37, %s10591_s22 }
 0x1ee   : > { %v1755_v23 = vpop.permute.xlu1 %1754  ;;  %v1371_v58 = vpop.permute.xlu0 %1370 }
 0x1ef   : > { %1465 = vst.msk [vmem:[#allocation3 + $0x10] sm:$0xff] %vm1462_vm4, %v1371_v58 }
 0x1f0   : > { %1774 = vrot.lane.b32.xlu1 %v1122_v12, %s15723_s12  ;;  %1390 = vrot.lane.b32.xlu0 %v1314_v63, %s15745_s24 }
 0x1f2   : > { %v1948_v13 = vpop.permute.xlu1 %1947  ;;  %v1560_v59 = vpop.permute.xlu0 %1559 }
 0x1f3   : > { %1656 = vst.msk [vmem:[#allocation3] sm:$0xff] %vm1655_vm6, %v1560_v59 }
 0x1f4   : > { %1967 = vrot.lane.b32.xlu1 %v1315_v7, %s15721_s13  ;;  %1579 = vrot.lane.b32.xlu0 %v11223_v24, %s15743_s14 }
 0x1f6   : > { %v1562_v53 = vpop.permute.xlu1 %1561  ;;  %v1753_v5 = vpop.permute.xlu0 %1752 }
 0x1f7   : > { %1657 = vst.msk [vmem:[#allocation3 + $0x8] sm:$0xff] %vm1655_vm6, %v1562_v53  ;;  %v1316_v53 = vld [vmem:[#allocation2 + $0xdc] sm:$0xff] }
 0x1f8   : > { %1849 = vst.msk [vmem:[#allocation3] sm:$0xff] %vm1848_vm7, %v1753_v5  ;;  %1850 = vst.msk [vmem:[#allocation3 + $0x8] sm:$0xff] %vm1848_vm7, %v1755_v23  ;;  %1581 = vrot.lane.b32.xlu1 %v11233_v32, %s15743_s14  ;;  %1772 = vrot.lane.b32.xlu0 %v1121_v37, %s15723_s12  ;;  %v1124_v37 = vld [vmem:[#allocation2 + $0xe3] sm:$0xff] }
 0x1f9   : > { %2043 = vst.msk [vmem:[#allocation3 + $0x8] sm:$0xff] %vm2041_vm8, %v1948_v13  ;;  %v1317_v13 = vld [vmem:[#allocation2 + $0xe4] sm:$0xff] }
 0x1fa   : > { %v1184_v12 = vpop.permute.xlu1 %1183  ;;  %v1946_v51 = vpop.permute.xlu0 %1945 }
 0x1fb   : > { %1275 = vst.msk [vmem:[#allocation3 + $0x28] sm:$0xff] %vm1269_vm3, %v1184_v12 }
 0x1fc   : > { %2042 = vst.msk [vmem:[#allocation3] sm:$0xff] %vm2041_vm8, %v1946_v51  ;;  %2157 = vrot.lane.b32.xlu1 %v11233_v32, %s15719_s15  ;;  %1965 = vrot.lane.b32.xlu0 %v1314_v63, %s15721_s13  ;;  %v1123_v32 = vld [vmem:[#allocation2 + $0xdb] sm:$0xff] }
 0x1fe   : > { %v1377_v60 = vpop.permute.xlu1 %1376  ;;  %v1182_v7 = vpop.permute.xlu0 %1181 }
 0x1ff   : > { %1468 = vst.msk [vmem:[#allocation3 + $0x28] sm:$0xff] %vm1462_vm4, %v1377_v60 }
 0x200   : > { %1274 = vst.msk [vmem:[#allocation3 + $0x20] sm:$0xff] %vm1269_vm3, %v1182_v7  ;;  %1203 = vrot.lane.b32.xlu1 %v1124_v37, %s10591_s22  ;;  %2155 = vrot.lane.b32.xlu0 %v11223_v24, %s15719_s15 }
 0x202   : > { %v1759_v23 = vpop.permute.xlu1 %1758  ;;  %v1375_v58 = vpop.permute.xlu0 %1374 }
 0x203   : > { %1467 = vst.msk [vmem:[#allocation3 + $0x20] sm:$0xff] %vm1462_vm4, %v1375_v58  ;;  %v1126_v58 = vld [vmem:[#allocation2 + $0xfb] sm:$0xff] }
 0x204   : > { %1396 = vrot.lane.b32.xlu1 %v1317_v13, %s15745_s24  ;;  %1201 = vrot.lane.b32.xlu0 %v1123_v32, %s10591_s22 }
 0x206   : > { %v1952_v63 = vpop.permute.xlu1 %1951  ;;  %v1564_v59 = vpop.permute.xlu0 %1563 }
 0x207   : > { %1658 = vst.msk [vmem:[#allocation3 + $0x10] sm:$0xff] %vm1655_vm6, %v1564_v59 }
 0x208   : > { %1778 = vrot.lane.b32.xlu1 %v1124_v37, %s15723_s12  ;;  %1394 = vrot.lane.b32.xlu0 %v1316_v53, %s15745_s24 }
 0x20a   : > { %v1566_v24 = vpop.permute.xlu1 %1565  ;;  %v1757_v5 = vpop.permute.xlu0 %1756 }
 0x20b   : > { %1659 = vst.msk [vmem:[#allocation3 + $0x18] sm:$0xff] %vm1655_vm6, %v1566_v24  ;;  %v1318_v24 = vld [vmem:[#allocation2 + $0xf4] sm:$0xff] }
 0x20c   : > { %1851 = vst.msk [vmem:[#allocation3 + $0x10] sm:$0xff] %vm1848_vm7, %v1757_v5  ;;  %1852 = vst.msk [vmem:[#allocation3 + $0x18] sm:$0xff] %vm1848_vm7, %v1759_v23  ;;  %1971 = vrot.lane.b32.xlu1 %v1317_v13, %s15721_s13  ;;  %1583 = vrot.lane.b32.xlu0 %v11235_v35, %s15743_s14 }
 0x20d   : > { %2045 = vst.msk [vmem:[#allocation3 + $0x18] sm:$0xff] %vm2041_vm8, %v1952_v63  ;;  %v1319_v63 = vld [vmem:[#allocation2 + $0xfc] sm:$0xff] }
 0x20e   : > { %v2142_v12 = vpop.permute.xlu1 %2141  ;;  %v1950_v51 = vpop.permute.xlu0 %1949 }
 0x20f   : > { %2237 = vst.msk [vmem:[#allocation3 + $0x8] sm:$0xff] %vm2235_vm9, %v2142_v12 }
 0x210   : > { %2044 = vst.msk [vmem:[#allocation3 + $0x10] sm:$0xff] %vm2041_vm8, %v1950_v51  ;;  %1585 = vrot.lane.b32.xlu1 %v11245_v41, %s15743_s14  ;;  %1776 = vrot.lane.b32.xlu0 %v1123_v32, %s15723_s12 }
 0x212   : > { %v1188_v60 = vpop.permute.xlu1 %1187  ;;  %v2140_v7 = vpop.permute.xlu0 %2139 }
 0x213   : > { %1277 = vst.msk [vmem:[#allocation3 + $0x38] sm:$0xff] %vm1269_vm3, %v1188_v60 }
 0x214   : > { %2236 = vst.msk [vmem:[#allocation3] sm:$0xff] %vm2235_vm9, %v2140_v7  ;;  %2161 = vrot.lane.b32.xlu1 %v11245_v41, %s15719_s15  ;;  %1969 = vrot.lane.b32.xlu0 %v1316_v53, %s15721_s13  ;;  %v1125_v41 = vld [vmem:[#allocation2 + $0xf3] sm:$0xff] }
 0x216   : > { %v1381_v37 = vpop.permute.xlu1 %1380  ;;  %v1186_v23 = vpop.permute.xlu0 %1185 }
 0x217   : > { %1470 = vst.msk [vmem:[#allocation3 + $0x38] sm:$0xff] %vm1462_vm4, %v1381_v37 }
 0x218   : > { %1276 = vst.msk [vmem:[#allocation3 + $0x30] sm:$0xff] %vm1269_vm3, %v1186_v23  ;;  %1207 = vrot.lane.b32.xlu1 %v1126_v58, %s10591_s22  ;;  %2159 = vrot.lane.b32.xlu0 %v11235_v35, %s15719_s15 }
 0x21a   : > { %v1763_v13 = vpop.permute.xlu1 %1762  ;;  %v1379_v32 = vpop.permute.xlu0 %1378 }
 0x21b   : > { %1469 = vst.msk [vmem:[#allocation3 + $0x30] sm:$0xff] %vm1462_vm4, %v1379_v32 }
 0x21c   : > { %1400 = vrot.lane.b32.xlu1 %v1319_v63, %s15745_s24  ;;  %1205 = vrot.lane.b32.xlu0 %v1125_v41, %s10591_s22 }
 0x21e   : > { %v1956_v59 = vpop.permute.xlu1 %1955  ;;  %v1568_v53 = vpop.permute.xlu0 %1567 }
 0x21f   : > { %1660 = vst.msk [vmem:[#allocation3 + $0x20] sm:$0xff] %vm1655_vm6, %v1568_v53  ;;  %v1320_v53 = vld [vmem:[#allocation2 + $0x10c] sm:$0xff] }
 0x220   : > { %1782 = vrot.lane.b32.xlu1 %v1126_v58, %s15723_s12  ;;  %1398 = vrot.lane.b32.xlu0 %v1318_v24, %s15745_s24  ;;  %v11469_v58 = vld [vmem:[#allocation2 + $0x113] sm:$0xff] }
 0x222   : > { %v1570_v35 = vpop.permute.xlu1 %1569  ;;  %v1761_v5 = vpop.permute.xlu0 %1760 }
 0x223   : > { %1661 = vst.msk [vmem:[#allocation3 + $0x28] sm:$0xff] %vm1655_vm6, %v1570_v35 }
 0x224   : > { %1853 = vst.msk [vmem:[#allocation3 + $0x20] sm:$0xff] %vm1848_vm7, %v1761_v5  ;;  %1854 = vst.msk [vmem:[#allocation3 + $0x28] sm:$0xff] %vm1848_vm7, %v1763_v13  ;;  %1975 = vrot.lane.b32.xlu1 %v1319_v63, %s15721_s13  ;;  %1587 = vrot.lane.b32.xlu0 %v11247_v43, %s15743_s14  ;;  %v11476_v63 = vld [vmem:[#allocation2 + $0x10b] sm:$0xff] }
 0x225   : > { %2047 = vst.msk [vmem:[#allocation3 + $0x28] sm:$0xff] %vm2041_vm8, %v1956_v59 }
 0x226   : > { %v2146_v12 = vpop.permute.xlu1 %2145  ;;  %v1954_v51 = vpop.permute.xlu0 %1953 }
 0x227   : > { %2239 = vst.msk [vmem:[#allocation3 + $0x18] sm:$0xff] %vm2235_vm9, %v2146_v12 }
 0x228   : > { %2046 = vst.msk [vmem:[#allocation3 + $0x20] sm:$0xff] %vm2041_vm8, %v1954_v51  ;;  %1589 = vrot.lane.b32.xlu1 %v11258_v49, %s15743_s14  ;;  %1780 = vrot.lane.b32.xlu0 %v1125_v41, %s15723_s12 }
 0x22a   : > { %v1192_v60 = vpop.permute.xlu1 %1191  ;;  %v2144_v7 = vpop.permute.xlu0 %2143 }
 0x22b   : > { %1279 = vst.msk [vmem:[#allocation3 + $0x48] sm:$0xff] %vm1269_vm3, %v1192_v60  ;;  %v11500_v60 = vld [vmem:[#allocation2 + $0x12b] sm:$0xff] }
 0x22c   : > { %2238 = vst.msk [vmem:[#allocation3 + $0x10] sm:$0xff] %vm2235_vm9, %v2144_v7  ;;  %2165 = vrot.lane.b32.xlu1 %v11258_v49, %s15719_s15  ;;  %1973 = vrot.lane.b32.xlu0 %v1318_v24, %s15721_s13  ;;  %v1321_v49 = vld [vmem:[#allocation2 + $0x114] sm:$0xff] }
 0x22e   : > { %v1385_v37 = vpop.permute.xlu1 %1384  ;;  %v1190_v23 = vpop.permute.xlu0 %1189 }
 0x22f   : > { %1472 = vst.msk [vmem:[#allocation3 + $0x48] sm:$0xff] %vm1462_vm4, %v1385_v37 }
 0x230   : > { %1278 = vst.msk [vmem:[#allocation3 + $0x40] sm:$0xff] %vm1269_vm3, %v1190_v23  ;;  %1211 = vrot.lane.b32.xlu1 %v11469_v58, %s10591_s22  ;;  %2163 = vrot.lane.b32.xlu0 %v11247_v43, %s15719_s15  ;;  %v1323_v23 = vld [vmem:[#allocation2 + $0x12c] sm:$0xff] }
 0x232   : > { %v1767_v13 = vpop.permute.xlu1 %1766  ;;  %v1383_v32 = vpop.permute.xlu0 %1382 }
 0x233   : > { %1471 = vst.msk [vmem:[#allocation3 + $0x40] sm:$0xff] %vm1462_vm4, %v1383_v32 }
 0x234   : > { %1404 = vrot.lane.b32.xlu1 %v1321_v49, %s15745_s24  ;;  %1209 = vrot.lane.b32.xlu0 %v11476_v63, %s10591_s22 }
 0x236   : > { %v1960_v41 = vpop.permute.xlu1 %1959  ;;  %v1572_v59 = vpop.permute.xlu0 %1571 }
 0x237   : > { %1662 = vst.msk [vmem:[#allocation3 + $0x30] sm:$0xff] %vm1655_vm6, %v1572_v59 }
 0x238   : > { %1786 = vrot.lane.b32.xlu1 %v11469_v58, %s15723_s12  ;;  %1402 = vrot.lane.b32.xlu0 %v1320_v53, %s15745_s24 }
 0x23a   : > { %v1574_v43 = vpop.permute.xlu1 %1573  ;;  %v1765_v24 = vpop.permute.xlu0 %1764 }
 0x23b   : > { %1663 = vst.msk [vmem:[#allocation3 + $0x38] sm:$0xff] %vm1655_vm6, %v1574_v43 }
 0x23c   : > { %1855 = vst.msk [vmem:[#allocation3 + $0x30] sm:$0xff] %vm1848_vm7, %v1765_v24  ;;  %1856 = vst.msk [vmem:[#allocation3 + $0x38] sm:$0xff] %vm1848_vm7, %v1767_v13  ;;  %1979 = vrot.lane.b32.xlu1 %v1321_v49, %s15721_s13  ;;  %1591 = vrot.lane.b32.xlu0 %v11260_v52, %s15743_s14  ;;  %v11507_v13 = vld [vmem:[#allocation2 + $0x123] sm:$0xff] }
 0x23d   : > { %2049 = vst.msk [vmem:[#allocation3 + $0x38] sm:$0xff] %vm2041_vm8, %v1960_v41  ;;  %v1322_v41 = vld [vmem:[#allocation2 + $0x124] sm:$0xff] }
 0x23e   : > { %v2150_v35 = vpop.permute.xlu1 %2149  ;;  %v1958_v5 = vpop.permute.xlu0 %1957 }
 0x23f   : > { %2241 = vst.msk [vmem:[#allocation3 + $0x28] sm:$0xff] %vm2235_vm9, %v2150_v35 }
 0x240   : > { %2048 = vst.msk [vmem:[#allocation3 + $0x30] sm:$0xff] %vm2041_vm8, %v1958_v5  ;;  %1593 = vrot.lane.b32.xlu1 %v11271_v2, %s15743_s14  ;;  %1784 = vrot.lane.b32.xlu0 %v11476_v63, %s15723_s12 }
 0x242   : > { %v1196_v12 = vpop.permute.xlu1 %1195  ;;  %v2148_v51 = vpop.permute.xlu0 %2147 }
 0x243   : > { %1281 = vst.msk [vmem:[#allocation3 + $0x58] sm:$0xff] %vm1269_vm3, %v1196_v12  ;;  %v11530_v12 = vld [vmem:[#allocation2 + $0x143] sm:$0xff] }
 0x244   : > { %2240 = vst.msk [vmem:[#allocation3 + $0x20] sm:$0xff] %vm2235_vm9, %v2148_v51  ;;  %1215 = vrot.lane.b32.xlu1 %v11500_v60, %s10591_s22  ;;  %1977 = vrot.lane.b32.xlu0 %v1320_v53, %s15721_s13 }
 0x246   : > { %v1389_v7 = vpop.permute.xlu1 %1388  ;;  %v1194_v37 = vpop.permute.xlu0 %1193 }
 0x247   : > { %1474 = vst.msk [vmem:[#allocation3 + $0x58] sm:$0xff] %vm1462_vm4, %v1389_v7 }
 0x248   : > { %1280 = vst.msk [vmem:[#allocation3 + $0x50] sm:$0xff] %vm1269_vm3, %v1194_v37  ;;  %1408 = vrot.lane.b32.xlu1 %v1323_v23, %s15745_s24  ;;  %1213 = vrot.lane.b32.xlu0 %v11507_v13, %s10591_s22  ;;  %v1325_v37 = vld [vmem:[#allocation2 + $0x144] sm:$0xff] }
 0x24a   : > { %v1771_v32 = vpop.permute.xlu1 %1770  ;;  %v1387_v49 = vpop.permute.xlu0 %1386 }
 0x24b   : > { %1473 = vst.msk [vmem:[#allocation3 + $0x50] sm:$0xff] %vm1462_vm4, %v1387_v49 }
 0x24c   : > { %1790 = vrot.lane.b32.xlu1 %v11500_v60, %s15723_s12  ;;  %1406 = vrot.lane.b32.xlu0 %v1322_v41, %s15745_s24 }
 0x24e   : > { %v1964_v59 = vpop.permute.xlu1 %1963  ;;  %v1576_v53 = vpop.permute.xlu0 %1575 }
 0x24f   : > { %1664 = vst.msk [vmem:[#allocation3 + $0x40] sm:$0xff] %vm1655_vm6, %v1576_v53 }
 0x250   : > { %1983 = vrot.lane.b32.xlu1 %v1323_v23, %s15721_s13  ;;  %1595 = vrot.lane.b32.xlu0 %v11273_v6, %s15743_s14  ;;  %v11537_v23 = vld [vmem:[#allocation2 + $0x13b] sm:$0xff] }
 0x252   : > { %v1578_v43 = vpop.permute.xlu1 %1577  ;;  %v1769_v24 = vpop.permute.xlu0 %1768 }
 0x253   : > { %1665 = vst.msk [vmem:[#allocation3 + $0x48] sm:$0xff] %vm1655_vm6, %v1578_v43 }
 0x254   : > { %1857 = vst.msk [vmem:[#allocation3 + $0x40] sm:$0xff] %vm1848_vm7, %v1769_v24  ;;  %1858 = vst.msk [vmem:[#allocation3 + $0x48] sm:$0xff] %vm1848_vm7, %v1771_v32  ;;  %1597 = vrot.lane.b32.xlu1 %v11284_v17, %s15743_s14  ;;  %1788 = vrot.lane.b32.xlu0 %v11507_v13, %s15723_s12 }
 0x255   : > { %2051 = vst.msk [vmem:[#allocation3 + $0x48] sm:$0xff] %vm2041_vm8, %v1964_v59 }
 0x256   : > { %v2154_v35 = vpop.permute.xlu1 %2153  ;;  %v1962_v5 = vpop.permute.xlu0 %1961 }
 0x257   : > { %2243 = vst.msk [vmem:[#allocation3 + $0x38] sm:$0xff] %vm2235_vm9, %v2154_v35 }
 0x258   : > { %2050 = vst.msk [vmem:[#allocation3 + $0x40] sm:$0xff] %vm2041_vm8, %v1962_v5  ;;  %1219 = vrot.lane.b32.xlu1 %v11530_v12, %s10591_s22  ;;  %1981 = vrot.lane.b32.xlu0 %v1322_v41, %s15721_s13  ;;  %v1324_v41 = vld [vmem:[#allocation2 + $0x13c] sm:$0xff] }
 0x25a   : > { %v1200_v51 = vpop.permute.xlu1 %1199  ;;  %v2152_v7 = vpop.permute.xlu0 %2151 }
 0x25b   : > { %1283 = vst.msk [vmem:[#allocation3 + $0x68] sm:$0xff] %vm1269_vm3, %v1200_v51  ;;  %v11558_v51 = vld [vmem:[#allocation2 + $0x15b] sm:$0xff] }
 0x25c   : > { %2242 = vst.msk [vmem:[#allocation3 + $0x30] sm:$0xff] %vm2235_vm9, %v2152_v7  ;;  %1412 = vrot.lane.b32.xlu1 %v1325_v37, %s15745_s24  ;;  %1217 = vrot.lane.b32.xlu0 %v11537_v23, %s10591_s22 }
 0x25e   : > { %v1393_v32 = vpop.permute.xlu1 %1392  ;;  %v1198_v49 = vpop.permute.xlu0 %1197 }
 0x25f   : > { %1476 = vst.msk [vmem:[#allocation3 + $0x68] sm:$0xff] %vm1462_vm4, %v1393_v32  ;;  %v11567_v32 = vld [vmem:[#allocation2 + $0x15c] sm:$0xff] }
 0x260   : > { %1282 = vst.msk [vmem:[#allocation3 + $0x60] sm:$0xff] %vm1269_vm3, %v1198_v49  ;;  %1794 = vrot.lane.b32.xlu1 %v11530_v12, %s15723_s12  ;;  %1410 = vrot.lane.b32.xlu0 %v1324_v41, %s15745_s24  ;;  %v11569_v49 = vld [vmem:[#allocation2 + $0x153] sm:$0xff] }
 0x262   : > { %v1775_v59 = vpop.permute.xlu1 %1774  ;;  %v1391_v53 = vpop.permute.xlu0 %1390 }
 0x263   : > { %1475 = vst.msk [vmem:[#allocation3 + $0x60] sm:$0xff] %vm1462_vm4, %v1391_v53  ;;  %v11577_v53 = vld [vmem:[#allocation2 + $0x154] sm:$0xff] }
 0x264   : > { %1987 = vrot.lane.b32.xlu1 %v1325_v37, %s15721_s13  ;;  %1599 = vrot.lane.b32.xlu0 %v11286_v20, %s15743_s14 }
 0x266   : > { %v1968_v43 = vpop.permute.xlu1 %1967  ;;  %v1580_v24 = vpop.permute.xlu0 %1579 }
 0x267   : > { %1666 = vst.msk [vmem:[#allocation3 + $0x50] sm:$0xff] %vm1655_vm6, %v1580_v24 }
 0x268   : > { %1601 = vrot.lane.b32.xlu1 %v11297_v30, %s15743_s14  ;;  %1792 = vrot.lane.b32.xlu0 %v11537_v23, %s15723_s12 }
 0x26a   : > { %v1582_v35 = vpop.permute.xlu1 %1581  ;;  %v1773_v5 = vpop.permute.xlu0 %1772 }
 0x26b   : > { %1667 = vst.msk [vmem:[#allocation3 + $0x58] sm:$0xff] %vm1655_vm6, %v1582_v35 }
 0x26c   : > { %1859 = vst.msk [vmem:[#allocation3 + $0x50] sm:$0xff] %vm1848_vm7, %v1773_v5  ;;  %1860 = vst.msk [vmem:[#allocation3 + $0x58] sm:$0xff] %vm1848_vm7, %v1775_v59  ;;  %1223 = vrot.lane.b32.xlu1 %v11558_v51, %s10591_s22  ;;  %1985 = vrot.lane.b32.xlu0 %v1324_v41, %s15721_s13 }
 0x26d   : > { %2053 = vst.msk [vmem:[#allocation3 + $0x58] sm:$0xff] %vm2041_vm8, %v1968_v43 }
 0x26e   : > { %v2158_v7 = vpop.permute.xlu1 %2157  ;;  %v1966_v37 = vpop.permute.xlu0 %1965 }
 0x26f   : > { %2245 = vst.msk [vmem:[#allocation3 + $0x48] sm:$0xff] %vm2235_vm9, %v2158_v7 }
 0x270   : > { %2052 = vst.msk [vmem:[#allocation3 + $0x50] sm:$0xff] %vm2041_vm8, %v1966_v37  ;;  %1416 = vrot.lane.b32.xlu1 %v11567_v32, %s15745_s24  ;;  %1221 = vrot.lane.b32.xlu0 %v11569_v49, %s10591_s22 }
 0x272   : > { %v1204_v59 = vpop.permute.xlu1 %1203  ;;  %v2156_v41 = vpop.permute.xlu0 %2155 }
 0x273   : > { %1285 = vst.msk [vmem:[#allocation3 + $0x78] sm:$0xff] %vm1269_vm3, %v1204_v59  ;;  %v11595_v59 = vld [vmem:[#allocation2 + $0x173] sm:$0xff] }
 0x274   : > { %2244 = vst.msk [vmem:[#allocation3 + $0x40] sm:$0xff] %vm2235_vm9, %v2156_v41  ;;  %1798 = vrot.lane.b32.xlu1 %v11558_v51, %s15723_s12  ;;  %1414 = vrot.lane.b32.xlu0 %v11577_v53, %s15745_s24 }
 0x276   : > { %v1397_v43 = vpop.permute.xlu1 %1396  ;;  %v1202_v24 = vpop.permute.xlu0 %1201 }
 0x277   : > { %1478 = vst.msk [vmem:[#allocation3 + $0x78] sm:$0xff] %vm1462_vm4, %v1397_v43 }
 0x278   : > { %1284 = vst.msk [vmem:[#allocation3 + $0x70] sm:$0xff] %vm1269_vm3, %v1202_v24  ;;  %1991 = vrot.lane.b32.xlu1 %v11567_v32, %s15721_s13  ;;  %1603 = vrot.lane.b32.xlu0 %v11299_v31, %s15743_s14  ;;  %v11603_v24 = vld [vmem:[#allocation2 + $0x174] sm:$0xff] }
 0x27a   : > { %v1779_v35 = vpop.permute.xlu1 %1778  ;;  %v1395_v5 = vpop.permute.xlu0 %1394 }
 0x27b   : > { %1477 = vst.msk [vmem:[#allocation3 + $0x70] sm:$0xff] %vm1462_vm4, %v1395_v5  ;;  %v11605_v5 = vld [vmem:[#allocation2 + $0x16b] sm:$0xff] }
 0x27c   : > { %1605 = vrot.lane.b32.xlu1 %v11309_v44, %s15743_s14  ;;  %1796 = vrot.lane.b32.xlu0 %v11569_v49, %s15723_s12 }
 0x27e   : > { %v1972_v7 = vpop.permute.xlu1 %1971  ;;  %v1584_v37 = vpop.permute.xlu0 %1583 }
 0x27f   : > { %1668 = vst.msk [vmem:[#allocation3 + $0x60] sm:$0xff] %vm1655_vm6, %v1584_v37 }
 0x280   : > { %1227 = vrot.lane.b32.xlu1 %v11595_v59, %s10591_s22  ;;  %1989 = vrot.lane.b32.xlu0 %v11577_v53, %s15721_s13 }
 0x282   : > { %v1586_v41 = vpop.permute.xlu1 %1585  ;;  %v1777_v43 = vpop.permute.xlu0 %1776 }
 0x283   : > { %1669 = vst.msk [vmem:[#allocation3 + $0x68] sm:$0xff] %vm1655_vm6, %v1586_v41  ;;  %v11615_v41 = vld [vmem:[#allocation2 + $0x16c] sm:$0xff] }
 0x284   : > { %1861 = vst.msk [vmem:[#allocation3 + $0x60] sm:$0xff] %vm1848_vm7, %v1777_v43  ;;  %1862 = vst.msk [vmem:[#allocation3 + $0x68] sm:$0xff] %vm1848_vm7, %v1779_v35  ;;  %1420 = vrot.lane.b32.xlu1 %v11603_v24, %s15745_s24  ;;  %1225 = vrot.lane.b32.xlu0 %v11605_v5, %s10591_s22 }
 0x285   : > { %2055 = vst.msk [vmem:[#allocation3 + $0x68] sm:$0xff] %vm2041_vm8, %v1972_v7 }
 0x286   : > { %v2162_v37 = vpop.permute.xlu1 %2161  ;;  %v1970_v29 = vpop.permute.xlu0 %1969 }
 0x287   : > { %2247 = vst.msk [vmem:[#allocation3 + $0x58] sm:$0xff] %vm2235_vm9, %v2162_v37 }
 0x288   : > { %2054 = vst.msk [vmem:[#allocation3 + $0x60] sm:$0xff] %vm2041_vm8, %v1970_v29  ;;  %1802 = vrot.lane.b32.xlu1 %v11595_v59, %s15723_s12  ;;  %1418 = vrot.lane.b32.xlu0 %v11615_v41, %s15745_s24 }
 0x28a   : > { %v1208_v35 = vpop.permute.xlu1 %1207  ;;  %v2160_v43 = vpop.permute.xlu0 %2159 }
 0x28b   : > { %1287 = vst.msk [vmem:[#allocation3 + $0x88] sm:$0xff] %vm1269_vm3, %v1208_v35 }
 0x28c   : > { %2246 = vst.msk [vmem:[#allocation3 + $0x50] sm:$0xff] %vm2235_vm9, %v2160_v43  ;;  %1995 = vrot.lane.b32.xlu1 %v11603_v24, %s15721_s13  ;;  %1607 = vrot.lane.b32.xlu0 %v11311_v45, %s15743_s14  ;;  %v11634_v43 = vld [vmem:[#allocation2 + $0x18b] sm:$0xff] }
 0x28e   : > { %v1401_v29 = vpop.permute.xlu1 %1400  ;;  %v1206_v7 = vpop.permute.xlu0 %1205 }
 0x28f   : > { %1480 = vst.msk [vmem:[#allocation3 + $0x88] sm:$0xff] %vm1462_vm4, %v1401_v29 }
 0x290   : > { %1286 = vst.msk [vmem:[#allocation3 + $0x80] sm:$0xff] %vm1269_vm3, %v1206_v7  ;;  %1609 = vrot.lane.b32.xlu1 %v11321_v14, %s15743_s14  ;;  %1800 = vrot.lane.b32.xlu0 %v11605_v5, %s15723_s12 }
 0x292   : > { %v1783_v37 = vpop.permute.xlu1 %1782  ;;  %v1399_v35 = vpop.permute.xlu0 %1398 }
 0x293   : > { %1479 = vst.msk [vmem:[#allocation3 + $0x80] sm:$0xff] %vm1462_vm4, %v1399_v35 }
 0x294   : > { %1231 = vrot.lane.b32.xlu1 %v11634_v43, %s10591_s22  ;;  %1993 = vrot.lane.b32.xlu0 %v11615_v41, %s15721_s13 }
 0x296   : > { %v1976_v29 = vpop.permute.xlu1 %1975  ;;  %v1588_v7 = vpop.permute.xlu0 %1587 }
 0x297   : > { %1670 = vst.msk [vmem:[#allocation3 + $0x70] sm:$0xff] %vm1655_vm6, %v1588_v7 }
 0x298   : > { %1424 = vrot.lane.b32.xlu1 %v11641_v19, %s15745_s24  ;;  %1229 = vrot.lane.b32.xlu0 %v11643_v26, %s10591_s22 }
 0x29a   : > { %v1590_v35 = vpop.permute.xlu1 %1589  ;;  %v1781_v11 = vpop.permute.xlu0 %1780 }
 0x29b   : > { %1671 = vst.msk [vmem:[#allocation3 + $0x78] sm:$0xff] %vm1655_vm6, %v1590_v35  ;;  %v11673_v35 = vld [vmem:[#allocation2 + $0x1a3] sm:$0xff] }
 0x29c   : > { %1863 = vst.msk [vmem:[#allocation3 + $0x70] sm:$0xff] %vm1848_vm7, %v1781_v11  ;;  %1864 = vst.msk [vmem:[#allocation3 + $0x78] sm:$0xff] %vm1848_vm7, %v1783_v37  ;;  %1806 = vrot.lane.b32.xlu1 %v11634_v43, %s15723_s12  ;;  %1422 = vrot.lane.b32.xlu0 %v11651_v18, %s15745_s24 }
 0x29d   : > { %2057 = vst.msk [vmem:[#allocation3 + $0x78] sm:$0xff] %vm2041_vm8, %v1976_v29 }
 0x29e   : > { %v2166_v7 = vpop.permute.xlu1 %2165  ;;  %v1974_v1 = vpop.permute.xlu0 %1973 }
 0x29f   : > { %2249 = vst.msk [vmem:[#allocation3 + $0x68] sm:$0xff] %vm2235_vm9, %v2166_v7 }
 0x2a0   : > { %2056 = vst.msk [vmem:[#allocation3 + $0x70] sm:$0xff] %vm2041_vm8, %v1974_v1  ;;  %1999 = vrot.lane.b32.xlu1 %v11641_v19, %s15721_s13  ;;  %1611 = vrot.lane.b32.xlu0 %v11323_v42, %s15743_s14 }
 0x2a2   : > { %v1212_v11 = vpop.permute.xlu1 %1211  ;;  %v2164_v37 = vpop.permute.xlu0 %2163 }
 0x2a3   : > { %1289 = vst.msk [vmem:[#allocation3 + $0x98] sm:$0xff] %vm1269_vm3, %v1212_v11 }
 0x2a4   : > { %2248 = vst.msk [vmem:[#allocation3 + $0x60] sm:$0xff] %vm2235_vm9, %v2164_v37  ;;  %1613 = vrot.lane.b32.xlu1 %v11334_v25, %s15743_s14  ;;  %1804 = vrot.lane.b32.xlu0 %v11643_v26, %s15723_s12  ;;  %v11680_v37 = vld [vmem:[#allocation2 + $0x1a4] sm:$0xff] }
 0x2a6   : > { %v1405_v29 = vpop.permute.xlu1 %1404  ;;  %v1210_v1 = vpop.permute.xlu0 %1209 }
 0x2a7   : > { %1482 = vst.msk [vmem:[#allocation3 + $0x98] sm:$0xff] %vm1462_vm4, %v1405_v29 }
 0x2a8   : > { %1288 = vst.msk [vmem:[#allocation3 + $0x90] sm:$0xff] %vm1269_vm3, %v1210_v1  ;;  %1235 = vrot.lane.b32.xlu1 %v11673_v35, %s10591_s22  ;;  %1997 = vrot.lane.b32.xlu0 %v11651_v18, %s15721_s13 }
 0x2aa   : > { %v1787_v7 = vpop.permute.xlu1 %1786  ;;  %v1403_v11 = vpop.permute.xlu0 %1402 }
 0x2ab   : > { %1481 = vst.msk [vmem:[#allocation3 + $0x90] sm:$0xff] %vm1462_vm4, %v1403_v11 }
 0x2ac   : > { %1428 = vrot.lane.b32.xlu1 %v11680_v37, %s15745_s24  ;;  %1233 = vrot.lane.b32.xlu0 %v11682_v8, %s10591_s22 }
 0x2ae   : > { %v1980_v29 = vpop.permute.xlu1 %1979  ;;  %v1592_v1 = vpop.permute.xlu0 %1591 }
 0x2af   : > { %1672 = vst.msk [vmem:[#allocation3 + $0x80] sm:$0xff] %vm1655_vm6, %v1592_v1 }
 0x2b0   : > { %1810 = vrot.lane.b32.xlu1 %v11673_v35, %s15723_s12  ;;  %1426 = vrot.lane.b32.xlu0 %v11689_v57, %s15745_s24 }
 0x2b2   : > { %v1594_v11 = vpop.permute.xlu1 %1593  ;;  %v1785_v0 = vpop.permute.xlu0 %1784 }
 0x2b3   : > { %1673 = vst.msk [vmem:[#allocation3 + $0x88] sm:$0xff] %vm1655_vm6, %v1594_v11  ;;  %v11711_v11 = vld [vmem:[#allocation2 + $0x1bb] sm:$0xff] }
 0x2b4   : > { %1865 = vst.msk [vmem:[#allocation3 + $0x80] sm:$0xff] %vm1848_vm7, %v1785_v0  ;;  %1866 = vst.msk [vmem:[#allocation3 + $0x88] sm:$0xff] %vm1848_vm7, %v1787_v7  ;;  %2003 = vrot.lane.b32.xlu1 %v11680_v37, %s15721_s13  ;;  %1615 = vrot.lane.b32.xlu0 %v11336_v38, %s15743_s14 }
 0x2b5   : > { %2059 = vst.msk [vmem:[#allocation3 + $0x88] sm:$0xff] %vm2041_vm8, %v1980_v29 }
 0x2b6   : > { %v1216_v1 = vpop.permute.xlu1 %1215  ;;  %v1978_v47 = vpop.permute.xlu0 %1977 }
 0x2b7   : > { %1291 = vst.msk [vmem:[#allocation3 + $0xa8] sm:$0xff] %vm1269_vm3, %v1216_v1  ;;  %v11718_v1 = vld [vmem:[#allocation2 + $0x1bc] sm:$0xff] }
 0x2b8   : > { %2058 = vst.msk [vmem:[#allocation3 + $0x80] sm:$0xff] %vm2041_vm8, %v1978_v47  ;;  %1617 = vrot.lane.b32.xlu1 %v11345_v36, %s15743_s14  ;;  %1808 = vrot.lane.b32.xlu0 %v11682_v8, %s15723_s12 }
 0x2ba   : > { %v1409_v0 = vpop.permute.xlu1 %1408  ;;  %v1214_v7 = vpop.permute.xlu0 %1213 }
 0x2bb   : > { %1484 = vst.msk [vmem:[#allocation3 + $0xa8] sm:$0xff] %vm1462_vm4, %v1409_v0 }
 0x2bc   : > { %1290 = vst.msk [vmem:[#allocation3 + $0xa0] sm:$0xff] %vm1269_vm3, %v1214_v7  ;;  %1814 = vrot.lane.b32.xlu1 %v11711_v11, %s15723_s12  ;;  %2001 = vrot.lane.b32.xlu0 %v11689_v57, %s15721_s13 }
 0x2be   : > { %v1791_v47 = vpop.permute.xlu1 %1790  ;;  %v1407_v29 = vpop.permute.xlu0 %1406 }
 0x2bf   : > { %1483 = vst.msk [vmem:[#allocation3 + $0xa0] sm:$0xff] %vm1462_vm4, %v1407_v29 }
 0x2c0   : > { %2007 = vrot.lane.b32.xlu1 %v11718_v1, %s15721_s13  ;;  %1619 = vrot.lane.b32.xlu0 %v11720_v54, %s15743_s14 }
 0x2c2   : > { %v1984_v0 = vpop.permute.xlu1 %1983  ;;  %v1596_v7 = vpop.permute.xlu0 %1595 }
 0x2c3   : > { %1674 = vst.msk [vmem:[#allocation3 + $0x90] sm:$0xff] %vm1655_vm6, %v1596_v7 }
 0x2c4   : > { %1621 = vrot.lane.b32.xlu1 %v1526_v40, %s15743_s14  ;;  %1812 = vrot.lane.b32.xlu0 %v11727_v46, %s15723_s12  ;;  %s15866_s12 = smov 16  }
 0x2c6   : > { %v1598_v29 = vpop.permute.xlu1 %1597  ;;  %v1789_v34 = vpop.permute.xlu0 %1788 }
 0x2c7   : > { %1675 = vst.msk [vmem:[#allocation3 + $0x98] sm:$0xff] %vm1655_vm6, %v1598_v29 }
 0x2c8   : > { %1867 = vst.msk [vmem:[#allocation3 + $0x90] sm:$0xff] %vm1848_vm7, %v1789_v34  ;;  %1868 = vst.msk [vmem:[#allocation3 + $0x98] sm:$0xff] %vm1848_vm7, %v1791_v47  ;;  %2169 = vrot.lane.b32.xlu1 %v11271_v2, %s15719_s15  ;;  %2005 = vrot.lane.b32.xlu0 %v11734_v39, %s15721_s13  ;;  %s10599_s13 = smov 32  }
 0x2c9   : > { %2061 = vst.msk [vmem:[#allocation3 + $0x98] sm:$0xff] %vm2041_vm8, %v1984_v0 }
 0x2ca   : > { %v1220_v7 = vpop.permute.xlu1 %1219  ;;  %v1982_v28 = vpop.permute.xlu0 %1981 }
 0x2cb   : > { %1293 = vst.msk [vmem:[#allocation3 + $0xb8] sm:$0xff] %vm1269_vm3, %v1220_v7  ;;  %v2269_v7 = vld [vmem:[#allocation2 + $0x6b] sm:$0xff] }
 0x2cc   : > { %2060 = vst.msk [vmem:[#allocation3 + $0x90] sm:$0xff] %vm2041_vm8, %v1982_v28  ;;  %2173 = vrot.lane.b32.xlu1 %v11284_v17, %s15719_s15  ;;  %2167 = vrot.lane.b32.xlu0 %v11260_v52, %s15719_s15 }
 0x2ce   : > { %v1413_v34 = vpop.permute.xlu1 %1412  ;;  %v1218_v47 = vpop.permute.xlu0 %1217 }
 0x2cf   : > { %1486 = vst.msk [vmem:[#allocation3 + $0xb8] sm:$0xff] %vm1462_vm4, %v1413_v34  ;;  %v2271_v34 = vld [vmem:[#allocation2 + $0x83] sm:$0xff] }
 0x2d0   : > { %1292 = vst.msk [vmem:[#allocation3 + $0xb0] sm:$0xff] %vm1269_vm3, %v1218_v47  ;;  %2177 = vrot.lane.b32.xlu1 %v11297_v30, %s15719_s15  ;;  %2171 = vrot.lane.b32.xlu0 %v11273_v6, %s15719_s15  ;;  %v2268_v47 = vld [vmem:[#allocation2 + $0x63] sm:$0xff] }
 0x2d2   : > { %v1795_v2 = vpop.permute.xlu1 %1794  ;;  %v1411_v28 = vpop.permute.xlu0 %1410 }
 0x2d3   : > { %1485 = vst.msk [vmem:[#allocation3 + $0xb0] sm:$0xff] %vm1462_vm4, %v1411_v28  ;;  %v2273_v28 = vld [vmem:[#allocation2 + $0x9b] sm:$0xff] }
 0x2d4   : > { %2181 = vrot.lane.b32.xlu1 %v11309_v44, %s15719_s15  ;;  %2175 = vrot.lane.b32.xlu0 %v11286_v20, %s15719_s15 }
 0x2d6   : > { %v1988_v52 = vpop.permute.xlu1 %1987  ;;  %v1600_v17 = vpop.permute.xlu0 %1599 }
 0x2d7   : > { %1676 = vst.msk [vmem:[#allocation3 + $0xa0] sm:$0xff] %vm1655_vm6, %v1600_v17 }
 0x2d8   : > { %2185 = vrot.lane.b32.xlu1 %v11321_v14, %s15719_s15  ;;  %2179 = vrot.lane.b32.xlu0 %v11299_v31, %s15719_s15 }
 0x2da   : > { %v1602_v6 = vpop.permute.xlu1 %1601  ;;  %v1793_v30 = vpop.permute.xlu0 %1792 }
 0x2db   : > { %1677 = vst.msk [vmem:[#allocation3 + $0xa8] sm:$0xff] %vm1655_vm6, %v1602_v6 }
 0x2dc   : > { %1869 = vst.msk [vmem:[#allocation3 + $0xa0] sm:$0xff] %vm1848_vm7, %v1793_v30  ;;  %1870 = vst.msk [vmem:[#allocation3 + $0xa8] sm:$0xff] %vm1848_vm7, %v1795_v2  ;;  %2189 = vrot.lane.b32.xlu1 %v11334_v25, %s15719_s15  ;;  %2183 = vrot.lane.b32.xlu0 %v11311_v45, %s15719_s15  ;;  %v2106_v45 = vld [vmem:[#allocation2 + $0x1d2] sm:$0xff] }
 0x2dd   : > { %2063 = vst.msk [vmem:[#allocation3 + $0xa8] sm:$0xff] %vm2041_vm8, %v1988_v52  ;;  %v2270_v52 = vld [vmem:[#allocation2 + $0x7b] sm:$0xff]  ;;  %v2275_v30 = vld [vmem:[#allocation2 + $0xb3] sm:$0xff] }
 0x2de   : > { %v1224_v20 = vpop.permute.xlu1 %1223  ;;  %v1986_v44 = vpop.permute.xlu0 %1985 }
 0x2df   : > { %1295 = vst.msk [vmem:[#allocation3 + $0xc8] sm:$0xff] %vm1269_vm3, %v1224_v20  ;;  %v2272_v20 = vld [vmem:[#allocation2 + $0x93] sm:$0xff] }
 0x2e0   : > { %2062 = vst.msk [vmem:[#allocation3 + $0xa0] sm:$0xff] %vm2041_vm8, %v1986_v44  ;;  %2193 = vrot.lane.b32.xlu1 %v11345_v36, %s15719_s15  ;;  %2187 = vrot.lane.b32.xlu0 %v11323_v42, %s15719_s15  ;;  %v2105_v42 = vld [vmem:[#allocation2 + $0x1ca] sm:$0xff] }
 0x2e2   : > { %v1417_v31 = vpop.permute.xlu1 %1416  ;;  %v1222_v14 = vpop.permute.xlu0 %1221 }
 0x2e3   : > { %1488 = vst.msk [vmem:[#allocation3 + $0xc8] sm:$0xff] %vm1462_vm4, %v1417_v31 }
 0x2e4   : > { %1294 = vst.msk [vmem:[#allocation3 + $0xc0] sm:$0xff] %vm1269_vm3, %v1222_v14  ;;  %2197 = vrot.lane.b32.xlu1 %v1526_v40, %s15719_s15  ;;  %2191 = vrot.lane.b32.xlu0 %v11336_v38, %s15719_s15  ;;  %v2277_v14 = vld [vmem:[#allocation2 + $0xcb] sm:$0xff] }
 0x2e6   : > { %v1799_v25 = vpop.permute.xlu1 %1798  ;;  %v1415_v0 = vpop.permute.xlu0 %1414 }
 0x2e7   : > { %1487 = vst.msk [vmem:[#allocation3 + $0xc0] sm:$0xff] %vm1462_vm4, %v1415_v0 }
 0x2e8   : > { %2201 = vrot.lane.b32.xlu1 %v2106_v45, %s15719_s15  ;;  %2195 = vrot.lane.b32.xlu0 %v11720_v54, %s15719_s15  ;;  %v2274_v45 = vld [vmem:[#allocation2 + $0xab] sm:$0xff] }
 0x2ea   : > { %v1992_v36 = vpop.permute.xlu1 %1991  ;;  %v1604_v29 = vpop.permute.xlu0 %1603 }
 0x2eb   : > { %1678 = vst.msk [vmem:[#allocation3 + $0xb0] sm:$0xff] %vm1655_vm6, %v1604_v29 }
 0x2ec   : > { %2334 = vrot.lane.b32.xlu1 %v2269_v7, %s10598_s16  ;;  %2199 = vrot.lane.b32.xlu0 %v2105_v42, %s15719_s15  ;;  %v2279_v42 = vld [vmem:[#allocation2 + $0xe3] sm:$0xff]  ;;  %s10601_s15 = smov 2  }
 0x2ee   : > { %v1606_v40 = vpop.permute.xlu1 %1605  ;;  %v1797_v38 = vpop.permute.xlu0 %1796 }
 0x2ef   : > { %1679 = vst.msk [vmem:[#allocation3 + $0xb8] sm:$0xff] %vm1655_vm6, %v1606_v40  ;;  %v2281_v40 = vld [vmem:[#allocation2 + $0xfb] sm:$0xff] }
 0x2f0   : > { %1871 = vst.msk [vmem:[#allocation3 + $0xb0] sm:$0xff] %vm1848_vm7, %v1797_v38  ;;  %1872 = vst.msk [vmem:[#allocation3 + $0xb8] sm:$0xff] %vm1848_vm7, %v1799_v25  ;;  %2338 = vrot.lane.b32.xlu1 %v2271_v34, %s10598_s16  ;;  %2332 = vrot.lane.b32.xlu0 %v2268_v47, %s10598_s16  ;;  %v2278_v38 = vld [vmem:[#allocation2 + $0xdb] sm:$0xff] }
 0x2f1   : > { %2065 = vst.msk [vmem:[#allocation3 + $0xb8] sm:$0xff] %vm2041_vm8, %v1992_v36  ;;  %v2276_v36 = vld [vmem:[#allocation2 + $0xc3] sm:$0xff] }
 0x2f2   : > { %v1228_v54 = vpop.permute.xlu1 %1227  ;;  %v1990_v2 = vpop.permute.xlu0 %1989 }
 0x2f3   : > { %1297 = vst.msk [vmem:[#allocation3 + $0xd8] sm:$0xff] %vm1269_vm3, %v1228_v54  ;;  %v2280_v54 = vld [vmem:[#allocation2 + $0xf3] sm:$0xff] }
 0x2f4   : > { %2064 = vst.msk [vmem:[#allocation3 + $0xb0] sm:$0xff] %vm2041_vm8, %v1990_v2  ;;  %2342 = vrot.lane.b32.xlu1 %v2273_v28, %s10598_s16  ;;  %2336 = vrot.lane.b32.xlu0 %v2270_v52, %s10598_s16 }
 0x2f6   : > { %v1421_v17 = vpop.permute.xlu1 %1420  ;;  %v1226_v6 = vpop.permute.xlu0 %1225 }
 0x2f7   : > { %1490 = vst.msk [vmem:[#allocation3 + $0xd8] sm:$0xff] %vm1462_vm4, %v1421_v17 }
 0x2f8   : > { %1296 = vst.msk [vmem:[#allocation3 + $0xd0] sm:$0xff] %vm1269_vm3, %v1226_v6  ;;  %2346 = vrot.lane.b32.xlu1 %v2275_v30, %s10598_s16  ;;  %2340 = vrot.lane.b32.xlu0 %v2272_v20, %s10598_s16  ;;  %v2299_v20 = vld [vmem:[#allocation2 + $0x1d3] sm:$0xff] }
 0x2fa   : > { %v1803_v44 = vpop.permute.xlu1 %1802  ;;  %v1419_v31 = vpop.permute.xlu0 %1418 }
 0x2fb   : > { %1489 = vst.msk [vmem:[#allocation3 + $0xd0] sm:$0xff] %vm1462_vm4, %v1419_v31 }
 0x2fc   : > { %2350 = vrot.lane.b32.xlu1 %v2277_v14, %s10598_s16  ;;  %2344 = vrot.lane.b32.xlu0 %v2274_v45, %s10598_s16 }
 0x2fe   : > { %v1996_v25 = vpop.permute.xlu1 %1995  ;;  %v1608_v0 = vpop.permute.xlu0 %1607 }
 0x2ff   : > { %1680 = vst.msk [vmem:[#allocation3 + $0xc0] sm:$0xff] %vm1655_vm6, %v1608_v0  ;;  %v2462_v0 = vld [vmem:[#allocation2 + $0x6c] sm:$0xff] }
 0x300   : > { %2354 = vrot.lane.b32.xlu1 %v2279_v42, %s10598_s16  ;;  %2348 = vrot.lane.b32.xlu0 %v2276_v36, %s10598_s16  ;;  %v2464_v36 = vld [vmem:[#allocation2 + $0x84] sm:$0xff] }
 0x302   : > { %v1610_v29 = vpop.permute.xlu1 %1609  ;;  %v1801_v7 = vpop.permute.xlu0 %1800 }
 0x303   : > { %1681 = vst.msk [vmem:[#allocation3 + $0xc8] sm:$0xff] %vm1655_vm6, %v1610_v29  ;;  %v2461_v29 = vld [vmem:[#allocation2 + $0x64] sm:$0xff] }
 0x304   : > { %1873 = vst.msk [vmem:[#allocation3 + $0xc0] sm:$0xff] %vm1848_vm7, %v1801_v7  ;;  %1874 = vst.msk [vmem:[#allocation3 + $0xc8] sm:$0xff] %vm1848_vm7, %v1803_v44  ;;  %2358 = vrot.lane.b32.xlu1 %v2281_v40, %s10598_s16  ;;  %2352 = vrot.lane.b32.xlu0 %v2278_v38, %s10598_s16  ;;  %v2466_v38 = vld [vmem:[#allocation2 + $0x9c] sm:$0xff] }
 0x305   : > { %2067 = vst.msk [vmem:[#allocation3 + $0xc8] sm:$0xff] %vm2041_vm8, %v1996_v25 }
 0x306   : > { %v1232_v34 = vpop.permute.xlu1 %1231  ;;  %v1994_v47 = vpop.permute.xlu0 %1993 }
 0x307   : > { %1299 = vst.msk [vmem:[#allocation3 + $0xe8] sm:$0xff] %vm1269_vm3, %v1232_v34  ;;  %v2463_v34 = vld [vmem:[#allocation2 + $0x7c] sm:$0xff] }
 0x308   : > { %2066 = vst.msk [vmem:[#allocation3 + $0xc0] sm:$0xff] %vm2041_vm8, %v1994_v47  ;;  %2362 = vrot.lane.b32.xlu1 %v11469_v58, %s10598_s16  ;;  %2356 = vrot.lane.b32.xlu0 %v2280_v54, %s10598_s16 }
 0x30a   : > { %v1425_v2 = vpop.permute.xlu1 %1424  ;;  %v1230_v28 = vpop.permute.xlu0 %1229 }
 0x30b   : > { %1492 = vst.msk [vmem:[#allocation3 + $0xe8] sm:$0xff] %vm1462_vm4, %v1425_v2  ;;  %v2468_v2 = vld [vmem:[#allocation2 + $0xb4] sm:$0xff] }
 0x30c   : > { %1298 = vst.msk [vmem:[#allocation3 + $0xe0] sm:$0xff] %vm1269_vm3, %v1230_v28  ;;  %2366 = vrot.lane.b32.xlu1 %v11500_v60, %s10598_s16  ;;  %2360 = vrot.lane.b32.xlu0 %v11476_v63, %s10598_s16  ;;  %v2465_v28 = vld [vmem:[#allocation2 + $0x94] sm:$0xff] }
 0x30e   : > { %v1807_v52 = vpop.permute.xlu1 %1806  ;;  %v1423_v17 = vpop.permute.xlu0 %1422 }
 0x30f   : > { %1491 = vst.msk [vmem:[#allocation3 + $0xe0] sm:$0xff] %vm1462_vm4, %v1423_v17 }
 0x310   : > { %2370 = vrot.lane.b32.xlu1 %v11530_v12, %s10598_s16  ;;  %2364 = vrot.lane.b32.xlu0 %v11507_v13, %s10598_s16 }
 0x312   : > { %v2000_v58 = vpop.permute.xlu1 %1999  ;;  %v1612_v6 = vpop.permute.xlu0 %1611 }
 0x313   : > { %1682 = vst.msk [vmem:[#allocation3 + $0xd0] sm:$0xff] %vm1655_vm6, %v1612_v6  ;;  %v2467_v6 = vld [vmem:[#allocation2 + $0xac] sm:$0xff] }
 0x314   : > { %2374 = vrot.lane.b32.xlu1 %v11558_v51, %s10598_s16  ;;  %2368 = vrot.lane.b32.xlu0 %v11537_v23, %s10598_s16 }
 0x316   : > { %v1614_v63 = vpop.permute.xlu1 %1613  ;;  %v1805_v60 = vpop.permute.xlu0 %1804 }
 0x317   : > { %1683 = vst.msk [vmem:[#allocation3 + $0xd8] sm:$0xff] %vm1655_vm6, %v1614_v63 }
 0x318   : > { %1875 = vst.msk [vmem:[#allocation3 + $0xd0] sm:$0xff] %vm1848_vm7, %v1805_v60  ;;  %1876 = vst.msk [vmem:[#allocation3 + $0xd8] sm:$0xff] %vm1848_vm7, %v1807_v52  ;;  %2378 = vrot.lane.b32.xlu1 %v11595_v59, %s10598_s16  ;;  %2372 = vrot.lane.b32.xlu0 %v11569_v49, %s10598_s16  ;;  %v2686_v49 = vld [vmem:[%s15678_s3] sm:$0xff]  ;;  %v2687_v59 = vld [vmem:[%s15678_s3 + $0x8] sm:$0xff] }
 0x319   : > { %2069 = vst.msk [vmem:[#allocation3 + $0xd8] sm:$0xff] %vm2041_vm8, %v2000_v58  ;;  %v2470_v58 = vld [vmem:[#allocation2 + $0xcc] sm:$0xff] }
 0x31a   : > { %v1236_v13 = vpop.permute.xlu1 %1235  ;;  %v1998_v12 = vpop.permute.xlu0 %1997 }
 0x31b   : > { %1301 = vst.msk [vmem:[#allocation3 + $0xf8] sm:$0xff] %vm1269_vm3, %v1236_v13  ;;  %v2472_v13 = vld [vmem:[#allocation2 + $0xe4] sm:$0xff] }
 0x31c   : > { %2068 = vst.msk [vmem:[#allocation3 + $0xd0] sm:$0xff] %vm2041_vm8, %v1998_v12  ;;  %2382 = vrot.lane.b32.xlu1 %v11634_v43, %s10598_s16  ;;  %2376 = vrot.lane.b32.xlu0 %v11605_v5, %s10598_s16  ;;  %v10441_v5 = vpack.c.bf16 %v2687_v59, %v2686_v49  ;;  %v2469_v12 = vld [vmem:[#allocation2 + $0xc4] sm:$0xff]  ;;  %v2474_v49 = vld [vmem:[#allocation2 + $0xfc] sm:$0xff] }
 0x31d   : > { %v2471_v59 = vld [vmem:[#allocation2 + $0xdc] sm:$0xff] }
 0x31e   : > { %v1429_v23 = vpop.permute.xlu1 %1428  ;;  %v1234_v51 = vpop.permute.xlu0 %1233  ;;  %10442 = vmatprep.subr.bf16.mxu1 %v10441_v5 }
 0x31f   : > { %1494 = vst.msk [vmem:[#allocation3 + $0xf8] sm:$0xff] %vm1462_vm4, %v1429_v23  ;;  %10444 = vmatpush3.bf16.msra.mxu1 %v10441_v5 }
 0x320   : > { %1300 = vst.msk [vmem:[#allocation3 + $0xf0] sm:$0xff] %vm1269_vm3, %v1234_v51  ;;  %2386 = vrot.lane.b32.xlu1 %v11673_v35, %s10598_s16  ;;  %2380 = vrot.lane.b32.xlu0 %v11643_v26, %s10598_s16  ;;  %v2688_v26 = vld [vmem:[%s15678_s3 + $0x10] sm:$0xff]  ;;  %v2689_v35 = vld [vmem:[%s15678_s3 + $0x18] sm:$0xff] }
 0x321   : > { %v10445_v44 = vpack.c.bf16 %v2689_v35, %v2688_v26  ;;  %v2473_v26 = vld [vmem:[#allocation2 + $0xf4] sm:$0xff] }
 0x322   : > { %v1811_v43 = vpop.permute.xlu1 %1810  ;;  %v1427_v30 = vpop.permute.xlu0 %1426 }
 0x323   : > { %1493 = vst.msk [vmem:[#allocation3 + $0xf0] sm:$0xff] %vm1462_vm4, %v1427_v30  ;;  %10446 = vmatprep.subr.bf16.mxu1 %v10445_v44  ;;  %v2476_v30 = vld [vmem:[#allocation2 + $0x114] sm:$0xff] }
 0x324   : > { %2390 = vrot.lane.b32.xlu1 %v11711_v11, %s10598_s16  ;;  %2384 = vrot.lane.b32.xlu0 %v11682_v8, %s10598_s16  ;;  %v2690_v8 = vld [vmem:[%s15678_s3 + $0x20] sm:$0xf]  ;;  %v2298_v11 = vld [vmem:[#allocation2 + $0x1cb] sm:$0xff] }
 0x325   : > { %10448 = vmatpush3.bf16.msra.mxu1 %v10445_v44  ;;  %v2478_v44 = vld [vmem:[#allocation2 + $0x12c] sm:$0xff] }
 0x326   : > { %v2004_v31 = vpop.permute.xlu1 %2003  ;;  %v1616_v14 = vpop.permute.xlu0 %1615  ;;  %10279 = vmatprep.subr.msk.mxu1 %vm522_vm0, %v2690_v8 }
 0x327   : > { %1684 = vst.msk [vmem:[#allocation3 + $0xe0] sm:$0xff] %vm1655_vm6, %v1616_v14 }
 0x328   : > { %2394 = vrot.lane.b32.xlu1 %v2299_v20, %s10598_s16  ;;  %2388 = vrot.lane.b32.xlu0 %v11727_v46, %s10598_s16 }
 0x329   : > { %10280 = vmatpush3.msk.msra.mxu1 %vm522_vm0, %v2690_v8 }
 0x32a   : > { %v1618_v45 = vpop.permute.xlu1 %1617  ;;  %v1809_v25 = vpop.permute.xlu0 %1808 }
 0x32b   : > { %1685 = vst.msk [vmem:[#allocation3 + $0xe8] sm:$0xff] %vm1655_vm6, %v1618_v45  ;;  %v2477_v45 = vld [vmem:[#allocation2 + $0x124] sm:$0xff] }
 0x32c   : > { %1877 = vst.msk [vmem:[#allocation3 + $0xe0] sm:$0xff] %vm1848_vm7, %v1809_v25  ;;  %1878 = vst.msk [vmem:[#allocation3 + $0xe8] sm:$0xff] %vm1848_vm7, %v1811_v43  ;;  %2527 = vrot.lane.b32.xlu1 %v2462_v0, %s10599_s13  ;;  %2392 = vrot.lane.b32.xlu0 %v2298_v11, %s10598_s16  ;;  %v2480_v11 = vld [vmem:[#allocation2 + $0x144] sm:$0xff] }
 0x32d   : > { %2071 = vst.msk [vmem:[#allocation3 + $0xe8] sm:$0xff] %vm2041_vm8, %v2004_v31  ;;  %v2475_v31 = vld [vmem:[#allocation2 + $0x10c] sm:$0xff] }
 0x32e   : > { %v1815_v46 = vpop.permute.xlu1 %1814  ;;  %v2002_v42 = vpop.permute.xlu0 %2001 }
 0x32f   : > { %2070 = vst.msk [vmem:[#allocation3 + $0xe0] sm:$0xff] %vm2041_vm8, %v2002_v42 }
 0x330   : > { %2531 = vrot.lane.b32.xlu1 %v2464_v36, %s10599_s13  ;;  %2525 = vrot.lane.b32.xlu0 %v2461_v29, %s10599_s13 }
 0x332   : > { %v2008_v7 = vpop.permute.xlu1 %2007  ;;  %v1620_v40 = vpop.permute.xlu0 %1619 }
 0x333   : > { %1686 = vst.msk [vmem:[#allocation3 + $0xf0] sm:$0xff] %vm1655_vm6, %v1620_v40 }
 0x334   : > { %2535 = vrot.lane.b32.xlu1 %v2466_v38, %s10599_s13  ;;  %2529 = vrot.lane.b32.xlu0 %v2463_v34, %s10599_s13 }
 0x336   : > { %v1622_v47 = vpop.permute.xlu1 %1621  ;;  %v1813_v54 = vpop.permute.xlu0 %1812 }
 0x337   : > { %1687 = vst.msk [vmem:[#allocation3 + $0xf8] sm:$0xff] %vm1655_vm6, %v1622_v47 }
 0x338   : > { %1879 = vst.msk [vmem:[#allocation3 + $0xf0] sm:$0xff] %vm1848_vm7, %v1813_v54  ;;  %1880 = vst.msk [vmem:[#allocation3 + $0xf8] sm:$0xff] %vm1848_vm7, %v1815_v46  ;;  %2539 = vrot.lane.b32.xlu1 %v2468_v2, %s10599_s13  ;;  %2533 = vrot.lane.b32.xlu0 %v2465_v28, %s10599_s13  ;;  %v2479_v46 = vld [vmem:[#allocation2 + $0x13c] sm:$0xff] }
 0x339   : > { %2073 = vst.msk [vmem:[#allocation3 + $0xf8] sm:$0xff] %vm2041_vm8, %v2008_v7 }
 0x33a   : > { %v2170_v52 = vpop.permute.xlu1 %2169  ;;  %v2006_v17 = vpop.permute.xlu0 %2005 }
 0x33b   : > { %2251 = vst.msk [vmem:[#allocation3 + $0x78] sm:$0xff] %vm2235_vm9, %v2170_v52 }
 0x33c   : > { %2072 = vst.msk [vmem:[#allocation3 + $0xf0] sm:$0xff] %vm2041_vm8, %v2006_v17  ;;  %2543 = vrot.lane.b32.xlu1 %v2470_v58, %s10599_s13  ;;  %2537 = vrot.lane.b32.xlu0 %v2467_v6, %s10599_s13 }
 0x33e   : > { %v2174_v63 = vpop.permute.xlu1 %2173  ;;  %v2168_v60 = vpop.permute.xlu0 %2167 }
 0x33f   : > { %2253 = vst.msk [vmem:[#allocation3 + $0x88] sm:$0xff] %vm2235_vm9, %v2174_v63  ;;  %2250 = vst.msk [vmem:[#allocation3 + $0x70] sm:$0xff] %vm2235_vm9, %v2168_v60 }
 0x340   : > { %2547 = vrot.lane.b32.xlu1 %v2472_v13, %s10599_s13  ;;  %2541 = vrot.lane.b32.xlu0 %v2469_v12, %s10599_s13 }
 0x342   : > { %v2178_v23 = vpop.permute.xlu1 %2177  ;;  %v2172_v51 = vpop.permute.xlu0 %2171 }
 0x343   : > { %2255 = vst.msk [vmem:[#allocation3 + $0x98] sm:$0xff] %vm2235_vm9, %v2178_v23  ;;  %2252 = vst.msk [vmem:[#allocation3 + $0x80] sm:$0xff] %vm2235_vm9, %v2172_v51  ;;  %v15848_v51 = vld [vmem:[#allocation23_spill] sm:$0xff] }
 0x344   : > { %2551 = vrot.lane.b32.xlu1 %v2474_v49, %s10599_s13  ;;  %2545 = vrot.lane.b32.xlu0 %v2471_v59, %s10599_s13 }
 0x346   : > { %v2182_v5 = vpop.permute.xlu1 %2181  ;;  %v2176_v43 = vpop.permute.xlu0 %2175 }
 0x347   : > { %2257 = vst.msk [vmem:[#allocation3 + $0xa8] sm:$0xff] %vm2235_vm9, %v2182_v5  ;;  %2254 = vst.msk [vmem:[#allocation3 + $0x90] sm:$0xff] %vm2235_vm9, %v2176_v43  ;;  %v15849_v5 = vld [vmem:[#allocation26_spill] sm:$0xff]  ;;  %v15850_v43 = vld [vmem:[#allocation25_spill] sm:$0xff] }
 0x348   : > { %2555 = vrot.lane.b32.xlu1 %v2476_v30, %s10599_s13  ;;  %2549 = vrot.lane.b32.xlu0 %v2473_v26, %s10599_s13 }
 0x34a   : > { %v2186_v35 = vpop.permute.xlu1 %2185  ;;  %v2180_v20 = vpop.permute.xlu0 %2179 }
 0x34b   : > { %2259 = vst.msk [vmem:[#allocation3 + $0xb8] sm:$0xff] %vm2235_vm9, %v2186_v35  ;;  %2256 = vst.msk [vmem:[#allocation3 + $0xa0] sm:$0xff] %vm2235_vm9, %v2180_v20  ;;  %v15851_v35 = vld [vmem:[#allocation28_spill] sm:$0xff]  ;;  %v15852_v20 = vld [vmem:[#allocation27_spill] sm:$0xff] }
 0x34c   : > { %2559 = vrot.lane.b32.xlu1 %v2478_v44, %s10599_s13  ;;  %2553 = vrot.lane.b32.xlu0 %v2475_v31, %s10599_s13 }
 0x34e   : > { %v2190_v14 = vpop.permute.xlu1 %2189  ;;  %v2184_v8 = vpop.permute.xlu0 %2183 }
 0x34f   : > { %2261 = vst.msk [vmem:[#allocation3 + $0xc8] sm:$0xff] %vm2235_vm9, %v2190_v14  ;;  %2258 = vst.msk [vmem:[#allocation3 + $0xb0] sm:$0xff] %vm2235_vm9, %v2184_v8  ;;  %v15853_v14 = vld [vmem:[#allocation30_spill] sm:$0xff]  ;;  %v15854_v8 = vld [vmem:[#allocation29_spill] sm:$0xff] }
 0x350   : > { %2563 = vrot.lane.b32.xlu1 %v2480_v11, %s10599_s13  ;;  %2557 = vrot.lane.b32.xlu0 %v2477_v45, %s10599_s13 }
 0x352   : > { %v2194_v25 = vpop.permute.xlu1 %2193  ;;  %v2188_v0 = vpop.permute.xlu0 %2187 }
 0x353   : > { %2263 = vst.msk [vmem:[#allocation3 + $0xd8] sm:$0xff] %vm2235_vm9, %v2194_v25  ;;  %2260 = vst.msk [vmem:[#allocation3 + $0xc0] sm:$0xff] %vm2235_vm9, %v2188_v0  ;;  %v15855_v25 = vld [vmem:[#allocation32_spill] sm:$0xff]  ;;  %v15856_v0 = vld [vmem:[#allocation31_spill] sm:$0xff] }
 0x354   : > { %2567 = vrot.lane.b32.xlu1 %v11567_v32, %s10599_s13  ;;  %2561 = vrot.lane.b32.xlu0 %v2479_v46, %s10599_s13 }
 0x356   : > { %v2198_v42 = vpop.permute.xlu1 %2197  ;;  %v2192_v36 = vpop.permute.xlu0 %2191 }
 0x357   : > { %2265 = vst.msk [vmem:[#allocation3 + $0xe8] sm:$0xff] %vm2235_vm9, %v2198_v42  ;;  %2262 = vst.msk [vmem:[#allocation3 + $0xd0] sm:$0xff] %vm2235_vm9, %v2192_v36  ;;  %v15857_v36 = vld [vmem:[#allocation34_spill] sm:$0xff] }
 0x358   : > { %2571 = vrot.lane.b32.xlu1 %v11603_v24, %s10599_s13  ;;  %2565 = vrot.lane.b32.xlu0 %v11577_v53, %s10599_s13 }
 0x35a   : > { %v2202_v29 = vpop.permute.xlu1 %2201  ;;  %v2196_v7 = vpop.permute.xlu0 %2195 }
 0x35b   : > { %2267 = vst.msk [vmem:[#allocation3 + $0xf8] sm:$0xff] %vm2235_vm9, %v2202_v29  ;;  %2264 = vst.msk [vmem:[#allocation3 + $0xe0] sm:$0xff] %vm2235_vm9, %v2196_v7  ;;  %v15858_v29 = vld [vmem:[#allocation33_spill] sm:$0xff] }
 0x35c   : > { %2575 = vrot.lane.b32.xlu1 %v11641_v19, %s10599_s13  ;;  %2569 = vrot.lane.b32.xlu0 %v11615_v41, %s10599_s13  ;;  %v2492_v19 = vld [vmem:[#allocation2 + $0x1d4] sm:$0xff] }
 0x35e   : > { %v2335_v32 = vpop.permute.xlu1 %2334  ;;  %v2200_v40 = vpop.permute.xlu0 %2199 }
 0x35f   : > { %2430 = vst.msk [vmem:[#allocation3 + $0x8] sm:$0xff] %vm2428_vm10, %v2335_v32 }
 0x360   : > { %2266 = vst.msk [vmem:[#allocation3 + $0xf0] sm:$0xff] %vm2235_vm9, %v2200_v40  ;;  %2579 = vrot.lane.b32.xlu1 %v11680_v37, %s10599_s13  ;;  %2573 = vrot.lane.b32.xlu0 %v11651_v18, %s10599_s13  ;;  %v2491_v18 = vld [vmem:[#allocation2 + $0x1cc] sm:$0xff] }
 0x361   : > { %v15859_v40 = vld [vmem:[#allocation36_spill] sm:$0xff] }
 0x362   : > { %v2339_v53 = vpop.permute.xlu1 %2338  ;;  %v2333_v24 = vpop.permute.xlu0 %2332 }
 0x363   : > { %2432 = vst.msk [vmem:[#allocation3 + $0x18] sm:$0xff] %vm2428_vm10, %v2339_v53  ;;  %2429 = vst.msk [vmem:[#allocation3] sm:$0xff] %vm2428_vm10, %v2333_v24  ;;  %v15860_v53 = vld [vmem:[#allocation35_spill] sm:$0xff] }
 0x364   : > { %2583 = vrot.lane.b32.xlu1 %v11718_v1, %s10599_s13  ;;  %2577 = vrot.lane.b32.xlu0 %v11689_v57, %s10599_s13  ;;  %v3346_v24 = vld [vmem:[#allocation2 + $0x21] sm:$0xff] }
 0x366   : > { %v2343_v41 = vpop.permute.xlu1 %2342  ;;  %v2337_v38 = vpop.permute.xlu0 %2336 }
 0x367   : > { %2434 = vst.msk [vmem:[#allocation3 + $0x28] sm:$0xff] %vm2428_vm10, %v2343_v41  ;;  %2431 = vst.msk [vmem:[#allocation3 + $0x10] sm:$0xff] %vm2428_vm10, %v2337_v38 }
 0x368   : > { %2587 = vrot.lane.b32.xlu1 %v2492_v19, %s10599_s13  ;;  %2581 = vrot.lane.b32.xlu0 %v11734_v39, %s10599_s13 }
 0x36a   : > { %v2347_v37 = vpop.permute.xlu1 %2346  ;;  %v2341_v34 = vpop.permute.xlu0 %2340 }
 0x36b   : > { %2436 = vst.msk [vmem:[#allocation3 + $0x38] sm:$0xff] %vm2428_vm10, %v2347_v37  ;;  %2433 = vst.msk [vmem:[#allocation3 + $0x20] sm:$0xff] %vm2428_vm10, %v2341_v34  ;;  %v15862_v37 = vld [vmem:[#allocation37_spill] sm:$0xff] }
 0x36c   : > { %3218 = vrot.lane.b32.xlu1 %v10943_v48, %s10600_s30  ;;  %2585 = vrot.lane.b32.xlu0 %v2491_v18, %s10599_s13  ;;  %v15861_v18 = vld [vmem:[#allocation38_spill] sm:$0xff] }
 0x36d   : > { %v3348_v34 = vld [vmem:[#allocation2 + $0x39] sm:$0xff] }
 0x36e   : > { %v2351_v57 = vpop.permute.xlu1 %2350  ;;  %v2345_v1 = vpop.permute.xlu0 %2344 }
 0x36f   : > { %2438 = vst.msk [vmem:[#allocation3 + $0x48] sm:$0xff] %vm2428_vm10, %v2351_v57  ;;  %2435 = vst.msk [vmem:[#allocation3 + $0x30] sm:$0xff] %vm2428_vm10, %v2345_v1  ;;  %v3345_v57 = vld [vmem:[#allocation2 + $0x19] sm:$0xff] }
 0x370   : > { %3222 = vrot.lane.b32.xlu1 %v10956_v55, %s10600_s30  ;;  %3216 = vrot.lane.b32.xlu0 %v10945_v50, %s10600_s30 }
 0x372   : > { %v2355_v39 = vpop.permute.xlu1 %2354  ;;  %v2349_v47 = vpop.permute.xlu0 %2348 }
 0x373   : > { %2440 = vst.msk [vmem:[#allocation3 + $0x58] sm:$0xff] %vm2428_vm10, %v2355_v39  ;;  %2437 = vst.msk [vmem:[#allocation3 + $0x40] sm:$0xff] %vm2428_vm10, %v2349_v47 }
 0x374   : > { %3226 = vrot.lane.b32.xlu1 %v10970_v61, %s10600_s30  ;;  %3220 = vrot.lane.b32.xlu0 %v10958_v56, %s10600_s30 }
 0x376   : > { %v2359_v54 = vpop.permute.xlu1 %2358  ;;  %v2353_v2 = vpop.permute.xlu0 %2352 }
 0x377   : > { %2442 = vst.msk [vmem:[#allocation3 + $0x68] sm:$0xff] %vm2428_vm10, %v2359_v54  ;;  %2439 = vst.msk [vmem:[#allocation3 + $0x50] sm:$0xff] %vm2428_vm10, %v2353_v2  ;;  %v3410_v2 = vld [vmem:[#allocation2 + $0x23] sm:$0xff] }
 0x378   : > { %3230 = vrot.lane.b32.xlu1 %v10984_v3, %s10600_s30  ;;  %3224 = vrot.lane.b32.xlu0 %v10972_v62, %s10600_s30 }
 0x37a   : > { %v2363_v28 = vpop.permute.xlu1 %2362  ;;  %v2357_v52 = vpop.permute.xlu0 %2356 }
 0x37b   : > { %2444 = vst.msk [vmem:[#allocation3 + $0x78] sm:$0xff] %vm2428_vm10, %v2363_v28  ;;  %2441 = vst.msk [vmem:[#allocation3 + $0x60] sm:$0xff] %vm2428_vm10, %v2357_v52  ;;  %v15863_v28 = vld [vmem:[#allocation39_spill] sm:$0xff]  ;;  %v3409_v52 = vld [vmem:[#allocation2 + $0x1b] sm:$0xff] }
 0x37c   : > { %3234 = vrot.lane.b32.xlu1 %v10998_v9, %s10600_s30  ;;  %3228 = vrot.lane.b32.xlu0 %v10986_v4, %s10600_s30 }
 0x37e   : > { %v2367_v17 = vpop.permute.xlu1 %2366  ;;  %v2361_v58 = vpop.permute.xlu0 %2360 }
 0x37f   : > { %2446 = vst.msk [vmem:[#allocation3 + $0x88] sm:$0xff] %vm2428_vm10, %v2367_v17  ;;  %2443 = vst.msk [vmem:[#allocation3 + $0x70] sm:$0xff] %vm2428_vm10, %v2361_v58 }
 0x380   : > { %3238 = vrot.lane.b32.xlu1 %v11012_v15, %s10600_s30  ;;  %3232 = vrot.lane.b32.xlu0 %v11000_v10, %s10600_s30 }
 0x382   : > { %v2371_v6 = vpop.permute.xlu1 %2370  ;;  %v2365_v63 = vpop.permute.xlu0 %2364 }
 0x383   : > { %2448 = vst.msk [vmem:[#allocation3 + $0x98] sm:$0xff] %vm2428_vm10, %v2371_v6  ;;  %2445 = vst.msk [vmem:[#allocation3 + $0x80] sm:$0xff] %vm2428_vm10, %v2365_v63  ;;  %v3412_v63 = vld [vmem:[#allocation2 + $0x3b] sm:$0xff] }
 0x384   : > { %3242 = vrot.lane.b32.xlu1 %v11026_v21, %s10600_s30  ;;  %3236 = vrot.lane.b32.xlu0 %v11014_v16, %s10600_s30 }
 0x386   : > { %v2375_v60 = vpop.permute.xlu1 %2374  ;;  %v2369_v13 = vpop.permute.xlu0 %2368 }
 0x387   : > { %2450 = vst.msk [vmem:[#allocation3 + $0xa8] sm:$0xff] %vm2428_vm10, %v2375_v60  ;;  %2447 = vst.msk [vmem:[#allocation3 + $0x90] sm:$0xff] %vm2428_vm10, %v2369_v13  ;;  %v3411_v60 = vld [vmem:[#allocation2 + $0x33] sm:$0xff] }
 0x388   : > { %3246 = vrot.lane.b32.xlu1 %v11040_v27, %s10600_s30  ;;  %3240 = vrot.lane.b32.xlu0 %v11028_v22, %s10600_s30 }
 0x38a   : > { %v2379_v12 = vpop.permute.xlu1 %2378  ;;  %v2373_v23 = vpop.permute.xlu0 %2372 }
 0x38b   : > { %2452 = vst.msk [vmem:[#allocation3 + $0xb8] sm:$0xff] %vm2428_vm10, %v2379_v12  ;;  %2449 = vst.msk [vmem:[#allocation3 + $0xa0] sm:$0xff] %vm2428_vm10, %v2373_v23 }
 0x38c   : > { %3250 = vrot.lane.b32.xlu1 %v11054_v33, %s10600_s30  ;;  %3244 = vrot.lane.b32.xlu0 %v15848_v51, %s10600_s30 }
 0x38e   : > { %v2383_v49 = vpop.permute.xlu1 %2382  ;;  %v2377_v59 = vpop.permute.xlu0 %2376 }
 0x38f   : > { %2454 = vst.msk [vmem:[#allocation3 + $0xc8] sm:$0xff] %vm2428_vm10, %v2383_v49  ;;  %2451 = vst.msk [vmem:[#allocation3 + $0xb0] sm:$0xff] %vm2428_vm10, %v2377_v59 }
 0x390   : > { %3254 = vrot.lane.b32.xlu1 %v15849_v5, %s10600_s30  ;;  %3248 = vrot.lane.b32.xlu0 %v15850_v43, %s10600_s30 }
 0x392   : > { %v2387_v30 = vpop.permute.xlu1 %2386  ;;  %v2381_v26 = vpop.permute.xlu0 %2380 }
 0x393   : > { %2456 = vst.msk [vmem:[#allocation3 + $0xd8] sm:$0xff] %vm2428_vm10, %v2387_v30  ;;  %2453 = vst.msk [vmem:[#allocation3 + $0xc0] sm:$0xff] %vm2428_vm10, %v2381_v26 }
 0x394   : > { %3258 = vrot.lane.b32.xlu1 %v15851_v35, %s10600_s30  ;;  %3252 = vrot.lane.b32.xlu0 %v15852_v20, %s10600_s30 }
 0x396   : > { %v2391_v44 = vpop.permute.xlu1 %2390  ;;  %v2385_v31 = vpop.permute.xlu0 %2384 }
 0x397   : > { %2458 = vst.msk [vmem:[#allocation3 + $0xe8] sm:$0xff] %vm2428_vm10, %v2391_v44  ;;  %2455 = vst.msk [vmem:[#allocation3 + $0xd0] sm:$0xff] %vm2428_vm10, %v2385_v31 }
 0x398   : > { %3262 = vrot.lane.b32.xlu1 %v15853_v14, %s10600_s30  ;;  %3256 = vrot.lane.b32.xlu0 %v15854_v8, %s10600_s30 }
 0x39a   : > { %v2395_v11 = vpop.permute.xlu1 %2394  ;;  %v2389_v45 = vpop.permute.xlu0 %2388 }
 0x39b   : > { %2460 = vst.msk [vmem:[#allocation3 + $0xf8] sm:$0xff] %vm2428_vm10, %v2395_v11  ;;  %2457 = vst.msk [vmem:[#allocation3 + $0xe0] sm:$0xff] %vm2428_vm10, %v2389_v45 }
 0x39c   : > { %3266 = vrot.lane.b32.xlu1 %v15855_v25, %s10600_s30  ;;  %3260 = vrot.lane.b32.xlu0 %v15856_v0, %s10600_s30 }
 0x39e   : > { %v2528_v46 = vpop.permute.xlu1 %2527  ;;  %v2393_v42 = vpop.permute.xlu0 %2392 }
 0x39f   : > { %2623 = vst.msk [vmem:[#allocation3 + $0x8] sm:$0xff] %vm2621_vm11, %v2528_v46 }
 0x3a0   : > { %2459 = vst.msk [vmem:[#allocation3 + $0xf0] sm:$0xff] %vm2428_vm10, %v2393_v42  ;;  %3270 = vrot.lane.b32.xlu1 %v15857_v36, %s10600_s30  ;;  %3264 = vrot.lane.b32.xlu0 %v15858_v29, %s10600_s30 }
 0x3a2   : > { %v2532_v7 = vpop.permute.xlu1 %2531  ;;  %v2526_v32 = vpop.permute.xlu0 %2525 }
 0x3a3   : > { %2625 = vst.msk [vmem:[#allocation3 + $0x18] sm:$0xff] %vm2621_vm11, %v2532_v7  ;;  %2622 = vst.msk [vmem:[#allocation3] sm:$0xff] %vm2621_vm11, %v2526_v32 }
 0x3a4   : > { %3274 = vrot.lane.b32.xlu1 %v15859_v40, %s10600_s30  ;;  %3268 = vrot.lane.b32.xlu0 %v15860_v53, %s10600_s30 }
 0x3a6   : > { %v2536_v19 = vpop.permute.xlu1 %2535  ;;  %v2530_v41 = vpop.permute.xlu0 %2529  ;;  %v2655_v38 = vld [vmem:[#allocation3 + $0x8] sm:$0xff] }
 0x3a7   : > { %2627 = vst.msk [vmem:[#allocation3 + $0x28] sm:$0xff] %vm2621_vm11, %v2536_v19  ;;  %2624 = vst.msk [vmem:[#allocation3 + $0x10] sm:$0xff] %vm2621_vm11, %v2530_v41 }
 0x3a8   : > { %3378 = vst.msk [vmem:[#allocation3 + $0x8] sm:$0xff] %vm425_vm1, %v3346_v24  ;;  %3278 = vrot.lane.b32.xlu1 %v15861_v18, %s10600_s30  ;;  %3272 = vrot.lane.b32.xlu0 %v15862_v37, %s10600_s30 }
 0x3aa   : > { %v2540_v1 = vpop.permute.xlu1 %2539  ;;  %v2534_v39 = vpop.permute.xlu0 %2533  ;;  %v2654_v47 = vld [vmem:[#allocation3] sm:$0xff]  ;;  %v2657_v54 = vld [vmem:[#allocation3 + $0x18] sm:$0xff] }
 0x3ab   : > { %2629 = vst.msk [vmem:[#allocation3 + $0x38] sm:$0xff] %vm2621_vm11, %v2540_v1  ;;  %2626 = vst.msk [vmem:[#allocation3 + $0x20] sm:$0xff] %vm2621_vm11, %v2534_v39  ;;  %10281 = vmatprep.mubr.msk.f32.mxu1 %vm2698_vm12, %v2654_v47 }
 0x3ac   : > { %3380 = vst.msk [vmem:[#allocation3 + $0x18] sm:$0xff] %vm425_vm1, %v3348_v34  ;;  %3377 = vst.msk [vmem:[#allocation3] sm:$0xff] %vm425_vm1, %v3345_v57  ;;  %3276 = vrot.lane.b32.xlu0 %v15863_v28, %s10600_s30  ;;  %10282 = vmatmul.mubr.msk.f32.vlgmr.msra.gmra.mrb[0].mxu1 %vm2698_vm12, %v2655_v38  ;;  %s15867_s30 = smov 20  }
 0x3ad   : > { %3475 = vrot.lane.b32.xlu1 %v3410_v2, %s10591_s22 }
 0x3ae   : > { %v2544_v17 = vpop.permute.xlu1 %2543  ;;  %v2538_v58 = vpop.permute.xlu0 %2537  ;;  %v2656_v6 = vld [vmem:[#allocation3 + $0x10] sm:$0xff]  ;;  %v2659_v49 = vld [vmem:[#allocation3 + $0x28] sm:$0xff] }
 0x3af   : > { %2631 = vst.msk [vmem:[#allocation3 + $0x48] sm:$0xff] %vm2621_vm11, %v2544_v17  ;;  %2628 = vst.msk [vmem:[#allocation3 + $0x30] sm:$0xff] %vm2621_vm11, %v2538_v58  ;;  %10284 = vmatprep.mubr.msk.f32.mxu1 %vm2698_vm12, %v2656_v6 }
 0x3b0   : > { %10285 = vmatmul.mubr.msk.f32.gmra.mrb[2].mxu1 %vm2698_vm12, %v2657_v54  ;;  %3473 = vrot.lane.b32.xlu0 %v3409_v52, %s10591_s22 }
 0x3b1   : > { %3479 = vrot.lane.b32.xlu1 %v3412_v63, %s10591_s22 }
 0x3b2   : > { %v2548_v13 = vpop.permute.xlu1 %2547  ;;  %v2542_v12 = vpop.permute.xlu0 %2541  ;;  %v2658_v23 = vld [vmem:[#allocation3 + $0x20] sm:$0xff]  ;;  %v2661_v44 = vld [vmem:[#allocation3 + $0x38] sm:$0xff] }
 0x3b3   : > { %2633 = vst.msk [vmem:[#allocation3 + $0x58] sm:$0xff] %vm2621_vm11, %v2548_v13  ;;  %2630 = vst.msk [vmem:[#allocation3 + $0x40] sm:$0xff] %vm2621_vm11, %v2542_v12  ;;  %10287 = vmatprep.mubr.msk.f32.mxu1 %vm2698_vm12, %v2658_v23 }
 0x3b4   : > { %10288 = vmatmul.mubr.msk.f32.gmra.mrb[4].mxu1 %vm2698_vm12, %v2659_v49  ;;  %3477 = vrot.lane.b32.xlu0 %v3411_v60, %s10591_s22 }
 0x3b6   : > { %v2552_v59 = vpop.permute.xlu1 %2551  ;;  %v2546_v30 = vpop.permute.xlu0 %2545  ;;  %v2660_v26 = vld [vmem:[#allocation3 + $0x30] sm:$0xff]  ;;  %v2663_v46 = vld [vmem:[#allocation3 + $0x48] sm:$0xff] }
 0x3b7   : > { %2635 = vst.msk [vmem:[#allocation3 + $0x68] sm:$0xff] %vm2621_vm11, %v2552_v59  ;;  %2632 = vst.msk [vmem:[#allocation3 + $0x50] sm:$0xff] %vm2621_vm11, %v2546_v30  ;;  %10290 = vmatprep.mubr.msk.f32.mxu1 %vm2698_vm12, %v2660_v26 }
 0x3b8   : > { %10291 = vmatmul.mubr.msk.f32.gmra.mrb[6].mxu1 %vm2698_vm12, %v2661_v44 }
 0x3ba   : > { %v2556_v31 = vpop.permute.xlu1 %2555  ;;  %v2550_v11 = vpop.permute.xlu0 %2549  ;;  %v2662_v45 = vld [vmem:[#allocation3 + $0x40] sm:$0xff]  ;;  %v2665_v24 = vld [vmem:[#allocation3 + $0x58] sm:$0xff] }
 0x3bb   : > { %2637 = vst.msk [vmem:[#allocation3 + $0x78] sm:$0xff] %vm2621_vm11, %v2556_v31  ;;  %2634 = vst.msk [vmem:[#allocation3 + $0x60] sm:$0xff] %vm2621_vm11, %v2550_v11  ;;  %10293 = vmatprep.mubr.msk.f32.mxu1 %vm2698_vm12, %v2662_v45 }
 0x3bc   : > { %10294 = vmatmul.mubr.msk.f32.gmra.mrb[8].mxu1 %vm2698_vm12, %v2663_v46  ;;  %v3347_v46 = vld [vmem:[#allocation2 + $0x31] sm:$0xff] }
 0x3bd   : > { %3379 = vst.msk [vmem:[#allocation3 + $0x10] sm:$0xff] %vm425_vm1, %v3347_v46 }
 0x3be   : > { %v2560_v42 = vpop.permute.xlu1 %2559  ;;  %v2554_v7 = vpop.permute.xlu0 %2553  ;;  %v2664_v32 = vld [vmem:[#allocation3 + $0x50] sm:$0xff]  ;;  %v2667_v34 = vld [vmem:[#allocation3 + $0x68] sm:$0xff] }
 0x3bf   : > { %2639 = vst.msk [vmem:[#allocation3 + $0x88] sm:$0xff] %vm2621_vm11, %v2560_v42  ;;  %2636 = vst.msk [vmem:[#allocation3 + $0x70] sm:$0xff] %vm2621_vm11, %v2554_v7  ;;  %10296 = vmatprep.mubr.msk.f32.mxu1 %vm2698_vm12, %v2664_v32 }
 0x3c0   : > { %10297 = vmatmul.mubr.msk.f32.gmra.mrb[10].mxu1 %vm2698_vm12, %v2665_v24 }
 0x3c2   : > { %v2564_v19 = vpop.permute.xlu1 %2563  ;;  %v2558_v41 = vpop.permute.xlu0 %2557  ;;  %v2666_v38 = vld [vmem:[#allocation3 + $0x60] sm:$0xff]  ;;  %v2669_v47 = vld [vmem:[#allocation3 + $0x78] sm:$0xff] }
 0x3c3   : > { %2641 = vst.msk [vmem:[#allocation3 + $0x98] sm:$0xff] %vm2621_vm11, %v2564_v19  ;;  %2638 = vst.msk [vmem:[#allocation3 + $0x80] sm:$0xff] %vm2621_vm11, %v2558_v41  ;;  %10299 = vmatprep.mubr.msk.f32.mxu1 %vm2698_vm12, %v2666_v38 }
 0x3c4   : > { %10300 = vmatmul.mubr.msk.f32.gmra.mrb[12].mxu1 %vm2698_vm12, %v2667_v34 }
 0x3c6   : > { %v2568_v57 = vpop.permute.xlu1 %2567  ;;  %v2562_v1 = vpop.permute.xlu0 %2561  ;;  %v2668_v39 = vld [vmem:[#allocation3 + $0x70] sm:$0xff]  ;;  %v2671_v17 = vld [vmem:[#allocation3 + $0x88] sm:$0xff] }
 0x3c7   : > { %2643 = vst.msk [vmem:[#allocation3 + $0xa8] sm:$0xff] %vm2621_vm11, %v2568_v57  ;;  %2640 = vst.msk [vmem:[#allocation3 + $0x90] sm:$0xff] %vm2621_vm11, %v2562_v1  ;;  %10302 = vmatprep.mubr.msk.f32.mxu1 %vm2698_vm12, %v2668_v39 }
 0x3c8   : > { %10303 = vmatmul.mubr.msk.f32.gmra.mrb[14].mxu1 %vm2698_vm12, %v2669_v47 }
 0x3ca   : > { %v2572_v54 = vpop.permute.xlu1 %2571  ;;  %v2566_v2 = vpop.permute.xlu0 %2565  ;;  %v2670_v52 = vld [vmem:[#allocation3 + $0x80] sm:$0xff]  ;;  %v2673_v60 = vld [vmem:[#allocation3 + $0x98] sm:$0xff] }
 0x3cb   : > { %2645 = vst.msk [vmem:[#allocation3 + $0xb8] sm:$0xff] %vm2621_vm11, %v2572_v54  ;;  %2642 = vst.msk [vmem:[#allocation3 + $0xa0] sm:$0xff] %vm2621_vm11, %v2566_v2  ;;  %10305 = vmatprep.mubr.msk.f32.mxu1 %vm2698_vm12, %v2670_v52 }
 0x3cc   : > { %10306 = vmatmul.mubr.msk.f32.gmra.mrb[16].mxu1 %vm2698_vm12, %v2671_v17 }
 0x3ce   : > { %v2576_v58 = vpop.permute.xlu1 %2575  ;;  %v2570_v6 = vpop.permute.xlu0 %2569  ;;  %v2672_v63 = vld [vmem:[#allocation3 + $0x90] sm:$0xff]  ;;  %v2675_v49 = vld [vmem:[#allocation3 + $0xa8] sm:$0xff] }
 0x3cf   : > { %2647 = vst.msk [vmem:[#allocation3 + $0xc8] sm:$0xff] %vm2621_vm11, %v2576_v58  ;;  %2644 = vst.msk [vmem:[#allocation3 + $0xb0] sm:$0xff] %vm2621_vm11, %v2570_v6  ;;  %10308 = vmatprep.mubr.msk.f32.mxu1 %vm2698_vm12, %v2672_v63 }
 0x3d0   : > { %10309 = vmatmul.mubr.msk.f32.gmra.mrb[18].mxu1 %vm2698_vm12, %v2673_v60 }
 0x3d2   : > { %v2580_v13 = vpop.permute.xlu1 %2579  ;;  %v2574_v12 = vpop.permute.xlu0 %2573  ;;  %v2674_v23 = vld [vmem:[#allocation3 + $0xa0] sm:$0xff]  ;;  %v2677_v44 = vld [vmem:[#allocation3 + $0xb8] sm:$0xff] }
 0x3d3   : > { %2649 = vst.msk [vmem:[#allocation3 + $0xd8] sm:$0xff] %vm2621_vm11, %v2580_v13  ;;  %2646 = vst.msk [vmem:[#allocation3 + $0xc0] sm:$0xff] %vm2621_vm11, %v2574_v12  ;;  %10311 = vmatprep.mubr.msk.f32.mxu1 %vm2698_vm12, %v2674_v23 }
 0x3d4   : > { %10312 = vmatmul.mubr.msk.f32.gmra.mrb[20].mxu1 %vm2698_vm12, %v2675_v49 }
 0x3d6   : > { %v2584_v59 = vpop.permute.xlu1 %2583  ;;  %v2578_v30 = vpop.permute.xlu0 %2577  ;;  %v2676_v26 = vld [vmem:[#allocation3 + $0xb0] sm:$0xff]  ;;  %v2679_v42 = vld [vmem:[#allocation3 + $0xc8] sm:$0xff] }
 0x3d7   : > { %2651 = vst.msk [vmem:[#allocation3 + $0xe8] sm:$0xff] %vm2621_vm11, %v2584_v59  ;;  %2648 = vst.msk [vmem:[#allocation3 + $0xd0] sm:$0xff] %vm2621_vm11, %v2578_v30  ;;  %10314 = vmatprep.mubr.msk.f32.mxu1 %vm2698_vm12, %v2676_v26 }
 0x3d8   : > { %10315 = vmatmul.mubr.msk.f32.gmra.mrb[22].mxu1 %vm2698_vm12, %v2677_v44 }
 0x3da   : > { %v2588_v31 = vpop.permute.xlu1 %2587  ;;  %v2582_v11 = vpop.permute.xlu0 %2581  ;;  %v2678_v45 = vld [vmem:[#allocation3 + $0xc0] sm:$0xff]  ;;  %v2681_v19 = vld [vmem:[#allocation3 + $0xd8] sm:$0xff] }
 0x3db   : > { %2653 = vst.msk [vmem:[#allocation3 + $0xf8] sm:$0xff] %vm2621_vm11, %v2588_v31  ;;  %2650 = vst.msk [vmem:[#allocation3 + $0xe0] sm:$0xff] %vm2621_vm11, %v2582_v11  ;;  %10317 = vmatprep.mubr.msk.f32.mxu1 %vm2698_vm12, %v2678_v45 }
 0x3dc   : > { %10318 = vmatmul.mubr.msk.f32.gmra.mrb[24].mxu1 %vm2698_vm12, %v2679_v42 }
 0x3de   : > { %v3219_v7 = vpop.permute.xlu1 %3218  ;;  %v2586_v32 = vpop.permute.xlu0 %2585  ;;  %v2680_v24 = vld [vmem:[#allocation3 + $0xd0] sm:$0xff]  ;;  %v2683_v57 = vld [vmem:[#allocation3 + $0xe8] sm:$0xff] }
 0x3df   : > { %3313 = vst.msk [vmem:[#allocation2 + $0x53] sm:$0xff] %vm425_vm1, %v3219_v7  ;;  %10320 = vmatprep.mubr.msk.f32.mxu1 %vm2698_vm12, %v2680_v24 }
 0x3e0   : > { %2652 = vst.msk [vmem:[#allocation3 + $0xf0] sm:$0xff] %vm2621_vm11, %v2586_v32  ;;  %10321 = vmatmul.mubr.msk.f32.gmra.mrb[26].mxu1 %vm2698_vm12, %v2681_v19 }
 0x3e2   : > { %v3223_v41 = vpop.permute.xlu1 %3222  ;;  %v3217_v38 = vpop.permute.xlu0 %3216  ;;  %v2682_v34 = vld [vmem:[#allocation3 + $0xe0] sm:$0xff]  ;;  %v2685_v1 = vld [vmem:[#allocation3 + $0xf8] sm:$0xff] }
 0x3e3   : > { %3315 = vst.msk [vmem:[#allocation2 + $0x6b] sm:$0xff] %vm425_vm1, %v3223_v41  ;;  %3312 = vst.msk [vmem:[#allocation2 + $0x4b] sm:$0xff] %vm425_vm1, %v3217_v38  ;;  %10323 = vmatprep.mubr.msk.f32.mxu1 %vm2698_vm12, %v2682_v34 }
 0x3e4   : > { %10324 = vmatmul.mubr.msk.f32.gmra.mrb[28].mxu1 %vm2698_vm12, %v2683_v57 }
 0x3e6   : > { %v3227_v39 = vpop.permute.xlu1 %3226  ;;  %v3221_v47 = vpop.permute.xlu0 %3220  ;;  %v3414_v54 = vld [vmem:[#allocation2 + $0x53] sm:$0xff] }
 0x3e7   : > { %v2684_v2 = vld [vmem:[#allocation3 + $0xf0] sm:$0xff]  ;;  %3317 = vst.msk [vmem:[#allocation2 + $0x83] sm:$0xff] %vm425_vm1, %v3227_v39  ;;  %3314 = vst.msk [vmem:[#allocation2 + $0x63] sm:$0xff] %vm425_vm1, %v3221_v47  ;;  %3483 = vrot.lane.b32.xlu1 %v3414_v54, %s10591_s22 }
 0x3e8   : > { %10326 = vmatprep.mubr.msk.f32.mxu1 %vm2698_vm12, %v2684_v2 }
 0x3e9   : > { %10327 = vmatmul.mubr.msk.f32.gmra.mrb[30].mxu1 %vm2698_vm12, %v2685_v1 }
 0x3ea   : > { %v3231_v52 = vpop.permute.xlu1 %3230  ;;  %v3225_v17 = vpop.permute.xlu0 %3224  ;;  %v3416_v58 = vld [vmem:[#allocation2 + $0x6b] sm:$0xff] }
 0x3eb   : > { %v3413_v6 = vld [vmem:[#allocation2 + $0x4b] sm:$0xff]  ;;  %3319 = vst.msk [vmem:[#allocation2 + $0x9b] sm:$0xff] %vm425_vm1, %v3231_v52  ;;  %3316 = vst.msk [vmem:[#allocation2 + $0x7b] sm:$0xff] %vm425_vm1, %v3225_v17  ;;  %3487 = vrot.lane.b32.xlu1 %v3416_v58, %s10591_s22 }
 0x3ec   : > { %v12129_v63 = vld [vmem:[#allocation2 + $0x51] sm:$0xff]  ;;  %3481 = vrot.lane.b32.xlu0 %v3413_v6, %s10591_s22  ;;  %v12137_v60 = vld [vmem:[#allocation2 + $0x49] sm:$0xff] }
 0x3ed   : > { %3382 = vst.msk [vmem:[#allocation3 + $0x28] sm:$0xff] %vm425_vm1, %v12129_v63  ;;  %3381 = vst.msk [vmem:[#allocation3 + $0x20] sm:$0xff] %vm425_vm1, %v12137_v60 }
 0x3ee   : > { %v3235_v13 = vpop.permute.xlu1 %3234  ;;  %v3229_v12 = vpop.permute.xlu0 %3228  ;;  %v3418_v23 = vld [vmem:[#allocation2 + $0x83] sm:$0xff] }
 0x3ef   : > { %v3415_v49 = vld [vmem:[#allocation2 + $0x63] sm:$0xff]  ;;  %3321 = vst.msk [vmem:[#allocation2 + $0xb3] sm:$0xff] %vm425_vm1, %v3235_v13  ;;  %3318 = vst.msk [vmem:[#allocation2 + $0x93] sm:$0xff] %vm425_vm1, %v3229_v12  ;;  %3491 = vrot.lane.b32.xlu1 %v3418_v23, %s10591_s22 }
 0x3f0   : > { %v12141_v59 = vld [vmem:[#allocation2 + $0x69] sm:$0xff]  ;;  %3485 = vrot.lane.b32.xlu0 %v3415_v49, %s10591_s22  ;;  %v12149_v30 = vld [vmem:[#allocation2 + $0x61] sm:$0xff] }
 0x3f1   : > { %3384 = vst.msk [vmem:[#allocation3 + $0x38] sm:$0xff] %vm425_vm1, %v12141_v59  ;;  %3383 = vst.msk [vmem:[#allocation3 + $0x30] sm:$0xff] %vm425_vm1, %v12149_v30 }
 0x3f2   : > { %v3239_v26 = vpop.permute.xlu1 %3238  ;;  %v3233_v44 = vpop.permute.xlu0 %3232  ;;  %v3420_v31 = vld [vmem:[#allocation2 + $0x9b] sm:$0xff] }
 0x3f3   : > { %v3417_v11 = vld [vmem:[#allocation2 + $0x7b] sm:$0xff]  ;;  %3323 = vst.msk [vmem:[#allocation2 + $0xcb] sm:$0xff] %vm425_vm1, %v3239_v26  ;;  %3320 = vst.msk [vmem:[#allocation2 + $0xab] sm:$0xff] %vm425_vm1, %v3233_v44  ;;  %3495 = vrot.lane.b32.xlu1 %v3420_v31, %s10591_s22 }
 0x3f4   : > { %v12153_v45 = vld [vmem:[#allocation2 + $0x81] sm:$0xff]  ;;  %3489 = vrot.lane.b32.xlu0 %v3417_v11, %s10591_s22  ;;  %v12161_v46 = vld [vmem:[#allocation2 + $0x79] sm:$0xff] }
 0x3f5   : > { %3386 = vst.msk [vmem:[#allocation3 + $0x48] sm:$0xff] %vm425_vm1, %v12153_v45  ;;  %3385 = vst.msk [vmem:[#allocation3 + $0x40] sm:$0xff] %vm425_vm1, %v12161_v46 }
 0x3f6   : > { %v3243_v42 = vpop.permute.xlu1 %3242  ;;  %v3237_v7 = vpop.permute.xlu0 %3236  ;;  %v3422_v32 = vld [vmem:[#allocation2 + $0xb3] sm:$0xff] }
 0x3f7   : > { %v3419_v24 = vld [vmem:[#allocation2 + $0x93] sm:$0xff]  ;;  %3325 = vst.msk [vmem:[#allocation2 + $0xe3] sm:$0xff] %vm425_vm1, %v3243_v42  ;;  %3322 = vst.msk [vmem:[#allocation2 + $0xc3] sm:$0xff] %vm425_vm1, %v3237_v7  ;;  %3499 = vrot.lane.b32.xlu1 %v3422_v32, %s10591_s22 }
 0x3f8   : > { %v12165_v19 = vld [vmem:[#allocation2 + $0x99] sm:$0xff]  ;;  %3493 = vrot.lane.b32.xlu0 %v3419_v24, %s10591_s22  ;;  %v12173_v41 = vld [vmem:[#allocation2 + $0x91] sm:$0xff] }
 0x3f9   : > { %3388 = vst.msk [vmem:[#allocation3 + $0x58] sm:$0xff] %vm425_vm1, %v12165_v19  ;;  %3387 = vst.msk [vmem:[#allocation3 + $0x50] sm:$0xff] %vm425_vm1, %v12173_v41 }
 0x3fa   : > { %v3247_v38 = vpop.permute.xlu1 %3246  ;;  %v3241_v34 = vpop.permute.xlu0 %3240  ;;  %v3424_v57 = vld [vmem:[#allocation2 + $0xcb] sm:$0xff] }
 0x3fb   : > { %v3421_v1 = vld [vmem:[#allocation2 + $0xab] sm:$0xff]  ;;  %3327 = vst.msk [vmem:[#allocation2 + $0xfb] sm:$0xff] %vm425_vm1, %v3247_v38  ;;  %3324 = vst.msk [vmem:[#allocation2 + $0xdb] sm:$0xff] %vm425_vm1, %v3241_v34  ;;  %3503 = vrot.lane.b32.xlu1 %v3424_v57, %s10591_s22 }
 0x3fc   : > { %v12177_v39 = vld [vmem:[#allocation2 + $0xb1] sm:$0xff]  ;;  %3497 = vrot.lane.b32.xlu0 %v3421_v1, %s10591_s22  ;;  %v12185_v47 = vld [vmem:[#allocation2 + $0xa9] sm:$0xff] }
 0x3fd   : > { %3390 = vst.msk [vmem:[#allocation3 + $0x68] sm:$0xff] %vm425_vm1, %v12177_v39  ;;  %3389 = vst.msk [vmem:[#allocation3 + $0x60] sm:$0xff] %vm425_vm1, %v12185_v47  ;;  %v12448_v35 = vld [vmem:[#allocation2 + $0xad] sm:$0xff] }
 0x3fe   : > { %v3251_v54 = vpop.permute.xlu1 %3250  ;;  %v3245_v2 = vpop.permute.xlu0 %3244  ;;  %v3426_v52 = vld [vmem:[#allocation2 + $0xe3] sm:$0xff]  ;;  %v12452_v20 = vld [vmem:[#allocation2 + $0xcd] sm:$0xff] }
 0x3ff   : > { %v3423_v17 = vld [vmem:[#allocation2 + $0xc3] sm:$0xff]  ;;  %3329 = vst.msk [vmem:[#allocation2 + $0x113] sm:$0xff] %vm425_vm1, %v3251_v54  ;;  %3326 = vst.msk [vmem:[#allocation2 + $0xf3] sm:$0xff] %vm425_vm1, %v3245_v2  ;;  %3507 = vrot.lane.b32.xlu1 %v3426_v52, %s10591_s22 }
 0x400   : > { %v12189_v58 = vld [vmem:[#allocation2 + $0xc9] sm:$0xff]  ;;  %3501 = vrot.lane.b32.xlu0 %v3423_v17, %s10591_s22  ;;  %v12197_v6 = vld [vmem:[#allocation2 + $0xc1] sm:$0xff] }
 0x401   : > { %3392 = vst.msk [vmem:[#allocation3 + $0x78] sm:$0xff] %vm425_vm1, %v12189_v58  ;;  %3391 = vst.msk [vmem:[#allocation3 + $0x70] sm:$0xff] %vm425_vm1, %v12197_v6  ;;  %v12456_v5 = vld [vmem:[#allocation2 + $0xc5] sm:$0xff] }
 0x402   : > { %v3255_v13 = vpop.permute.xlu1 %3254  ;;  %v3249_v12 = vpop.permute.xlu0 %3248  ;;  %v3428_v23 = vld [vmem:[#allocation2 + $0xfb] sm:$0xff]  ;;  %v12460_v43 = vld [vmem:[#allocation2 + $0xe5] sm:$0xff] }
 0x403   : > { %v3425_v49 = vld [vmem:[#allocation2 + $0xdb] sm:$0xff]  ;;  %3331 = vst.msk [vmem:[#allocation2 + $0x12b] sm:$0xff] %vm425_vm1, %v3255_v13  ;;  %3328 = vst.msk [vmem:[#allocation2 + $0x10b] sm:$0xff] %vm425_vm1, %v3249_v12  ;;  %3511 = vrot.lane.b32.xlu1 %v3428_v23, %s10591_s22 }
 0x404   : > { %v12201_v26 = vld [vmem:[#allocation2 + $0xe1] sm:$0xff]  ;;  %3505 = vrot.lane.b32.xlu0 %v3425_v49, %s10591_s22  ;;  %v12209_v44 = vld [vmem:[#allocation2 + $0xd9] sm:$0xff] }
 0x405   : > { %3394 = vst.msk [vmem:[#allocation3 + $0x88] sm:$0xff] %vm425_vm1, %v12201_v26  ;;  %3393 = vst.msk [vmem:[#allocation3 + $0x80] sm:$0xff] %vm425_vm1, %v12209_v44  ;;  %v12464_v33 = vld [vmem:[#allocation2 + $0xdd] sm:$0xff] }
 0x406   : > { %v3259_v31 = vpop.permute.xlu1 %3258  ;;  %v3253_v11 = vpop.permute.xlu0 %3252  ;;  %v3430_v42 = vld [vmem:[#allocation2 + $0x113] sm:$0xff]  ;;  %v12468_v51 = vld [vmem:[#allocation2 + $0xfd] sm:$0xff] }
 0x407   : > { %v3427_v7 = vld [vmem:[#allocation2 + $0xf3] sm:$0xff]  ;;  %3333 = vst.msk [vmem:[#allocation2 + $0x143] sm:$0xff] %vm425_vm1, %v3259_v31  ;;  %3330 = vst.msk [vmem:[#allocation2 + $0x123] sm:$0xff] %vm425_vm1, %v3253_v11  ;;  %3515 = vrot.lane.b32.xlu1 %v3430_v42, %s10591_s22 }
 0x408   : > { %v12213_v32 = vld [vmem:[#allocation2 + $0xf9] sm:$0xff]  ;;  %3509 = vrot.lane.b32.xlu0 %v3427_v7, %s10591_s22  ;;  %v12221_v24 = vld [vmem:[#allocation2 + $0xf1] sm:$0xff] }
 0x409   : > { %3396 = vst.msk [vmem:[#allocation3 + $0x98] sm:$0xff] %vm425_vm1, %v12213_v32  ;;  %3395 = vst.msk [vmem:[#allocation3 + $0x90] sm:$0xff] %vm425_vm1, %v12221_v24  ;;  %v12472_v27 = vld [vmem:[#allocation2 + $0xf5] sm:$0xff] }
 0x40a   : > { %v3263_v38 = vpop.permute.xlu1 %3262  ;;  %v3257_v34 = vpop.permute.xlu0 %3256  ;;  %v3432_v57 = vld [vmem:[#allocation2 + $0x12b] sm:$0xff]  ;;  %v12477_v16 = vld [vmem:[#allocation2 + $0x115] sm:$0xff] }
 0x40b   : > { %v3429_v1 = vld [vmem:[#allocation2 + $0x10b] sm:$0xff]  ;;  %3335 = vst.msk [vmem:[#allocation2 + $0x15b] sm:$0xff] %vm425_vm1, %v3263_v38  ;;  %3332 = vst.msk [vmem:[#allocation2 + $0x13b] sm:$0xff] %vm425_vm1, %v3257_v34  ;;  %3519 = vrot.lane.b32.xlu1 %v3432_v57, %s10591_s22 }
 0x40c   : > { %v12225_v54 = vld [vmem:[#allocation2 + $0x111] sm:$0xff]  ;;  %3513 = vrot.lane.b32.xlu0 %v3429_v1, %s10591_s22  ;;  %v12233_v2 = vld [vmem:[#allocation2 + $0x109] sm:$0xff] }
 0x40d   : > { %3398 = vst.msk [vmem:[#allocation3 + $0xa8] sm:$0xff] %vm425_vm1, %v12225_v54  ;;  %3397 = vst.msk [vmem:[#allocation3 + $0xa0] sm:$0xff] %vm425_vm1, %v12233_v2  ;;  %v12482_v15 = vld [vmem:[#allocation2 + $0x10d] sm:$0xff] }
 0x40e   : > { %v3267_v52 = vpop.permute.xlu1 %3266  ;;  %v3261_v17 = vpop.permute.xlu0 %3260  ;;  %v3434_v13 = vld [vmem:[#allocation2 + $0x143] sm:$0xff]  ;;  %v12487_v4 = vld [vmem:[#allocation2 + $0x12d] sm:$0xff] }
 0x40f   : > { %v3431_v12 = vld [vmem:[#allocation2 + $0x123] sm:$0xff]  ;;  %3337 = vst.msk [vmem:[#allocation2 + $0x173] sm:$0xff] %vm425_vm1, %v3267_v52  ;;  %3334 = vst.msk [vmem:[#allocation2 + $0x153] sm:$0xff] %vm425_vm1, %v3261_v17  ;;  %3523 = vrot.lane.b32.xlu1 %v3434_v13, %s10591_s22 }
 0x410   : > { %v12237_v23 = vld [vmem:[#allocation2 + $0x129] sm:$0xff]  ;;  %3517 = vrot.lane.b32.xlu0 %v3431_v12, %s10591_s22  ;;  %v12245_v49 = vld [vmem:[#allocation2 + $0x121] sm:$0xff] }
 0x411   : > { %3400 = vst.msk [vmem:[#allocation3 + $0xb8] sm:$0xff] %vm425_vm1, %v12237_v23  ;;  %3399 = vst.msk [vmem:[#allocation3 + $0xb0] sm:$0xff] %vm425_vm1, %v12245_v49  ;;  %v12497_v62 = vld [vmem:[#allocation2 + $0x145] sm:$0xff] }
 0x412   : > { %v3271_v31 = vpop.permute.xlu1 %3270  ;;  %v3265_v11 = vpop.permute.xlu0 %3264  ;;  %v3433_v42 = vld [vmem:[#allocation2 + $0x13b] sm:$0xff] }
 0x413   : > { %v12249_v7 = vld [vmem:[#allocation2 + $0x141] sm:$0xff]  ;;  %v12251_v38 = vld [vmem:[#allocation2 + $0x139] sm:$0xff]  ;;  %3339 = vst.msk [vmem:[#allocation2 + $0x18b] sm:$0xff] %vm425_vm1, %v3271_v31  ;;  %3336 = vst.msk [vmem:[#allocation2 + $0x16b] sm:$0xff] %vm425_vm1, %v3265_v11 }
 0x414   : > { %3521 = vrot.lane.b32.xlu0 %v3433_v42, %s10591_s22  ;;  %3402 = vst.msk [vmem:[#allocation3 + $0xc8] sm:$0xff] %vm425_vm1, %v12249_v7  ;;  %3401 = vst.msk [vmem:[#allocation3 + $0xc0] sm:$0xff] %vm425_vm1, %v12251_v38  ;;  %v12507_v56 = vld [vmem:[#allocation2 + $0x15d] sm:$0xff] }
 0x416   : > { %v3275_v34 = vpop.permute.xlu1 %3274  ;;  %v3269_v57 = vpop.permute.xlu0 %3268  ;;  %v12262_v1 = vld [vmem:[#allocation2 + $0x159] sm:$0xff]  ;;  %v12264_v52 = vld [vmem:[#allocation2 + $0x151] sm:$0xff] }
 0x417   : > { %3341 = vst.msk [vmem:[#allocation2 + $0x1a3] sm:$0xff] %vm425_vm1, %v3275_v34  ;;  %3338 = vst.msk [vmem:[#allocation2 + $0x183] sm:$0xff] %vm425_vm1, %v3269_v57  ;;  %v12517_v50 = vld [vmem:[#allocation2 + $0x175] sm:$0xff] }
 0x418   : > { %3404 = vst.msk [vmem:[#allocation3 + $0xd8] sm:$0xff] %vm425_vm1, %v12262_v1  ;;  %3403 = vst.msk [vmem:[#allocation3 + $0xd0] sm:$0xff] %vm425_vm1, %v12264_v52 }
 0x41a   : > { %v3279_v17 = vpop.permute.xlu1 %3278  ;;  %v3273_v13 = vpop.permute.xlu0 %3272  ;;  %v12272_v12 = vld [vmem:[#allocation2 + $0x171] sm:$0xff]  ;;  %v12274_v31 = vld [vmem:[#allocation2 + $0x169] sm:$0xff] }
 0x41b   : > { %3343 = vst.msk [vmem:[#allocation2 + $0x1bb] sm:$0xff] %vm425_vm1, %v3279_v17  ;;  %3340 = vst.msk [vmem:[#allocation2 + $0x19b] sm:$0xff] %vm425_vm1, %v3273_v13 }
 0x41c   : > { %3406 = vst.msk [vmem:[#allocation3 + $0xe8] sm:$0xff] %vm425_vm1, %v12272_v12  ;;  %3405 = vst.msk [vmem:[#allocation3 + $0xe0] sm:$0xff] %vm425_vm1, %v12274_v31 }
 0x41e   : > { %v3277_v11 = vpop.permute.xlu0 %3276  ;;  %v12280_v42 = vld [vmem:[#allocation2 + $0x189] sm:$0xff]  ;;  %v12285_v57 = vld [vmem:[#allocation2 + $0x181] sm:$0xff] }
 0x41f   : > { %3342 = vst.msk [vmem:[#allocation2 + $0x1b3] sm:$0xff] %vm425_vm1, %v3277_v11  ;;  %v3476_v34 = vpop.permute.xlu1 %3475  ;;  %3408 = vst.msk [vmem:[#allocation3 + $0xf8] sm:$0xff] %vm425_vm1, %v12280_v42 }
 0x420   : > { %3570 = vst.msk [vmem:[#allocation3 + $0x8] sm:$0xff] %vm1269_vm3, %v3476_v34 }
 0x421   : > { %3407 = vst.msk [vmem:[#allocation3 + $0xf0] sm:$0xff] %vm425_vm1, %v12285_v57  ;;  %vm6052_vm1 = vcmask 48160  }
 0x422   : > { %v3474_v17 = vpop.permute.xlu0 %3473 }
 0x423   : > { %v3480_v13 = vpop.permute.xlu1 %3479  ;;  %3569 = vst.msk [vmem:[#allocation3] sm:$0xff] %vm1269_vm3, %v3474_v17 }
 0x424   : > { %3572 = vst.msk [vmem:[#allocation3 + $0x18] sm:$0xff] %vm1269_vm3, %v3480_v13 }
 0x426   : > { %v3478_v28 = vpop.permute.xlu0 %3477 }
 0x427   : > { %3571 = vst.msk [vmem:[#allocation3 + $0x10] sm:$0xff] %vm1269_vm3, %v3478_v28 }
 0x459   : > { %v3484_v11 = vpop.permute.xlu1 %3483 }
 0x45a   : > { %3574 = vst.msk [vmem:[#allocation3 + $0x28] sm:$0xff] %vm1269_vm3, %v3484_v11 }
 0x45d   : > { %v3488_v18 = vpop.permute.xlu1 %3487 }
 0x45e   : > { %v3482_v37 = vpop.permute.xlu0 %3481  ;;  %3576 = vst.msk [vmem:[#allocation3 + $0x38] sm:$0xff] %vm1269_vm3, %v3488_v18 }
 0x45f   : > { %3573 = vst.msk [vmem:[#allocation3 + $0x20] sm:$0xff] %vm1269_vm3, %v3482_v37 }
 0x461   : > { %v3492_v34 = vpop.permute.xlu1 %3491 }
 0x462   : > { %v3486_v40 = vpop.permute.xlu0 %3485  ;;  %3578 = vst.msk [vmem:[#allocation3 + $0x48] sm:$0xff] %vm1269_vm3, %v3492_v34 }
 0x463   : > { %3575 = vst.msk [vmem:[#allocation3 + $0x30] sm:$0xff] %vm1269_vm3, %v3486_v40 }
 0x465   : > { %v3496_v17 = vpop.permute.xlu1 %3495 }
 0x466   : > { %v3490_v13 = vpop.permute.xlu0 %3489  ;;  %3580 = vst.msk [vmem:[#allocation3 + $0x58] sm:$0xff] %vm1269_vm3, %v3496_v17 }
 0x467   : > { %3577 = vst.msk [vmem:[#allocation3 + $0x40] sm:$0xff] %vm1269_vm3, %v3490_v13 }
 0x469   : > { %v3500_v28 = vpop.permute.xlu1 %3499 }
 0x46a   : > { %v3494_v11 = vpop.permute.xlu0 %3493  ;;  %3582 = vst.msk [vmem:[#allocation3 + $0x68] sm:$0xff] %vm1269_vm3, %v3500_v28 }
 0x46b   : > { %3579 = vst.msk [vmem:[#allocation3 + $0x50] sm:$0xff] %vm1269_vm3, %v3494_v11 }
 0x46d   : > { %v3504_v18 = vpop.permute.xlu1 %3503 }
 0x46e   : > { %v3498_v37 = vpop.permute.xlu0 %3497  ;;  %3584 = vst.msk [vmem:[#allocation3 + $0x78] sm:$0xff] %vm1269_vm3, %v3504_v18 }
 0x46f   : > { %3581 = vst.msk [vmem:[#allocation3 + $0x60] sm:$0xff] %vm1269_vm3, %v3498_v37 }
 0x471   : > { %v3508_v34 = vpop.permute.xlu1 %3507 }
 0x472   : > { %v3502_v40 = vpop.permute.xlu0 %3501  ;;  %3586 = vst.msk [vmem:[#allocation3 + $0x88] sm:$0xff] %vm1269_vm3, %v3508_v34  ;;  %v12313_v34 = vld [vmem:[%s15679_s4] ss:$0 sm:$0xff] }
 0x473   : > { %3583 = vst.msk [vmem:[#allocation3 + $0x70] sm:$0xff] %vm1269_vm3, %v3502_v40 }
 0x475   : > { %v3512_v17 = vpop.permute.xlu1 %3511 }
 0x476   : > { %v3506_v13 = vpop.permute.xlu0 %3505  ;;  %3588 = vst.msk [vmem:[#allocation3 + $0x98] sm:$0xff] %vm1269_vm3, %v3512_v17 }
 0x477   : > { %3585 = vst.msk [vmem:[#allocation3 + $0x80] sm:$0xff] %vm1269_vm3, %v3506_v13 }
 0x479   : > { %v3516_v28 = vpop.permute.xlu1 %3515 }
 0x47a   : > { %v3510_v11 = vpop.permute.xlu0 %3509  ;;  %3590 = vst.msk [vmem:[#allocation3 + $0xa8] sm:$0xff] %vm1269_vm3, %v3516_v28 }
 0x47b   : > { %3587 = vst.msk [vmem:[#allocation3 + $0x90] sm:$0xff] %vm1269_vm3, %v3510_v11 }
 0x47d   : > { %v3520_v18 = vpop.permute.xlu1 %3519 }
 0x47e   : > { %v3514_v37 = vpop.permute.xlu0 %3513  ;;  %3592 = vst.msk [vmem:[#allocation3 + $0xb8] sm:$0xff] %vm1269_vm3, %v3520_v18 }
 0x47f   : > { %3589 = vst.msk [vmem:[#allocation3 + $0xa0] sm:$0xff] %vm1269_vm3, %v3514_v37  ;;  %v10283_v40 = vpop.f32.mrb[0].mxu1 }
 0x480   : > { %v2870_v17 = vadd.f32 %v10283_v40, %v12313_v34  ;;  %v2864_v13 = vpop.f32.mrb[1].mxu1 }
 0x481   : > { %v2865_v53 = vadd.f32 %v12313_v34, %v2864_v13  ;;  %v3524_v28 = vpop.permute.xlu1 %3523 }
 0x482   : > { %v3518_v36 = vpop.permute.xlu0 %3517  ;;  %v3024_v11 = vmax.f32 %v2870_v17, 0.0  ;;  %3594 = vst.msk [vmem:[#allocation3 + $0xc8] sm:$0xff] %vm1269_vm3, %v3524_v28 }
 0x483   : > { %3591 = vst.msk [vmem:[#allocation3 + $0xb0] sm:$0xff] %vm1269_vm3, %v3518_v36  ;;  %v3023_v29 = vmax.f32 %v2865_v53, 0.0  ;;  %v10286_v25 = vpop.f32.mrb[2].mxu1 }
 0x484   : > { %v2880_v0 = vadd.f32 %v10286_v25, %v12313_v34  ;;  %3089 = vrot.lane.b32.xlu1 %v3024_v11, %s10601_s15  ;;  %v2874_v18 = vpop.f32.mrb[3].mxu1 }
 0x485   : > { %v2875_v37 = vadd.f32 %v12313_v34, %v2874_v18  ;;  %3087 = vrot.lane.b32.xlu0 %v3023_v29, %s10601_s15 }
 0x486   : > { %v3522_v40 = vpop.permute.xlu0 %3521  ;;  %v3026_v13 = vmax.f32 %v2880_v0, 0.0 }
 0x487   : > { %3593 = vst.msk [vmem:[#allocation3 + $0xc0] sm:$0xff] %vm1269_vm3, %v3522_v40  ;;  %v3025_v17 = vmax.f32 %v2875_v37, 0.0  ;;  %v10289_v28 = vpop.f32.mrb[4].mxu1 }
 0x488   : > { %v2890_v36 = vadd.f32 %v10289_v28, %v12313_v34  ;;  %3093 = vrot.lane.b32.xlu1 %v3026_v13, %s10601_s15  ;;  %v2884_v53 = vpop.f32.mrb[5].mxu1 }
 0x489   : > { %v2885_v25 = vadd.f32 %v12313_v34, %v2884_v53  ;;  %3091 = vrot.lane.b32.xlu0 %v3025_v17, %s10601_s15 }
 0x48a   : > { %v3028_v11 = vmax.f32 %v2890_v36, 0.0 }
 0x48b   : > { %v3027_v14 = vmax.f32 %v2885_v25, 0.0  ;;  %v10292_v18 = vpop.f32.mrb[6].mxu1 }
 0x48c   : > { %v2900_v29 = vadd.f32 %v10292_v18, %v12313_v34  ;;  %3097 = vrot.lane.b32.xlu1 %v3028_v11, %s10601_s15  ;;  %v2894_v0 = vpop.f32.mrb[7].mxu1 }
 0x48d   : > { %v2895_v37 = vadd.f32 %v12313_v34, %v2894_v0  ;;  %3095 = vrot.lane.b32.xlu0 %v3027_v14, %s10601_s15 }
 0x48e   : > { %v3030_v40 = vmax.f32 %v2900_v29, 0.0 }
 0x48f   : > { %v3029_v28 = vmax.f32 %v2895_v37, 0.0  ;;  %v10295_v13 = vpop.f32.mrb[8].mxu1 }
 0x490   : > { %v2910_v8 = vadd.f32 %v10295_v13, %v12313_v34  ;;  %3101 = vrot.lane.b32.xlu1 %v3030_v40, %s10601_s15  ;;  %v2904_v17 = vpop.f32.mrb[9].mxu1 }
 0x491   : > { %v2905_v36 = vadd.f32 %v12313_v34, %v2904_v17  ;;  %3099 = vrot.lane.b32.xlu0 %v3029_v28, %s10601_s15 }
 0x492   : > { %v3032_v53 = vmax.f32 %v2910_v8, 0.0 }
 0x493   : > { %v3031_v25 = vmax.f32 %v2905_v36, 0.0  ;;  %v10298_v11 = vpop.f32.mrb[10].mxu1 }
 0x494   : > { %v2920_v18 = vadd.f32 %v10298_v11, %v12313_v34  ;;  %3105 = vrot.lane.b32.xlu1 %v3032_v53, %s10601_s15  ;;  %v2914_v14 = vpop.f32.mrb[11].mxu1 }
 0x495   : > { %v2915_v29 = vadd.f32 %v12313_v34, %v2914_v14  ;;  %3103 = vrot.lane.b32.xlu0 %v3031_v25, %s10601_s15 }
 0x496   : > { %v3034_v0 = vmax.f32 %v2920_v18, 0.0 }
 0x497   : > { %v3033_v37 = vmax.f32 %v2915_v29, 0.0  ;;  %v10301_v40 = vpop.f32.mrb[12].mxu1 }
 0x498   : > { %v2930_v13 = vadd.f32 %v10301_v40, %v12313_v34  ;;  %3109 = vrot.lane.b32.xlu1 %v3034_v0, %s10601_s15  ;;  %v2924_v28 = vpop.f32.mrb[13].mxu1 }
 0x499   : > { %v2925_v8 = vadd.f32 %v12313_v34, %v2924_v28  ;;  %3107 = vrot.lane.b32.xlu0 %v3033_v37, %s10601_s15 }
 0x49a   : > { %v3036_v17 = vmax.f32 %v2930_v13, 0.0 }
 0x49b   : > { %v3035_v36 = vmax.f32 %v2925_v8, 0.0  ;;  %v10304_v53 = vpop.f32.mrb[14].mxu1 }
 0x49c   : > { %v2940_v11 = vadd.f32 %v10304_v53, %v12313_v34  ;;  %3113 = vrot.lane.b32.xlu1 %v3036_v17, %s10601_s15  ;;  %v2934_v25 = vpop.f32.mrb[15].mxu1 }
 0x49d   : > { %v2935_v18 = vadd.f32 %v12313_v34, %v2934_v25  ;;  %3111 = vrot.lane.b32.xlu0 %v3035_v36, %s10601_s15 }
 0x49e   : > { %v3038_v14 = vmax.f32 %v2940_v11, 0.0 }
 0x49f   : > { %v3037_v29 = vmax.f32 %v2935_v18, 0.0  ;;  %v10307_v0 = vpop.f32.mrb[16].mxu1 }
 0x4a0   : > { %v2950_v40 = vadd.f32 %v10307_v0, %v12313_v34  ;;  %3117 = vrot.lane.b32.xlu1 %v3038_v14, %s10601_s15  ;;  %v2944_v37 = vpop.f32.mrb[17].mxu1 }
 0x4a1   : > { %v2945_v13 = vadd.f32 %v12313_v34, %v2944_v37  ;;  %3115 = vrot.lane.b32.xlu0 %v3037_v29, %s10601_s15 }
 0x4a2   : > { %v3040_v28 = vmax.f32 %v2950_v40, 0.0 }
 0x4a3   : > { %v3039_v8 = vmax.f32 %v2945_v13, 0.0  ;;  %v10310_v17 = vpop.f32.mrb[18].mxu1 }
 0x4a4   : > { %v2960_v53 = vadd.f32 %v10310_v17, %v12313_v34  ;;  %3121 = vrot.lane.b32.xlu1 %v3040_v28, %s10601_s15  ;;  %v2954_v36 = vpop.f32.mrb[19].mxu1 }
 0x4a5   : > { %v2955_v11 = vadd.f32 %v12313_v34, %v2954_v36  ;;  %3119 = vrot.lane.b32.xlu0 %v3039_v8, %s10601_s15 }
 0x4a6   : > { %v3042_v25 = vmax.f32 %v2960_v53, 0.0 }
 0x4a7   : > { %v3041_v18 = vmax.f32 %v2955_v11, 0.0  ;;  %v10313_v14 = vpop.f32.mrb[20].mxu1 }
 0x4a8   : > { %v2970_v0 = vadd.f32 %v10313_v14, %v12313_v34  ;;  %3125 = vrot.lane.b32.xlu1 %v3042_v25, %s10601_s15  ;;  %v2964_v29 = vpop.f32.mrb[21].mxu1 }
 0x4a9   : > { %v2965_v40 = vadd.f32 %v12313_v34, %v2964_v29  ;;  %3123 = vrot.lane.b32.xlu0 %v3041_v18, %s10601_s15 }
 0x4aa   : > { %v3044_v37 = vmax.f32 %v2970_v0, 0.0 }
 0x4ab   : > { %v3043_v13 = vmax.f32 %v2965_v40, 0.0  ;;  %v10316_v28 = vpop.f32.mrb[22].mxu1 }
 0x4ac   : > { %v2980_v17 = vadd.f32 %v10316_v28, %v12313_v34  ;;  %3129 = vrot.lane.b32.xlu1 %v3044_v37, %s10601_s15  ;;  %v2974_v8 = vpop.f32.mrb[23].mxu1 }
 0x4ad   : > { %v2975_v53 = vadd.f32 %v12313_v34, %v2974_v8  ;;  %3127 = vrot.lane.b32.xlu0 %v3043_v13, %s10601_s15 }
 0x4ae   : > { %v3046_v36 = vmax.f32 %v2980_v17, 0.0 }
 0x4af   : > { %v3045_v11 = vmax.f32 %v2975_v53, 0.0  ;;  %v10319_v25 = vpop.f32.mrb[24].mxu1 }
 0x4b0   : > { %v2990_v14 = vadd.f32 %v10319_v25, %v12313_v34  ;;  %3133 = vrot.lane.b32.xlu1 %v3046_v36, %s10601_s15  ;;  %v2984_v18 = vpop.f32.mrb[25].mxu1 }
 0x4b1   : > { %v2985_v0 = vadd.f32 %v12313_v34, %v2984_v18  ;;  %3131 = vrot.lane.b32.xlu0 %v3045_v11, %s10601_s15 }
 0x4b2   : > { %v3048_v29 = vmax.f32 %v2990_v14, 0.0 }
 0x4b3   : > { %v3047_v40 = vmax.f32 %v2985_v0, 0.0  ;;  %v10322_v37 = vpop.f32.mrb[26].mxu1 }
 0x4b4   : > { %v3000_v28 = vadd.f32 %v10322_v37, %v12313_v34  ;;  %3137 = vrot.lane.b32.xlu1 %v3048_v29, %s10601_s15  ;;  %v2994_v13 = vpop.f32.mrb[27].mxu1 }
 0x4b5   : > { %v2995_v17 = vadd.f32 %v12313_v34, %v2994_v13  ;;  %3135 = vrot.lane.b32.xlu0 %v3047_v40, %s10601_s15 }
 0x4b6   : > { %v3050_v8 = vmax.f32 %v3000_v28, 0.0 }
 0x4b7   : > { %v3049_v53 = vmax.f32 %v2995_v17, 0.0  ;;  %v10325_v36 = vpop.f32.mrb[28].mxu1 }
 0x4b8   : > { %v3010_v25 = vadd.f32 %v10325_v36, %v12313_v34  ;;  %3141 = vrot.lane.b32.xlu1 %v3050_v8, %s10601_s15  ;;  %v3004_v11 = vpop.f32.mrb[29].mxu1  ;;  %v12384_v8 = vld [vmem:[#allocation2 + $0x15b] sm:$0xff]  ;;  %v12392_v36 = vld [vmem:[#allocation2 + $0x173] sm:$0xff] }
 0x4b9   : > { %v3005_v14 = vadd.f32 %v12313_v34, %v3004_v11  ;;  %3139 = vrot.lane.b32.xlu0 %v3049_v53, %s10601_s15  ;;  %v12388_v53 = vld [vmem:[#allocation2 + $0x153] sm:$0xff]  ;;  %v12404_v11 = vld [vmem:[#allocation2 + $0x183] sm:$0xff] }
 0x4ba   : > { %v3052_v18 = vmax.f32 %v3010_v25, 0.0  ;;  %v12400_v25 = vld [vmem:[#allocation2 + $0x18b] sm:$0xff] }
 0x4bb   : > { %v3051_v0 = vmax.f32 %v3005_v14, 0.0  ;;  %v3602_v14 = vld [vmem:[#allocation2 + $0x25] sm:$0xff] }
 0x4bc   : > { %v10328_v29 = vpop.f32.mrb[30].mxu1  ;;  %3145 = vrot.lane.b32.xlu1 %v3052_v18, %s10601_s15  ;;  %v3601_v18 = vld [vmem:[#allocation2 + $0x1d] sm:$0xff] }
 0x4bd   : > { %v3020_v37 = vadd.f32 %v10328_v29, %v12313_v34  ;;  %v3014_v40 = vpop.f32.mrb[31].mxu1  ;;  %3143 = vrot.lane.b32.xlu0 %v3051_v0, %s10601_s15  ;;  %v3604_v0 = vld [vmem:[#allocation2 + $0x3d] sm:$0xff]  ;;  %v3603_v29 = vld [vmem:[#allocation2 + $0x35] sm:$0xff] }
 0x4be   : > { %v3015_v28 = vadd.f32 %v12313_v34, %v3014_v40  ;;  %v12396_v34 = vld [vmem:[#allocation2 + $0x16b] sm:$0xff] }
 0x4bf   : > { %v3054_v13 = vmax.f32 %v3020_v37, 0.0  ;;  %v12412_v37 = vld [vmem:[#allocation2 + $0x55] sm:$0xff]  ;;  %v12416_v40 = vld [vmem:[#allocation2 + $0x4d] sm:$0xff] }
 0x4c0   : > { %v3053_v17 = vmax.f32 %v3015_v28, 0.0  ;;  %v12420_v28 = vld [vmem:[#allocation2 + $0x6d] sm:$0xff] }
 0x4c1   : > { %3149 = vrot.lane.b32.xlu1 %v3054_v13, %s10601_s15  ;;  %v12424_v13 = vld [vmem:[#allocation2 + $0x65] sm:$0xff] }
 0x4c2   : > { %3147 = vrot.lane.b32.xlu0 %v3053_v17, %s10601_s15  ;;  %v12428_v17 = vld [vmem:[#allocation2 + $0x85] sm:$0xff] }
 0x4c5   : > { %3527 = vrot.lane.b32.xlu1 %v12384_v8, %s10591_s22 }
 0x4c6   : > { %3525 = vrot.lane.b32.xlu0 %v12388_v53, %s10591_s22 }
 0x4c9   : > { %3531 = vrot.lane.b32.xlu1 %v12392_v36, %s10591_s22 }
 0x4ca   : > { %3529 = vrot.lane.b32.xlu0 %v12396_v34, %s10591_s22 }
 0x4cd   : > { %3535 = vrot.lane.b32.xlu1 %v12400_v25, %s10591_s22 }
 0x4ce   : > { %3533 = vrot.lane.b32.xlu0 %v12404_v11, %s10591_s22 }
 0x4d1   : > { %3667 = vrot.lane.b32.xlu1 %v3602_v14, %s15745_s24  ;;  %v12432_v14 = vld [vmem:[#allocation2 + $0x7d] sm:$0xff] }
 0x4d2   : > { %3665 = vrot.lane.b32.xlu0 %v3601_v18, %s15745_s24  ;;  %v12436_v18 = vld [vmem:[#allocation2 + $0x9d] sm:$0xff] }
 0x4d5   : > { %3671 = vrot.lane.b32.xlu1 %v3604_v0, %s15745_s24  ;;  %v12440_v0 = vld [vmem:[#allocation2 + $0x95] sm:$0xff] }
 0x4d6   : > { %3669 = vrot.lane.b32.xlu0 %v3603_v29, %s15745_s24  ;;  %v12444_v29 = vld [vmem:[#allocation2 + $0xb5] sm:$0xff] }
 0x4d9   : > { %3675 = vrot.lane.b32.xlu1 %v12412_v37, %s15745_s24 }
 0x4da   : > { %3673 = vrot.lane.b32.xlu0 %v12416_v40, %s15745_s24 }
 0x4dd   : > { %3679 = vrot.lane.b32.xlu1 %v12420_v28, %s15745_s24 }
 0x4de   : > { %3677 = vrot.lane.b32.xlu0 %v12424_v13, %s15745_s24 }
 0x4e1   : > { %3683 = vrot.lane.b32.xlu1 %v12428_v17, %s15745_s24 }
 0x4e2   : > { %3681 = vrot.lane.b32.xlu0 %v12432_v14, %s15745_s24 }
 0x4e5   : > { %3687 = vrot.lane.b32.xlu1 %v12436_v18, %s15745_s24 }
 0x4e6   : > { %3685 = vrot.lane.b32.xlu0 %v12440_v0, %s15745_s24 }
 0x4e9   : > { %3691 = vrot.lane.b32.xlu1 %v12444_v29, %s15745_s24 }
 0x4ea   : > { %3689 = vrot.lane.b32.xlu0 %v12448_v35, %s15745_s24 }
 0x4ed   : > { %3695 = vrot.lane.b32.xlu1 %v12452_v20, %s15745_s24 }
 0x4ee   : > { %3693 = vrot.lane.b32.xlu0 %v12456_v5, %s15745_s24 }
 0x4f1   : > { %3699 = vrot.lane.b32.xlu1 %v12460_v43, %s15745_s24 }
 0x4f2   : > { %3697 = vrot.lane.b32.xlu0 %v12464_v33, %s15745_s24 }
 0x4f5   : > { %3703 = vrot.lane.b32.xlu1 %v12468_v51, %s15745_s24 }
 0x4f6   : > { %3701 = vrot.lane.b32.xlu0 %v12472_v27, %s15745_s24  ;;  %v3090_v22 = vpop.permute.xlu1 %3089 }
 0x4f7   : > { %3185 = vst.msk [vmem:[#allocation4 + $0x8] sm:$0xff] %vm3183_vm13, %v3090_v22  ;;  %v3088_v21 = vpop.permute.xlu0 %3087 }
 0x4f8   : > { %3184 = vst.msk [vmem:[#allocation4] sm:$0xff] %vm3183_vm13, %v3088_v21  ;;  %v12492_v21 = vld [vmem:[#allocation2 + $0x125] sm:$0xff] }
 0x4f9   : > { %3707 = vrot.lane.b32.xlu1 %v12477_v16, %s15745_s24 }
 0x4fa   : > { %3705 = vrot.lane.b32.xlu0 %v12482_v15, %s15745_s24  ;;  %v3094_v10 = vpop.permute.xlu1 %3093 }
 0x4fb   : > { %3187 = vst.msk [vmem:[#allocation4 + $0x18] sm:$0xff] %vm3183_vm13, %v3094_v10  ;;  %v3092_v9 = vpop.permute.xlu0 %3091 }
 0x4fc   : > { %3186 = vst.msk [vmem:[#allocation4 + $0x10] sm:$0xff] %vm3183_vm13, %v3092_v9  ;;  %v12502_v9 = vld [vmem:[#allocation2 + $0x13d] sm:$0xff] }
 0x4fd   : > { %3711 = vrot.lane.b32.xlu1 %v12487_v4, %s15745_s24 }
 0x4fe   : > { %3709 = vrot.lane.b32.xlu0 %v12492_v21, %s15745_s24  ;;  %v3098_v22 = vpop.permute.xlu1 %3097 }
 0x4ff   : > { %3189 = vst.msk [vmem:[#allocation4 + $0x28] sm:$0xff] %vm3183_vm13, %v3098_v22  ;;  %v3096_v3 = vpop.permute.xlu0 %3095 }
 0x500   : > { %3188 = vst.msk [vmem:[#allocation4 + $0x20] sm:$0xff] %vm3183_vm13, %v3096_v3  ;;  %v12512_v3 = vld [vmem:[#allocation2 + $0x155] sm:$0xff] }
 0x501   : > { %3715 = vrot.lane.b32.xlu1 %v12497_v62, %s15745_s24  ;;  %15864 = vst [vmem:[#allocation40_spill] sm:$0xff] %v12512_v3 }
 0x502   : > { %3713 = vrot.lane.b32.xlu0 %v12502_v9, %s15745_s24  ;;  %v3102_v10 = vpop.permute.xlu1 %3101 }
 0x503   : > { %3191 = vst.msk [vmem:[#allocation4 + $0x38] sm:$0xff] %vm3183_vm13, %v3102_v10  ;;  %v3100_v61 = vpop.permute.xlu0 %3099 }
 0x504   : > { %3190 = vst.msk [vmem:[#allocation4 + $0x30] sm:$0xff] %vm3183_vm13, %v3100_v61  ;;  %v12522_v61 = vld [vmem:[#allocation2 + $0x16d] sm:$0xff] }
 0x505   : > { %3719 = vrot.lane.b32.xlu1 %v12507_v56, %s15745_s24  ;;  %15865 = vst [vmem:[#allocation41_spill] sm:$0xff] %v12522_v61 }
 0x506   : > { %3717 = vrot.lane.b32.xlu0 %v12512_v3, %s15745_s24  ;;  %v3106_v22 = vpop.permute.xlu1 %3105  ;;  %v12527_v3 = vld [vmem:[#allocation2 + $0x18d] sm:$0xff] }
 0x507   : > { %3193 = vst.msk [vmem:[#allocation4 + $0x48] sm:$0xff] %vm3183_vm13, %v3106_v22  ;;  %v3104_v55 = vpop.permute.xlu0 %3103 }
 0x508   : > { %3192 = vst.msk [vmem:[#allocation4 + $0x40] sm:$0xff] %vm3183_vm13, %v3104_v55  ;;  %v12532_v55 = vld [vmem:[#allocation2 + $0x185] sm:$0xff] }
 0x509   : > { %3723 = vrot.lane.b32.xlu1 %v12517_v50, %s15745_s24 }
 0x50a   : > { %3721 = vrot.lane.b32.xlu0 %v12522_v61, %s15745_s24  ;;  %v3110_v10 = vpop.permute.xlu1 %3109 }
 0x50b   : > { %3195 = vst.msk [vmem:[#allocation4 + $0x58] sm:$0xff] %vm3183_vm13, %v3110_v10  ;;  %v3108_v48 = vpop.permute.xlu0 %3107 }
 0x50c   : > { %3194 = vst.msk [vmem:[#allocation4 + $0x50] sm:$0xff] %vm3183_vm13, %v3108_v48 }
 0x50d   : > { %3727 = vrot.lane.b32.xlu1 %v12527_v3, %s15745_s24 }
 0x50e   : > { %3725 = vrot.lane.b32.xlu0 %v12532_v55, %s15745_s24  ;;  %v3114_v22 = vpop.permute.xlu1 %3113 }
 0x50f   : > { %3197 = vst.msk [vmem:[#allocation4 + $0x68] sm:$0xff] %vm3183_vm13, %v3114_v22  ;;  %v3112_v61 = vpop.permute.xlu0 %3111 }
 0x510   : > { %3196 = vst.msk [vmem:[#allocation4 + $0x60] sm:$0xff] %vm3183_vm13, %v3112_v61 }
 0x511   : > { %3859 = vrot.lane.b32.xlu1 %v12129_v63, %s15743_s14 }
 0x512   : > { %3857 = vrot.lane.b32.xlu0 %v12137_v60, %s15743_s14  ;;  %v3118_v48 = vpop.permute.xlu1 %3117 }
 0x513   : > { %3199 = vst.msk [vmem:[#allocation4 + $0x78] sm:$0xff] %vm3183_vm13, %v3118_v48  ;;  %v3116_v10 = vpop.permute.xlu0 %3115 }
 0x514   : > { %3198 = vst.msk [vmem:[#allocation4 + $0x70] sm:$0xff] %vm3183_vm13, %v3116_v10 }
 0x515   : > { %3863 = vrot.lane.b32.xlu1 %v12141_v59, %s15743_s14 }
 0x516   : > { %3861 = vrot.lane.b32.xlu0 %v12149_v30, %s15743_s14  ;;  %v3122_v22 = vpop.permute.xlu1 %3121 }
 0x517   : > { %3201 = vst.msk [vmem:[#allocation4 + $0x88] sm:$0xff] %vm3183_vm13, %v3122_v22  ;;  %v3120_v61 = vpop.permute.xlu0 %3119  ;;  %v12621_v22 = vld [vmem:[#allocation2 + $0x1a1] sm:$0xff] }
 0x518   : > { %3200 = vst.msk [vmem:[#allocation4 + $0x80] sm:$0xff] %vm3183_vm13, %v3120_v61  ;;  %v12626_v61 = vld [vmem:[#allocation2 + $0x199] sm:$0xff] }
 0x519   : > { %3867 = vrot.lane.b32.xlu1 %v12153_v45, %s15743_s14 }
 0x51a   : > { %3865 = vrot.lane.b32.xlu0 %v12161_v46, %s15743_s14  ;;  %v3126_v63 = vpop.permute.xlu1 %3125 }
 0x51b   : > { %3203 = vst.msk [vmem:[#allocation4 + $0x98] sm:$0xff] %vm3183_vm13, %v3126_v63  ;;  %v3124_v60 = vpop.permute.xlu0 %3123 }
 0x51c   : > { %3202 = vst.msk [vmem:[#allocation4 + $0x90] sm:$0xff] %vm3183_vm13, %v3124_v60 }
 0x51d   : > { %3871 = vrot.lane.b32.xlu1 %v12165_v19, %s15743_s14 }
 0x51e   : > { %3869 = vrot.lane.b32.xlu0 %v12173_v41, %s15743_s14  ;;  %v3130_v59 = vpop.permute.xlu1 %3129 }
 0x51f   : > { %3205 = vst.msk [vmem:[#allocation4 + $0xa8] sm:$0xff] %vm3183_vm13, %v3130_v59  ;;  %v3128_v30 = vpop.permute.xlu0 %3127  ;;  %v12631_v59 = vld [vmem:[#allocation2 + $0x1b9] sm:$0xff] }
 0x520   : > { %3204 = vst.msk [vmem:[#allocation4 + $0xa0] sm:$0xff] %vm3183_vm13, %v3128_v30  ;;  %v12636_v30 = vld [vmem:[#allocation2 + $0x1b1] sm:$0xff] }
 0x521   : > { %3875 = vrot.lane.b32.xlu1 %v12177_v39, %s15743_s14 }
 0x522   : > { %3873 = vrot.lane.b32.xlu0 %v12185_v47, %s15743_s14  ;;  %v3134_v45 = vpop.permute.xlu1 %3133 }
 0x523   : > { %3207 = vst.msk [vmem:[#allocation4 + $0xb8] sm:$0xff] %vm3183_vm13, %v3134_v45  ;;  %v3132_v46 = vpop.permute.xlu0 %3131 }
 0x524   : > { %3206 = vst.msk [vmem:[#allocation4 + $0xb0] sm:$0xff] %vm3183_vm13, %v3132_v46 }
 0x525   : > { %3879 = vrot.lane.b32.xlu1 %v12189_v58, %s15743_s14 }
 0x526   : > { %3877 = vrot.lane.b32.xlu0 %v12197_v6, %s15743_s14  ;;  %v3138_v19 = vpop.permute.xlu1 %3137 }
 0x527   : > { %3209 = vst.msk [vmem:[#allocation4 + $0xc8] sm:$0xff] %vm3183_vm13, %v3138_v19  ;;  %v3136_v41 = vpop.permute.xlu0 %3135  ;;  %v3986_v19 = vld [vmem:[#allocation2 + $0x53] sm:$0xff] }
 0x528   : > { %3208 = vst.msk [vmem:[#allocation4 + $0xc0] sm:$0xff] %vm3183_vm13, %v3136_v41  ;;  %v3985_v41 = vld [vmem:[#allocation2 + $0x4b] sm:$0xff] }
 0x529   : > { %3883 = vrot.lane.b32.xlu1 %v12201_v26, %s15743_s14 }
 0x52a   : > { %3881 = vrot.lane.b32.xlu0 %v12209_v44, %s15743_s14  ;;  %v3142_v39 = vpop.permute.xlu1 %3141 }
 0x52b   : > { %3211 = vst.msk [vmem:[#allocation4 + $0xd8] sm:$0xff] %vm3183_vm13, %v3142_v39  ;;  %v3140_v47 = vpop.permute.xlu0 %3139 }
 0x52c   : > { %3210 = vst.msk [vmem:[#allocation4 + $0xd0] sm:$0xff] %vm3183_vm13, %v3140_v47 }
 0x52d   : > { %3887 = vrot.lane.b32.xlu1 %v12213_v32, %s15743_s14 }
 0x52e   : > { %3885 = vrot.lane.b32.xlu0 %v12221_v24, %s15743_s14  ;;  %v3146_v58 = vpop.permute.xlu1 %3145 }
 0x52f   : > { %3213 = vst.msk [vmem:[#allocation4 + $0xe8] sm:$0xff] %vm3183_vm13, %v3146_v58  ;;  %v3144_v6 = vpop.permute.xlu0 %3143  ;;  %v3988_v58 = vld [vmem:[#allocation2 + $0x6b] sm:$0xff] }
 0x530   : > { %3212 = vst.msk [vmem:[#allocation4 + $0xe0] sm:$0xff] %vm3183_vm13, %v3144_v6  ;;  %v3987_v6 = vld [vmem:[#allocation2 + $0x63] sm:$0xff] }
 0x531   : > { %3891 = vrot.lane.b32.xlu1 %v12225_v54, %s15743_s14 }
 0x532   : > { %3889 = vrot.lane.b32.xlu0 %v12233_v2, %s15743_s14 }
 0x533   : > { %v3150_v26 = vpop.permute.xlu1 %3149 }
 0x534   : > { %3215 = vst.msk [vmem:[#allocation4 + $0xf8] sm:$0xff] %vm3183_vm13, %v3150_v26  ;;  %v3148_v44 = vpop.permute.xlu0 %3147 }
 0x535   : > { %3214 = vst.msk [vmem:[#allocation4 + $0xf0] sm:$0xff] %vm3183_vm13, %v3148_v44  ;;  %3895 = vrot.lane.b32.xlu1 %v12237_v23, %s15743_s14  ;;  %vm9776_vm13 = vcmask 1043459  }
 0x536   : > { %3893 = vrot.lane.b32.xlu0 %v12245_v49, %s15743_s14 }
 0x537   : > { %v3528_v32 = vpop.permute.xlu1 %3527 }
 0x538   : > { %3596 = vst.msk [vmem:[#allocation3 + $0xd8] sm:$0xff] %vm1269_vm3, %v3528_v32  ;;  %v3526_v24 = vpop.permute.xlu0 %3525  ;;  %v12649_v32 = vld [vmem:[#allocation2 + $0x83] sm:$0xff] }
 0x539   : > { %3595 = vst.msk [vmem:[#allocation3 + $0xd0] sm:$0xff] %vm1269_vm3, %v3526_v24  ;;  %3899 = vrot.lane.b32.xlu1 %v12249_v7, %s15743_s14  ;;  %v12654_v24 = vld [vmem:[#allocation2 + $0x7b] sm:$0xff] }
 0x53a   : > { %3897 = vrot.lane.b32.xlu0 %v12251_v38, %s15743_s14 }
 0x53b   : > { %v3532_v54 = vpop.permute.xlu1 %3531 }
 0x53c   : > { %3598 = vst.msk [vmem:[#allocation3 + $0xe8] sm:$0xff] %vm1269_vm3, %v3532_v54  ;;  %v3530_v2 = vpop.permute.xlu0 %3529 }
 0x53d   : > { %3597 = vst.msk [vmem:[#allocation3 + $0xe0] sm:$0xff] %vm1269_vm3, %v3530_v2  ;;  %3903 = vrot.lane.b32.xlu1 %v12262_v1, %s15743_s14 }
 0x53e   : > { %3901 = vrot.lane.b32.xlu0 %v12264_v52, %s15743_s14 }
 0x53f   : > { %v3536_v23 = vpop.permute.xlu1 %3535 }
 0x540   : > { %3600 = vst.msk [vmem:[#allocation3 + $0xf8] sm:$0xff] %vm1269_vm3, %v3536_v23  ;;  %v3534_v49 = vpop.permute.xlu0 %3533  ;;  %v12659_v23 = vld [vmem:[#allocation2 + $0x9b] sm:$0xff] }
 0x541   : > { %3599 = vst.msk [vmem:[#allocation3 + $0xf0] sm:$0xff] %vm1269_vm3, %v3534_v49  ;;  %3907 = vrot.lane.b32.xlu1 %v12272_v12, %s15743_s14  ;;  %v12664_v49 = vld [vmem:[#allocation2 + $0x93] sm:$0xff]  ;;  %vm6438_vm3 = vcmask 80960  }
 0x542   : > { %3905 = vrot.lane.b32.xlu0 %v12274_v31, %s15743_s14 }
 0x543   : > { %v3668_v7 = vpop.permute.xlu1 %3667 }
 0x544   : > { %3762 = vst.msk [vmem:[#allocation3 + $0x8] sm:$0xff] %vm1462_vm4, %v3668_v7  ;;  %v3666_v38 = vpop.permute.xlu0 %3665 }
 0x545   : > { %3761 = vst.msk [vmem:[#allocation3] sm:$0xff] %vm1462_vm4, %v3666_v38  ;;  %3911 = vrot.lane.b32.xlu1 %v12280_v42, %s15743_s14 }
 0x546   : > { %3909 = vrot.lane.b32.xlu0 %v12285_v57, %s15743_s14 }
 0x547   : > { %v3672_v48 = vpop.permute.xlu1 %3671 }
 0x548   : > { %3764 = vst.msk [vmem:[#allocation3 + $0x18] sm:$0xff] %vm1462_vm4, %v3672_v48  ;;  %v3670_v10 = vpop.permute.xlu0 %3669  ;;  %v12669_v48 = vld [vmem:[#allocation2 + $0xb3] sm:$0xff] }
 0x549   : > { %3763 = vst.msk [vmem:[#allocation3 + $0x10] sm:$0xff] %vm1462_vm4, %v3670_v10  ;;  %3915 = vrot.lane.b32.xlu1 %v12621_v22, %s15743_s14  ;;  %v12674_v10 = vld [vmem:[#allocation2 + $0xab] sm:$0xff] }
 0x54a   : > { %3913 = vrot.lane.b32.xlu0 %v12626_v61, %s15743_s14 }
 0x54b   : > { %v3676_v63 = vpop.permute.xlu1 %3675 }
 0x54c   : > { %3766 = vst.msk [vmem:[#allocation3 + $0x28] sm:$0xff] %vm1462_vm4, %v3676_v63  ;;  %v3674_v60 = vpop.permute.xlu0 %3673 }
 0x54d   : > { %3765 = vst.msk [vmem:[#allocation3 + $0x20] sm:$0xff] %vm1462_vm4, %v3674_v60  ;;  %3919 = vrot.lane.b32.xlu1 %v12631_v59, %s15743_s14 }
 0x54e   : > { %3917 = vrot.lane.b32.xlu0 %v12636_v30, %s15743_s14  ;;  %s10602_s14 = smov 6  }
 0x54f   : > { %v3680_v45 = vpop.permute.xlu1 %3679 }
 0x550   : > { %3768 = vst.msk [vmem:[#allocation3 + $0x38] sm:$0xff] %vm1462_vm4, %v3680_v45  ;;  %v3678_v46 = vpop.permute.xlu0 %3677  ;;  %v12679_v45 = vld [vmem:[#allocation2 + $0xcb] sm:$0xff] }
 0x551   : > { %3767 = vst.msk [vmem:[#allocation3 + $0x30] sm:$0xff] %vm1462_vm4, %v3678_v46  ;;  %4051 = vrot.lane.b32.xlu1 %v3986_v19, %s15866_s12  ;;  %v12684_v46 = vld [vmem:[#allocation2 + $0xc3] sm:$0xff] }
 0x552   : > { %4049 = vrot.lane.b32.xlu0 %v3985_v41, %s15866_s12 }
 0x553   : > { %v3684_v39 = vpop.permute.xlu1 %3683 }
 0x554   : > { %3770 = vst.msk [vmem:[#allocation3 + $0x48] sm:$0xff] %vm1462_vm4, %v3684_v39  ;;  %v3682_v47 = vpop.permute.xlu0 %3681  ;;  %v12689_v39 = vld [vmem:[#allocation2 + $0xe3] sm:$0xff] }
 0x555   : > { %3769 = vst.msk [vmem:[#allocation3 + $0x40] sm:$0xff] %vm1462_vm4, %v3682_v47  ;;  %4055 = vrot.lane.b32.xlu1 %v3988_v58, %s15866_s12  ;;  %v12694_v47 = vld [vmem:[#allocation2 + $0xdb] sm:$0xff] }
 0x556   : > { %4053 = vrot.lane.b32.xlu0 %v3987_v6, %s15866_s12 }
 0x557   : > { %v3688_v26 = vpop.permute.xlu1 %3687 }
 0x558   : > { %3772 = vst.msk [vmem:[#allocation3 + $0x58] sm:$0xff] %vm1462_vm4, %v3688_v26  ;;  %v3686_v44 = vpop.permute.xlu0 %3685  ;;  %v12699_v26 = vld [vmem:[#allocation2 + $0xfb] sm:$0xff] }
 0x559   : > { %3771 = vst.msk [vmem:[#allocation3 + $0x50] sm:$0xff] %vm1462_vm4, %v3686_v44  ;;  %4059 = vrot.lane.b32.xlu1 %v12649_v32, %s15866_s12  ;;  %v12704_v44 = vld [vmem:[#allocation2 + $0xf3] sm:$0xff] }
 0x55a   : > { %4057 = vrot.lane.b32.xlu0 %v12654_v24, %s15866_s12 }
 0x55b   : > { %v3692_v54 = vpop.permute.xlu1 %3691 }
 0x55c   : > { %3774 = vst.msk [vmem:[#allocation3 + $0x68] sm:$0xff] %vm1462_vm4, %v3692_v54  ;;  %v3690_v2 = vpop.permute.xlu0 %3689 }
 0x55d   : > { %3773 = vst.msk [vmem:[#allocation3 + $0x60] sm:$0xff] %vm1462_vm4, %v3690_v2  ;;  %4063 = vrot.lane.b32.xlu1 %v12659_v23, %s15866_s12 }
 0x55e   : > { %4061 = vrot.lane.b32.xlu0 %v12664_v49, %s15866_s12 }
 0x55f   : > { %v3696_v7 = vpop.permute.xlu1 %3695 }
 0x560   : > { %3776 = vst.msk [vmem:[#allocation3 + $0x78] sm:$0xff] %vm1462_vm4, %v3696_v7  ;;  %v3694_v38 = vpop.permute.xlu0 %3693  ;;  %v12709_v7 = vld [vmem:[#allocation2 + $0x113] sm:$0xff] }
 0x561   : > { %3775 = vst.msk [vmem:[#allocation3 + $0x70] sm:$0xff] %vm1462_vm4, %v3694_v38  ;;  %4067 = vrot.lane.b32.xlu1 %v12669_v48, %s15866_s12  ;;  %v12714_v38 = vld [vmem:[#allocation2 + $0x10b] sm:$0xff] }
 0x562   : > { %4065 = vrot.lane.b32.xlu0 %v12674_v10, %s15866_s12 }
 0x563   : > { %v3700_v63 = vpop.permute.xlu1 %3699 }
 0x564   : > { %3778 = vst.msk [vmem:[#allocation3 + $0x88] sm:$0xff] %vm1462_vm4, %v3700_v63  ;;  %v3698_v60 = vpop.permute.xlu0 %3697 }
 0x565   : > { %3777 = vst.msk [vmem:[#allocation3 + $0x80] sm:$0xff] %vm1462_vm4, %v3698_v60  ;;  %4071 = vrot.lane.b32.xlu1 %v12679_v45, %s15866_s12 }
 0x566   : > { %4069 = vrot.lane.b32.xlu0 %v12684_v46, %s15866_s12 }
 0x567   : > { %v3704_v19 = vpop.permute.xlu1 %3703 }
 0x568   : > { %3780 = vst.msk [vmem:[#allocation3 + $0x98] sm:$0xff] %vm1462_vm4, %v3704_v19  ;;  %v3702_v41 = vpop.permute.xlu0 %3701  ;;  %v12719_v19 = vld [vmem:[#allocation2 + $0x12b] sm:$0xff] }
 0x569   : > { %3779 = vst.msk [vmem:[#allocation3 + $0x90] sm:$0xff] %vm1462_vm4, %v3702_v41  ;;  %4075 = vrot.lane.b32.xlu1 %v12689_v39, %s15866_s12  ;;  %v12724_v41 = vld [vmem:[#allocation2 + $0x123] sm:$0xff] }
 0x56a   : > { %4073 = vrot.lane.b32.xlu0 %v12694_v47, %s15866_s12 }
 0x56b   : > { %v3708_v58 = vpop.permute.xlu1 %3707 }
 0x56c   : > { %3782 = vst.msk [vmem:[#allocation3 + $0xa8] sm:$0xff] %vm1462_vm4, %v3708_v58  ;;  %v3706_v6 = vpop.permute.xlu0 %3705 }
 0x56d   : > { %3781 = vst.msk [vmem:[#allocation3 + $0xa0] sm:$0xff] %vm1462_vm4, %v3706_v6  ;;  %4079 = vrot.lane.b32.xlu1 %v12699_v26, %s15866_s12 }
 0x56e   : > { %4077 = vrot.lane.b32.xlu0 %v12704_v44, %s15866_s12 }
 0x56f   : > { %v3712_v54 = vpop.permute.xlu1 %3711 }
 0x570   : > { %3784 = vst.msk [vmem:[#allocation3 + $0xb8] sm:$0xff] %vm1462_vm4, %v3712_v54  ;;  %v3710_v2 = vpop.permute.xlu0 %3709  ;;  %v12729_v54 = vld [vmem:[#allocation2 + $0x143] sm:$0xff] }
 0x571   : > { %3783 = vst.msk [vmem:[#allocation3 + $0xb0] sm:$0xff] %vm1462_vm4, %v3710_v2  ;;  %4083 = vrot.lane.b32.xlu1 %v12709_v7, %s15866_s12  ;;  %v12734_v2 = vld [vmem:[#allocation2 + $0x13b] sm:$0xff] }
 0x572   : > { %4081 = vrot.lane.b32.xlu0 %v12714_v38, %s15866_s12 }
 0x573   : > { %v3716_v63 = vpop.permute.xlu1 %3715 }
 0x574   : > { %3786 = vst.msk [vmem:[#allocation3 + $0xc8] sm:$0xff] %vm1462_vm4, %v3716_v63  ;;  %v3714_v60 = vpop.permute.xlu0 %3713 }
 0x575   : > { %3785 = vst.msk [vmem:[#allocation3 + $0xc0] sm:$0xff] %vm1462_vm4, %v3714_v60  ;;  %4087 = vrot.lane.b32.xlu1 %v12719_v19, %s15866_s12 }
 0x576   : > { %4085 = vrot.lane.b32.xlu0 %v12724_v41, %s15866_s12 }
 0x577   : > { %v3720_v58 = vpop.permute.xlu1 %3719 }
 0x578   : > { %3788 = vst.msk [vmem:[#allocation3 + $0xd8] sm:$0xff] %vm1462_vm4, %v3720_v58  ;;  %v3718_v6 = vpop.permute.xlu0 %3717 }
 0x579   : > { %3787 = vst.msk [vmem:[#allocation3 + $0xd0] sm:$0xff] %vm1462_vm4, %v3718_v6  ;;  %4091 = vrot.lane.b32.xlu1 %v12729_v54, %s15866_s12 }
 0x57a   : > { %4089 = vrot.lane.b32.xlu0 %v12734_v2, %s15866_s12 }
 0x57b   : > { %v3724_v63 = vpop.permute.xlu1 %3723 }
 0x57c   : > { %3790 = vst.msk [vmem:[#allocation3 + $0xe8] sm:$0xff] %vm1462_vm4, %v3724_v63  ;;  %v3722_v60 = vpop.permute.xlu0 %3721 }
 0x57d   : > { %3789 = vst.msk [vmem:[#allocation3 + $0xe0] sm:$0xff] %vm1462_vm4, %v3722_v60  ;;  %4095 = vrot.lane.b32.xlu1 %v12384_v8, %s15866_s12 }
 0x57e   : > { %4093 = vrot.lane.b32.xlu0 %v12388_v53, %s15866_s12 }
 0x57f   : > { %v3728_v58 = vpop.permute.xlu1 %3727 }
 0x580   : > { %3792 = vst.msk [vmem:[#allocation3 + $0xf8] sm:$0xff] %vm1462_vm4, %v3728_v58  ;;  %v3726_v6 = vpop.permute.xlu0 %3725  ;;  %v12767_v58 = vld [vmem:[#allocation2 + $0x1bb] sm:$0xff] }
 0x581   : > { %3791 = vst.msk [vmem:[#allocation3 + $0xf0] sm:$0xff] %vm1462_vm4, %v3726_v6  ;;  %4099 = vrot.lane.b32.xlu1 %v12392_v36, %s15866_s12  ;;  %v12757_v36 = vld [vmem:[#allocation2 + $0x1a3] sm:$0xff]  ;;  %v12772_v6 = vld [vmem:[#allocation2 + $0x1b3] sm:$0xff]  ;;  %vm6631_vm4 = vcmask 97360  }
 0x582   : > { %4097 = vrot.lane.b32.xlu0 %v12396_v34, %s15866_s12  ;;  %v12762_v34 = vld [vmem:[#allocation2 + $0x19b] sm:$0xff] }
 0x583   : > { %v3860_v63 = vpop.permute.xlu1 %3859 }
 0x584   : > { %3954 = vst.msk [vmem:[#allocation3 + $0x8] sm:$0xff] %vm1655_vm6, %v3860_v63  ;;  %v3858_v60 = vpop.permute.xlu0 %3857 }
 0x585   : > { %3953 = vst.msk [vmem:[#allocation3] sm:$0xff] %vm1655_vm6, %v3858_v60  ;;  %4103 = vrot.lane.b32.xlu1 %v12400_v25, %s15866_s12 }
 0x586   : > { %4101 = vrot.lane.b32.xlu0 %v12404_v11, %s15866_s12 }
 0x587   : > { %v3864_v8 = vpop.permute.xlu1 %3863 }
 0x588   : > { %3956 = vst.msk [vmem:[#allocation3 + $0x18] sm:$0xff] %vm1655_vm6, %v3864_v8  ;;  %v3862_v53 = vpop.permute.xlu0 %3861 }
 0x589   : > { %3955 = vst.msk [vmem:[#allocation3 + $0x10] sm:$0xff] %vm1655_vm6, %v3862_v53  ;;  %4107 = vrot.lane.b32.xlu1 %v12757_v36, %s15866_s12 }
 0x58a   : > { %4105 = vrot.lane.b32.xlu0 %v12762_v34, %s15866_s12 }
 0x58b   : > { %v3868_v25 = vpop.permute.xlu1 %3867 }
 0x58c   : > { %3958 = vst.msk [vmem:[#allocation3 + $0x28] sm:$0xff] %vm1655_vm6, %v3868_v25  ;;  %v3866_v11 = vpop.permute.xlu0 %3865 }
 0x58d   : > { %3957 = vst.msk [vmem:[#allocation3 + $0x20] sm:$0xff] %vm1655_vm6, %v3866_v11  ;;  %4111 = vrot.lane.b32.xlu1 %v12767_v58, %s15866_s12 }
 0x58e   : > { %4109 = vrot.lane.b32.xlu0 %v12772_v6, %s15866_s12 }
 0x58f   : > { %v3872_v63 = vpop.permute.xlu1 %3871 }
 0x590   : > { %3960 = vst.msk [vmem:[#allocation3 + $0x38] sm:$0xff] %vm1655_vm6, %v3872_v63  ;;  %v3870_v60 = vpop.permute.xlu0 %3869 }
 0x591   : > { %3959 = vst.msk [vmem:[#allocation3 + $0x30] sm:$0xff] %vm1655_vm6, %v3870_v60  ;;  %4243 = vrot.lane.b32.xlu1 %v12412_v37, %s15867_s30 }
 0x592   : > { %4241 = vrot.lane.b32.xlu0 %v12416_v40, %s15867_s30 }
 0x593   : > { %v3876_v8 = vpop.permute.xlu1 %3875 }
 0x594   : > { %3962 = vst.msk [vmem:[#allocation3 + $0x48] sm:$0xff] %vm1655_vm6, %v3876_v8  ;;  %v3874_v53 = vpop.permute.xlu0 %3873 }
 0x595   : > { %3961 = vst.msk [vmem:[#allocation3 + $0x40] sm:$0xff] %vm1655_vm6, %v3874_v53  ;;  %4247 = vrot.lane.b32.xlu1 %v12420_v28, %s15867_s30  ;;  %v12866_v53 = vld [vmem:[#allocation2 + $0x19d] sm:$0xff] }
 0x596   : > { %4245 = vrot.lane.b32.xlu0 %v12424_v13, %s15867_s30 }
 0x597   : > { %v3880_v25 = vpop.permute.xlu1 %3879 }
 0x598   : > { %3964 = vst.msk [vmem:[#allocation3 + $0x58] sm:$0xff] %vm1655_vm6, %v3880_v25  ;;  %v3878_v11 = vpop.permute.xlu0 %3877  ;;  %v12871_v25 = vld [vmem:[#allocation2 + $0x1bd] sm:$0xff] }
 0x599   : > { %3963 = vst.msk [vmem:[#allocation3 + $0x50] sm:$0xff] %vm1655_vm6, %v3878_v11  ;;  %4251 = vrot.lane.b32.xlu1 %v12428_v17, %s15867_s30  ;;  %v12876_v11 = vld [vmem:[#allocation2 + $0x1b5] sm:$0xff] }
 0x59a   : > { %4249 = vrot.lane.b32.xlu0 %v12432_v14, %s15867_s30 }
 0x59b   : > { %v3884_v37 = vpop.permute.xlu1 %3883 }
 0x59c   : > { %3966 = vst.msk [vmem:[#allocation3 + $0x68] sm:$0xff] %vm1655_vm6, %v3884_v37  ;;  %v3882_v40 = vpop.permute.xlu0 %3881 }
 0x59d   : > { %3965 = vst.msk [vmem:[#allocation3 + $0x60] sm:$0xff] %vm1655_vm6, %v3882_v40  ;;  %4255 = vrot.lane.b32.xlu1 %v12436_v18, %s15867_s30 }
 0x59e   : > { %4253 = vrot.lane.b32.xlu0 %v12440_v0, %s15867_s30 }
 0x59f   : > { %v3888_v28 = vpop.permute.xlu1 %3887 }
 0x5a0   : > { %3968 = vst.msk [vmem:[#allocation3 + $0x78] sm:$0xff] %vm1655_vm6, %v3888_v28  ;;  %v3886_v13 = vpop.permute.xlu0 %3885  ;;  %v4371_v28 = vld [vmem:[#allocation2 + $0x81] sm:$0xff] }
 0x5a1   : > { %3967 = vst.msk [vmem:[#allocation3 + $0x70] sm:$0xff] %vm1655_vm6, %v3886_v13  ;;  %4259 = vrot.lane.b32.xlu1 %v12444_v29, %s15867_s30  ;;  %v4370_v13 = vld [vmem:[#allocation2 + $0x79] sm:$0xff] }
 0x5a2   : > { %4257 = vrot.lane.b32.xlu0 %v12448_v35, %s15867_s30 }
 0x5a3   : > { %v3892_v17 = vpop.permute.xlu1 %3891 }
 0x5a4   : > { %3970 = vst.msk [vmem:[#allocation3 + $0x88] sm:$0xff] %vm1655_vm6, %v3892_v17  ;;  %v3890_v14 = vpop.permute.xlu0 %3889 }
 0x5a5   : > { %3969 = vst.msk [vmem:[#allocation3 + $0x80] sm:$0xff] %vm1655_vm6, %v3890_v14  ;;  %4263 = vrot.lane.b32.xlu1 %v12452_v20, %s15867_s30 }
 0x5a6   : > { %4261 = vrot.lane.b32.xlu0 %v12456_v5, %s15867_s30 }
 0x5a7   : > { %v3896_v18 = vpop.permute.xlu1 %3895 }
 0x5a8   : > { %3972 = vst.msk [vmem:[#allocation3 + $0x98] sm:$0xff] %vm1655_vm6, %v3896_v18  ;;  %v3894_v0 = vpop.permute.xlu0 %3893  ;;  %v4373_v18 = vld [vmem:[#allocation2 + $0x99] sm:$0xff] }
 0x5a9   : > { %3971 = vst.msk [vmem:[#allocation3 + $0x90] sm:$0xff] %vm1655_vm6, %v3894_v0  ;;  %4267 = vrot.lane.b32.xlu1 %v12460_v43, %s15867_s30  ;;  %v4372_v0 = vld [vmem:[#allocation2 + $0x91] sm:$0xff] }
 0x5aa   : > { %4265 = vrot.lane.b32.xlu0 %v12464_v33, %s15867_s30 }
 0x5ab   : > { %v3900_v35 = vpop.permute.xlu1 %3899 }
 0x5ac   : > { %3974 = vst.msk [vmem:[#allocation3 + $0xa8] sm:$0xff] %vm1655_vm6, %v3900_v35  ;;  %v3898_v29 = vpop.permute.xlu0 %3897 }
 0x5ad   : > { %3973 = vst.msk [vmem:[#allocation3 + $0xa0] sm:$0xff] %vm1655_vm6, %v3898_v29  ;;  %4271 = vrot.lane.b32.xlu1 %v12468_v51, %s15867_s30 }
 0x5ae   : > { %4269 = vrot.lane.b32.xlu0 %v12472_v27, %s15867_s30 }
 0x5af   : > { %v3904_v5 = vpop.permute.xlu1 %3903 }
 0x5b0   : > { %3976 = vst.msk [vmem:[#allocation3 + $0xb8] sm:$0xff] %vm1655_vm6, %v3904_v5  ;;  %v3902_v20 = vpop.permute.xlu0 %3901  ;;  %v4375_v5 = vld [vmem:[#allocation2 + $0xb1] sm:$0xff] }
 0x5b1   : > { %3975 = vst.msk [vmem:[#allocation3 + $0xb0] sm:$0xff] %vm1655_vm6, %v3902_v20  ;;  %4275 = vrot.lane.b32.xlu1 %v12477_v16, %s15867_s30  ;;  %v4374_v20 = vld [vmem:[#allocation2 + $0xa9] sm:$0xff] }
 0x5b2   : > { %4273 = vrot.lane.b32.xlu0 %v12482_v15, %s15867_s30 }
 0x5b3   : > { %v3908_v33 = vpop.permute.xlu1 %3907 }
 0x5b4   : > { %3978 = vst.msk [vmem:[#allocation3 + $0xc8] sm:$0xff] %vm1655_vm6, %v3908_v33  ;;  %v3906_v43 = vpop.permute.xlu0 %3905 }
 0x5b5   : > { %3977 = vst.msk [vmem:[#allocation3 + $0xc0] sm:$0xff] %vm1655_vm6, %v3906_v43  ;;  %4279 = vrot.lane.b32.xlu1 %v12487_v4, %s15867_s30  ;;  %v15868_v4 = vld [vmem:[#allocation40_spill] sm:$0xff] }
 0x5b6   : > { %4277 = vrot.lane.b32.xlu0 %v12492_v21, %s15867_s30 }
 0x5b7   : > { %v3912_v27 = vpop.permute.xlu1 %3911 }
 0x5b8   : > { %3980 = vst.msk [vmem:[#allocation3 + $0xd8] sm:$0xff] %vm1655_vm6, %v3912_v27  ;;  %v3910_v51 = vpop.permute.xlu0 %3909  ;;  %v4377_v27 = vld [vmem:[#allocation2 + $0xc9] sm:$0xff] }
 0x5b9   : > { %3979 = vst.msk [vmem:[#allocation3 + $0xd0] sm:$0xff] %vm1655_vm6, %v3910_v51  ;;  %4283 = vrot.lane.b32.xlu1 %v12497_v62, %s15867_s30  ;;  %v15869_v62 = vld [vmem:[#allocation41_spill] sm:$0xff]  ;;  %v4376_v51 = vld [vmem:[#allocation2 + $0xc1] sm:$0xff] }
 0x5ba   : > { %4281 = vrot.lane.b32.xlu0 %v12502_v9, %s15867_s30 }
 0x5bb   : > { %v3916_v15 = vpop.permute.xlu1 %3915 }
 0x5bc   : > { %3982 = vst.msk [vmem:[#allocation3 + $0xe8] sm:$0xff] %vm1655_vm6, %v3916_v15  ;;  %v3914_v16 = vpop.permute.xlu0 %3913 }
 0x5bd   : > { %3981 = vst.msk [vmem:[#allocation3 + $0xe0] sm:$0xff] %vm1655_vm6, %v3914_v16  ;;  %4287 = vrot.lane.b32.xlu1 %v12507_v56, %s15867_s30 }
 0x5be   : > { %4285 = vrot.lane.b32.xlu0 %v15868_v4, %s15867_s30  ;;  %v4379_v4 = vld [vmem:[#allocation2 + $0xe1] sm:$0xff] }
 0x5bf   : > { %v3920_v21 = vpop.permute.xlu1 %3919 }
 0x5c0   : > { %3984 = vst.msk [vmem:[#allocation3 + $0xf8] sm:$0xff] %vm1655_vm6, %v3920_v21  ;;  %v3918_v63 = vpop.permute.xlu0 %3917  ;;  %v4378_v21 = vld [vmem:[#allocation2 + $0xd9] sm:$0xff] }
 0x5c1   : > { %3983 = vst.msk [vmem:[#allocation3 + $0xf0] sm:$0xff] %vm1655_vm6, %v3918_v63  ;;  %4291 = vrot.lane.b32.xlu1 %v12517_v50, %s15867_s30  ;;  %v12861_v50 = vld [vmem:[#allocation2 + $0x1a5] sm:$0xff]  ;;  %vm7018_vm6 = vcmask 130160  }
 0x5c2   : > { %4289 = vrot.lane.b32.xlu0 %v15869_v62, %s15867_s30 }
 0x5c3   : > { %v4052_v9 = vpop.permute.xlu1 %4051 }
 0x5c4   : > { %4146 = vst.msk [vmem:[#allocation3 + $0x8] sm:$0xff] %vm1848_vm7, %v4052_v9  ;;  %v4050_v60 = vpop.permute.xlu0 %4049  ;;  %v4381_v9 = vld [vmem:[#allocation2 + $0xf9] sm:$0xff] }
 0x5c5   : > { %4145 = vst.msk [vmem:[#allocation3] sm:$0xff] %vm1848_vm7, %v4050_v60  ;;  %4295 = vrot.lane.b32.xlu1 %v12527_v3, %s15867_s30  ;;  %v4380_v60 = vld [vmem:[#allocation2 + $0xf1] sm:$0xff] }
 0x5c6   : > { %4293 = vrot.lane.b32.xlu0 %v12532_v55, %s15867_s30 }
 0x5c7   : > { %v4056_v56 = vpop.permute.xlu1 %4055 }
 0x5c8   : > { %4148 = vst.msk [vmem:[#allocation3 + $0x18] sm:$0xff] %vm1848_vm7, %v4056_v56  ;;  %v4054_v8 = vpop.permute.xlu0 %4053 }
 0x5c9   : > { %4147 = vst.msk [vmem:[#allocation3 + $0x10] sm:$0xff] %vm1848_vm7, %v4054_v8  ;;  %4299 = vrot.lane.b32.xlu1 %v12861_v50, %s15867_s30 }
 0x5ca   : > { %4297 = vrot.lane.b32.xlu0 %v12866_v53, %s15867_s30 }
 0x5cb   : > { %v4060_v3 = vpop.permute.xlu1 %4059 }
 0x5cc   : > { %4150 = vst.msk [vmem:[#allocation3 + $0x28] sm:$0xff] %vm1848_vm7, %v4060_v3  ;;  %v4058_v55 = vpop.permute.xlu0 %4057  ;;  %v4383_v3 = vld [vmem:[#allocation2 + $0x111] sm:$0xff] }
 0x5cd   : > { %4149 = vst.msk [vmem:[#allocation3 + $0x20] sm:$0xff] %vm1848_vm7, %v4058_v55  ;;  %4303 = vrot.lane.b32.xlu1 %v12871_v25, %s15867_s30  ;;  %v4382_v55 = vld [vmem:[#allocation2 + $0x109] sm:$0xff] }
 0x5ce   : > { %4301 = vrot.lane.b32.xlu0 %v12876_v11, %s15867_s30  ;;  %s10605_s30 = smov 14  }
 0x5cf   : > { %v4064_v37 = vpop.permute.xlu1 %4063 }
 0x5d0   : > { %4152 = vst.msk [vmem:[#allocation3 + $0x38] sm:$0xff] %vm1848_vm7, %v4064_v37  ;;  %v4062_v40 = vpop.permute.xlu0 %4061 }
 0x5d1   : > { %4151 = vst.msk [vmem:[#allocation3 + $0x30] sm:$0xff] %vm1848_vm7, %v4062_v40  ;;  %4436 = vrot.lane.b32.xlu1 %v4371_v28, %s15870_s25  ;;  %v4385_v28 = vld [vmem:[#allocation2 + $0x129] sm:$0xff] }
 0x5d2   : > { %4434 = vrot.lane.b32.xlu0 %v4370_v13, %s15870_s25  ;;  %v4384_v13 = vld [vmem:[#allocation2 + $0x121] sm:$0xff] }
 0x5d3   : > { %v4068_v17 = vpop.permute.xlu1 %4067 }
 0x5d4   : > { %4154 = vst.msk [vmem:[#allocation3 + $0x48] sm:$0xff] %vm1848_vm7, %v4068_v17  ;;  %v4066_v14 = vpop.permute.xlu0 %4065 }
 0x5d5   : > { %4153 = vst.msk [vmem:[#allocation3 + $0x40] sm:$0xff] %vm1848_vm7, %v4066_v14  ;;  %4440 = vrot.lane.b32.xlu1 %v4373_v18, %s15870_s25  ;;  %v4387_v18 = vld [vmem:[#allocation2 + $0x141] sm:$0xff] }
 0x5d6   : > { %4438 = vrot.lane.b32.xlu0 %v4372_v0, %s15870_s25  ;;  %v4386_v0 = vld [vmem:[#allocation2 + $0x139] sm:$0xff] }
 0x5d7   : > { %v4072_v35 = vpop.permute.xlu1 %4071 }
 0x5d8   : > { %4156 = vst.msk [vmem:[#allocation3 + $0x58] sm:$0xff] %vm1848_vm7, %v4072_v35  ;;  %v4070_v29 = vpop.permute.xlu0 %4069 }
 0x5d9   : > { %4155 = vst.msk [vmem:[#allocation3 + $0x50] sm:$0xff] %vm1848_vm7, %v4070_v29  ;;  %4444 = vrot.lane.b32.xlu1 %v4375_v5, %s15870_s25 }
 0x5da   : > { %4442 = vrot.lane.b32.xlu0 %v4374_v20, %s15870_s25 }
 0x5db   : > { %v4076_v33 = vpop.permute.xlu1 %4075 }
 0x5dc   : > { %4158 = vst.msk [vmem:[#allocation3 + $0x68] sm:$0xff] %vm1848_vm7, %v4076_v33  ;;  %v4074_v43 = vpop.permute.xlu0 %4073 }
 0x5dd   : > { %4157 = vst.msk [vmem:[#allocation3 + $0x60] sm:$0xff] %vm1848_vm7, %v4074_v43  ;;  %4448 = vrot.lane.b32.xlu1 %v4377_v27, %s15870_s25  ;;  %v4398_v27 = vld [vmem:[#allocation2 + $0x1c9] sm:$0xff] }
 0x5de   : > { %4446 = vrot.lane.b32.xlu0 %v4376_v51, %s15870_s25 }
 0x5df   : > { %v4080_v15 = vpop.permute.xlu1 %4079 }
 0x5e0   : > { %4160 = vst.msk [vmem:[#allocation3 + $0x78] sm:$0xff] %vm1848_vm7, %v4080_v15  ;;  %v4078_v16 = vpop.permute.xlu0 %4077  ;;  %v4400_v15 = vld [vmem:[#allocation2 + $0x1e1] sm:$0xff] }
 0x5e1   : > { %4159 = vst.msk [vmem:[#allocation3 + $0x70] sm:$0xff] %vm1848_vm7, %v4078_v16  ;;  %4452 = vrot.lane.b32.xlu1 %v4379_v4, %s15870_s25  ;;  %v4979_v16 = vld [vmem:[%s15680_s5 + $0x8] sm:$0xff] }
 0x5e2   : > { %4450 = vrot.lane.b32.xlu0 %v4378_v21, %s15870_s25 }
 0x5e3   : > { %v4084_v63 = vpop.permute.xlu1 %4083 }
 0x5e4   : > { %4162 = vst.msk [vmem:[#allocation3 + $0x88] sm:$0xff] %vm1848_vm7, %v4084_v63  ;;  %v4082_v62 = vpop.permute.xlu0 %4081 }
 0x5e5   : > { %4161 = vst.msk [vmem:[#allocation3 + $0x80] sm:$0xff] %vm1848_vm7, %v4082_v62  ;;  %4456 = vrot.lane.b32.xlu1 %v4381_v9, %s15870_s25 }
 0x5e6   : > { %4454 = vrot.lane.b32.xlu0 %v4380_v60, %s15870_s25 }
 0x5e7   : > { %v4088_v56 = vpop.permute.xlu1 %4087 }
 0x5e8   : > { %4164 = vst.msk [vmem:[#allocation3 + $0x98] sm:$0xff] %vm1848_vm7, %v4088_v56  ;;  %v4086_v8 = vpop.permute.xlu0 %4085 }
 0x5e9   : > { %4163 = vst.msk [vmem:[#allocation3 + $0x90] sm:$0xff] %vm1848_vm7, %v4086_v8  ;;  %4460 = vrot.lane.b32.xlu1 %v4383_v3, %s15870_s25 }
 0x5ea   : > { %4458 = vrot.lane.b32.xlu0 %v4382_v55, %s15870_s25 }
 0x5eb   : > { %v4092_v37 = vpop.permute.xlu1 %4091 }
 0x5ec   : > { %4166 = vst.msk [vmem:[#allocation3 + $0xa8] sm:$0xff] %vm1848_vm7, %v4092_v37  ;;  %v4090_v40 = vpop.permute.xlu0 %4089 }
 0x5ed   : > { %4165 = vst.msk [vmem:[#allocation3 + $0xa0] sm:$0xff] %vm1848_vm7, %v4090_v40  ;;  %4464 = vrot.lane.b32.xlu1 %v4385_v28, %s15870_s25  ;;  %v4582_v28 = vld [vmem:[#allocation2 + $0x16b] sm:$0xff] }
 0x5ee   : > { %4462 = vrot.lane.b32.xlu0 %v4384_v13, %s15870_s25 }
 0x5ef   : > { %v4096_v17 = vpop.permute.xlu1 %4095 }
 0x5f0   : > { %4168 = vst.msk [vmem:[#allocation3 + $0xb8] sm:$0xff] %vm1848_vm7, %v4096_v17  ;;  %v4094_v14 = vpop.permute.xlu0 %4093 }
 0x5f1   : > { %4167 = vst.msk [vmem:[#allocation3 + $0xb0] sm:$0xff] %vm1848_vm7, %v4094_v14  ;;  %4468 = vrot.lane.b32.xlu1 %v4387_v18, %s15870_s25  ;;  %v4585_v14 = vld [vmem:[#allocation2 + $0x18b] sm:$0xff]  ;;  %v4584_v18 = vld [vmem:[#allocation2 + $0x183] sm:$0xff] }
 0x5f2   : > { %4466 = vrot.lane.b32.xlu0 %v4386_v0, %s15870_s25 }
 0x5f3   : > { %v4100_v35 = vpop.permute.xlu1 %4099 }
 0x5f4   : > { %4170 = vst.msk [vmem:[#allocation3 + $0xc8] sm:$0xff] %vm1848_vm7, %v4100_v35  ;;  %v4098_v29 = vpop.permute.xlu0 %4097 }
 0x5f5   : > { %4169 = vst.msk [vmem:[#allocation3 + $0xc0] sm:$0xff] %vm1848_vm7, %v4098_v29  ;;  %4472 = vrot.lane.b32.xlu1 %v12262_v1, %s15870_s25 }
 0x5f6   : > { %4470 = vrot.lane.b32.xlu0 %v12264_v52, %s15870_s25 }
 0x5f7   : > { %v4104_v5 = vpop.permute.xlu1 %4103 }
 0x5f8   : > { %4172 = vst.msk [vmem:[#allocation3 + $0xd8] sm:$0xff] %vm1848_vm7, %v4104_v5  ;;  %v4102_v20 = vpop.permute.xlu0 %4101 }
 0x5f9   : > { %4171 = vst.msk [vmem:[#allocation3 + $0xd0] sm:$0xff] %vm1848_vm7, %v4102_v20  ;;  %4476 = vrot.lane.b32.xlu1 %v12272_v12, %s15870_s25  ;;  %v4591_v20 = vld [vmem:[#allocation2 + $0x1d3] sm:$0xff] }
 0x5fa   : > { %4474 = vrot.lane.b32.xlu0 %v12274_v31, %s15870_s25 }
 0x5fb   : > { %v4108_v33 = vpop.permute.xlu1 %4107 }
 0x5fc   : > { %4174 = vst.msk [vmem:[#allocation3 + $0xe8] sm:$0xff] %vm1848_vm7, %v4108_v33  ;;  %v4106_v43 = vpop.permute.xlu0 %4105 }
 0x5fd   : > { %4173 = vst.msk [vmem:[#allocation3 + $0xe0] sm:$0xff] %vm1848_vm7, %v4106_v43  ;;  %4480 = vrot.lane.b32.xlu1 %v12280_v42, %s15870_s25  ;;  %v4399_v42 = vld [vmem:[#allocation2 + $0x1d1] sm:$0xff] }
 0x5fe   : > { %4478 = vrot.lane.b32.xlu0 %v12285_v57, %s15870_s25  ;;  %v4590_v43 = vld [vmem:[#allocation2 + $0x1cb] sm:$0xff] }
 0x5ff   : > { %v4112_v1 = vpop.permute.xlu1 %4111 }
 0x600   : > { %4176 = vst.msk [vmem:[#allocation3 + $0xf8] sm:$0xff] %vm1848_vm7, %v4112_v1  ;;  %v4110_v52 = vpop.permute.xlu0 %4109 }
 0x601   : > { %4175 = vst.msk [vmem:[#allocation3 + $0xf0] sm:$0xff] %vm1848_vm7, %v4110_v52  ;;  %4484 = vrot.lane.b32.xlu1 %v12621_v22, %s15870_s25  ;;  %v4592_v52 = vld [vmem:[#allocation2 + $0x1e3] sm:$0xff]  ;;  %vm7211_vm7 = vcmask 146560  }
 0x602   : > { %4482 = vrot.lane.b32.xlu0 %v12626_v61, %s15870_s25  ;;  %v4401_v61 = vld [vmem:[#allocation2 + $0x1e9] sm:$0xff] }
 0x603   : > { %v4244_v12 = vpop.permute.xlu1 %4243 }
 0x604   : > { %4338 = vst.msk [vmem:[#allocation3 + $0x8] sm:$0xff] %vm2041_vm8, %v4244_v12  ;;  %v4242_v31 = vpop.permute.xlu0 %4241 }
 0x605   : > { %4337 = vst.msk [vmem:[#allocation3] sm:$0xff] %vm2041_vm8, %v4242_v31  ;;  %4488 = vrot.lane.b32.xlu1 %v12631_v59, %s15870_s25  ;;  %v4755_v31 = vld [vmem:[#allocation2 + $0x85] sm:$0xff] }
 0x606   : > { %4486 = vrot.lane.b32.xlu0 %v12636_v30, %s15870_s25  ;;  %v4978_v30 = vld [vmem:[%s15680_s5] sm:$0xff] }
 0x607   : > { %v4248_v57 = vpop.permute.xlu1 %4247  ;;  %v10449_v4 = vpack.c.bf16 %v4979_v16, %v4978_v30  ;;  %v4758_v30 = vld [vmem:[#allocation2 + $0xad] sm:$0xff] }
 0x608   : > { %4340 = vst.msk [vmem:[#allocation3 + $0x18] sm:$0xff] %vm2041_vm8, %v4248_v57  ;;  %v4246_v22 = vpop.permute.xlu0 %4245 }
 0x609   : > { %4339 = vst.msk [vmem:[#allocation3 + $0x10] sm:$0xff] %vm2041_vm8, %v4246_v22  ;;  %4492 = vrot.lane.b32.xlu1 %v4399_v42, %s15870_s25  ;;  %10450 = vmatprep.subr.bf16.mxu0 %v10449_v4  ;;  %v4754_v42 = vld [vmem:[#allocation2 + $0x7d] sm:$0xff] }
 0x60a   : > { %4490 = vrot.lane.b32.xlu0 %v4398_v27, %s15870_s25  ;;  %10452 = vmatpush3.bf16.msra.mxu0 %v10449_v4  ;;  %v4757_v22 = vld [vmem:[#allocation2 + $0x9d] sm:$0xff] }
 0x60b   : > { %v4252_v51 = vpop.permute.xlu1 %4251 }
 0x60c   : > { %4342 = vst.msk [vmem:[#allocation3 + $0x28] sm:$0xff] %vm2041_vm8, %v4252_v51  ;;  %v4250_v59 = vpop.permute.xlu0 %4249 }
 0x60d   : > { %4341 = vst.msk [vmem:[#allocation3 + $0x20] sm:$0xff] %vm2041_vm8, %v4250_v59  ;;  %4496 = vrot.lane.b32.xlu1 %v4401_v61, %s15870_s25  ;;  %v4756_v61 = vld [vmem:[#allocation2 + $0x95] sm:$0xff] }
 0x60e   : > { %4494 = vrot.lane.b32.xlu0 %v4400_v15, %s15870_s25  ;;  %v4759_v59 = vld [vmem:[#allocation2 + $0xb5] sm:$0xff]  ;;  %s10603_s25 = smov 118  }
 0x60f   : > { %v4256_v21 = vpop.permute.xlu1 %4255 }
 0x610   : > { %4344 = vst.msk [vmem:[#allocation3 + $0x38] sm:$0xff] %vm2041_vm8, %v4256_v21  ;;  %v4254_v63 = vpop.permute.xlu0 %4253  ;;  %v4761_v21 = vld [vmem:[#allocation2 + $0xcd] sm:$0xff] }
 0x611   : > { %4343 = vst.msk [vmem:[#allocation3 + $0x30] sm:$0xff] %vm2041_vm8, %v4254_v63  ;;  %4628 = vrot.lane.b32.xlu1 %v12649_v32, %s10598_s16  ;;  %v4760_v63 = vld [vmem:[#allocation2 + $0xc5] sm:$0xff] }
 0x612   : > { %4626 = vrot.lane.b32.xlu0 %v12654_v24, %s10598_s16 }
 0x613   : > { %v4260_v62 = vpop.permute.xlu1 %4259 }
 0x614   : > { %4346 = vst.msk [vmem:[#allocation3 + $0x48] sm:$0xff] %vm2041_vm8, %v4260_v62  ;;  %v4258_v9 = vpop.permute.xlu0 %4257 }
 0x615   : > { %4345 = vst.msk [vmem:[#allocation3 + $0x40] sm:$0xff] %vm2041_vm8, %v4258_v9  ;;  %4632 = vrot.lane.b32.xlu1 %v12659_v23, %s10598_s16 }
 0x616   : > { %4630 = vrot.lane.b32.xlu0 %v12664_v49, %s10598_s16 }
 0x617   : > { %v4264_v60 = vpop.permute.xlu1 %4263 }
 0x618   : > { %4348 = vst.msk [vmem:[#allocation3 + $0x58] sm:$0xff] %vm2041_vm8, %v4264_v60  ;;  %v4262_v32 = vpop.permute.xlu0 %4261  ;;  %v4763_v60 = vld [vmem:[#allocation2 + $0xe5] sm:$0xff] }
 0x619   : > { %4347 = vst.msk [vmem:[#allocation3 + $0x50] sm:$0xff] %vm2041_vm8, %v4262_v32  ;;  %4636 = vrot.lane.b32.xlu1 %v12669_v48, %s10598_s16  ;;  %v4980_v48 = vld [vmem:[%s15680_s5 + $0x10] sm:$0xff]  ;;  %v4762_v32 = vld [vmem:[#allocation2 + $0xdd] sm:$0xff] }
 0x61a   : > { %4634 = vrot.lane.b32.xlu0 %v12674_v10, %s10598_s16  ;;  %v4981_v10 = vld [vmem:[%s15680_s5 + $0x18] sm:$0xff] }
 0x61b   : > { %v4268_v24 = vpop.permute.xlu1 %4267 }
 0x61c   : > { %4350 = vst.msk [vmem:[#allocation3 + $0x68] sm:$0xff] %vm2041_vm8, %v4268_v24  ;;  %v4266_v56 = vpop.permute.xlu0 %4265 }
 0x61d   : > { %4349 = vst.msk [vmem:[#allocation3 + $0x60] sm:$0xff] %vm2041_vm8, %v4266_v56  ;;  %4640 = vrot.lane.b32.xlu1 %v12679_v45, %s10598_s16  ;;  %v10453_v45 = vpack.c.bf16 %v4981_v10, %v4980_v48 }
 0x61e   : > { %4638 = vrot.lane.b32.xlu0 %v12684_v46, %s10598_s16 }
 0x61f   : > { %v4272_v23 = vpop.permute.xlu1 %4271  ;;  %10454 = vmatprep.subr.bf16.mxu0 %v10453_v45 }
 0x620   : > { %4352 = vst.msk [vmem:[#allocation3 + $0x78] sm:$0xff] %vm2041_vm8, %v4272_v23  ;;  %v4270_v49 = vpop.permute.xlu0 %4269  ;;  %10456 = vmatpush3.bf16.msra.mxu0 %v10453_v45  ;;  %v4765_v23 = vld [vmem:[#allocation2 + $0xfd] sm:$0xff]  ;;  %v4767_v45 = vld [vmem:[#allocation2 + $0x115] sm:$0xff] }
 0x621   : > { %4351 = vst.msk [vmem:[#allocation3 + $0x70] sm:$0xff] %vm2041_vm8, %v4270_v49  ;;  %4644 = vrot.lane.b32.xlu1 %v12689_v39, %s10598_s16  ;;  %v4764_v49 = vld [vmem:[#allocation2 + $0xf5] sm:$0xff] }
 0x622   : > { %4642 = vrot.lane.b32.xlu0 %v12694_v47, %s10598_s16 }
 0x623   : > { %v4276_v46 = vpop.permute.xlu1 %4275 }
 0x624   : > { %4354 = vst.msk [vmem:[#allocation3 + $0x88] sm:$0xff] %vm2041_vm8, %v4276_v46  ;;  %v4274_v8 = vpop.permute.xlu0 %4273  ;;  %v4766_v46 = vld [vmem:[#allocation2 + $0x10d] sm:$0xff] }
 0x625   : > { %4353 = vst.msk [vmem:[#allocation3 + $0x80] sm:$0xff] %vm2041_vm8, %v4274_v8  ;;  %4648 = vrot.lane.b32.xlu1 %v12699_v26, %s10598_s16 }
 0x626   : > { %4646 = vrot.lane.b32.xlu0 %v12704_v44, %s10598_s16 }
 0x627   : > { %v4280_v39 = vpop.permute.xlu1 %4279 }
 0x628   : > { %4356 = vst.msk [vmem:[#allocation3 + $0x98] sm:$0xff] %vm2041_vm8, %v4280_v39  ;;  %v4278_v3 = vpop.permute.xlu0 %4277 }
 0x629   : > { %4355 = vst.msk [vmem:[#allocation3 + $0x90] sm:$0xff] %vm2041_vm8, %v4278_v3  ;;  %4652 = vrot.lane.b32.xlu1 %v12709_v7, %s10598_s16  ;;  %v4769_v3 = vld [vmem:[#allocation2 + $0x12d] sm:$0xff] }
 0x62a   : > { %4650 = vrot.lane.b32.xlu0 %v12714_v38, %s10598_s16 }
 0x62b   : > { %v4284_v47 = vpop.permute.xlu1 %4283 }
 0x62c   : > { %4358 = vst.msk [vmem:[#allocation3 + $0xa8] sm:$0xff] %vm2041_vm8, %v4284_v47  ;;  %v4282_v26 = vpop.permute.xlu0 %4281  ;;  %v4768_v47 = vld [vmem:[#allocation2 + $0x125] sm:$0xff] }
 0x62d   : > { %4357 = vst.msk [vmem:[#allocation3 + $0xa0] sm:$0xff] %vm2041_vm8, %v4282_v26  ;;  %4656 = vrot.lane.b32.xlu1 %v12719_v19, %s10598_s16  ;;  %v4581_v19 = vld [vmem:[#allocation2 + $0x15b] sm:$0xff] }
 0x62e   : > { %4654 = vrot.lane.b32.xlu0 %v12724_v41, %s10598_s16  ;;  %v4580_v41 = vld [vmem:[#allocation2 + $0x153] sm:$0xff] }
 0x62f   : > { %v4288_v44 = vpop.permute.xlu1 %4287 }
 0x630   : > { %4360 = vst.msk [vmem:[#allocation3 + $0xb8] sm:$0xff] %vm2041_vm8, %v4288_v44  ;;  %v4286_v55 = vpop.permute.xlu0 %4285 }
 0x631   : > { %4359 = vst.msk [vmem:[#allocation3 + $0xb0] sm:$0xff] %vm2041_vm8, %v4286_v55  ;;  %4660 = vrot.lane.b32.xlu1 %v12729_v54, %s10598_s16  ;;  %v4583_v54 = vld [vmem:[#allocation2 + $0x173] sm:$0xff]  ;;  %v4771_v55 = vld [vmem:[#allocation2 + $0x145] sm:$0xff] }
 0x632   : > { %4658 = vrot.lane.b32.xlu0 %v12734_v2, %s10598_s16  ;;  %v4982_v2 = vld [vmem:[%s15680_s5 + $0x20] sm:$0xf] }
 0x633   : > { %v4292_v7 = vpop.permute.xlu1 %4291  ;;  %10337 = vmatprep.subr.msk.mxu0 %vm522_vm0, %v4982_v2 }
 0x634   : > { %4362 = vst.msk [vmem:[#allocation3 + $0xc8] sm:$0xff] %vm2041_vm8, %v4292_v7  ;;  %v4290_v38 = vpop.permute.xlu0 %4289  ;;  %10338 = vmatpush3.msk.msra.mxu0 %vm522_vm0, %v4982_v2  ;;  %v4770_v7 = vld [vmem:[#allocation2 + $0x13d] sm:$0xff]  ;;  %v4775_v2 = vld [vmem:[#allocation2 + $0x175] sm:$0xff]  ;;  %vm7383_vm0 = vcmask 1041408  }
 0x635   : > { %4361 = vst.msk [vmem:[#allocation3 + $0xc0] sm:$0xff] %vm2041_vm8, %v4290_v38  ;;  %4664 = vrot.lane.b32.xlu1 %v4581_v19, %s10598_s16 }
 0x636   : > { %4662 = vrot.lane.b32.xlu0 %v4580_v41, %s10598_s16  ;;  %v4773_v41 = vld [vmem:[#allocation2 + $0x15d] sm:$0xff] }
 0x637   : > { %v4296_v37 = vpop.permute.xlu1 %4295 }
 0x638   : > { %4364 = vst.msk [vmem:[#allocation3 + $0xd8] sm:$0xff] %vm2041_vm8, %v4296_v37  ;;  %v4294_v40 = vpop.permute.xlu0 %4293  ;;  %v4772_v37 = vld [vmem:[#allocation2 + $0x155] sm:$0xff] }
 0x639   : > { %4363 = vst.msk [vmem:[#allocation3 + $0xd0] sm:$0xff] %vm2041_vm8, %v4294_v40  ;;  %4668 = vrot.lane.b32.xlu1 %v4583_v54, %s10598_s16 }
 0x63a   : > { %4666 = vrot.lane.b32.xlu0 %v4582_v28, %s10598_s16  ;;  %v4774_v28 = vld [vmem:[#allocation2 + $0x16d] sm:$0xff] }
 0x63b   : > { %v4300_v13 = vpop.permute.xlu1 %4299 }
 0x63c   : > { %4366 = vst.msk [vmem:[#allocation3 + $0xe8] sm:$0xff] %vm2041_vm8, %v4300_v13  ;;  %v4298_v17 = vpop.permute.xlu0 %4297 }
 0x63d   : > { %4365 = vst.msk [vmem:[#allocation3 + $0xe0] sm:$0xff] %vm2041_vm8, %v4298_v17  ;;  %4672 = vrot.lane.b32.xlu1 %v4585_v14, %s10598_s16  ;;  %v4777_v14 = vld [vmem:[#allocation2 + $0x18d] sm:$0xff] }
 0x63e   : > { %4670 = vrot.lane.b32.xlu0 %v4584_v18, %s10598_s16  ;;  %v4776_v18 = vld [vmem:[#allocation2 + $0x185] sm:$0xff] }
 0x63f   : > { %v4304_v0 = vpop.permute.xlu1 %4303 }
 0x640   : > { %4368 = vst.msk [vmem:[#allocation3 + $0xf8] sm:$0xff] %vm2041_vm8, %v4304_v0  ;;  %v4302_v35 = vpop.permute.xlu0 %4301 }
 0x641   : > { %4367 = vst.msk [vmem:[#allocation3 + $0xf0] sm:$0xff] %vm2041_vm8, %v4302_v35  ;;  %4676 = vrot.lane.b32.xlu1 %v12757_v36, %s10598_s16  ;;  %vm7286_vm8 = vcmask 146432  }
 0x642   : > { %4674 = vrot.lane.b32.xlu0 %v12762_v34, %s10598_s16  ;;  %v4593_v34 = vld [vmem:[#allocation2 + $0x1eb] sm:$0xff] }
 0x643   : > { %v4437_v29 = vpop.permute.xlu1 %4436 }
 0x644   : > { %4531 = vst.msk [vmem:[#allocation3 + $0x8] sm:$0xff] %vm2235_vm9, %v4437_v29  ;;  %v4435_v5 = vpop.permute.xlu0 %4434 }
 0x645   : > { %4530 = vst.msk [vmem:[#allocation3] sm:$0xff] %vm2235_vm9, %v4435_v5  ;;  %4680 = vrot.lane.b32.xlu1 %v12767_v58, %s10598_s16 }
 0x646   : > { %4678 = vrot.lane.b32.xlu0 %v12772_v6, %s10598_s16 }
 0x647   : > { %v4441_v33 = vpop.permute.xlu1 %4440 }
 0x648   : > { %4533 = vst.msk [vmem:[#allocation3 + $0x18] sm:$0xff] %vm2235_vm9, %v4441_v33  ;;  %v4439_v36 = vpop.permute.xlu0 %4438 }
 0x649   : > { %4532 = vst.msk [vmem:[#allocation3 + $0x10] sm:$0xff] %vm2235_vm9, %v4439_v36  ;;  %4684 = vrot.lane.b32.xlu1 %v4591_v20, %s10598_s16  ;;  %v4783_v20 = vld [vmem:[#allocation2 + $0x1d5] sm:$0xff] }
 0x64a   : > { %4682 = vrot.lane.b32.xlu0 %v4590_v43, %s10598_s16  ;;  %v4782_v43 = vld [vmem:[#allocation2 + $0x1cd] sm:$0xff] }
 0x64b   : > { %v4445_v1 = vpop.permute.xlu1 %4444 }
 0x64c   : > { %4535 = vst.msk [vmem:[#allocation3 + $0x28] sm:$0xff] %vm2235_vm9, %v4445_v1  ;;  %v4443_v58 = vpop.permute.xlu0 %4442 }
 0x64d   : > { %4534 = vst.msk [vmem:[#allocation3 + $0x20] sm:$0xff] %vm2235_vm9, %v4443_v58  ;;  %4688 = vrot.lane.b32.xlu1 %v4593_v34, %s10598_s16  ;;  %v4784_v34 = vld [vmem:[#allocation2 + $0x1e5] sm:$0xff] }
 0x64e   : > { %4686 = vrot.lane.b32.xlu0 %v4592_v52, %s10598_s16  ;;  %s10078_s16 = sshll.u32 %s10690_s21, 10 }
 0x64f   : > { %v4449_v6 = vpop.permute.xlu1 %4448 }
 0x650   : > { %4537 = vst.msk [vmem:[#allocation3 + $0x38] sm:$0xff] %vm2235_vm9, %v4449_v6  ;;  %v4447_v12 = vpop.permute.xlu0 %4446 }
 0x651   : > { %4536 = vst.msk [vmem:[#allocation3 + $0x30] sm:$0xff] %vm2235_vm9, %v4447_v12  ;;  %4820 = vrot.lane.b32.xlu1 %v4755_v31, %s10599_s13 }
 0x652   : > { %4818 = vrot.lane.b32.xlu0 %v4754_v42, %s10599_s13 }
 0x653   : > { %v4453_v57 = vpop.permute.xlu1 %4452 }
 0x654   : > { %4539 = vst.msk [vmem:[#allocation3 + $0x48] sm:$0xff] %vm2235_vm9, %v4453_v57  ;;  %v4451_v27 = vpop.permute.xlu0 %4450 }
 0x655   : > { %4538 = vst.msk [vmem:[#allocation3 + $0x40] sm:$0xff] %vm2235_vm9, %v4451_v27  ;;  %4824 = vrot.lane.b32.xlu1 %v4757_v22, %s10599_s13 }
 0x656   : > { %4822 = vrot.lane.b32.xlu0 %v4756_v61, %s10599_s13 }
 0x657   : > { %v4457_v51 = vpop.permute.xlu1 %4456 }
 0x658   : > { %4541 = vst.msk [vmem:[#allocation3 + $0x58] sm:$0xff] %vm2235_vm9, %v4457_v51  ;;  %v4455_v15 = vpop.permute.xlu0 %4454 }
 0x659   : > { %4540 = vst.msk [vmem:[#allocation3 + $0x50] sm:$0xff] %vm2235_vm9, %v4455_v15  ;;  %4828 = vrot.lane.b32.xlu1 %v4759_v59, %s10599_s13 }
 0x65a   : > { %4826 = vrot.lane.b32.xlu0 %v4758_v30, %s10599_s13 }
 0x65b   : > { %v4461_v16 = vpop.permute.xlu1 %4460 }
 0x65c   : > { %4543 = vst.msk [vmem:[#allocation3 + $0x68] sm:$0xff] %vm2235_vm9, %v4461_v16  ;;  %v4459_v4 = vpop.permute.xlu0 %4458 }
 0x65d   : > { %4542 = vst.msk [vmem:[#allocation3 + $0x60] sm:$0xff] %vm2235_vm9, %v4459_v4  ;;  %4832 = vrot.lane.b32.xlu1 %v4761_v21, %s10599_s13 }
 0x65e   : > { %4830 = vrot.lane.b32.xlu0 %v4760_v63, %s10599_s13 }
 0x65f   : > { %v4465_v62 = vpop.permute.xlu1 %4464 }
 0x660   : > { %4545 = vst.msk [vmem:[#allocation3 + $0x78] sm:$0xff] %vm2235_vm9, %v4465_v62  ;;  %v4463_v9 = vpop.permute.xlu0 %4462 }
 0x661   : > { %4544 = vst.msk [vmem:[#allocation3 + $0x70] sm:$0xff] %vm2235_vm9, %v4463_v9  ;;  %4836 = vrot.lane.b32.xlu1 %v4763_v60, %s10599_s13 }
 0x662   : > { %4834 = vrot.lane.b32.xlu0 %v4762_v32, %s10599_s13 }
 0x663   : > { %v4469_v24 = vpop.permute.xlu1 %4468 }
 0x664   : > { %4547 = vst.msk [vmem:[#allocation3 + $0x88] sm:$0xff] %vm2235_vm9, %v4469_v24  ;;  %v4467_v56 = vpop.permute.xlu0 %4466 }
 0x665   : > { %4546 = vst.msk [vmem:[#allocation3 + $0x80] sm:$0xff] %vm2235_vm9, %v4467_v56  ;;  %4840 = vrot.lane.b32.xlu1 %v4765_v23, %s10599_s13 }
 0x666   : > { %4838 = vrot.lane.b32.xlu0 %v4764_v49, %s10599_s13 }
 0x667   : > { %v4473_v48 = vpop.permute.xlu1 %4472 }
 0x668   : > { %4549 = vst.msk [vmem:[#allocation3 + $0x98] sm:$0xff] %vm2235_vm9, %v4473_v48  ;;  %v4471_v10 = vpop.permute.xlu0 %4470 }
 0x669   : > { %4548 = vst.msk [vmem:[#allocation3 + $0x90] sm:$0xff] %vm2235_vm9, %v4471_v10  ;;  %4844 = vrot.lane.b32.xlu1 %v4767_v45, %s10599_s13 }
 0x66a   : > { %4842 = vrot.lane.b32.xlu0 %v4766_v46, %s10599_s13 }
 0x66b   : > { %v4477_v8 = vpop.permute.xlu1 %4476 }
 0x66c   : > { %4551 = vst.msk [vmem:[#allocation3 + $0xa8] sm:$0xff] %vm2235_vm9, %v4477_v8  ;;  %v4475_v39 = vpop.permute.xlu0 %4474 }
 0x66d   : > { %4550 = vst.msk [vmem:[#allocation3 + $0xa0] sm:$0xff] %vm2235_vm9, %v4475_v39  ;;  %4848 = vrot.lane.b32.xlu1 %v4769_v3, %s10599_s13 }
 0x66e   : > { %4846 = vrot.lane.b32.xlu0 %v4768_v47, %s10599_s13 }
 0x66f   : > { %v4481_v26 = vpop.permute.xlu1 %4480 }
 0x670   : > { %4553 = vst.msk [vmem:[#allocation3 + $0xb8] sm:$0xff] %vm2235_vm9, %v4481_v26  ;;  %v4479_v44 = vpop.permute.xlu0 %4478 }
 0x671   : > { %4552 = vst.msk [vmem:[#allocation3 + $0xb0] sm:$0xff] %vm2235_vm9, %v4479_v44  ;;  %4852 = vrot.lane.b32.xlu1 %v4771_v55, %s10599_s13 }
 0x672   : > { %4850 = vrot.lane.b32.xlu0 %v4770_v7, %s10599_s13 }
 0x673   : > { %v4485_v38 = vpop.permute.xlu1 %4484 }
 0x674   : > { %4555 = vst.msk [vmem:[#allocation3 + $0xc8] sm:$0xff] %vm2235_vm9, %v4485_v38  ;;  %v4483_v19 = vpop.permute.xlu0 %4482 }
 0x675   : > { %4554 = vst.msk [vmem:[#allocation3 + $0xc0] sm:$0xff] %vm2235_vm9, %v4483_v19  ;;  %4856 = vrot.lane.b32.xlu1 %v4773_v41, %s10599_s13 }
 0x676   : > { %4854 = vrot.lane.b32.xlu0 %v4772_v37, %s10599_s13 }
 0x677   : > { %v4489_v40 = vpop.permute.xlu1 %4488 }
 0x678   : > { %4557 = vst.msk [vmem:[#allocation3 + $0xd8] sm:$0xff] %vm2235_vm9, %v4489_v40  ;;  %v4487_v54 = vpop.permute.xlu0 %4486 }
 0x679   : > { %4556 = vst.msk [vmem:[#allocation3 + $0xd0] sm:$0xff] %vm2235_vm9, %v4487_v54  ;;  %4860 = vrot.lane.b32.xlu1 %v4775_v2, %s10599_s13 }
 0x67a   : > { %4858 = vrot.lane.b32.xlu0 %v4774_v28, %s10599_s13 }
 0x67b   : > { %v4493_v13 = vpop.permute.xlu1 %4492 }
 0x67c   : > { %4559 = vst.msk [vmem:[#allocation3 + $0xe8] sm:$0xff] %vm2235_vm9, %v4493_v13  ;;  %v4491_v17 = vpop.permute.xlu0 %4490 }
 0x67d   : > { %4558 = vst.msk [vmem:[#allocation3 + $0xe0] sm:$0xff] %vm2235_vm9, %v4491_v17  ;;  %4864 = vrot.lane.b32.xlu1 %v4777_v14, %s10599_s13 }
 0x67e   : > { %4862 = vrot.lane.b32.xlu0 %v4776_v18, %s10599_s13 }
 0x67f   : > { %v4497_v0 = vpop.permute.xlu1 %4496 }
 0x680   : > { %4561 = vst.msk [vmem:[#allocation3 + $0xf8] sm:$0xff] %vm2235_vm9, %v4497_v0  ;;  %v4495_v35 = vpop.permute.xlu0 %4494 }
 0x681   : > { %4560 = vst.msk [vmem:[#allocation3 + $0xf0] sm:$0xff] %vm2235_vm9, %v4495_v35  ;;  %4868 = vrot.lane.b32.xlu1 %v12861_v50, %s10599_s13  ;;  %vm8618_vm9 = vcmask 91136  }
 0x682   : > { %4866 = vrot.lane.b32.xlu0 %v12866_v53, %s10599_s13  ;;  %v4785_v53 = vld [vmem:[#allocation2 + $0x1ed] sm:$0xff] }
 0x683   : > { %v4629_v29 = vpop.permute.xlu1 %4628 }
 0x684   : > { %4723 = vst.msk [vmem:[#allocation3 + $0x8] sm:$0xff] %vm2428_vm10, %v4629_v29  ;;  %v4627_v5 = vpop.permute.xlu0 %4626 }
 0x685   : > { %4722 = vst.msk [vmem:[#allocation3] sm:$0xff] %vm2428_vm10, %v4627_v5  ;;  %4872 = vrot.lane.b32.xlu1 %v12871_v25, %s10599_s13 }
 0x686   : > { %4870 = vrot.lane.b32.xlu0 %v12876_v11, %s10599_s13 }
 0x687   : > { %v4633_v33 = vpop.permute.xlu1 %4632 }
 0x688   : > { %4725 = vst.msk [vmem:[#allocation3 + $0x18] sm:$0xff] %vm2428_vm10, %v4633_v33  ;;  %v4631_v50 = vpop.permute.xlu0 %4630 }
 0x689   : > { %4724 = vst.msk [vmem:[#allocation3 + $0x10] sm:$0xff] %vm2428_vm10, %v4631_v50  ;;  %4876 = vrot.lane.b32.xlu1 %v4783_v20, %s10599_s13 }
 0x68a   : > { %4874 = vrot.lane.b32.xlu0 %v4782_v43, %s10599_s13 }
 0x68b   : > { %v4637_v36 = vpop.permute.xlu1 %4636 }
 0x68c   : > { %4727 = vst.msk [vmem:[#allocation3 + $0x28] sm:$0xff] %vm2428_vm10, %v4637_v36  ;;  %v4635_v25 = vpop.permute.xlu0 %4634 }
 0x68d   : > { %4726 = vst.msk [vmem:[#allocation3 + $0x20] sm:$0xff] %vm2428_vm10, %v4635_v25  ;;  %4880 = vrot.lane.b32.xlu1 %v4785_v53, %s10599_s13 }
 0x68e   : > { %4878 = vrot.lane.b32.xlu0 %v4784_v34, %s10599_s13 }
 0x68f   : > { %v4641_v11 = vpop.permute.xlu1 %4640 }
 0x690   : > { %4729 = vst.msk [vmem:[#allocation3 + $0x38] sm:$0xff] %vm2428_vm10, %v4641_v11  ;;  %v4639_v1 = vpop.permute.xlu0 %4638 }
 0x691   : > { %4728 = vst.msk [vmem:[#allocation3 + $0x30] sm:$0xff] %vm2428_vm10, %v4639_v1 }
 0x693   : > { %v4645_v52 = vpop.permute.xlu1 %4644 }
 0x694   : > { %4731 = vst.msk [vmem:[#allocation3 + $0x48] sm:$0xff] %vm2428_vm10, %v4645_v52  ;;  %v4643_v58 = vpop.permute.xlu0 %4642 }
 0x695   : > { %4730 = vst.msk [vmem:[#allocation3 + $0x40] sm:$0xff] %vm2428_vm10, %v4643_v58 }
 0x697   : > { %v4649_v6 = vpop.permute.xlu1 %4648 }
 0x698   : > { %4733 = vst.msk [vmem:[#allocation3 + $0x58] sm:$0xff] %vm2428_vm10, %v4649_v6  ;;  %v4647_v12 = vpop.permute.xlu0 %4646 }
 0x699   : > { %4732 = vst.msk [vmem:[#allocation3 + $0x50] sm:$0xff] %vm2428_vm10, %v4647_v12 }
 0x69b   : > { %v4653_v31 = vpop.permute.xlu1 %4652 }
 0x69c   : > { %4735 = vst.msk [vmem:[#allocation3 + $0x68] sm:$0xff] %vm2428_vm10, %v4653_v31  ;;  %v4651_v42 = vpop.permute.xlu0 %4650 }
 0x69d   : > { %4734 = vst.msk [vmem:[#allocation3 + $0x60] sm:$0xff] %vm2428_vm10, %v4651_v42 }
 0x69f   : > { %v4657_v57 = vpop.permute.xlu1 %4656 }
 0x6a0   : > { %4737 = vst.msk [vmem:[#allocation3 + $0x78] sm:$0xff] %vm2428_vm10, %v4657_v57  ;;  %v4655_v27 = vpop.permute.xlu0 %4654 }
 0x6a1   : > { %4736 = vst.msk [vmem:[#allocation3 + $0x70] sm:$0xff] %vm2428_vm10, %v4655_v27 }
 0x6a3   : > { %v4661_v22 = vpop.permute.xlu1 %4660 }
 0x6a4   : > { %4739 = vst.msk [vmem:[#allocation3 + $0x88] sm:$0xff] %vm2428_vm10, %v4661_v22  ;;  %v4659_v61 = vpop.permute.xlu0 %4658 }
 0x6a5   : > { %4738 = vst.msk [vmem:[#allocation3 + $0x80] sm:$0xff] %vm2428_vm10, %v4659_v61 }
 0x6a7   : > { %v4665_v51 = vpop.permute.xlu1 %4664 }
 0x6a8   : > { %4741 = vst.msk [vmem:[#allocation3 + $0x98] sm:$0xff] %vm2428_vm10, %v4665_v51  ;;  %v4663_v15 = vpop.permute.xlu0 %4662 }
 0x6a9   : > { %4740 = vst.msk [vmem:[#allocation3 + $0x90] sm:$0xff] %vm2428_vm10, %v4663_v15 }
 0x6ab   : > { %v4669_v59 = vpop.permute.xlu1 %4668 }
 0x6ac   : > { %4743 = vst.msk [vmem:[#allocation3 + $0xa8] sm:$0xff] %vm2428_vm10, %v4669_v59  ;;  %v4667_v30 = vpop.permute.xlu0 %4666 }
 0x6ad   : > { %4742 = vst.msk [vmem:[#allocation3 + $0xa0] sm:$0xff] %vm2428_vm10, %v4667_v30 }
 0x6af   : > { %v4673_v16 = vpop.permute.xlu1 %4672 }
 0x6b0   : > { %4745 = vst.msk [vmem:[#allocation3 + $0xb8] sm:$0xff] %vm2428_vm10, %v4673_v16  ;;  %v4671_v4 = vpop.permute.xlu0 %4670 }
 0x6b1   : > { %4744 = vst.msk [vmem:[#allocation3 + $0xb0] sm:$0xff] %vm2428_vm10, %v4671_v4 }
 0x6b3   : > { %v4677_v21 = vpop.permute.xlu1 %4676 }
 0x6b4   : > { %4747 = vst.msk [vmem:[#allocation3 + $0xc8] sm:$0xff] %vm2428_vm10, %v4677_v21  ;;  %v4675_v63 = vpop.permute.xlu0 %4674 }
 0x6b5   : > { %4746 = vst.msk [vmem:[#allocation3 + $0xc0] sm:$0xff] %vm2428_vm10, %v4675_v63 }
 0x6b7   : > { %v4681_v62 = vpop.permute.xlu1 %4680 }
 0x6b8   : > { %4749 = vst.msk [vmem:[#allocation3 + $0xd8] sm:$0xff] %vm2428_vm10, %v4681_v62  ;;  %v4679_v9 = vpop.permute.xlu0 %4678 }
 0x6b9   : > { %4748 = vst.msk [vmem:[#allocation3 + $0xd0] sm:$0xff] %vm2428_vm10, %v4679_v9 }
 0x6bb   : > { %v4685_v60 = vpop.permute.xlu1 %4684 }
 0x6bc   : > { %4751 = vst.msk [vmem:[#allocation3 + $0xe8] sm:$0xff] %vm2428_vm10, %v4685_v60  ;;  %v4683_v32 = vpop.permute.xlu0 %4682 }
 0x6bd   : > { %4750 = vst.msk [vmem:[#allocation3 + $0xe0] sm:$0xff] %vm2428_vm10, %v4683_v32 }
 0x6bf   : > { %v4689_v24 = vpop.permute.xlu1 %4688 }
 0x6c0   : > { %4753 = vst.msk [vmem:[#allocation3 + $0xf8] sm:$0xff] %vm2428_vm10, %v4689_v24  ;;  %v4687_v56 = vpop.permute.xlu0 %4686 }
 0x6c1   : > { %4752 = vst.msk [vmem:[#allocation3 + $0xf0] sm:$0xff] %vm2428_vm10, %v4687_v56  ;;  %vm9515_vm10 = vcmask 97280  }
 0x6c3   : > { %v4821_v23 = vpop.permute.xlu1 %4820 }
 0x6c4   : > { %4915 = vst.msk [vmem:[#allocation3 + $0x8] sm:$0xff] %vm2621_vm11, %v4821_v23  ;;  %v4819_v49 = vpop.permute.xlu0 %4818  ;;  %v13218_v23 = vld [vmem:[%s15681_s6] ss:$0 sm:$0xff] }
 0x6c5   : > { %4914 = vst.msk [vmem:[#allocation3] sm:$0xff] %vm2621_vm11, %v4819_v49 }
 0x6c7   : > { %v4825_v48 = vpop.permute.xlu1 %4824 }
 0x6c8   : > { %4917 = vst.msk [vmem:[#allocation3 + $0x18] sm:$0xff] %vm2621_vm11, %v4825_v48  ;;  %v4823_v10 = vpop.permute.xlu0 %4822 }
 0x6c9   : > { %4916 = vst.msk [vmem:[#allocation3 + $0x10] sm:$0xff] %vm2621_vm11, %v4823_v10 }
 0x6cb   : > { %v4829_v45 = vpop.permute.xlu1 %4828  ;;  %v4947_v39 = vld [vmem:[#allocation3 + $0x8] sm:$0xff] }
 0x6cc   : > { %4919 = vst.msk [vmem:[#allocation3 + $0x28] sm:$0xff] %vm2621_vm11, %v4829_v45  ;;  %v4827_v46 = vpop.permute.xlu0 %4826  ;;  %v4946_v8 = vld [vmem:[#allocation3] sm:$0xff] }
 0x6cd   : > { %4918 = vst.msk [vmem:[#allocation3 + $0x20] sm:$0xff] %vm2621_vm11, %v4827_v46  ;;  %10339 = vmatprep.mubr.msk.f32.mxu0 %vm2698_vm12, %v4946_v8 }
 0x6ce   : > { %10340 = vmatmul.mubr.msk.f32.vlgmr.msra.gmra.mrb[32].mxu0 %vm2698_vm12, %v4947_v39 }
 0x6cf   : > { %v4833_v3 = vpop.permute.xlu1 %4832  ;;  %v4949_v44 = vld [vmem:[#allocation3 + $0x18] sm:$0xff] }
 0x6d0   : > { %4921 = vst.msk [vmem:[#allocation3 + $0x38] sm:$0xff] %vm2621_vm11, %v4833_v3  ;;  %v4831_v47 = vpop.permute.xlu0 %4830  ;;  %v4948_v26 = vld [vmem:[#allocation3 + $0x10] sm:$0xff] }
 0x6d1   : > { %4920 = vst.msk [vmem:[#allocation3 + $0x30] sm:$0xff] %vm2621_vm11, %v4831_v47  ;;  %10342 = vmatprep.mubr.msk.f32.mxu0 %vm2698_vm12, %v4948_v26 }
 0x6d2   : > { %10343 = vmatmul.mubr.msk.f32.gmra.mrb[34].mxu0 %vm2698_vm12, %v4949_v44 }
 0x6d3   : > { %v4837_v55 = vpop.permute.xlu1 %4836  ;;  %v4951_v19 = vld [vmem:[#allocation3 + $0x28] sm:$0xff] }
 0x6d4   : > { %4923 = vst.msk [vmem:[#allocation3 + $0x48] sm:$0xff] %vm2621_vm11, %v4837_v55  ;;  %v4835_v7 = vpop.permute.xlu0 %4834  ;;  %v4950_v38 = vld [vmem:[#allocation3 + $0x20] sm:$0xff] }
 0x6d5   : > { %4922 = vst.msk [vmem:[#allocation3 + $0x40] sm:$0xff] %vm2621_vm11, %v4835_v7  ;;  %10345 = vmatprep.mubr.msk.f32.mxu0 %vm2698_vm12, %v4950_v38 }
 0x6d6   : > { %10346 = vmatmul.mubr.msk.f32.gmra.mrb[36].mxu0 %vm2698_vm12, %v4951_v19 }
 0x6d7   : > { %v4841_v41 = vpop.permute.xlu1 %4840  ;;  %v4953_v54 = vld [vmem:[#allocation3 + $0x38] sm:$0xff] }
 0x6d8   : > { %4925 = vst.msk [vmem:[#allocation3 + $0x58] sm:$0xff] %vm2621_vm11, %v4841_v41  ;;  %v4839_v37 = vpop.permute.xlu0 %4838  ;;  %v4952_v40 = vld [vmem:[#allocation3 + $0x30] sm:$0xff] }
 0x6d9   : > { %4924 = vst.msk [vmem:[#allocation3 + $0x50] sm:$0xff] %vm2621_vm11, %v4839_v37  ;;  %10348 = vmatprep.mubr.msk.f32.mxu0 %vm2698_vm12, %v4952_v40 }
 0x6da   : > { %10349 = vmatmul.mubr.msk.f32.gmra.mrb[38].mxu0 %vm2698_vm12, %v4953_v54 }
 0x6db   : > { %v4845_v2 = vpop.permute.xlu1 %4844  ;;  %v4955_v17 = vld [vmem:[#allocation3 + $0x48] sm:$0xff] }
 0x6dc   : > { %4927 = vst.msk [vmem:[#allocation3 + $0x68] sm:$0xff] %vm2621_vm11, %v4845_v2  ;;  %v4843_v28 = vpop.permute.xlu0 %4842  ;;  %v4954_v13 = vld [vmem:[#allocation3 + $0x40] sm:$0xff] }
 0x6dd   : > { %4926 = vst.msk [vmem:[#allocation3 + $0x60] sm:$0xff] %vm2621_vm11, %v4843_v28  ;;  %10351 = vmatprep.mubr.msk.f32.mxu0 %vm2698_vm12, %v4954_v13 }
 0x6de   : > { %10352 = vmatmul.mubr.msk.f32.gmra.mrb[40].mxu0 %vm2698_vm12, %v4955_v17 }
 0x6df   : > { %v4849_v14 = vpop.permute.xlu1 %4848  ;;  %v4957_v35 = vld [vmem:[#allocation3 + $0x58] sm:$0xff] }
 0x6e0   : > { %4929 = vst.msk [vmem:[#allocation3 + $0x78] sm:$0xff] %vm2621_vm11, %v4849_v14  ;;  %v4847_v18 = vpop.permute.xlu0 %4846  ;;  %v4956_v0 = vld [vmem:[#allocation3 + $0x50] sm:$0xff] }
 0x6e1   : > { %4928 = vst.msk [vmem:[#allocation3 + $0x70] sm:$0xff] %vm2621_vm11, %v4847_v18  ;;  %10354 = vmatprep.mubr.msk.f32.mxu0 %vm2698_vm12, %v4956_v0 }
 0x6e2   : > { %10355 = vmatmul.mubr.msk.f32.gmra.mrb[42].mxu0 %vm2698_vm12, %v4957_v35 }
 0x6e3   : > { %v4853_v29 = vpop.permute.xlu1 %4852  ;;  %v4959_v33 = vld [vmem:[#allocation3 + $0x68] sm:$0xff] }
 0x6e4   : > { %4931 = vst.msk [vmem:[#allocation3 + $0x88] sm:$0xff] %vm2621_vm11, %v4853_v29  ;;  %v4851_v5 = vpop.permute.xlu0 %4850  ;;  %v4958_v20 = vld [vmem:[#allocation3 + $0x60] sm:$0xff] }
 0x6e5   : > { %4930 = vst.msk [vmem:[#allocation3 + $0x80] sm:$0xff] %vm2621_vm11, %v4851_v5  ;;  %10357 = vmatprep.mubr.msk.f32.mxu0 %vm2698_vm12, %v4958_v20 }
 0x6e6   : > { %10358 = vmatmul.mubr.msk.f32.gmra.mrb[44].mxu0 %vm2698_vm12, %v4959_v33 }
 0x6e7   : > { %v4857_v43 = vpop.permute.xlu1 %4856  ;;  %v4961_v36 = vld [vmem:[#allocation3 + $0x78] sm:$0xff] }
 0x6e8   : > { %4933 = vst.msk [vmem:[#allocation3 + $0x98] sm:$0xff] %vm2621_vm11, %v4857_v43  ;;  %v4855_v50 = vpop.permute.xlu0 %4854  ;;  %v4960_v53 = vld [vmem:[#allocation3 + $0x70] sm:$0xff] }
 0x6e9   : > { %4932 = vst.msk [vmem:[#allocation3 + $0x90] sm:$0xff] %vm2621_vm11, %v4855_v50  ;;  %10360 = vmatprep.mubr.msk.f32.mxu0 %vm2698_vm12, %v4960_v53 }
 0x6ea   : > { %10361 = vmatmul.mubr.msk.f32.gmra.mrb[46].mxu0 %vm2698_vm12, %v4961_v36 }
 0x6eb   : > { %v4861_v34 = vpop.permute.xlu1 %4860  ;;  %v4963_v1 = vld [vmem:[#allocation3 + $0x88] sm:$0xff] }
 0x6ec   : > { %4935 = vst.msk [vmem:[#allocation3 + $0xa8] sm:$0xff] %vm2621_vm11, %v4861_v34  ;;  %v4859_v25 = vpop.permute.xlu0 %4858  ;;  %v4962_v11 = vld [vmem:[#allocation3 + $0x80] sm:$0xff] }
 0x6ed   : > { %4934 = vst.msk [vmem:[#allocation3 + $0xa0] sm:$0xff] %vm2621_vm11, %v4859_v25  ;;  %10363 = vmatprep.mubr.msk.f32.mxu0 %vm2698_vm12, %v4962_v11 }
 0x6ee   : > { %10364 = vmatmul.mubr.msk.f32.gmra.mrb[48].mxu0 %vm2698_vm12, %v4963_v1 }
 0x6ef   : > { %v4865_v52 = vpop.permute.xlu1 %4864  ;;  %v4965_v12 = vld [vmem:[#allocation3 + $0x98] sm:$0xff] }
 0x6f0   : > { %4937 = vst.msk [vmem:[#allocation3 + $0xb8] sm:$0xff] %vm2621_vm11, %v4865_v52  ;;  %v4863_v58 = vpop.permute.xlu0 %4862  ;;  %v4964_v6 = vld [vmem:[#allocation3 + $0x90] sm:$0xff] }
 0x6f1   : > { %4936 = vst.msk [vmem:[#allocation3 + $0xb0] sm:$0xff] %vm2621_vm11, %v4863_v58  ;;  %10366 = vmatprep.mubr.msk.f32.mxu0 %vm2698_vm12, %v4964_v6 }
 0x6f2   : > { %10367 = vmatmul.mubr.msk.f32.gmra.mrb[50].mxu0 %vm2698_vm12, %v4965_v12 }
 0x6f3   : > { %v4869_v31 = vpop.permute.xlu1 %4868  ;;  %v4967_v27 = vld [vmem:[#allocation3 + $0xa8] sm:$0xff] }
 0x6f4   : > { %4939 = vst.msk [vmem:[#allocation3 + $0xc8] sm:$0xff] %vm2621_vm11, %v4869_v31  ;;  %v4867_v42 = vpop.permute.xlu0 %4866  ;;  %v4966_v57 = vld [vmem:[#allocation3 + $0xa0] sm:$0xff] }
 0x6f5   : > { %4938 = vst.msk [vmem:[#allocation3 + $0xc0] sm:$0xff] %vm2621_vm11, %v4867_v42  ;;  %10369 = vmatprep.mubr.msk.f32.mxu0 %vm2698_vm12, %v4966_v57 }
 0x6f6   : > { %10370 = vmatmul.mubr.msk.f32.gmra.mrb[52].mxu0 %vm2698_vm12, %v4967_v27 }
 0x6f7   : > { %v4873_v22 = vpop.permute.xlu1 %4872  ;;  %v4969_v15 = vld [vmem:[#allocation3 + $0xb8] sm:$0xff] }
 0x6f8   : > { %4941 = vst.msk [vmem:[#allocation3 + $0xd8] sm:$0xff] %vm2621_vm11, %v4873_v22  ;;  %v4871_v61 = vpop.permute.xlu0 %4870  ;;  %v4968_v51 = vld [vmem:[#allocation3 + $0xb0] sm:$0xff] }
 0x6f9   : > { %4940 = vst.msk [vmem:[#allocation3 + $0xd0] sm:$0xff] %vm2621_vm11, %v4871_v61  ;;  %10372 = vmatprep.mubr.msk.f32.mxu0 %vm2698_vm12, %v4968_v51 }
 0x6fa   : > { %10373 = vmatmul.mubr.msk.f32.gmra.mrb[54].mxu0 %vm2698_vm12, %v4969_v15 }
 0x6fb   : > { %v4877_v59 = vpop.permute.xlu1 %4876  ;;  %v4971_v4 = vld [vmem:[#allocation3 + $0xc8] sm:$0xff] }
 0x6fc   : > { %v4875_v30 = vpop.permute.xlu0 %4874  ;;  %4943 = vst.msk [vmem:[#allocation3 + $0xe8] sm:$0xff] %vm2621_vm11, %v4877_v59  ;;  %v4970_v16 = vld [vmem:[#allocation3 + $0xc0] sm:$0xff] }
 0x6fd   : > { %4942 = vst.msk [vmem:[#allocation3 + $0xe0] sm:$0xff] %vm2621_vm11, %v4875_v30  ;;  %10375 = vmatprep.mubr.msk.f32.mxu0 %vm2698_vm12, %v4970_v16 }
 0x6fe   : > { %10376 = vmatmul.mubr.msk.f32.gmra.mrb[56].mxu0 %vm2698_vm12, %v4971_v4 }
 0x6ff   : > { %v4881_v21 = vpop.permute.xlu1 %4880  ;;  %v4973_v9 = vld [vmem:[#allocation3 + $0xd8] sm:$0xff] }
 0x700   : > { %v4879_v63 = vpop.permute.xlu0 %4878  ;;  %4945 = vst.msk [vmem:[#allocation3 + $0xf8] sm:$0xff] %vm2621_vm11, %v4881_v21  ;;  %v4972_v62 = vld [vmem:[#allocation3 + $0xd0] sm:$0xff] }
 0x701   : > { %4944 = vst.msk [vmem:[#allocation3 + $0xf0] sm:$0xff] %vm2621_vm11, %v4879_v63  ;;  %10378 = vmatprep.mubr.msk.f32.mxu0 %vm2698_vm12, %v4972_v62  ;;  %vm9772_vm11 = vcmask 1041409  }
 0x702   : > { %10379 = vmatmul.mubr.msk.f32.gmra.mrb[58].mxu0 %vm2698_vm12, %v4973_v9 }
 0x703   : > { %v4975_v60 = vld [vmem:[#allocation3 + $0xe8] sm:$0xff] }
 0x704   : > { %v4974_v32 = vld [vmem:[#allocation3 + $0xe0] sm:$0xff] }
 0x705   : > { %10381 = vmatprep.mubr.msk.f32.mxu0 %vm2698_vm12, %v4974_v32 }
 0x706   : > { %10382 = vmatmul.mubr.msk.f32.gmra.mrb[60].mxu0 %vm2698_vm12, %v4975_v60 }
 0x707   : > { %v4977_v24 = vld [vmem:[#allocation3 + $0xf8] sm:$0xff] }
 0x708   : > { %v4976_v56 = vld [vmem:[#allocation3 + $0xf0] sm:$0xff] }
 0x709   : > { %10384 = vmatprep.mubr.msk.f32.mxu0 %vm2698_vm12, %v4976_v56 }
 0x70a   : > { %10385 = vmatmul.mubr.msk.f32.gmra.mrb[62].mxu0 %vm2698_vm12, %v4977_v24  ;;  %vm9774_vm12 = vcmask 1042434  }
 0x7a1   : > { %v10341_v49 = vpop.f32.mrb[32].mxu0 }
 0x7a2   : > { %v5161_v48 = vadd.f32 %v10341_v49, %v13218_v23  ;;  %v5155_v10 = vpop.f32.mrb[33].mxu0 }
 0x7a3   : > { %v5156_v45 = vadd.f32 %v13218_v23, %v5155_v10 }
 0x7a4   : > { %v5315_v46 = vmax.f32 %v5161_v48, 0.0 }
 0x7a5   : > { %v5314_v8 = vmax.f32 %v5156_v45, 0.0  ;;  %v10344_v39 = vpop.f32.mrb[34].mxu0 }
 0x7a6   : > { %v5171_v3 = vadd.f32 %v10344_v39, %v13218_v23  ;;  %5380 = vrot.lane.b32.xlu1 %v5315_v46, %s10602_s14  ;;  %v5165_v47 = vpop.f32.mrb[35].mxu0 }
 0x7a7   : > { %v5166_v26 = vadd.f32 %v13218_v23, %v5165_v47  ;;  %5378 = vrot.lane.b32.xlu0 %v5314_v8, %s10602_s14 }
 0x7a8   : > { %v5317_v44 = vmax.f32 %v5171_v3, 0.0 }
 0x7a9   : > { %v5316_v55 = vmax.f32 %v5166_v26, 0.0  ;;  %v10347_v7 = vpop.f32.mrb[36].mxu0 }
 0x7aa   : > { %v5181_v38 = vadd.f32 %v10347_v7, %v13218_v23  ;;  %5384 = vrot.lane.b32.xlu1 %v5317_v44, %s10602_s14  ;;  %v5175_v19 = vpop.f32.mrb[37].mxu0 }
 0x7ab   : > { %v5176_v41 = vadd.f32 %v13218_v23, %v5175_v19  ;;  %5382 = vrot.lane.b32.xlu0 %v5316_v55, %s10602_s14 }
 0x7ac   : > { %v5319_v37 = vmax.f32 %v5181_v38, 0.0 }
 0x7ad   : > { %v5318_v40 = vmax.f32 %v5176_v41, 0.0  ;;  %v10350_v54 = vpop.f32.mrb[38].mxu0 }
 0x7ae   : > { %v5191_v2 = vadd.f32 %v10350_v54, %v13218_v23  ;;  %5388 = vrot.lane.b32.xlu1 %v5319_v37, %s10602_s14  ;;  %v5185_v28 = vpop.f32.mrb[39].mxu0 }
 0x7af   : > { %v5186_v13 = vadd.f32 %v13218_v23, %v5185_v28  ;;  %5386 = vrot.lane.b32.xlu0 %v5318_v40, %s10602_s14 }
 0x7b0   : > { %v5321_v17 = vmax.f32 %v5191_v2, 0.0 }
 0x7b1   : > { %v5320_v14 = vmax.f32 %v5186_v13, 0.0  ;;  %v10353_v18 = vpop.f32.mrb[40].mxu0 }
 0x7b2   : > { %v5201_v0 = vadd.f32 %v10353_v18, %v13218_v23  ;;  %5392 = vrot.lane.b32.xlu1 %v5321_v17, %s10602_s14  ;;  %v5195_v35 = vpop.f32.mrb[41].mxu0 }
 0x7b3   : > { %v5196_v29 = vadd.f32 %v13218_v23, %v5195_v35  ;;  %5390 = vrot.lane.b32.xlu0 %v5320_v14, %s10602_s14 }
 0x7b4   : > { %v5323_v5 = vmax.f32 %v5201_v0, 0.0 }
 0x7b5   : > { %v5322_v20 = vmax.f32 %v5196_v29, 0.0  ;;  %v10356_v33 = vpop.f32.mrb[42].mxu0 }
 0x7b6   : > { %v5211_v43 = vadd.f32 %v10356_v33, %v13218_v23  ;;  %5396 = vrot.lane.b32.xlu1 %v5323_v5, %s10602_s14  ;;  %v5205_v50 = vpop.f32.mrb[43].mxu0 }
 0x7b7   : > { %v5206_v53 = vadd.f32 %v13218_v23, %v5205_v50  ;;  %5394 = vrot.lane.b32.xlu0 %v5322_v20, %s10602_s14 }
 0x7b8   : > { %v5325_v36 = vmax.f32 %v5211_v43, 0.0 }
 0x7b9   : > { %v5324_v34 = vmax.f32 %v5206_v53, 0.0  ;;  %v10359_v25 = vpop.f32.mrb[44].mxu0  ;;  %v15871_v53 = vld [vmem:[#allocation8_spill] sm:$0xff] }
 0x7ba   : > { %v5221_v11 = vadd.f32 %v10359_v25, %v13218_v23  ;;  %5400 = vrot.lane.b32.xlu1 %v5325_v36, %s10602_s14  ;;  %v5215_v1 = vpop.f32.mrb[45].mxu0  ;;  %v15872_v36 = vld [vmem:[#allocation9_spill] sm:$0xff]  ;;  %v15875_v25 = vld [vmem:[#allocation12_spill] sm:$0xff] }
 0x7bb   : > { %v5216_v52 = vadd.f32 %v13218_v23, %v5215_v1  ;;  %5398 = vrot.lane.b32.xlu0 %v5324_v34, %s10602_s14  ;;  %v15873_v34 = vld [vmem:[#allocation10_spill] sm:$0xff] }
 0x7bc   : > { %v5327_v58 = vmax.f32 %v5221_v11, 0.0  ;;  %v15876_v11 = vld [vmem:[#allocation13_spill] sm:$0xff]  ;;  %v15877_v1 = vld [vmem:[#allocation14_spill] sm:$0xff] }
 0x7bd   : > { %v5326_v6 = vmax.f32 %v5216_v52, 0.0  ;;  %v10362_v12 = vpop.f32.mrb[46].mxu0  ;;  %v15878_v52 = vld [vmem:[#allocation15_spill] sm:$0xff] }
 0x7be   : > { %v5231_v31 = vadd.f32 %v10362_v12, %v13218_v23  ;;  %5404 = vrot.lane.b32.xlu1 %v5327_v58, %s10602_s14  ;;  %v5225_v42 = vpop.f32.mrb[47].mxu0  ;;  %v15879_v58 = vld [vmem:[#allocation16_spill] sm:$0xff]  ;;  %v15881_v12 = vld [vmem:[#allocation18_spill] sm:$0xff] }
 0x7bf   : > { %v5226_v57 = vadd.f32 %v13218_v23, %v5225_v42  ;;  %5402 = vrot.lane.b32.xlu0 %v5326_v6, %s10602_s14  ;;  %v15880_v6 = vld [vmem:[#allocation17_spill] sm:$0xff]  ;;  %v15883_v42 = vld [vmem:[#allocation20_spill] sm:$0xff] }
 0x7c0   : > { %v5329_v27 = vmax.f32 %v5231_v31, 0.0  ;;  %v15882_v31 = vld [vmem:[#allocation19_spill] sm:$0xff] }
 0x7c1   : > { %v5328_v22 = vmax.f32 %v5226_v57, 0.0  ;;  %v10365_v61 = vpop.f32.mrb[48].mxu0  ;;  %v15884_v57 = vld [vmem:[#allocation21_spill] sm:$0xff] }
 0x7c2   : > { %v5241_v51 = vadd.f32 %v10365_v61, %v13218_v23  ;;  %5408 = vrot.lane.b32.xlu1 %v5329_v27, %s10602_s14  ;;  %v5235_v15 = vpop.f32.mrb[49].mxu0  ;;  %v15885_v27 = vld [vmem:[#allocation22_spill] sm:$0xff]  ;;  %v15887_v61 = vld [vmem:[#allocation24_spill] sm:$0xff] }
 0x7c3   : > { %v5236_v59 = vadd.f32 %v13218_v23, %v5235_v15  ;;  %5406 = vrot.lane.b32.xlu0 %v5328_v22, %s10602_s14  ;;  %v15886_v22 = vld [vmem:[#allocation23_spill] sm:$0xff]  ;;  %v15889_v15 = vld [vmem:[#allocation26_spill] sm:$0xff] }
 0x7c4   : > { %v5331_v30 = vmax.f32 %v5241_v51, 0.0  ;;  %v15888_v51 = vld [vmem:[#allocation25_spill] sm:$0xff] }
 0x7c5   : > { %v5330_v16 = vmax.f32 %v5236_v59, 0.0  ;;  %v10368_v4 = vpop.f32.mrb[50].mxu0  ;;  %v15890_v59 = vld [vmem:[#allocation27_spill] sm:$0xff] }
 0x7c6   : > { %v5251_v21 = vadd.f32 %v10368_v4, %v13218_v23  ;;  %5412 = vrot.lane.b32.xlu1 %v5331_v30, %s10602_s14  ;;  %v5245_v63 = vpop.f32.mrb[51].mxu0  ;;  %v15891_v30 = vld [vmem:[#allocation28_spill] sm:$0xff]  ;;  %v15893_v4 = vld [vmem:[#allocation30_spill] sm:$0xff] }
 0x7c7   : > { %v5246_v62 = vadd.f32 %v13218_v23, %v5245_v63  ;;  %5410 = vrot.lane.b32.xlu0 %v5330_v16, %s10602_s14  ;;  %v15892_v16 = vld [vmem:[#allocation29_spill] sm:$0xff]  ;;  %v15895_v63 = vld [vmem:[#allocation32_spill] sm:$0xff] }
 0x7c8   : > { %v5333_v9 = vmax.f32 %v5251_v21, 0.0  ;;  %v15894_v21 = vld [vmem:[#allocation31_spill] sm:$0xff] }
 0x7c9   : > { %v5332_v60 = vmax.f32 %v5246_v62, 0.0  ;;  %v10371_v32 = vpop.f32.mrb[52].mxu0  ;;  %v15896_v62 = vld [vmem:[#allocation33_spill] sm:$0xff] }
 0x7ca   : > { %v5261_v24 = vadd.f32 %v10371_v32, %v13218_v23  ;;  %5416 = vrot.lane.b32.xlu1 %v5333_v9, %s10602_s14  ;;  %v5255_v56 = vpop.f32.mrb[53].mxu0  ;;  %v15897_v32 = vld [vmem:[#allocation34_spill] sm:$0xff] }
 0x7cb   : > { %v5256_v49 = vadd.f32 %v13218_v23, %v5255_v56  ;;  %5414 = vrot.lane.b32.xlu0 %v5332_v60, %s10602_s14 }
 0x7cc   : > { %v5335_v48 = vmax.f32 %v5261_v24, 0.0  ;;  %v15898_v24 = vld [vmem:[#allocation35_spill] sm:$0xff] }
 0x7cd   : > { %v5334_v10 = vmax.f32 %v5256_v49, 0.0  ;;  %v10374_v45 = vpop.f32.mrb[54].mxu0 }
 0x7ce   : > { %v5271_v46 = vadd.f32 %v10374_v45, %v13218_v23  ;;  %5420 = vrot.lane.b32.xlu1 %v5335_v48, %s10602_s14  ;;  %v5265_v8 = vpop.f32.mrb[55].mxu0  ;;  %v15899_v48 = vld [vmem:[#allocation36_spill] sm:$0xff] }
 0x7cf   : > { %v5266_v39 = vadd.f32 %v13218_v23, %v5265_v8  ;;  %5418 = vrot.lane.b32.xlu0 %v5334_v10, %s10602_s14  ;;  %v15900_v10 = vld [vmem:[#allocation37_spill] sm:$0xff]  ;;  %v15901_v8 = vld [vmem:[#allocation38_spill] sm:$0xff] }
 0x7d0   : > { %v5337_v3 = vmax.f32 %v5271_v46, 0.0 }
 0x7d1   : > { %v5336_v47 = vmax.f32 %v5266_v39, 0.0  ;;  %v10377_v26 = vpop.f32.mrb[56].mxu0  ;;  %v15902_v39 = vld [vmem:[#allocation39_spill] sm:$0xff] }
 0x7d2   : > { %v5281_v44 = vadd.f32 %v10377_v26, %v13218_v23  ;;  %5424 = vrot.lane.b32.xlu1 %v5337_v3, %s10602_s14  ;;  %v5275_v55 = vpop.f32.mrb[57].mxu0  ;;  %v5700_v3 = vld [vmem:[#allocation2 + $0xb] sm:$0xff]  ;;  %v5699_v26 = vld [vmem:[#allocation2 + $0x3] sm:$0xff] }
 0x7d3   : > { %v5276_v7 = vadd.f32 %v13218_v23, %v5275_v55  ;;  %5422 = vrot.lane.b32.xlu0 %v5336_v47, %s10602_s14  ;;  %v5702_v55 = vld [vmem:[#allocation2 + $0x23] sm:$0xff] }
 0x7d4   : > { %v5339_v38 = vmax.f32 %v5281_v44, 0.0 }
 0x7d5   : > { %v5338_v19 = vmax.f32 %v5276_v7, 0.0  ;;  %v10380_v41 = vpop.f32.mrb[58].mxu0 }
 0x7d6   : > { %v5291_v37 = vadd.f32 %v10380_v41, %v13218_v23  ;;  %5428 = vrot.lane.b32.xlu1 %v5339_v38, %s10602_s14  ;;  %v5285_v40 = vpop.f32.mrb[59].mxu0  ;;  %v5701_v38 = vld [vmem:[#allocation2 + $0x1b] sm:$0xff] }
 0x7d7   : > { %v5286_v54 = vadd.f32 %v13218_v23, %v5285_v40  ;;  %5426 = vrot.lane.b32.xlu0 %v5338_v19, %s10602_s14  ;;  %v5704_v41 = vld [vmem:[#allocation2 + $0x3b] sm:$0xff]  ;;  %v5703_v40 = vld [vmem:[#allocation2 + $0x33] sm:$0xff] }
 0x7d8   : > { %v5341_v2 = vmax.f32 %v5291_v37, 0.0 }
 0x7d9   : > { %v5340_v28 = vmax.f32 %v5286_v54, 0.0  ;;  %v10383_v13 = vpop.f32.mrb[60].mxu0 }
 0x7da   : > { %v5301_v17 = vadd.f32 %v10383_v13, %v13218_v23  ;;  %5432 = vrot.lane.b32.xlu1 %v5341_v2, %s10602_s14  ;;  %v5295_v14 = vpop.f32.mrb[61].mxu0 }
 0x7db   : > { %v5296_v18 = vadd.f32 %v13218_v23, %v5295_v14  ;;  %5430 = vrot.lane.b32.xlu0 %v5340_v28, %s10602_s14 }
 0x7dc   : > { %v5343_v0 = vmax.f32 %v5301_v17, 0.0 }
 0x7dd   : > { %v5342_v35 = vmax.f32 %v5296_v18, 0.0  ;;  %v10386_v29 = vpop.f32.mrb[62].mxu0 }
 0x7de   : > { %v5311_v5 = vadd.f32 %v10386_v29, %v13218_v23  ;;  %5436 = vrot.lane.b32.xlu1 %v5343_v0, %s10602_s14  ;;  %v5305_v20 = vpop.f32.mrb[63].mxu0 }
 0x7df   : > { %v5306_v33 = vadd.f32 %v13218_v23, %v5305_v20  ;;  %5434 = vrot.lane.b32.xlu0 %v5342_v35, %s10602_s14  ;;  %v15874_v23 = vld [vmem:[#allocation11_spill] sm:$0xff] }
 0x7e0   : > { %v5345_v43 = vmax.f32 %v5311_v5, 0.0 }
 0x7e1   : > { %v5344_v50 = vmax.f32 %v5306_v33, 0.0 }
 0x7e2   : > { %5440 = vrot.lane.b32.xlu1 %v5345_v43, %s10602_s14  ;;  %v5636_v43 = vld [vmem:[#allocation2 + $0x8] sm:$0xff] }
 0x7e3   : > { %5438 = vrot.lane.b32.xlu0 %v5344_v50, %s10602_s14  ;;  %v5635_v50 = vld [vmem:[#allocation2] sm:$0xff]  ;;  %5668 = vst.msk [vmem:[#allocation3 + $0x8] sm:$0xff] %vm850_vm5, %v5636_v43 }
 0x7e4   : > { %5667 = vst.msk [vmem:[#allocation3] sm:$0xff] %vm850_vm5, %v5635_v50 }
 0x7e6   : > { %5509 = vrot.lane.b32.xlu1 %v15871_v53, %s10603_s25 }
 0x7e7   : > { %5507 = vrot.lane.b32.xlu0 %v15872_v36, %s10603_s25 }
 0x7ea   : > { %5513 = vrot.lane.b32.xlu1 %v15873_v34, %s10603_s25  ;;  %v5638_v34 = vld [vmem:[#allocation2 + $0x20] sm:$0xff] }
 0x7eb   : > { %5511 = vrot.lane.b32.xlu0 %v15874_v23, %s10603_s25  ;;  %v5637_v23 = vld [vmem:[#allocation2 + $0x18] sm:$0xff]  ;;  %5670 = vst.msk [vmem:[#allocation3 + $0x18] sm:$0xff] %vm850_vm5, %v5638_v34 }
 0x7ec   : > { %5669 = vst.msk [vmem:[#allocation3 + $0x10] sm:$0xff] %vm850_vm5, %v5637_v23 }
 0x7ee   : > { %5517 = vrot.lane.b32.xlu1 %v15875_v25, %s10603_s25 }
 0x7ef   : > { %5515 = vrot.lane.b32.xlu0 %v15876_v11, %s10603_s25 }
 0x7f2   : > { %5521 = vrot.lane.b32.xlu1 %v15877_v1, %s10603_s25  ;;  %v5640_v1 = vld [vmem:[#allocation2 + $0x38] sm:$0xff] }
 0x7f3   : > { %5519 = vrot.lane.b32.xlu0 %v15878_v52, %s10603_s25  ;;  %v5639_v52 = vld [vmem:[#allocation2 + $0x30] sm:$0xff]  ;;  %5672 = vst.msk [vmem:[#allocation3 + $0x28] sm:$0xff] %vm850_vm5, %v5640_v1 }
 0x7f4   : > { %5671 = vst.msk [vmem:[#allocation3 + $0x20] sm:$0xff] %vm850_vm5, %v5639_v52 }
 0x7f6   : > { %5525 = vrot.lane.b32.xlu1 %v15879_v58, %s10603_s25 }
 0x7f7   : > { %5523 = vrot.lane.b32.xlu0 %v15880_v6, %s10603_s25 }
 0x7fa   : > { %5529 = vrot.lane.b32.xlu1 %v15881_v12, %s10603_s25 }
 0x7fb   : > { %5527 = vrot.lane.b32.xlu0 %v15882_v31, %s10603_s25 }
 0x7fe   : > { %5533 = vrot.lane.b32.xlu1 %v15883_v42, %s10603_s25 }
 0x7ff   : > { %5531 = vrot.lane.b32.xlu0 %v15884_v57, %s10603_s25 }
 0x802   : > { %5537 = vrot.lane.b32.xlu1 %v15885_v27, %s10603_s25 }
 0x803   : > { %5535 = vrot.lane.b32.xlu0 %v15886_v22, %s10603_s25 }
 0x806   : > { %5541 = vrot.lane.b32.xlu1 %v15887_v61, %s10603_s25 }
 0x807   : > { %5539 = vrot.lane.b32.xlu0 %v15888_v51, %s10603_s25 }
 0x80a   : > { %5545 = vrot.lane.b32.xlu1 %v15889_v15, %s10603_s25 }
 0x80b   : > { %5543 = vrot.lane.b32.xlu0 %v15890_v59, %s10603_s25 }
 0x80e   : > { %5549 = vrot.lane.b32.xlu1 %v15891_v30, %s10603_s25 }
 0x80f   : > { %5547 = vrot.lane.b32.xlu0 %v15892_v16, %s10603_s25 }
 0x812   : > { %5553 = vrot.lane.b32.xlu1 %v15893_v4, %s10603_s25 }
 0x813   : > { %5551 = vrot.lane.b32.xlu0 %v15894_v21, %s10603_s25 }
 0x816   : > { %5557 = vrot.lane.b32.xlu1 %v15895_v63, %s10603_s25 }
 0x817   : > { %5555 = vrot.lane.b32.xlu0 %v15896_v62, %s10603_s25 }
 0x818   : > { %v5381_v9 = vpop.permute.xlu1 %5380 }
 0x819   : > { %5476 = vst.msk [vmem:[#allocation4 + $0x8] sm:$0xff] %vm5474_vm14, %v5381_v9  ;;  %v5379_v60 = vpop.permute.xlu0 %5378 }
 0x81a   : > { %5475 = vst.msk [vmem:[#allocation4] sm:$0xff] %vm5474_vm14, %v5379_v60  ;;  %5561 = vrot.lane.b32.xlu1 %v15897_v32, %s10603_s25 }
 0x81b   : > { %5559 = vrot.lane.b32.xlu0 %v15898_v24, %s10603_s25 }
 0x81c   : > { %v5385_v56 = vpop.permute.xlu1 %5384 }
 0x81d   : > { %5478 = vst.msk [vmem:[#allocation4 + $0x18] sm:$0xff] %vm5474_vm14, %v5385_v56  ;;  %v5383_v49 = vpop.permute.xlu0 %5382 }
 0x81e   : > { %5477 = vst.msk [vmem:[#allocation4 + $0x10] sm:$0xff] %vm5474_vm14, %v5383_v49  ;;  %5565 = vrot.lane.b32.xlu1 %v15899_v48, %s10603_s25 }
 0x81f   : > { %5563 = vrot.lane.b32.xlu0 %v15900_v10, %s10603_s25 }
 0x820   : > { %v5389_v45 = vpop.permute.xlu1 %5388 }
 0x821   : > { %5480 = vst.msk [vmem:[#allocation4 + $0x28] sm:$0xff] %vm5474_vm14, %v5389_v45  ;;  %v5387_v46 = vpop.permute.xlu0 %5386 }
 0x822   : > { %5479 = vst.msk [vmem:[#allocation4 + $0x20] sm:$0xff] %vm5474_vm14, %v5387_v46  ;;  %5569 = vrot.lane.b32.xlu1 %v15901_v8, %s10603_s25 }
 0x823   : > { %5567 = vrot.lane.b32.xlu0 %v15902_v39, %s10603_s25  ;;  %s377_s25 = sand.u32 1, %s10580_s18  }
 0x824   : > { %v5393_v47 = vpop.permute.xlu1 %5392 }
 0x825   : > { %5482 = vst.msk [vmem:[#allocation4 + $0x38] sm:$0xff] %vm5474_vm14, %v5393_v47  ;;  %v5391_v44 = vpop.permute.xlu0 %5390 }
 0x826   : > { %5481 = vst.msk [vmem:[#allocation4 + $0x30] sm:$0xff] %vm5474_vm14, %v5391_v44  ;;  %5765 = vrot.lane.b32.xlu1 %v5700_v3, %s10601_s15 }
 0x827   : > { %5763 = vrot.lane.b32.xlu0 %v5699_v26, %s10601_s15 }
 0x828   : > { %v5397_v7 = vpop.permute.xlu1 %5396 }
 0x829   : > { %5484 = vst.msk [vmem:[#allocation4 + $0x48] sm:$0xff] %vm5474_vm14, %v5397_v7  ;;  %v5395_v19 = vpop.permute.xlu0 %5394 }
 0x82a   : > { %5483 = vst.msk [vmem:[#allocation4 + $0x40] sm:$0xff] %vm5474_vm14, %v5395_v19  ;;  %5769 = vrot.lane.b32.xlu1 %v5702_v55, %s10601_s15 }
 0x82b   : > { %5767 = vrot.lane.b32.xlu0 %v5701_v38, %s10601_s15 }
 0x82c   : > { %v5401_v37 = vpop.permute.xlu1 %5400 }
 0x82d   : > { %5486 = vst.msk [vmem:[#allocation4 + $0x58] sm:$0xff] %vm5474_vm14, %v5401_v37  ;;  %v5399_v54 = vpop.permute.xlu0 %5398 }
 0x82e   : > { %5485 = vst.msk [vmem:[#allocation4 + $0x50] sm:$0xff] %vm5474_vm14, %v5399_v54  ;;  %5773 = vrot.lane.b32.xlu1 %v5704_v41, %s10601_s15 }
 0x82f   : > { %5771 = vrot.lane.b32.xlu0 %v5703_v40, %s10601_s15 }
 0x830   : > { %v5405_v2 = vpop.permute.xlu1 %5404 }
 0x831   : > { %5488 = vst.msk [vmem:[#allocation4 + $0x68] sm:$0xff] %vm5474_vm14, %v5405_v2  ;;  %v5403_v28 = vpop.permute.xlu0 %5402 }
 0x832   : > { %5487 = vst.msk [vmem:[#allocation4 + $0x60] sm:$0xff] %vm5474_vm14, %v5403_v28 }
 0x834   : > { %v5409_v13 = vpop.permute.xlu1 %5408 }
 0x835   : > { %5490 = vst.msk [vmem:[#allocation4 + $0x78] sm:$0xff] %vm5474_vm14, %v5409_v13  ;;  %v5407_v17 = vpop.permute.xlu0 %5406 }
 0x836   : > { %5489 = vst.msk [vmem:[#allocation4 + $0x70] sm:$0xff] %vm5474_vm14, %v5407_v17 }
 0x838   : > { %v5413_v14 = vpop.permute.xlu1 %5412 }
 0x839   : > { %5492 = vst.msk [vmem:[#allocation4 + $0x88] sm:$0xff] %vm5474_vm14, %v5413_v14  ;;  %v5411_v18 = vpop.permute.xlu0 %5410 }
 0x83a   : > { %5491 = vst.msk [vmem:[#allocation4 + $0x80] sm:$0xff] %vm5474_vm14, %v5411_v18 }
 0x83c   : > { %v5417_v0 = vpop.permute.xlu1 %5416 }
 0x83d   : > { %5494 = vst.msk [vmem:[#allocation4 + $0x98] sm:$0xff] %vm5474_vm14, %v5417_v0  ;;  %v5415_v35 = vpop.permute.xlu0 %5414 }
 0x83e   : > { %5493 = vst.msk [vmem:[#allocation4 + $0x90] sm:$0xff] %vm5474_vm14, %v5415_v35 }
 0x840   : > { %v5421_v29 = vpop.permute.xlu1 %5420 }
 0x841   : > { %5496 = vst.msk [vmem:[#allocation4 + $0xa8] sm:$0xff] %vm5474_vm14, %v5421_v29  ;;  %v5419_v5 = vpop.permute.xlu0 %5418 }
 0x842   : > { %5495 = vst.msk [vmem:[#allocation4 + $0xa0] sm:$0xff] %vm5474_vm14, %v5419_v5 }
 0x844   : > { %v5425_v20 = vpop.permute.xlu1 %5424 }
 0x845   : > { %5498 = vst.msk [vmem:[#allocation4 + $0xb8] sm:$0xff] %vm5474_vm14, %v5425_v20  ;;  %v5423_v33 = vpop.permute.xlu0 %5422 }
 0x846   : > { %5497 = vst.msk [vmem:[#allocation4 + $0xb0] sm:$0xff] %vm5474_vm14, %v5423_v33 }
 0x848   : > { %v5429_v53 = vpop.permute.xlu1 %5428 }
 0x849   : > { %5500 = vst.msk [vmem:[#allocation4 + $0xc8] sm:$0xff] %vm5474_vm14, %v5429_v53  ;;  %v5427_v36 = vpop.permute.xlu0 %5426 }
 0x84a   : > { %5499 = vst.msk [vmem:[#allocation4 + $0xc0] sm:$0xff] %vm5474_vm14, %v5427_v36 }
 0x84c   : > { %v5433_v25 = vpop.permute.xlu1 %5432 }
 0x84d   : > { %5502 = vst.msk [vmem:[#allocation4 + $0xd8] sm:$0xff] %vm5474_vm14, %v5433_v25  ;;  %v5431_v11 = vpop.permute.xlu0 %5430 }
 0x84e   : > { %5501 = vst.msk [vmem:[#allocation4 + $0xd0] sm:$0xff] %vm5474_vm14, %v5431_v11 }
 0x850   : > { %v5437_v58 = vpop.permute.xlu1 %5436 }
 0x851   : > { %5504 = vst.msk [vmem:[#allocation4 + $0xe8] sm:$0xff] %vm5474_vm14, %v5437_v58  ;;  %v5435_v6 = vpop.permute.xlu0 %5434 }
 0x852   : > { %5503 = vst.msk [vmem:[#allocation4 + $0xe0] sm:$0xff] %vm5474_vm14, %v5435_v6 }
 0x854   : > { %v5441_v12 = vpop.permute.xlu1 %5440 }
 0x855   : > { %5506 = vst.msk [vmem:[#allocation4 + $0xf8] sm:$0xff] %vm5474_vm14, %v5441_v12  ;;  %v5439_v31 = vpop.permute.xlu0 %5438 }
 0x856   : > { %5505 = vst.msk [vmem:[#allocation4 + $0xf0] sm:$0xff] %vm5474_vm14, %v5439_v31  ;;  %vm9778_vm14 = vcmask 1044484  }
 0x858   : > { %v5510_v42 = vpop.permute.xlu1 %5509 }
 0x859   : > { %5604 = vst.msk [vmem:[#allocation2 + $0x53] sm:$0xff] %vm850_vm5, %v5510_v42  ;;  %v5508_v57 = vpop.permute.xlu0 %5507 }
 0x85a   : > { %5603 = vst.msk [vmem:[#allocation2 + $0x4b] sm:$0xff] %vm850_vm5, %v5508_v57 }
 0x85c   : > { %v5514_v27 = vpop.permute.xlu1 %5513 }
 0x85d   : > { %5606 = vst.msk [vmem:[#allocation2 + $0x6b] sm:$0xff] %vm850_vm5, %v5514_v27  ;;  %v5512_v22 = vpop.permute.xlu0 %5511 }
 0x85e   : > { %5605 = vst.msk [vmem:[#allocation2 + $0x63] sm:$0xff] %vm850_vm5, %v5512_v22 }
 0x860   : > { %v5518_v61 = vpop.permute.xlu1 %5517  ;;  %v5706_v51 = vld [vmem:[#allocation2 + $0x53] sm:$0xff] }
 0x861   : > { %5608 = vst.msk [vmem:[#allocation2 + $0x83] sm:$0xff] %vm850_vm5, %v5518_v61  ;;  %5777 = vrot.lane.b32.xlu1 %v5706_v51, %s10601_s15  ;;  %v5516_v15 = vpop.permute.xlu0 %5515  ;;  %v5705_v59 = vld [vmem:[#allocation2 + $0x4b] sm:$0xff] }
 0x862   : > { %v13398_v30 = vld [vmem:[#allocation2 + $0x50] sm:$0xff]  ;;  %5607 = vst.msk [vmem:[#allocation2 + $0x7b] sm:$0xff] %vm850_vm5, %v5516_v15  ;;  %5775 = vrot.lane.b32.xlu0 %v5705_v59, %s10601_s15  ;;  %v13404_v16 = vld [vmem:[#allocation2 + $0x48] sm:$0xff] }
 0x863   : > { %5674 = vst.msk [vmem:[#allocation3 + $0x38] sm:$0xff] %vm850_vm5, %v13398_v30  ;;  %5673 = vst.msk [vmem:[#allocation3 + $0x30] sm:$0xff] %vm850_vm5, %v13404_v16 }
 0x864   : > { %v5522_v4 = vpop.permute.xlu1 %5521  ;;  %v13408_v21 = vld [vmem:[#allocation2 + $0x6b] sm:$0xff] }
 0x865   : > { %5610 = vst.msk [vmem:[#allocation2 + $0x9b] sm:$0xff] %vm850_vm5, %v5522_v4  ;;  %5781 = vrot.lane.b32.xlu1 %v13408_v21, %s10601_s15  ;;  %v5520_v63 = vpop.permute.xlu0 %5519  ;;  %v13413_v62 = vld [vmem:[#allocation2 + $0x63] sm:$0xff] }
 0x866   : > { %v13415_v9 = vld [vmem:[#allocation2 + $0x68] sm:$0xff]  ;;  %5609 = vst.msk [vmem:[#allocation2 + $0x93] sm:$0xff] %vm850_vm5, %v5520_v63  ;;  %5779 = vrot.lane.b32.xlu0 %v13413_v62, %s10601_s15  ;;  %v13422_v60 = vld [vmem:[#allocation2 + $0x60] sm:$0xff] }
 0x867   : > { %5676 = vst.msk [vmem:[#allocation3 + $0x48] sm:$0xff] %vm850_vm5, %v13415_v9  ;;  %5675 = vst.msk [vmem:[#allocation3 + $0x40] sm:$0xff] %vm850_vm5, %v13422_v60 }
 0x868   : > { %v5526_v32 = vpop.permute.xlu1 %5525  ;;  %v13426_v24 = vld [vmem:[#allocation2 + $0x83] sm:$0xff] }
 0x869   : > { %5612 = vst.msk [vmem:[#allocation2 + $0xb3] sm:$0xff] %vm850_vm5, %v5526_v32  ;;  %5785 = vrot.lane.b32.xlu1 %v13426_v24, %s10601_s15  ;;  %v5524_v56 = vpop.permute.xlu0 %5523  ;;  %v13431_v49 = vld [vmem:[#allocation2 + $0x7b] sm:$0xff] }
 0x86a   : > { %v13433_v48 = vld [vmem:[#allocation2 + $0x80] sm:$0xff]  ;;  %5611 = vst.msk [vmem:[#allocation2 + $0xab] sm:$0xff] %vm850_vm5, %v5524_v56  ;;  %5783 = vrot.lane.b32.xlu0 %v13431_v49, %s10601_s15  ;;  %v13440_v10 = vld [vmem:[#allocation2 + $0x78] sm:$0xff] }
 0x86b   : > { %5678 = vst.msk [vmem:[#allocation3 + $0x58] sm:$0xff] %vm850_vm5, %v13433_v48  ;;  %5677 = vst.msk [vmem:[#allocation3 + $0x50] sm:$0xff] %vm850_vm5, %v13440_v10 }
 0x86c   : > { %v5530_v45 = vpop.permute.xlu1 %5529  ;;  %v13444_v46 = vld [vmem:[#allocation2 + $0x9b] sm:$0xff] }
 0x86d   : > { %5614 = vst.msk [vmem:[#allocation2 + $0xcb] sm:$0xff] %vm850_vm5, %v5530_v45  ;;  %5789 = vrot.lane.b32.xlu1 %v13444_v46, %s10601_s15  ;;  %v5528_v8 = vpop.permute.xlu0 %5527  ;;  %v13449_v39 = vld [vmem:[#allocation2 + $0x93] sm:$0xff] }
 0x86e   : > { %v13451_v3 = vld [vmem:[#allocation2 + $0x98] sm:$0xff]  ;;  %5613 = vst.msk [vmem:[#allocation2 + $0xc3] sm:$0xff] %vm850_vm5, %v5528_v8  ;;  %5787 = vrot.lane.b32.xlu0 %v13449_v39, %s10601_s15  ;;  %v13458_v47 = vld [vmem:[#allocation2 + $0x90] sm:$0xff] }
 0x86f   : > { %5680 = vst.msk [vmem:[#allocation3 + $0x68] sm:$0xff] %vm850_vm5, %v13451_v3  ;;  %5679 = vst.msk [vmem:[#allocation3 + $0x60] sm:$0xff] %vm850_vm5, %v13458_v47 }
 0x870   : > { %v5534_v26 = vpop.permute.xlu1 %5533  ;;  %v13462_v44 = vld [vmem:[#allocation2 + $0xb3] sm:$0xff] }
 0x871   : > { %5616 = vst.msk [vmem:[#allocation2 + $0xe3] sm:$0xff] %vm850_vm5, %v5534_v26  ;;  %5793 = vrot.lane.b32.xlu1 %v13462_v44, %s10601_s15  ;;  %v5532_v55 = vpop.permute.xlu0 %5531  ;;  %v13467_v7 = vld [vmem:[#allocation2 + $0xab] sm:$0xff] }
 0x872   : > { %v13469_v38 = vld [vmem:[#allocation2 + $0xb0] sm:$0xff]  ;;  %5615 = vst.msk [vmem:[#allocation2 + $0xdb] sm:$0xff] %vm850_vm5, %v5532_v55  ;;  %5791 = vrot.lane.b32.xlu0 %v13467_v7, %s10601_s15  ;;  %v13476_v19 = vld [vmem:[#allocation2 + $0xa8] sm:$0xff] }
 0x873   : > { %5682 = vst.msk [vmem:[#allocation3 + $0x78] sm:$0xff] %vm850_vm5, %v13469_v38  ;;  %5681 = vst.msk [vmem:[#allocation3 + $0x70] sm:$0xff] %vm850_vm5, %v13476_v19 }
 0x874   : > { %v5538_v41 = vpop.permute.xlu1 %5537  ;;  %v13480_v37 = vld [vmem:[#allocation2 + $0xcb] sm:$0xff] }
 0x875   : > { %5618 = vst.msk [vmem:[#allocation2 + $0xfb] sm:$0xff] %vm850_vm5, %v5538_v41  ;;  %5797 = vrot.lane.b32.xlu1 %v13480_v37, %s10601_s15  ;;  %v5536_v40 = vpop.permute.xlu0 %5535  ;;  %v13485_v54 = vld [vmem:[#allocation2 + $0xc3] sm:$0xff] }
 0x876   : > { %v13487_v2 = vld [vmem:[#allocation2 + $0xc8] sm:$0xff]  ;;  %5617 = vst.msk [vmem:[#allocation2 + $0xf3] sm:$0xff] %vm850_vm5, %v5536_v40  ;;  %5795 = vrot.lane.b32.xlu0 %v13485_v54, %s10601_s15  ;;  %v13494_v28 = vld [vmem:[#allocation2 + $0xc0] sm:$0xff] }
 0x877   : > { %5684 = vst.msk [vmem:[#allocation3 + $0x88] sm:$0xff] %vm850_vm5, %v13487_v2  ;;  %5683 = vst.msk [vmem:[#allocation3 + $0x80] sm:$0xff] %vm850_vm5, %v13494_v28  ;;  %v5893_v40 = vld [vmem:[#allocation2 + $0xe] sm:$0xff] }
 0x878   : > { %v5542_v13 = vpop.permute.xlu1 %5541  ;;  %v13498_v17 = vld [vmem:[#allocation2 + $0xe3] sm:$0xff] }
 0x879   : > { %5620 = vst.msk [vmem:[#allocation2 + $0x113] sm:$0xff] %vm850_vm5, %v5542_v13  ;;  %5801 = vrot.lane.b32.xlu1 %v13498_v17, %s10601_s15  ;;  %v5540_v14 = vpop.permute.xlu0 %5539  ;;  %v13503_v18 = vld [vmem:[#allocation2 + $0xdb] sm:$0xff] }
 0x87a   : > { %v13505_v0 = vld [vmem:[#allocation2 + $0xe0] sm:$0xff]  ;;  %5619 = vst.msk [vmem:[#allocation2 + $0x10b] sm:$0xff] %vm850_vm5, %v5540_v14  ;;  %5799 = vrot.lane.b32.xlu0 %v13503_v18, %s10601_s15  ;;  %v13512_v35 = vld [vmem:[#allocation2 + $0xd8] sm:$0xff] }
 0x87b   : > { %5686 = vst.msk [vmem:[#allocation3 + $0x98] sm:$0xff] %vm850_vm5, %v13505_v0  ;;  %5685 = vst.msk [vmem:[#allocation3 + $0x90] sm:$0xff] %vm850_vm5, %v13512_v35  ;;  %v5892_v14 = vld [vmem:[#allocation2 + $0x6] sm:$0xff] }
 0x87c   : > { %v5546_v29 = vpop.permute.xlu1 %5545  ;;  %v13516_v5 = vld [vmem:[#allocation2 + $0xfb] sm:$0xff] }
 0x87d   : > { %5622 = vst.msk [vmem:[#allocation2 + $0x12b] sm:$0xff] %vm850_vm5, %v5546_v29  ;;  %5805 = vrot.lane.b32.xlu1 %v13516_v5, %s10601_s15  ;;  %v5544_v20 = vpop.permute.xlu0 %5543  ;;  %v13521_v33 = vld [vmem:[#allocation2 + $0xf3] sm:$0xff] }
 0x87e   : > { %v13523_v43 = vld [vmem:[#allocation2 + $0xf8] sm:$0xff]  ;;  %5621 = vst.msk [vmem:[#allocation2 + $0x123] sm:$0xff] %vm850_vm5, %v5544_v20  ;;  %5803 = vrot.lane.b32.xlu0 %v13521_v33, %s10601_s15  ;;  %v13530_v50 = vld [vmem:[#allocation2 + $0xf0] sm:$0xff] }
 0x87f   : > { %5688 = vst.msk [vmem:[#allocation3 + $0xa8] sm:$0xff] %vm850_vm5, %v13523_v43  ;;  %5687 = vst.msk [vmem:[#allocation3 + $0xa0] sm:$0xff] %vm850_vm5, %v13530_v50 }
 0x880   : > { %v5550_v53 = vpop.permute.xlu1 %5549  ;;  %v13534_v36 = vld [vmem:[#allocation2 + $0x113] sm:$0xff] }
 0x881   : > { %5624 = vst.msk [vmem:[#allocation2 + $0x143] sm:$0xff] %vm850_vm5, %v5550_v53  ;;  %5809 = vrot.lane.b32.xlu1 %v13534_v36, %s10601_s15  ;;  %v5548_v34 = vpop.permute.xlu0 %5547  ;;  %v13539_v23 = vld [vmem:[#allocation2 + $0x10b] sm:$0xff] }
 0x882   : > { %v13541_v25 = vld [vmem:[#allocation2 + $0x110] sm:$0xff]  ;;  %5623 = vst.msk [vmem:[#allocation2 + $0x13b] sm:$0xff] %vm850_vm5, %v5548_v34  ;;  %5807 = vrot.lane.b32.xlu0 %v13539_v23, %s10601_s15  ;;  %v13548_v11 = vld [vmem:[#allocation2 + $0x108] sm:$0xff]  ;;  %v5894_v34 = vld [vmem:[#allocation2 + $0x1e] sm:$0xff] }
 0x883   : > { %5690 = vst.msk [vmem:[#allocation3 + $0xb8] sm:$0xff] %vm850_vm5, %v13541_v25  ;;  %5689 = vst.msk [vmem:[#allocation3 + $0xb0] sm:$0xff] %vm850_vm5, %v13548_v11  ;;  %v5895_v53 = vld [vmem:[#allocation2 + $0x26] sm:$0xff] }
 0x884   : > { %v5554_v1 = vpop.permute.xlu1 %5553  ;;  %v13552_v52 = vld [vmem:[#allocation2 + $0x12b] sm:$0xff] }
 0x885   : > { %5626 = vst.msk [vmem:[#allocation2 + $0x15b] sm:$0xff] %vm850_vm5, %v5554_v1  ;;  %5813 = vrot.lane.b32.xlu1 %v13552_v52, %s10601_s15  ;;  %v5552_v58 = vpop.permute.xlu0 %5551  ;;  %v13557_v6 = vld [vmem:[#allocation2 + $0x123] sm:$0xff] }
 0x886   : > { %v13559_v12 = vld [vmem:[#allocation2 + $0x128] sm:$0xff]  ;;  %5625 = vst.msk [vmem:[#allocation2 + $0x153] sm:$0xff] %vm850_vm5, %v5552_v58  ;;  %5811 = vrot.lane.b32.xlu0 %v13557_v6, %s10601_s15  ;;  %v13566_v31 = vld [vmem:[#allocation2 + $0x120] sm:$0xff] }
 0x887   : > { %5692 = vst.msk [vmem:[#allocation3 + $0xc8] sm:$0xff] %vm850_vm5, %v13559_v12  ;;  %5691 = vst.msk [vmem:[#allocation3 + $0xc0] sm:$0xff] %vm850_vm5, %v13566_v31 }
 0x888   : > { %v5558_v42 = vpop.permute.xlu1 %5557  ;;  %v5726_v57 = vld [vmem:[#allocation2 + $0x143] sm:$0xff] }
 0x889   : > { %5628 = vst.msk [vmem:[#allocation2 + $0x173] sm:$0xff] %vm850_vm5, %v5558_v42  ;;  %5817 = vrot.lane.b32.xlu1 %v5726_v57, %s10601_s15  ;;  %v5556_v27 = vpop.permute.xlu0 %5555  ;;  %v5725_v22 = vld [vmem:[#allocation2 + $0x13b] sm:$0xff] }
 0x88a   : > { %v13572_v61 = vld [vmem:[#allocation2 + $0x140] sm:$0xff]  ;;  %5627 = vst.msk [vmem:[#allocation2 + $0x16b] sm:$0xff] %vm850_vm5, %v5556_v27  ;;  %5815 = vrot.lane.b32.xlu0 %v5725_v22, %s10601_s15  ;;  %v13578_v51 = vld [vmem:[#allocation2 + $0x138] sm:$0xff] }
 0x88b   : > { %5694 = vst.msk [vmem:[#allocation3 + $0xd8] sm:$0xff] %vm850_vm5, %v13572_v61  ;;  %5693 = vst.msk [vmem:[#allocation3 + $0xd0] sm:$0xff] %vm850_vm5, %v13578_v51  ;;  %v5897_v42 = vld [vmem:[#allocation2 + $0x3e] sm:$0xff]  ;;  %v5896_v57 = vld [vmem:[#allocation2 + $0x36] sm:$0xff] }
 0x88c   : > { %v5562_v15 = vpop.permute.xlu1 %5561  ;;  %v5728_v59 = vld [vmem:[#allocation2 + $0x15b] sm:$0xff] }
 0x88d   : > { %5630 = vst.msk [vmem:[#allocation2 + $0x18b] sm:$0xff] %vm850_vm5, %v5562_v15  ;;  %5821 = vrot.lane.b32.xlu1 %v5728_v59, %s10601_s15  ;;  %v5560_v4 = vpop.permute.xlu0 %5559  ;;  %v5727_v63 = vld [vmem:[#allocation2 + $0x153] sm:$0xff] }
 0x88e   : > { %v13584_v32 = vld [vmem:[#allocation2 + $0x158] sm:$0xff]  ;;  %5629 = vst.msk [vmem:[#allocation2 + $0x183] sm:$0xff] %vm850_vm5, %v5560_v4  ;;  %5819 = vrot.lane.b32.xlu0 %v5727_v63, %s10601_s15  ;;  %v13590_v56 = vld [vmem:[#allocation2 + $0x150] sm:$0xff] }
 0x88f   : > { %15903 = vst [vmem:[#allocation40_spill] sm:$0xff] %v13584_v32  ;;  %5696 = vst.msk [vmem:[#allocation3 + $0xe8] sm:$0xff] %vm850_vm5, %v13584_v32  ;;  %v5899_v15 = vld [vmem:[#allocation2 + $0x56] sm:$0xff]  ;;  %v5898_v4 = vld [vmem:[#allocation2 + $0x4e] sm:$0xff] }
 0x890   : > { %15904 = vst [vmem:[#allocation41_spill] sm:$0xff] %v13590_v56  ;;  %5695 = vst.msk [vmem:[#allocation3 + $0xe0] sm:$0xff] %vm850_vm5, %v13590_v56  ;;  %v5566_v45 = vpop.permute.xlu1 %5565  ;;  %v5730_v8 = vld [vmem:[#allocation2 + $0x173] sm:$0xff] }
 0x891   : > { %5632 = vst.msk [vmem:[#allocation2 + $0x1a3] sm:$0xff] %vm850_vm5, %v5566_v45  ;;  %5825 = vrot.lane.b32.xlu1 %v5730_v8, %s10601_s15  ;;  %v5564_v26 = vpop.permute.xlu0 %5563  ;;  %v5729_v55 = vld [vmem:[#allocation2 + $0x16b] sm:$0xff]  ;;  %v5923_v32 = vld [vmem:[#allocation2 + $0x176] sm:$0xff] }
 0x892   : > { %v13596_v41 = vld [vmem:[#allocation2 + $0x170] sm:$0xff]  ;;  %5631 = vst.msk [vmem:[#allocation2 + $0x19b] sm:$0xff] %vm850_vm5, %v5564_v26  ;;  %5823 = vrot.lane.b32.xlu0 %v5729_v55, %s10601_s15  ;;  %v13602_v13 = vld [vmem:[#allocation2 + $0x168] sm:$0xff]  ;;  %v13634_v55 = vld [vmem:[#allocation2 + $0x7e] sm:$0xff]  ;;  %s10604_s15 = smov 10  }
 0x893   : > { %15905 = vst [vmem:[#allocation8_spill] sm:$0xff] %v13596_v41  ;;  %5698 = vst.msk [vmem:[#allocation3 + $0xf8] sm:$0xff] %vm850_vm5, %v13596_v41  ;;  %v13622_v45 = vld [vmem:[#allocation2 + $0x6e] sm:$0xff]  ;;  %v13626_v8 = vld [vmem:[#allocation2 + $0x66] sm:$0xff] }
 0x894   : > { %15906 = vst [vmem:[#allocation9_spill] sm:$0xff] %v13602_v13  ;;  %5697 = vst.msk [vmem:[#allocation3 + $0xf0] sm:$0xff] %vm850_vm5, %v13602_v13  ;;  %v5570_v29 = vpop.permute.xlu1 %5569  ;;  %v13630_v26 = vld [vmem:[#allocation2 + $0x86] sm:$0xff]  ;;  %v13702_v41 = vld [vmem:[#allocation2 + $0x15e] sm:$0xff] }
 0x895   : > { %5634 = vst.msk [vmem:[#allocation2 + $0x1bb] sm:$0xff] %vm850_vm5, %v5570_v29  ;;  %5958 = vrot.lane.b32.xlu1 %v5893_v40, %s10591_s22  ;;  %v5568_v20 = vpop.permute.xlu0 %5567  ;;  %v13638_v40 = vld [vmem:[#allocation2 + $0x9e] sm:$0xff]  ;;  %v13646_v29 = vld [vmem:[#allocation2 + $0xb6] sm:$0xff]  ;;  %15909 = vst [vmem:[#allocation12_spill] sm:$0xff] %v13702_v41 }
 0x896   : > { %5633 = vst.msk [vmem:[#allocation2 + $0x1b3] sm:$0xff] %vm850_vm5, %v5568_v20  ;;  %5956 = vrot.lane.b32.xlu0 %v5892_v14, %s10591_s22  ;;  %v13642_v14 = vld [vmem:[#allocation2 + $0x96] sm:$0xff]  ;;  %v13650_v20 = vld [vmem:[#allocation2 + $0xae] sm:$0xff]  ;;  %vm6825_vm5 = vcmask 113760  }
 0x897   : > { %v13706_v13 = vld [vmem:[#allocation2 + $0x156] sm:$0xff]  ;;  %v5922_v56 = vld [vmem:[#allocation2 + $0x16e] sm:$0xff] }
 0x898   : > { %v5766_v1 = vpop.permute.xlu1 %5765  ;;  %15910 = vst [vmem:[#allocation13_spill] sm:$0xff] %v13706_v13 }
 0x899   : > { %5962 = vrot.lane.b32.xlu1 %v5895_v53, %s10591_s22  ;;  %5861 = vst.msk [vmem:[#allocation3 + $0x8] sm:$0xff] %vm5859_vm15, %v5766_v1  ;;  %v5764_v58 = vpop.permute.xlu0 %5763  ;;  %v13654_v53 = vld [vmem:[#allocation2 + $0xce] sm:$0xff]  ;;  %v13662_v1 = vld [vmem:[#allocation2 + $0xe6] sm:$0xff] }
 0x89a   : > { %5960 = vrot.lane.b32.xlu0 %v5894_v34, %s10591_s22  ;;  %5860 = vst.msk [vmem:[#allocation3] sm:$0xff] %vm5859_vm15, %v5764_v58  ;;  %v13658_v34 = vld [vmem:[#allocation2 + $0xc6] sm:$0xff]  ;;  %v13666_v58 = vld [vmem:[#allocation2 + $0xde] sm:$0xff] }
 0x89c   : > { %v5770_v27 = vpop.permute.xlu1 %5769 }
 0x89d   : > { %5966 = vrot.lane.b32.xlu1 %v5897_v42, %s10591_s22  ;;  %5863 = vst.msk [vmem:[#allocation3 + $0x18] sm:$0xff] %vm5859_vm15, %v5770_v27  ;;  %v5768_v22 = vpop.permute.xlu0 %5767  ;;  %v13670_v42 = vld [vmem:[#allocation2 + $0xfe] sm:$0xff]  ;;  %v13678_v27 = vld [vmem:[#allocation2 + $0x116] sm:$0xff] }
 0x89e   : > { %5964 = vrot.lane.b32.xlu0 %v5896_v57, %s10591_s22  ;;  %5862 = vst.msk [vmem:[#allocation3 + $0x10] sm:$0xff] %vm5859_vm15, %v5768_v22  ;;  %v13674_v57 = vld [vmem:[#allocation2 + $0xf6] sm:$0xff]  ;;  %v13682_v22 = vld [vmem:[#allocation2 + $0x10e] sm:$0xff] }
 0x8a0   : > { %v5774_v59 = vpop.permute.xlu1 %5773 }
 0x8a1   : > { %5970 = vrot.lane.b32.xlu1 %v5899_v15, %s10591_s22  ;;  %5865 = vst.msk [vmem:[#allocation3 + $0x28] sm:$0xff] %vm5859_vm15, %v5774_v59  ;;  %v5772_v63 = vpop.permute.xlu0 %5771  ;;  %v13686_v15 = vld [vmem:[#allocation2 + $0x12e] sm:$0xff]  ;;  %v13690_v59 = vld [vmem:[#allocation2 + $0x126] sm:$0xff] }
 0x8a2   : > { %5968 = vrot.lane.b32.xlu0 %v5898_v4, %s10591_s22  ;;  %5864 = vst.msk [vmem:[#allocation3 + $0x20] sm:$0xff] %vm5859_vm15, %v5772_v63  ;;  %v13694_v4 = vld [vmem:[#allocation2 + $0x146] sm:$0xff]  ;;  %v13698_v63 = vld [vmem:[#allocation2 + $0x13e] sm:$0xff] }
 0x8a3   : > { %15907 = vst [vmem:[#allocation10_spill] sm:$0xff] %v13694_v4  ;;  %15908 = vst [vmem:[#allocation11_spill] sm:$0xff] %v13698_v63 }
 0x8a5   : > { %5974 = vrot.lane.b32.xlu1 %v13622_v45, %s10591_s22 }
 0x8a6   : > { %5972 = vrot.lane.b32.xlu0 %v13626_v8, %s10591_s22 }
 0x8a9   : > { %5978 = vrot.lane.b32.xlu1 %v13630_v26, %s10591_s22 }
 0x8aa   : > { %5976 = vrot.lane.b32.xlu0 %v13634_v55, %s10591_s22 }
 0x8ad   : > { %5982 = vrot.lane.b32.xlu1 %v13638_v40, %s10591_s22 }
 0x8ae   : > { %5980 = vrot.lane.b32.xlu0 %v13642_v14, %s10591_s22 }
 0x8b1   : > { %5986 = vrot.lane.b32.xlu1 %v13646_v29, %s10591_s22 }
 0x8b2   : > { %5984 = vrot.lane.b32.xlu0 %v13650_v20, %s10591_s22 }
 0x8b5   : > { %5990 = vrot.lane.b32.xlu1 %v13654_v53, %s10591_s22 }
 0x8b6   : > { %5988 = vrot.lane.b32.xlu0 %v13658_v34, %s10591_s22 }
 0x8b9   : > { %5994 = vrot.lane.b32.xlu1 %v13662_v1, %s10591_s22 }
 0x8ba   : > { %5992 = vrot.lane.b32.xlu0 %v13666_v58, %s10591_s22 }
 0x8bd   : > { %5998 = vrot.lane.b32.xlu1 %v13670_v42, %s10591_s22 }
 0x8be   : > { %5996 = vrot.lane.b32.xlu0 %v13674_v57, %s10591_s22 }
 0x8c1   : > { %6002 = vrot.lane.b32.xlu1 %v13678_v27, %s10591_s22 }
 0x8c2   : > { %6000 = vrot.lane.b32.xlu0 %v13682_v22, %s10591_s22 }
 0x8c5   : > { %6006 = vrot.lane.b32.xlu1 %v13686_v15, %s10591_s22 }
 0x8c6   : > { %6004 = vrot.lane.b32.xlu0 %v13690_v59, %s10591_s22 }
 0x8c9   : > { %6010 = vrot.lane.b32.xlu1 %v13694_v4, %s10591_s22 }
 0x8ca   : > { %6008 = vrot.lane.b32.xlu0 %v13698_v63, %s10591_s22 }
 0x8cd   : > { %6014 = vrot.lane.b32.xlu1 %v13702_v41, %s10591_s22 }
 0x8ce   : > { %6012 = vrot.lane.b32.xlu0 %v13706_v13, %s10591_s22 }
 0x8d1   : > { %6018 = vrot.lane.b32.xlu1 %v5923_v32, %s10591_s22 }
 0x8d2   : > { %6016 = vrot.lane.b32.xlu0 %v5922_v56, %s10591_s22  ;;  %s15911_s22 = smov 8  }
 0x8d3   : > { %v5778_v4 = vpop.permute.xlu1 %5777 }
 0x8d4   : > { %5867 = vst.msk [vmem:[#allocation3 + $0x38] sm:$0xff] %vm5859_vm15, %v5778_v4  ;;  %v5776_v63 = vpop.permute.xlu0 %5775 }
 0x8d5   : > { %5866 = vst.msk [vmem:[#allocation3 + $0x30] sm:$0xff] %vm5859_vm15, %v5776_v63  ;;  %6151 = vrot.lane.b32.xlu1 %v13398_v30, %s10602_s14 }
 0x8d6   : > { %6149 = vrot.lane.b32.xlu0 %v13404_v16, %s10602_s14 }
 0x8d7   : > { %v5782_v41 = vpop.permute.xlu1 %5781 }
 0x8d8   : > { %5869 = vst.msk [vmem:[#allocation3 + $0x48] sm:$0xff] %vm5859_vm15, %v5782_v41  ;;  %v5780_v13 = vpop.permute.xlu0 %5779 }
 0x8d9   : > { %5868 = vst.msk [vmem:[#allocation3 + $0x40] sm:$0xff] %vm5859_vm15, %v5780_v13  ;;  %6155 = vrot.lane.b32.xlu1 %v13415_v9, %s10602_s14  ;;  %v7276_v13 = vld [vmem:[%s15682_s7] sm:$0xff] }
 0x8da   : > { %6153 = vrot.lane.b32.xlu0 %v13422_v60, %s10602_s14 }
 0x8db   : > { %v5786_v32 = vpop.permute.xlu1 %5785 }
 0x8dc   : > { %5871 = vst.msk [vmem:[#allocation3 + $0x58] sm:$0xff] %vm5859_vm15, %v5786_v32  ;;  %v5784_v56 = vpop.permute.xlu0 %5783 }
 0x8dd   : > { %5870 = vst.msk [vmem:[#allocation3 + $0x50] sm:$0xff] %vm5859_vm15, %v5784_v56  ;;  %6348 = vrot.lane.b32.xlu1 %v13408_v21, %s15911_s22 }
 0x8de   : > { %6346 = vrot.lane.b32.xlu0 %v13413_v62, %s15911_s22 }
 0x8df   : > { %v5790_v30 = vpop.permute.xlu1 %5789 }
 0x8e0   : > { %5873 = vst.msk [vmem:[#allocation3 + $0x68] sm:$0xff] %vm5859_vm15, %v5790_v30  ;;  %v5788_v16 = vpop.permute.xlu0 %5787 }
 0x8e1   : > { %5872 = vst.msk [vmem:[#allocation3 + $0x60] sm:$0xff] %vm5859_vm15, %v5788_v16  ;;  %6541 = vrot.lane.b32.xlu1 %v13622_v45, %s10604_s15  ;;  %v7277_v45 = vld [vmem:[%s15682_s7 + $0x8] sm:$0xff] }
 0x8e2   : > { %6539 = vrot.lane.b32.xlu0 %v13626_v8, %s10604_s15  ;;  %v10457_v4 = vpack.c.bf16 %v7277_v45, %v7276_v13 }
 0x8e3   : > { %v5794_v9 = vpop.permute.xlu1 %5793 }
 0x8e4   : > { %5875 = vst.msk [vmem:[#allocation3 + $0x78] sm:$0xff] %vm5859_vm15, %v5794_v9  ;;  %v5792_v21 = vpop.permute.xlu0 %5791  ;;  %10461 = vmatprep.subr.bf16.mxu1 %v10457_v4  ;;  %10458 = vmatprep.subr.bf16.mxu0 %v10457_v4 }
 0x8e5   : > { %5874 = vst.msk [vmem:[#allocation3 + $0x70] sm:$0xff] %vm5859_vm15, %v5792_v21  ;;  %6157 = vrot.lane.b32.xlu1 %v13440_v10, %s10602_s14  ;;  %10463 = vmatpush3.bf16.msra.mxu1 %v10457_v4 }
 0x8e6   : > { %6733 = vrot.lane.b32.xlu0 %v13476_v19, %s15912_s29  ;;  %10460 = vmatpush3.bf16.msra.mxu0 %v10457_v4 }
 0x8e7   : > { %v5798_v62 = vpop.permute.xlu1 %5797 }
 0x8e8   : > { %5877 = vst.msk [vmem:[#allocation3 + $0x88] sm:$0xff] %vm5859_vm15, %v5798_v62  ;;  %v5796_v60 = vpop.permute.xlu0 %5795 }
 0x8e9   : > { %5876 = vst.msk [vmem:[#allocation3 + $0x80] sm:$0xff] %vm5859_vm15, %v5796_v60  ;;  %6926 = vrot.lane.b32.xlu1 %v13467_v7, %s10605_s30 }
 0x8ea   : > { %6735 = vrot.lane.b32.xlu0 %v13469_v38, %s15912_s29 }
 0x8eb   : > { %v5802_v41 = vpop.permute.xlu1 %5801 }
 0x8ec   : > { %5879 = vst.msk [vmem:[#allocation3 + $0x98] sm:$0xff] %vm5859_vm15, %v5802_v41  ;;  %v5800_v10 = vpop.permute.xlu0 %5799 }
 0x8ed   : > { %5878 = vst.msk [vmem:[#allocation3 + $0x90] sm:$0xff] %vm5859_vm15, %v5800_v10  ;;  %6350 = vrot.lane.b32.xlu1 %v13431_v49, %s15911_s22  ;;  %v7278_v49 = vld [vmem:[%s15682_s7 + $0x10] sm:$0x3] }
 0x8ee   : > { %6159 = vrot.lane.b32.xlu0 %v13433_v48, %s10602_s14  ;;  %10462 = vmatprep.subr.msk.mxu1 %vm7383_vm0, %v7278_v49 }
 0x8ef   : > { %v5806_v8 = vpop.permute.xlu1 %5805  ;;  %10391 = vmatprep.subr.msk.mxu0 %vm7383_vm0, %v7278_v49  ;;  %10464 = vmatpush3.msk.msra.mxu1 %vm7383_vm0, %v7278_v49 }
 0x8f0   : > { %5881 = vst.msk [vmem:[#allocation3 + $0xa8] sm:$0xff] %vm5859_vm15, %v5806_v8  ;;  %v5804_v63 = vpop.permute.xlu0 %5803  ;;  %10392 = vmatpush3.msk.msra.mxu0 %vm7383_vm0, %v7278_v49  ;;  %vm9782_vm0 = vcmask 1046534  }
 0x8f1   : > { %5880 = vst.msk [vmem:[#allocation3 + $0xa0] sm:$0xff] %vm5859_vm15, %v5804_v63  ;;  %7119 = vrot.lane.b32.xlu1 %v13650_v20, %s15866_s12 }
 0x8f2   : > { %6928 = vrot.lane.b32.xlu0 %v13462_v44, %s10605_s30 }
 0x8f3   : > { %v5810_v48 = vpop.permute.xlu1 %5809 }
 0x8f4   : > { %5883 = vst.msk [vmem:[#allocation3 + $0xb8] sm:$0xff] %vm5859_vm15, %v5810_v48  ;;  %v5808_v32 = vpop.permute.xlu0 %5807 }
 0x8f5   : > { %5882 = vst.msk [vmem:[#allocation3 + $0xb0] sm:$0xff] %vm5859_vm15, %v5808_v32  ;;  %6543 = vrot.lane.b32.xlu1 %v13634_v55, %s10604_s15 }
 0x8f6   : > { %6352 = vrot.lane.b32.xlu0 %v13426_v24, %s15911_s22 }
 0x8f7   : > { %v5814_v56 = vpop.permute.xlu1 %5813 }
 0x8f8   : > { %5885 = vst.msk [vmem:[#allocation3 + $0xc8] sm:$0xff] %vm5859_vm15, %v5814_v56  ;;  %v5812_v30 = vpop.permute.xlu0 %5811 }
 0x8f9   : > { %5884 = vst.msk [vmem:[#allocation3 + $0xc0] sm:$0xff] %vm5859_vm15, %v5812_v30  ;;  %6545 = vrot.lane.b32.xlu1 %v13630_v26, %s10604_s15 }
 0x8fa   : > { %7121 = vrot.lane.b32.xlu0 %v13646_v29, %s15866_s12 }
 0x8fb   : > { %v5818_v16 = vpop.permute.xlu1 %5817 }
 0x8fc   : > { %5887 = vst.msk [vmem:[#allocation3 + $0xd8] sm:$0xff] %vm5859_vm15, %v5818_v16  ;;  %v5816_v55 = vpop.permute.xlu0 %5815 }
 0x8fd   : > { %5886 = vst.msk [vmem:[#allocation3 + $0xd0] sm:$0xff] %vm5859_vm15, %v5816_v55  ;;  %6161 = vrot.lane.b32.xlu1 %v13458_v47, %s10602_s14 }
 0x8fe   : > { %6737 = vrot.lane.b32.xlu0 %v13494_v28, %s15912_s29 }
 0x8ff   : > { %v5822_v24 = vpop.permute.xlu1 %5821 }
 0x900   : > { %5889 = vst.msk [vmem:[#allocation3 + $0xe8] sm:$0xff] %vm5859_vm15, %v5822_v24  ;;  %v5820_v9 = vpop.permute.xlu0 %5819 }
 0x901   : > { %5888 = vst.msk [vmem:[#allocation3 + $0xe0] sm:$0xff] %vm5859_vm15, %v5820_v9  ;;  %6930 = vrot.lane.b32.xlu1 %v13485_v54, %s10605_s30 }
 0x902   : > { %6739 = vrot.lane.b32.xlu0 %v13487_v2, %s15912_s29 }
 0x903   : > { %v5826_v26 = vpop.permute.xlu1 %5825 }
 0x904   : > { %5891 = vst.msk [vmem:[#allocation3 + $0xf8] sm:$0xff] %vm5859_vm15, %v5826_v26  ;;  %v5824_v21 = vpop.permute.xlu0 %5823 }
 0x905   : > { %5890 = vst.msk [vmem:[#allocation3 + $0xf0] sm:$0xff] %vm5859_vm15, %v5824_v21  ;;  %6354 = vrot.lane.b32.xlu1 %v13449_v39, %s15911_s22  ;;  %vm9780_vm15 = vcmask 1045509  }
 0x906   : > { %6163 = vrot.lane.b32.xlu0 %v13451_v3, %s10602_s14 }
 0x907   : > { %v5959_v47 = vpop.permute.xlu1 %5958 }
 0x908   : > { %6054 = vst.msk [vmem:[#allocation3 + $0x8] sm:$0xff] %vm6052_vm1, %v5959_v47  ;;  %v5957_v62 = vpop.permute.xlu0 %5956 }
 0x909   : > { %6053 = vst.msk [vmem:[#allocation3] sm:$0xff] %vm6052_vm1, %v5957_v62  ;;  %7123 = vrot.lane.b32.xlu1 %v13658_v34, %s15866_s12 }
 0x90a   : > { %6932 = vrot.lane.b32.xlu0 %v13480_v37, %s10605_s30 }
 0x90b   : > { %v5963_v60 = vpop.permute.xlu1 %5962 }
 0x90c   : > { %6056 = vst.msk [vmem:[#allocation3 + $0x18] sm:$0xff] %vm6052_vm1, %v5963_v60  ;;  %v5961_v39 = vpop.permute.xlu0 %5960 }
 0x90d   : > { %6055 = vst.msk [vmem:[#allocation3 + $0x10] sm:$0xff] %vm6052_vm1, %v5961_v39  ;;  %6547 = vrot.lane.b32.xlu1 %v13642_v14, %s10604_s15 }
 0x90e   : > { %6356 = vrot.lane.b32.xlu0 %v13444_v46, %s15911_s22 }
 0x90f   : > { %v5967_v3 = vpop.permute.xlu1 %5966 }
 0x910   : > { %6058 = vst.msk [vmem:[#allocation3 + $0x28] sm:$0xff] %vm6052_vm1, %v5967_v3  ;;  %v5965_v41 = vpop.permute.xlu0 %5964 }
 0x911   : > { %6057 = vst.msk [vmem:[#allocation3 + $0x20] sm:$0xff] %vm6052_vm1, %v5965_v41  ;;  %6549 = vrot.lane.b32.xlu1 %v13638_v40, %s10604_s15 }
 0x912   : > { %7125 = vrot.lane.b32.xlu0 %v13654_v53, %s15866_s12 }
 0x913   : > { %v5971_v10 = vpop.permute.xlu1 %5970 }
 0x914   : > { %6060 = vst.msk [vmem:[#allocation3 + $0x38] sm:$0xff] %vm6052_vm1, %v5971_v10  ;;  %v5969_v13 = vpop.permute.xlu0 %5968 }
 0x915   : > { %6059 = vst.msk [vmem:[#allocation3 + $0x30] sm:$0xff] %vm6052_vm1, %v5969_v13  ;;  %6165 = vrot.lane.b32.xlu1 %v13476_v19, %s10602_s14  ;;  %v6294_v13 = vld [vmem:[#allocation2 + $0x10b] sm:$0xff] }
 0x916   : > { %6741 = vrot.lane.b32.xlu0 %v13512_v35, %s15912_s29 }
 0x917   : > { %v5975_v46 = vpop.permute.xlu1 %5974 }
 0x918   : > { %6062 = vst.msk [vmem:[#allocation3 + $0x48] sm:$0xff] %vm6052_vm1, %v5975_v46  ;;  %v5973_v14 = vpop.permute.xlu0 %5972 }
 0x919   : > { %6061 = vst.msk [vmem:[#allocation3 + $0x40] sm:$0xff] %vm6052_vm1, %v5973_v14  ;;  %6934 = vrot.lane.b32.xlu1 %v13503_v18, %s10605_s30 }
 0x91a   : > { %6743 = vrot.lane.b32.xlu0 %v13505_v0, %s15912_s29 }
 0x91b   : > { %v5979_v40 = vpop.permute.xlu1 %5978 }
 0x91c   : > { %6064 = vst.msk [vmem:[#allocation3 + $0x58] sm:$0xff] %vm6052_vm1, %v5979_v40  ;;  %v5977_v45 = vpop.permute.xlu0 %5976  ;;  %v15913_v40 = vld [vmem:[#allocation11_spill] sm:$0xff] }
 0x91d   : > { %6063 = vst.msk [vmem:[#allocation3 + $0x50] sm:$0xff] %vm6052_vm1, %v5977_v45  ;;  %6358 = vrot.lane.b32.xlu1 %v13467_v7, %s15911_s22  ;;  %v13985_v45 = vld [vmem:[#allocation2 + $0x143] sm:$0xff] }
 0x91e   : > { %6167 = vrot.lane.b32.xlu0 %v13469_v38, %s10602_s14 }
 0x91f   : > { %v5983_v19 = vpop.permute.xlu1 %5982 }
 0x920   : > { %6066 = vst.msk [vmem:[#allocation3 + $0x68] sm:$0xff] %vm6052_vm1, %v5983_v19  ;;  %v5981_v8 = vpop.permute.xlu0 %5980 }
 0x921   : > { %6065 = vst.msk [vmem:[#allocation3 + $0x60] sm:$0xff] %vm6052_vm1, %v5981_v8  ;;  %7127 = vrot.lane.b32.xlu1 %v13666_v58, %s15866_s12 }
 0x922   : > { %6936 = vrot.lane.b32.xlu0 %v13498_v17, %s10605_s30 }
 0x923   : > { %v5987_v4 = vpop.permute.xlu1 %5986 }
 0x924   : > { %6068 = vst.msk [vmem:[#allocation3 + $0x78] sm:$0xff] %vm6052_vm1, %v5987_v4  ;;  %v5985_v63 = vpop.permute.xlu0 %5984  ;;  %v6295_v4 = vld [vmem:[#allocation2 + $0x113] sm:$0xff] }
 0x925   : > { %6067 = vst.msk [vmem:[#allocation3 + $0x70] sm:$0xff] %vm6052_vm1, %v5985_v63  ;;  %6551 = vrot.lane.b32.xlu1 %v13650_v20, %s10604_s15 }
 0x926   : > { %6360 = vrot.lane.b32.xlu0 %v13462_v44, %s15911_s22 }
 0x927   : > { %v5991_v7 = vpop.permute.xlu1 %5990 }
 0x928   : > { %6070 = vst.msk [vmem:[#allocation3 + $0x88] sm:$0xff] %vm6052_vm1, %v5991_v7  ;;  %v5989_v38 = vpop.permute.xlu0 %5988 }
 0x929   : > { %6069 = vst.msk [vmem:[#allocation3 + $0x80] sm:$0xff] %vm6052_vm1, %v5989_v38  ;;  %6553 = vrot.lane.b32.xlu1 %v13646_v29, %s10604_s15  ;;  %v15914_v38 = vld [vmem:[#allocation10_spill] sm:$0xff] }
 0x92a   : > { %7129 = vrot.lane.b32.xlu0 %v13662_v1, %s15866_s12 }
 0x92b   : > { %v5995_v49 = vpop.permute.xlu1 %5994 }
 0x92c   : > { %6072 = vst.msk [vmem:[#allocation3 + $0x98] sm:$0xff] %vm6052_vm1, %v5995_v49  ;;  %v5993_v48 = vpop.permute.xlu0 %5992 }
 0x92d   : > { %6071 = vst.msk [vmem:[#allocation3 + $0x90] sm:$0xff] %vm6052_vm1, %v5993_v48  ;;  %6169 = vrot.lane.b32.xlu1 %v13494_v28, %s10602_s14 }
 0x92e   : > { %6745 = vrot.lane.b32.xlu0 %v13530_v50, %s15912_s29 }
 0x92f   : > { %v5999_v44 = vpop.permute.xlu1 %5998 }
 0x930   : > { %6074 = vst.msk [vmem:[#allocation3 + $0xa8] sm:$0xff] %vm6052_vm1, %v5999_v44  ;;  %v5997_v20 = vpop.permute.xlu0 %5996  ;;  %v15915_v44 = vld [vmem:[#allocation41_spill] sm:$0xff] }
 0x931   : > { %6073 = vst.msk [vmem:[#allocation3 + $0xa0] sm:$0xff] %vm6052_vm1, %v5997_v20  ;;  %6938 = vrot.lane.b32.xlu1 %v13521_v33, %s10605_s30 }
 0x932   : > { %6747 = vrot.lane.b32.xlu0 %v13523_v43, %s15912_s29 }
 0x933   : > { %v6003_v29 = vpop.permute.xlu1 %6002 }
 0x934   : > { %6076 = vst.msk [vmem:[#allocation3 + $0xb8] sm:$0xff] %vm6052_vm1, %v6003_v29  ;;  %v6001_v32 = vpop.permute.xlu0 %6000  ;;  %v14009_v29 = vld [vmem:[#allocation2 + $0x153] sm:$0xff] }
 0x935   : > { %6075 = vst.msk [vmem:[#allocation3 + $0xb0] sm:$0xff] %vm6052_vm1, %v6001_v32  ;;  %6362 = vrot.lane.b32.xlu1 %v13485_v54, %s15911_s22  ;;  %v15916_v32 = vld [vmem:[#allocation40_spill] sm:$0xff] }
 0x936   : > { %6171 = vrot.lane.b32.xlu0 %v13487_v2, %s10602_s14 }
 0x937   : > { %v6007_v28 = vpop.permute.xlu1 %6006 }
 0x938   : > { %6078 = vst.msk [vmem:[#allocation3 + $0xc8] sm:$0xff] %vm6052_vm1, %v6007_v28  ;;  %v6005_v56 = vpop.permute.xlu0 %6004 }
 0x939   : > { %6077 = vst.msk [vmem:[#allocation3 + $0xc0] sm:$0xff] %vm6052_vm1, %v6005_v56  ;;  %7131 = vrot.lane.b32.xlu1 %v13674_v57, %s15866_s12  ;;  %v6296_v56 = vld [vmem:[#allocation2 + $0x123] sm:$0xff] }
 0x93a   : > { %6940 = vrot.lane.b32.xlu0 %v13516_v5, %s10605_s30 }
 0x93b   : > { %v6011_v30 = vpop.permute.xlu1 %6010 }
 0x93c   : > { %6080 = vst.msk [vmem:[#allocation3 + $0xd8] sm:$0xff] %vm6052_vm1, %v6011_v30  ;;  %v6009_v16 = vpop.permute.xlu0 %6008 }
 0x93d   : > { %6079 = vst.msk [vmem:[#allocation3 + $0xd0] sm:$0xff] %vm6052_vm1, %v6009_v16  ;;  %6555 = vrot.lane.b32.xlu1 %v13658_v34, %s10604_s15 }
 0x93e   : > { %6364 = vrot.lane.b32.xlu0 %v13480_v37, %s15911_s22 }
 0x93f   : > { %v6015_v54 = vpop.permute.xlu1 %6014 }
 0x940   : > { %6082 = vst.msk [vmem:[#allocation3 + $0xe8] sm:$0xff] %vm6052_vm1, %v6015_v54  ;;  %v6013_v2 = vpop.permute.xlu0 %6012  ;;  %v15917_v54 = vld [vmem:[#allocation13_spill] sm:$0xff] }
 0x941   : > { %6081 = vst.msk [vmem:[#allocation3 + $0xe0] sm:$0xff] %vm6052_vm1, %v6013_v2  ;;  %6557 = vrot.lane.b32.xlu1 %v13654_v53, %s10604_s15  ;;  %v14025_v2 = vld [vmem:[#allocation2 + $0x15b] sm:$0xff] }
 0x942   : > { %7133 = vrot.lane.b32.xlu0 %v13670_v42, %s15866_s12 }
 0x943   : > { %v6019_v5 = vpop.permute.xlu1 %6018 }
 0x944   : > { %6084 = vst.msk [vmem:[#allocation3 + $0xf8] sm:$0xff] %vm6052_vm1, %v6019_v5  ;;  %v6017_v55 = vpop.permute.xlu0 %6016 }
 0x945   : > { %6083 = vst.msk [vmem:[#allocation3 + $0xf0] sm:$0xff] %vm6052_vm1, %v6017_v55  ;;  %6173 = vrot.lane.b32.xlu1 %v13512_v35, %s10602_s14  ;;  %vm9784_vm1 = vcmask 1047559  }
 0x946   : > { %6749 = vrot.lane.b32.xlu0 %v13548_v11, %s15912_s29 }
 0x947   : > { %v6152_v37 = vpop.permute.xlu1 %6151 }
 0x948   : > { %6247 = vst.msk [vmem:[#allocation3 + $0x8] sm:$0xff] %vm6245_vm2, %v6152_v37  ;;  %v6150_v53 = vpop.permute.xlu0 %6149  ;;  %v6489_v37 = vld [vmem:[#allocation2 + $0x126] sm:$0xff] }
 0x949   : > { %6246 = vst.msk [vmem:[#allocation3] sm:$0xff] %vm6245_vm2, %v6150_v53  ;;  %6942 = vrot.lane.b32.xlu1 %v13539_v23, %s10605_s30  ;;  %v6297_v53 = vld [vmem:[#allocation2 + $0x12b] sm:$0xff] }
 0x94a   : > { %6751 = vrot.lane.b32.xlu0 %v13541_v25, %s15912_s29 }
 0x94b   : > { %v6156_v34 = vpop.permute.xlu1 %6155 }
 0x94c   : > { %6249 = vst.msk [vmem:[#allocation3 + $0x18] sm:$0xff] %vm6245_vm2, %v6156_v34  ;;  %v6154_v35 = vpop.permute.xlu0 %6153 }
 0x94d   : > { %6248 = vst.msk [vmem:[#allocation3 + $0x10] sm:$0xff] %vm6245_vm2, %v6154_v35  ;;  %6366 = vrot.lane.b32.xlu1 %v13503_v18, %s15911_s22 }
 0x94e   : > { %6175 = vrot.lane.b32.xlu0 %v13505_v0, %s10602_s14 }
 0x94f   : > { %v6349_v24 = vpop.permute.xlu1 %6348 }
 0x950   : > { %6442 = vst.msk [vmem:[#allocation3 + $0x18] sm:$0xff] %vm6438_vm3, %v6349_v24  ;;  %v6347_v23 = vpop.permute.xlu0 %6346  ;;  %v6490_v24 = vld [vmem:[#allocation2 + $0x12e] sm:$0xff] }
 0x951   : > { %6441 = vst.msk [vmem:[#allocation3 + $0x10] sm:$0xff] %vm6438_vm3, %v6347_v23  ;;  %7135 = vrot.lane.b32.xlu1 %v13682_v22, %s15866_s12  ;;  %v15918_v23 = vld [vmem:[#allocation12_spill] sm:$0xff] }
 0x952   : > { %6944 = vrot.lane.b32.xlu0 %v13534_v36, %s10605_s30 }
 0x953   : > { %v6542_v9 = vpop.permute.xlu1 %6541 }
 0x954   : > { %6635 = vst.msk [vmem:[#allocation3 + $0x18] sm:$0xff] %vm6631_vm4, %v6542_v9  ;;  %v6540_v18 = vpop.permute.xlu0 %6539 }
 0x955   : > { %6634 = vst.msk [vmem:[#allocation3 + $0x10] sm:$0xff] %vm6631_vm4, %v6540_v18  ;;  %6559 = vrot.lane.b32.xlu1 %v13666_v58, %s10604_s15 }
 0x956   : > { %6368 = vrot.lane.b32.xlu0 %v13498_v17, %s15911_s22 }
 0x957   : > { %v6158_v0 = vpop.permute.xlu1 %6157 }
 0x958   : > { %6250 = vst.msk [vmem:[#allocation3 + $0x20] sm:$0xff] %vm6245_vm2, %v6158_v0  ;;  %v6734_v26 = vpop.permute.xlu0 %6733 }
 0x959   : > { %6828 = vst.msk [vmem:[#allocation3 + $0x10] sm:$0xff] %vm6825_vm5, %v6734_v26  ;;  %6561 = vrot.lane.b32.xlu1 %v13662_v1, %s10604_s15  ;;  %v15919_v26 = vld [vmem:[#allocation9_spill] sm:$0xff] }
 0x95a   : > { %7137 = vrot.lane.b32.xlu0 %v13678_v27, %s15866_s12 }
 0x95b   : > { %v6927_v36 = vpop.permute.xlu1 %6926 }
 0x95c   : > { %7021 = vst.msk [vmem:[#allocation3 + $0x10] sm:$0xff] %vm7018_vm6, %v6927_v36  ;;  %v6736_v58 = vpop.permute.xlu0 %6735 }
 0x95d   : > { %6829 = vst.msk [vmem:[#allocation3 + $0x18] sm:$0xff] %vm6825_vm5, %v6736_v58  ;;  %6177 = vrot.lane.b32.xlu1 %v13530_v50, %s10602_s14 }
 0x95e   : > { %6753 = vrot.lane.b32.xlu0 %v13566_v31, %s15912_s29 }
 0x95f   : > { %v6351_v17 = vpop.permute.xlu1 %6350 }
 0x960   : > { %6443 = vst.msk [vmem:[#allocation3 + $0x20] sm:$0xff] %vm6438_vm3, %v6351_v17  ;;  %v6160_v1 = vpop.permute.xlu0 %6159  ;;  %v14047_v17 = vld [vmem:[#allocation2 + $0x16b] sm:$0xff] }
 0x961   : > { %6251 = vst.msk [vmem:[#allocation3 + $0x28] sm:$0xff] %vm6245_vm2, %v6160_v1  ;;  %6946 = vrot.lane.b32.xlu1 %v13557_v6, %s10605_s30  ;;  %v15920_v1 = vld [vmem:[#allocation8_spill] sm:$0xff] }
 0x962   : > { %6755 = vrot.lane.b32.xlu0 %v13559_v12, %s15912_s29 }
 0x963   : > { %v7120_v21 = vpop.permute.xlu1 %7119 }
 0x964   : > { %7214 = vst.msk [vmem:[#allocation3 + $0x10] sm:$0xff] %vm7211_vm7, %v7120_v21  ;;  %v6929_v50 = vpop.permute.xlu0 %6928 }
 0x965   : > { %7022 = vst.msk [vmem:[#allocation3 + $0x18] sm:$0xff] %vm7018_vm6, %v6929_v50  ;;  %6370 = vrot.lane.b32.xlu1 %v13521_v33, %s15911_s22 }
 0x966   : > { %6179 = vrot.lane.b32.xlu0 %v13523_v43, %s10602_s14  ;;  %v6293_v43 = vld [vmem:[#allocation2 + $0xfb] sm:$0xff] }
 0x967   : > { %v6544_v47 = vpop.permute.xlu1 %6543 }
 0x968   : > { %6636 = vst.msk [vmem:[#allocation3 + $0x20] sm:$0xff] %vm6631_vm4, %v6544_v47  ;;  %v6353_v6 = vpop.permute.xlu0 %6352 }
 0x969   : > { %6444 = vst.msk [vmem:[#allocation3 + $0x28] sm:$0xff] %vm6438_vm3, %v6353_v6  ;;  %7139 = vrot.lane.b32.xlu1 %v13690_v59, %s15866_s12  ;;  %v14061_v6 = vld [vmem:[#allocation2 + $0x16e] sm:$0xff] }
 0x96a   : > { %6948 = vrot.lane.b32.xlu0 %v13552_v52, %s10605_s30 }
 0x96b   : > { %v6546_v62 = vpop.permute.xlu1 %6545  ;;  %v7246_v60 = vld [vmem:[#allocation3 + $0x10] sm:$0xff] }
 0x96c   : > { %6637 = vst.msk [vmem:[#allocation3 + $0x28] sm:$0xff] %vm6631_vm4, %v6546_v62  ;;  %10396 = vmatprep.mubr.msk.f32.mxu1 %vm7286_vm8, %v7246_v60  ;;  %v7122_v33 = vpop.permute.xlu0 %7121  ;;  %v14066_v62 = vld [vmem:[#allocation2 + $0x173] sm:$0xff] }
 0x96d   : > { %7215 = vst.msk [vmem:[#allocation3 + $0x18] sm:$0xff] %vm7211_vm7, %v7122_v33  ;;  %6563 = vrot.lane.b32.xlu1 %v13674_v57, %s10604_s15 }
 0x96e   : > { %6372 = vrot.lane.b32.xlu0 %v6293_v43, %s15911_s22  ;;  %v6491_v43 = vld [vmem:[#allocation2 + $0x13e] sm:$0xff] }
 0x96f   : > { %v6162_v59 = vpop.permute.xlu1 %6161 }
 0x970   : > { %6252 = vst.msk [vmem:[#allocation3 + $0x30] sm:$0xff] %vm6245_vm2, %v6162_v59  ;;  %v6738_v39 = vpop.permute.xlu0 %6737 }
 0x971   : > { %6830 = vst.msk [vmem:[#allocation3 + $0x20] sm:$0xff] %vm6825_vm5, %v6738_v39  ;;  %6565 = vrot.lane.b32.xlu1 %v13670_v42, %s10604_s15 }
 0x972   : > { %7141 = vrot.lane.b32.xlu0 %v13686_v15, %s15866_s12  ;;  %v13969_v15 = vld [vmem:[#allocation2 + $0x13b] sm:$0xff] }
 0x973   : > { %v6931_v52 = vpop.permute.xlu1 %6930 }
 0x974   : > { %7023 = vst.msk [vmem:[#allocation3 + $0x20] sm:$0xff] %vm7018_vm6, %v6931_v52  ;;  %v6740_v3 = vpop.permute.xlu0 %6739  ;;  %v7247_v57 = vld [vmem:[#allocation3 + $0x18] sm:$0xff] }
 0x975   : > { %6831 = vst.msk [vmem:[#allocation3 + $0x28] sm:$0xff] %vm6825_vm5, %v6740_v3  ;;  %6181 = vrot.lane.b32.xlu1 %v13548_v11, %s10602_s14  ;;  %10397 = vmatmul.mubr.msk.f32.vlgmr.msra.gmra.mrb[32].mxu1 %vm7286_vm8, %v7247_v57  ;;  %v6492_v52 = vld [vmem:[#allocation2 + $0x146] sm:$0xff]  ;;  %v14079_v3 = vld [vmem:[#allocation2 + $0x176] sm:$0xff] }
 0x976   : > { %6757 = vrot.lane.b32.xlu0 %v13578_v51, %s15912_s29 }
 0x977   : > { %v6355_v41 = vpop.permute.xlu1 %6354 }
 0x978   : > { %6445 = vst.msk [vmem:[#allocation3 + $0x30] sm:$0xff] %vm6438_vm3, %v6355_v41  ;;  %v6164_v42 = vpop.permute.xlu0 %6163 }
 0x979   : > { %6253 = vst.msk [vmem:[#allocation3 + $0x38] sm:$0xff] %vm6245_vm2, %v6164_v42  ;;  %6950 = vrot.lane.b32.xlu1 %v13969_v15, %s10605_s30 }
 0x97a   : > { %6759 = vrot.lane.b32.xlu0 %v13572_v61, %s15912_s29 }
 0x97b   : > { %v7124_v11 = vpop.permute.xlu1 %7123 }
 0x97c   : > { %7216 = vst.msk [vmem:[#allocation3 + $0x20] sm:$0xff] %vm7211_vm7, %v7124_v11  ;;  %v6933_v10 = vpop.permute.xlu0 %6932 }
 0x97d   : > { %7024 = vst.msk [vmem:[#allocation3 + $0x28] sm:$0xff] %vm7018_vm6, %v6933_v10  ;;  %6374 = vrot.lane.b32.xlu1 %v6294_v13, %s15911_s22  ;;  %v14093_v13 = vld [vmem:[#allocation2 + $0x183] sm:$0xff] }
 0x97e   : > { %6183 = vrot.lane.b32.xlu0 %v13541_v25, %s10602_s14 }
 0x97f   : > { %v6548_v46 = vpop.permute.xlu1 %6547 }
 0x980   : > { %6638 = vst.msk [vmem:[#allocation3 + $0x30] sm:$0xff] %vm6631_vm4, %v6548_v46  ;;  %v6357_v14 = vpop.permute.xlu0 %6356  ;;  %v14098_v46 = vld [vmem:[#allocation2 + $0x188] sm:$0xff] }
 0x981   : > { %6446 = vst.msk [vmem:[#allocation3 + $0x38] sm:$0xff] %vm6438_vm3, %v6357_v14  ;;  %7143 = vrot.lane.b32.xlu1 %v15913_v40, %s15866_s12 }
 0x982   : > { %6952 = vrot.lane.b32.xlu0 %v13985_v45, %s10605_s30 }
 0x983   : > { %v6550_v19 = vpop.permute.xlu1 %6549  ;;  %v7248_v8 = vld [vmem:[#allocation3 + $0x20] sm:$0xff] }
 0x984   : > { %6639 = vst.msk [vmem:[#allocation3 + $0x38] sm:$0xff] %vm6631_vm4, %v6550_v19  ;;  %10399 = vmatprep.mubr.msk.f32.mxu1 %vm7286_vm8, %v7248_v8  ;;  %v7126_v25 = vpop.permute.xlu0 %7125  ;;  %v14109_v8 = vld [vmem:[#allocation2 + $0x186] sm:$0xff] }
 0x985   : > { %7217 = vst.msk [vmem:[#allocation3 + $0x28] sm:$0xff] %vm7211_vm7, %v7126_v25  ;;  %6567 = vrot.lane.b32.xlu1 %v13682_v22, %s10604_s15  ;;  %v14114_v25 = vld [vmem:[#allocation2 + $0x18b] sm:$0xff] }
 0x986   : > { %6376 = vrot.lane.b32.xlu0 %v6295_v4, %s15911_s22 }
 0x987   : > { %v6166_v63 = vpop.permute.xlu1 %6165 }
 0x988   : > { %6254 = vst.msk [vmem:[#allocation3 + $0x40] sm:$0xff] %vm6245_vm2, %v6166_v63  ;;  %v6742_v7 = vpop.permute.xlu0 %6741 }
 0x989   : > { %6832 = vst.msk [vmem:[#allocation3 + $0x30] sm:$0xff] %vm6825_vm5, %v6742_v7  ;;  %6569 = vrot.lane.b32.xlu1 %v13678_v27, %s10604_s15 }
 0x98a   : > { %7145 = vrot.lane.b32.xlu0 %v15914_v38, %s15866_s12  ;;  %v6493_v38 = vld [vmem:[#allocation2 + $0x156] sm:$0xff] }
 0x98b   : > { %v6935_v49 = vpop.permute.xlu1 %6934 }
 0x98c   : > { %7025 = vst.msk [vmem:[#allocation3 + $0x30] sm:$0xff] %vm7018_vm6, %v6935_v49  ;;  %v6744_v48 = vpop.permute.xlu0 %6743  ;;  %v7249_v22 = vld [vmem:[#allocation3 + $0x28] sm:$0xff] }
 0x98d   : > { %6833 = vst.msk [vmem:[#allocation3 + $0x38] sm:$0xff] %vm6825_vm5, %v6744_v48  ;;  %6185 = vrot.lane.b32.xlu1 %v13566_v31, %s10602_s14  ;;  %10400 = vmatmul.mubr.msk.f32.gmra.mrb[34].mxu1 %vm7286_vm8, %v7249_v22  ;;  %v6494_v22 = vld [vmem:[#allocation2 + $0x15e] sm:$0xff] }
 0x98e   : > { %6761 = vrot.lane.b32.xlu0 %v15915_v44, %s15912_s29 }
 0x98f   : > { %v6359_v20 = vpop.permute.xlu1 %6358 }
 0x990   : > { %6447 = vst.msk [vmem:[#allocation3 + $0x40] sm:$0xff] %vm6438_vm3, %v6359_v20  ;;  %v6168_v27 = vpop.permute.xlu0 %6167 }
 0x991   : > { %6255 = vst.msk [vmem:[#allocation3 + $0x48] sm:$0xff] %vm6245_vm2, %v6168_v27  ;;  %6954 = vrot.lane.b32.xlu1 %v14009_v29, %s10605_s30 }
 0x992   : > { %6763 = vrot.lane.b32.xlu0 %v15916_v32, %s15912_s29 }
 0x993   : > { %v7128_v31 = vpop.permute.xlu1 %7127 }
 0x994   : > { %7218 = vst.msk [vmem:[#allocation3 + $0x30] sm:$0xff] %vm7211_vm7, %v7128_v31  ;;  %v6937_v28 = vpop.permute.xlu0 %6936 }
 0x995   : > { %7026 = vst.msk [vmem:[#allocation3 + $0x38] sm:$0xff] %vm7018_vm6, %v6937_v28  ;;  %6378 = vrot.lane.b32.xlu1 %v6296_v56, %s15911_s22  ;;  %v14141_v56 = vld [vmem:[#allocation2 + $0x19b] sm:$0xff] }
 0x996   : > { %6187 = vrot.lane.b32.xlu0 %v13559_v12, %s10602_s14 }
 0x997   : > { %v6552_v30 = vpop.permute.xlu1 %6551 }
 0x998   : > { %6640 = vst.msk [vmem:[#allocation3 + $0x40] sm:$0xff] %vm6631_vm4, %v6552_v30  ;;  %v6361_v16 = vpop.permute.xlu0 %6360  ;;  %v14146_v30 = vld [vmem:[#allocation2 + $0x1a0] sm:$0xff] }
 0x999   : > { %6448 = vst.msk [vmem:[#allocation3 + $0x48] sm:$0xff] %vm6438_vm3, %v6361_v16  ;;  %7147 = vrot.lane.b32.xlu1 %v15917_v54, %s15866_s12 }
 0x99a   : > { %6956 = vrot.lane.b32.xlu0 %v14025_v2, %s10605_s30 }
 0x99b   : > { %v6554_v5 = vpop.permute.xlu1 %6553  ;;  %v7250_v55 = vld [vmem:[#allocation3 + $0x30] sm:$0xff] }
 0x99c   : > { %6641 = vst.msk [vmem:[#allocation3 + $0x48] sm:$0xff] %vm6631_vm4, %v6554_v5  ;;  %10402 = vmatprep.mubr.msk.f32.mxu1 %vm7286_vm8, %v7250_v55  ;;  %v7130_v12 = vpop.permute.xlu0 %7129  ;;  %v14157_v55 = vld [vmem:[#allocation2 + $0x19e] sm:$0xff] }
 0x99d   : > { %7219 = vst.msk [vmem:[#allocation3 + $0x38] sm:$0xff] %vm7211_vm7, %v7130_v12  ;;  %6571 = vrot.lane.b32.xlu1 %v6489_v37, %s10604_s15  ;;  %v14162_v12 = vld [vmem:[#allocation2 + $0x1a3] sm:$0xff] }
 0x99e   : > { %6380 = vrot.lane.b32.xlu0 %v6297_v53, %s15911_s22 }
 0x99f   : > { %v6170_v34 = vpop.permute.xlu1 %6169 }
 0x9a0   : > { %6256 = vst.msk [vmem:[#allocation3 + $0x50] sm:$0xff] %vm6245_vm2, %v6170_v34  ;;  %v6746_v35 = vpop.permute.xlu0 %6745 }
 0x9a1   : > { %6834 = vst.msk [vmem:[#allocation3 + $0x40] sm:$0xff] %vm6825_vm5, %v6746_v35  ;;  %6573 = vrot.lane.b32.xlu1 %v6490_v24, %s10604_s15 }
 0x9a2   : > { %7149 = vrot.lane.b32.xlu0 %v15918_v23, %s15866_s12  ;;  %v14177_v23 = vld [vmem:[#allocation2 + $0x1a6] sm:$0xff] }
 0x9a3   : > { %v6939_v9 = vpop.permute.xlu1 %6938 }
 0x9a4   : > { %7027 = vst.msk [vmem:[#allocation3 + $0x40] sm:$0xff] %vm7018_vm6, %v6939_v9  ;;  %v6748_v18 = vpop.permute.xlu0 %6747  ;;  %v7251_v0 = vld [vmem:[#allocation3 + $0x38] sm:$0xff] }
 0x9a5   : > { %6835 = vst.msk [vmem:[#allocation3 + $0x48] sm:$0xff] %vm6825_vm5, %v6748_v18  ;;  %6189 = vrot.lane.b32.xlu1 %v13578_v51, %s10602_s14  ;;  %10403 = vmatmul.mubr.msk.f32.gmra.mrb[36].mxu1 %vm7286_vm8, %v7251_v0 }
 0x9a6   : > { %6765 = vrot.lane.b32.xlu0 %v15919_v26, %s15912_s29 }
 0x9a7   : > { %v6363_v36 = vpop.permute.xlu1 %6362 }
 0x9a8   : > { %6449 = vst.msk [vmem:[#allocation3 + $0x50] sm:$0xff] %vm6438_vm3, %v6363_v36  ;;  %v6172_v58 = vpop.permute.xlu0 %6171 }
 0x9a9   : > { %6257 = vst.msk [vmem:[#allocation3 + $0x58] sm:$0xff] %vm6245_vm2, %v6172_v58  ;;  %6958 = vrot.lane.b32.xlu1 %v14047_v17, %s10605_s30 }
 0x9aa   : > { %6767 = vrot.lane.b32.xlu0 %v15920_v1, %s15912_s29 }
 0x9ab   : > { %v7132_v51 = vpop.permute.xlu1 %7131 }
 0x9ac   : > { %7220 = vst.msk [vmem:[#allocation3 + $0x40] sm:$0xff] %vm7211_vm7, %v7132_v51  ;;  %v6941_v21 = vpop.permute.xlu0 %6940 }
 0x9ad   : > { %7028 = vst.msk [vmem:[#allocation3 + $0x48] sm:$0xff] %vm7018_vm6, %v6941_v21  ;;  %6382 = vrot.lane.b32.xlu1 %v13969_v15, %s15911_s22  ;;  %v14088_v15 = vld [vmem:[#allocation2 + $0x180] sm:$0xff] }
 0x9ae   : > { %6191 = vrot.lane.b32.xlu0 %v13572_v61, %s10602_s14 }
 0x9af   : > { %v6556_v50 = vpop.permute.xlu1 %6555 }
 0x9b0   : > { %6642 = vst.msk [vmem:[#allocation3 + $0x50] sm:$0xff] %vm6631_vm4, %v6556_v50  ;;  %v6365_v47 = vpop.permute.xlu0 %6364 }
 0x9b1   : > { %6450 = vst.msk [vmem:[#allocation3 + $0x58] sm:$0xff] %vm6438_vm3, %v6365_v47  ;;  %7151 = vrot.lane.b32.xlu1 %v14061_v6, %s15866_s12 }
 0x9b2   : > { %6960 = vrot.lane.b32.xlu0 %v14066_v62, %s10605_s30 }
 0x9b3   : > { %v6558_v60 = vpop.permute.xlu1 %6557  ;;  %v7252_v33 = vld [vmem:[#allocation3 + $0x40] sm:$0xff] }
 0x9b4   : > { %6643 = vst.msk [vmem:[#allocation3 + $0x58] sm:$0xff] %vm6631_vm4, %v6558_v60  ;;  %10405 = vmatprep.mubr.msk.f32.mxu1 %vm7286_vm8, %v7252_v33  ;;  %v7134_v61 = vpop.permute.xlu0 %7133 }
 0x9b5   : > { %7221 = vst.msk [vmem:[#allocation3 + $0x48] sm:$0xff] %vm7211_vm7, %v7134_v61  ;;  %6575 = vrot.lane.b32.xlu1 %v6491_v43, %s10604_s15 }
 0x9b6   : > { %6384 = vrot.lane.b32.xlu0 %v13985_v45, %s15911_s22 }
 0x9b7   : > { %v6174_v59 = vpop.permute.xlu1 %6173 }
 0x9b8   : > { %6258 = vst.msk [vmem:[#allocation3 + $0x60] sm:$0xff] %vm6245_vm2, %v6174_v59  ;;  %v6750_v39 = vpop.permute.xlu0 %6749 }
 0x9b9   : > { %6836 = vst.msk [vmem:[#allocation3 + $0x50] sm:$0xff] %vm6825_vm5, %v6750_v39  ;;  %6577 = vrot.lane.b32.xlu1 %v6492_v52, %s10604_s15  ;;  %v14227_v39 = vld [vmem:[#allocation2 + $0x1be] sm:$0xff] }
 0x9ba   : > { %7153 = vrot.lane.b32.xlu0 %v14079_v3, %s15866_s12 }
 0x9bb   : > { %v6943_v57 = vpop.permute.xlu1 %6942 }
 0x9bc   : > { %7029 = vst.msk [vmem:[#allocation3 + $0x50] sm:$0xff] %vm7018_vm6, %v6943_v57  ;;  %v6752_v41 = vpop.permute.xlu0 %6751  ;;  %v7253_v42 = vld [vmem:[#allocation3 + $0x48] sm:$0xff] }
 0x9bd   : > { %6837 = vst.msk [vmem:[#allocation3 + $0x58] sm:$0xff] %vm6825_vm5, %v6752_v41  ;;  %6193 = vrot.lane.b32.xlu1 %v15915_v44, %s10602_s14  ;;  %10406 = vmatmul.mubr.msk.f32.gmra.mrb[38].mxu1 %vm7286_vm8, %v7253_v42  ;;  %v14127_v44 = vld [vmem:[#allocation2 + $0x18e] sm:$0xff] }
 0x9be   : > { %6769 = vrot.lane.b32.xlu0 %v14088_v15, %s15912_s29  ;;  %v6884_v42 = vld [vmem:[#allocation2 + $0x1cb] sm:$0xff] }
 0x9bf   : > { %v6367_v11 = vpop.permute.xlu1 %6366 }
 0x9c0   : > { %6451 = vst.msk [vmem:[#allocation3 + $0x60] sm:$0xff] %vm6438_vm3, %v6367_v11  ;;  %v6176_v10 = vpop.permute.xlu0 %6175  ;;  %v6692_v11 = vld [vmem:[#allocation2 + $0x1d0] sm:$0xff] }
 0x9c1   : > { %6259 = vst.msk [vmem:[#allocation3 + $0x68] sm:$0xff] %vm6245_vm2, %v6176_v10  ;;  %6962 = vrot.lane.b32.xlu1 %v14093_v13, %s10605_s30 }
 0x9c2   : > { %6771 = vrot.lane.b32.xlu0 %v14098_v46, %s15912_s29 }
 0x9c3   : > { %v7136_v14 = vpop.permute.xlu1 %7135 }
 0x9c4   : > { %7222 = vst.msk [vmem:[#allocation3 + $0x50] sm:$0xff] %vm7211_vm7, %v7136_v14  ;;  %v6945_v40 = vpop.permute.xlu0 %6944  ;;  %v7077_v14 = vld [vmem:[#allocation2 + $0x1ce] sm:$0xff] }
 0x9c5   : > { %7030 = vst.msk [vmem:[#allocation3 + $0x58] sm:$0xff] %vm7018_vm6, %v6945_v40  ;;  %6386 = vrot.lane.b32.xlu1 %v14009_v29, %s15911_s22 }
 0x9c6   : > { %6195 = vrot.lane.b32.xlu0 %v15916_v32, %s10602_s14  ;;  %v14136_v32 = vld [vmem:[#allocation2 + $0x198] sm:$0xff] }
 0x9c7   : > { %v6560_v45 = vpop.permute.xlu1 %6559 }
 0x9c8   : > { %6644 = vst.msk [vmem:[#allocation3 + $0x60] sm:$0xff] %vm6631_vm4, %v6560_v45  ;;  %v6369_v19 = vpop.permute.xlu0 %6368  ;;  %v6885_v45 = vld [vmem:[#allocation2 + $0x1d3] sm:$0xff] }
 0x9c9   : > { %6452 = vst.msk [vmem:[#allocation3 + $0x68] sm:$0xff] %vm6438_vm3, %v6369_v19  ;;  %7155 = vrot.lane.b32.xlu1 %v14109_v8, %s15866_s12 }
 0x9ca   : > { %6964 = vrot.lane.b32.xlu0 %v14114_v25, %s10605_s30 }
 0x9cb   : > { %v6562_v4 = vpop.permute.xlu1 %6561  ;;  %v7254_v63 = vld [vmem:[#allocation3 + $0x50] sm:$0xff] }
 0x9cc   : > { %6645 = vst.msk [vmem:[#allocation3 + $0x68] sm:$0xff] %vm6631_vm4, %v6562_v4  ;;  %10408 = vmatprep.mubr.msk.f32.mxu1 %vm7286_vm8, %v7254_v63  ;;  %v7138_v7 = vpop.permute.xlu0 %7137 }
 0x9cd   : > { %7223 = vst.msk [vmem:[#allocation3 + $0x58] sm:$0xff] %vm7211_vm7, %v7138_v7  ;;  %6579 = vrot.lane.b32.xlu1 %v6493_v38, %s10604_s15  ;;  %v7078_v7 = vld [vmem:[#allocation2 + $0x1d6] sm:$0xff] }
 0x9ce   : > { %6388 = vrot.lane.b32.xlu0 %v14025_v2, %s15911_s22 }
 0x9cf   : > { %v6178_v49 = vpop.permute.xlu1 %6177 }
 0x9d0   : > { %6260 = vst.msk [vmem:[#allocation3 + $0x70] sm:$0xff] %vm6245_vm2, %v6178_v49  ;;  %v6754_v48 = vpop.permute.xlu0 %6753 }
 0x9d1   : > { %6838 = vst.msk [vmem:[#allocation3 + $0x60] sm:$0xff] %vm6825_vm5, %v6754_v48  ;;  %6581 = vrot.lane.b32.xlu1 %v6494_v22, %s10604_s15  ;;  %v6693_v48 = vld [vmem:[#allocation2 + $0x1e0] sm:$0xff] }
 0x9d2   : > { %7157 = vrot.lane.b32.xlu0 %v14127_v44, %s15866_s12 }
 0x9d3   : > { %v6947_v20 = vpop.permute.xlu1 %6946 }
 0x9d4   : > { %7031 = vst.msk [vmem:[#allocation3 + $0x60] sm:$0xff] %vm7018_vm6, %v6947_v20  ;;  %v6756_v27 = vpop.permute.xlu0 %6755  ;;  %v7255_v29 = vld [vmem:[#allocation3 + $0x58] sm:$0xff] }
 0x9d5   : > { %6839 = vst.msk [vmem:[#allocation3 + $0x68] sm:$0xff] %vm6825_vm5, %v6756_v27  ;;  %6197 = vrot.lane.b32.xlu1 %v15919_v26, %s10602_s14  ;;  %10409 = vmatmul.mubr.msk.f32.gmra.mrb[40].mxu1 %vm7286_vm8, %v7255_v29  ;;  %v14186_v26 = vld [vmem:[#allocation2 + $0x1b0] sm:$0xff]  ;;  %v6886_v20 = vld [vmem:[#allocation2 + $0x1e3] sm:$0xff] }
 0x9d6   : > { %6773 = vrot.lane.b32.xlu0 %v14136_v32, %s15912_s29  ;;  %v6694_v29 = vld [vmem:[#allocation2 + $0x1e8] sm:$0xff] }
 0x9d7   : > { %v6371_v31 = vpop.permute.xlu1 %6370 }
 0x9d8   : > { %6453 = vst.msk [vmem:[#allocation3 + $0x70] sm:$0xff] %vm6438_vm3, %v6371_v31  ;;  %v6180_v28 = vpop.permute.xlu0 %6179 }
 0x9d9   : > { %6261 = vst.msk [vmem:[#allocation3 + $0x78] sm:$0xff] %vm6245_vm2, %v6180_v28  ;;  %6966 = vrot.lane.b32.xlu1 %v14141_v56, %s10605_s30 }
 0x9da   : > { %6775 = vrot.lane.b32.xlu0 %v14146_v30, %s15912_s29 }
 0x9db   : > { %v7140_v16 = vpop.permute.xlu1 %7139 }
 0x9dc   : > { %7224 = vst.msk [vmem:[#allocation3 + $0x60] sm:$0xff] %vm7211_vm7, %v7140_v16  ;;  %v6949_v54 = vpop.permute.xlu0 %6948 }
 0x9dd   : > { %7032 = vst.msk [vmem:[#allocation3 + $0x68] sm:$0xff] %vm7018_vm6, %v6949_v54  ;;  %6390 = vrot.lane.b32.xlu1 %v14047_v17, %s15911_s22  ;;  %v14191_v17 = vld [vmem:[#allocation2 + $0x1b3] sm:$0xff] }
 0x9de   : > { %6199 = vrot.lane.b32.xlu0 %v15920_v1, %s10602_s14  ;;  %v14196_v1 = vld [vmem:[#allocation2 + $0x1b8] sm:$0xff] }
 0x9df   : > { %v6564_v2 = vpop.permute.xlu1 %6563 }
 0x9e0   : > { %6646 = vst.msk [vmem:[#allocation3 + $0x70] sm:$0xff] %vm6631_vm4, %v6564_v2  ;;  %v6373_v5 = vpop.permute.xlu0 %6372 }
 0x9e1   : > { %6454 = vst.msk [vmem:[#allocation3 + $0x78] sm:$0xff] %vm6438_vm3, %v6373_v5  ;;  %7159 = vrot.lane.b32.xlu1 %v14157_v55, %s15866_s12 }
 0x9e2   : > { %6968 = vrot.lane.b32.xlu0 %v14162_v12, %s10605_s30 }
 0x9e3   : > { %v6566_v37 = vpop.permute.xlu1 %6565  ;;  %v7256_v53 = vld [vmem:[#allocation3 + $0x60] sm:$0xff] }
 0x9e4   : > { %6647 = vst.msk [vmem:[#allocation3 + $0x78] sm:$0xff] %vm6631_vm4, %v6566_v37  ;;  %10411 = vmatprep.mubr.msk.f32.mxu1 %vm7286_vm8, %v7256_v53  ;;  %v7142_v34 = vpop.permute.xlu0 %7141  ;;  %v6279_v37 = vld [vmem:[#allocation2 + $0x53] sm:$0xff] }
 0x9e5   : > { %7225 = vst.msk [vmem:[#allocation3 + $0x68] sm:$0xff] %vm7211_vm7, %v7142_v34  ;;  %6583 = vrot.lane.b32.xlu1 %v14061_v6, %s10604_s15  ;;  %v14207_v6 = vld [vmem:[#allocation2 + $0x1b6] sm:$0xff] }
 0x9e6   : > { %6392 = vrot.lane.b32.xlu0 %v14066_v62, %s15911_s22  ;;  %v14212_v62 = vld [vmem:[#allocation2 + $0x1bb] sm:$0xff] }
 0x9e7   : > { %v6182_v35 = vpop.permute.xlu1 %6181 }
 0x9e8   : > { %6262 = vst.msk [vmem:[#allocation3 + $0x80] sm:$0xff] %vm6245_vm2, %v6182_v35  ;;  %v6758_v24 = vpop.permute.xlu0 %6757  ;;  %v6471_v35 = vld [vmem:[#allocation2 + $0x4e] sm:$0xff] }
 0x9e9   : > { %6840 = vst.msk [vmem:[#allocation3 + $0x70] sm:$0xff] %vm6825_vm5, %v6758_v24  ;;  %6585 = vrot.lane.b32.xlu1 %v14079_v3, %s10604_s15  ;;  %v6691_v3 = vld [vmem:[#allocation2 + $0x1c8] sm:$0xff] }
 0x9ea   : > { %7161 = vrot.lane.b32.xlu0 %v14177_v23, %s15866_s12  ;;  %v7080_v24 = vld [vmem:[#allocation2 + $0x1ee] sm:$0xff] }
 0x9eb   : > { %v6951_v9 = vpop.permute.xlu1 %6950 }
 0x9ec   : > { %7033 = vst.msk [vmem:[#allocation3 + $0x70] sm:$0xff] %vm7018_vm6, %v6951_v9  ;;  %v6760_v18 = vpop.permute.xlu0 %6759  ;;  %v7257_v0 = vld [vmem:[#allocation3 + $0x68] sm:$0xff] }
 0x9ed   : > { %6841 = vst.msk [vmem:[#allocation3 + $0x78] sm:$0xff] %vm6825_vm5, %v6760_v18  ;;  %6201 = vrot.lane.b32.xlu1 %v14088_v15, %s10602_s14  ;;  %10412 = vmatmul.mubr.msk.f32.gmra.mrb[42].mxu1 %vm7286_vm8, %v7257_v0 }
 0x9ee   : > { %6777 = vrot.lane.b32.xlu0 %v14186_v26, %s15912_s29 }
 0x9ef   : > { %v6375_v36 = vpop.permute.xlu1 %6374 }
 0x9f0   : > { %6455 = vst.msk [vmem:[#allocation3 + $0x80] sm:$0xff] %vm6438_vm3, %v6375_v36  ;;  %v6184_v58 = vpop.permute.xlu0 %6183  ;;  %v6472_v36 = vld [vmem:[#allocation2 + $0x56] sm:$0xff] }
 0x9f1   : > { %6263 = vst.msk [vmem:[#allocation3 + $0x88] sm:$0xff] %vm6245_vm2, %v6184_v58  ;;  %6970 = vrot.lane.b32.xlu1 %v14191_v17, %s10605_s30  ;;  %v6695_v58 = vld [vmem:[#allocation2 + $0x1f8] sm:$0xff] }
 0x9f2   : > { %6779 = vrot.lane.b32.xlu0 %v14196_v1, %s15912_s29 }
 0x9f3   : > { %v7144_v51 = vpop.permute.xlu1 %7143 }
 0x9f4   : > { %7226 = vst.msk [vmem:[#allocation3 + $0x70] sm:$0xff] %vm7211_vm7, %v7144_v51  ;;  %v6953_v21 = vpop.permute.xlu0 %6952  ;;  %v6665_v51 = vld [vmem:[#allocation2 + $0x90] sm:$0xff] }
 0x9f5   : > { %7034 = vst.msk [vmem:[#allocation3 + $0x78] sm:$0xff] %vm7018_vm6, %v6953_v21  ;;  %6394 = vrot.lane.b32.xlu1 %v14093_v13, %s15911_s22  ;;  %v6696_v21 = vld [vmem:[#allocation2 + $0x200] sm:$0xff] }
 0x9f6   : > { %6203 = vrot.lane.b32.xlu0 %v14098_v46, %s10602_s14 }
 0x9f7   : > { %v6568_v50 = vpop.permute.xlu1 %6567 }
 0x9f8   : > { %6648 = vst.msk [vmem:[#allocation3 + $0x80] sm:$0xff] %vm6631_vm4, %v6568_v50  ;;  %v6377_v47 = vpop.permute.xlu0 %6376 }
 0x9f9   : > { %6456 = vst.msk [vmem:[#allocation3 + $0x88] sm:$0xff] %vm6438_vm3, %v6377_v47  ;;  %7163 = vrot.lane.b32.xlu1 %v14207_v6, %s15866_s12 }
 0x9fa   : > { %6972 = vrot.lane.b32.xlu0 %v14212_v62, %s10605_s30 }
 0x9fb   : > { %v6570_v60 = vpop.permute.xlu1 %6569  ;;  %v7258_v33 = vld [vmem:[#allocation3 + $0x70] sm:$0xff] }
 0x9fc   : > { %6649 = vst.msk [vmem:[#allocation3 + $0x88] sm:$0xff] %vm6631_vm4, %v6570_v60  ;;  %10414 = vmatprep.mubr.msk.f32.mxu1 %vm7286_vm8, %v7258_v33  ;;  %v7146_v61 = vpop.permute.xlu0 %7145 }
 0x9fd   : > { %7227 = vst.msk [vmem:[#allocation3 + $0x78] sm:$0xff] %vm7211_vm7, %v7146_v61  ;;  %6587 = vrot.lane.b32.xlu1 %v14109_v8, %s10604_s15 }
 0x9fe   : > { %6396 = vrot.lane.b32.xlu0 %v14114_v25, %s15911_s22 }
 0x9ff   : > { %v6186_v43 = vpop.permute.xlu1 %6185 }
 0xa00   : > { %6264 = vst.msk [vmem:[#allocation3 + $0x90] sm:$0xff] %vm6245_vm2, %v6186_v43  ;;  %v6762_v59 = vpop.permute.xlu0 %6761  ;;  %v6858_v43 = vld [vmem:[#allocation2 + $0x93] sm:$0xff] }
 0xa01   : > { %6842 = vst.msk [vmem:[#allocation3 + $0x80] sm:$0xff] %vm6825_vm5, %v6762_v59  ;;  %6589 = vrot.lane.b32.xlu1 %v14127_v44, %s10604_s15  ;;  %v6889_v59 = vld [vmem:[#allocation2 + $0x203] sm:$0xff] }
 0xa02   : > { %7165 = vrot.lane.b32.xlu0 %v14227_v39, %s15866_s12 }
 0xa03   : > { %v6955_v52 = vpop.permute.xlu1 %6954 }
 0xa04   : > { %7035 = vst.msk [vmem:[#allocation3 + $0x80] sm:$0xff] %vm7018_vm6, %v6955_v52  ;;  %v6764_v57 = vpop.permute.xlu0 %6763  ;;  %v7259_v41 = vld [vmem:[#allocation3 + $0x78] sm:$0xff] }
 0xa05   : > { %6843 = vst.msk [vmem:[#allocation3 + $0x88] sm:$0xff] %vm6825_vm5, %v6764_v57  ;;  %6205 = vrot.lane.b32.xlu1 %v14136_v32, %s10602_s14  ;;  %10415 = vmatmul.mubr.msk.f32.gmra.mrb[44].mxu1 %vm7286_vm8, %v7259_v41  ;;  %v6859_v41 = vld [vmem:[#allocation2 + $0x9b] sm:$0xff] }
 0xa06   : > { %6781 = vrot.lane.b32.xlu0 %v6691_v3, %s15912_s29 }
 0xa07   : > { %v6379_v15 = vpop.permute.xlu1 %6378 }
 0xa08   : > { %6457 = vst.msk [vmem:[#allocation3 + $0x90] sm:$0xff] %vm6438_vm3, %v6379_v15  ;;  %v6188_v10 = vpop.permute.xlu0 %6187 }
 0xa09   : > { %6265 = vst.msk [vmem:[#allocation3 + $0x98] sm:$0xff] %vm6245_vm2, %v6188_v10  ;;  %6974 = vrot.lane.b32.xlu1 %v6884_v42, %s10605_s30  ;;  %v7081_v42 = vld [vmem:[#allocation2 + $0x1fe] sm:$0xff] }
 0xa0a   : > { %6783 = vrot.lane.b32.xlu0 %v6692_v11, %s15912_s29  ;;  %v14326_v11 = vld [vmem:[%s15683_s8] ss:$0 sm:$0xff] }
 0xa0b   : > { %v7148_v13 = vpop.permute.xlu1 %7147 }
 0xa0c   : > { %7228 = vst.msk [vmem:[#allocation3 + $0x80] sm:$0xff] %vm7211_vm7, %v7148_v13  ;;  %v6957_v46 = vpop.permute.xlu0 %6956 }
 0xa0d   : > { %7036 = vst.msk [vmem:[#allocation3 + $0x88] sm:$0xff] %vm7018_vm6, %v6957_v46  ;;  %6398 = vrot.lane.b32.xlu1 %v14141_v56, %s15911_s22  ;;  %v6278_v56 = vld [vmem:[#allocation2 + $0x4b] sm:$0xff]  ;;  %v7051_v46 = vld [vmem:[#allocation2 + $0x96] sm:$0xff] }
 0xa0e   : > { %6207 = vrot.lane.b32.xlu0 %v14146_v30, %s10602_s14  ;;  %v6887_v30 = vld [vmem:[#allocation2 + $0x1eb] sm:$0xff] }
 0xa0f   : > { %v6572_v40 = vpop.permute.xlu1 %6571 }
 0xa10   : > { %6650 = vst.msk [vmem:[#allocation3 + $0x90] sm:$0xff] %vm6631_vm4, %v6572_v40  ;;  %v6381_v19 = vpop.permute.xlu0 %6380 }
 0xa11   : > { %6458 = vst.msk [vmem:[#allocation3 + $0x98] sm:$0xff] %vm6438_vm3, %v6381_v19  ;;  %7167 = vrot.lane.b32.xlu1 %v7077_v14, %s15866_s12  ;;  %v7082_v14 = vld [vmem:[#allocation2 + $0x206] sm:$0xff] }
 0xa12   : > { %6976 = vrot.lane.b32.xlu0 %v6885_v45, %s10605_s30 }
 0xa13   : > { %v6574_v8 = vpop.permute.xlu1 %6573  ;;  %v7260_v25 = vld [vmem:[#allocation3 + $0x80] sm:$0xff] }
 0xa14   : > { %6651 = vst.msk [vmem:[#allocation3 + $0x98] sm:$0xff] %vm6631_vm4, %v6574_v8  ;;  %10417 = vmatprep.mubr.msk.f32.mxu1 %vm7286_vm8, %v7260_v25  ;;  %v7150_v4 = vpop.permute.xlu0 %7149  ;;  %v7052_v8 = vld [vmem:[#allocation2 + $0x9e] sm:$0xff] }
 0xa15   : > { %7229 = vst.msk [vmem:[#allocation3 + $0x88] sm:$0xff] %vm7211_vm7, %v7150_v4  ;;  %6591 = vrot.lane.b32.xlu1 %v14157_v55, %s10604_s15  ;;  %v7079_v55 = vld [vmem:[#allocation2 + $0x1e6] sm:$0xff] }
 0xa16   : > { %6400 = vrot.lane.b32.xlu0 %v14162_v12, %s15911_s22 }
 0xa17   : > { %v6190_v63 = vpop.permute.xlu1 %6189 }
 0xa18   : > { %6266 = vst.msk [vmem:[#allocation3 + $0xa0] sm:$0xff] %vm6245_vm2, %v6190_v63  ;;  %v6766_v38 = vpop.permute.xlu0 %6765 }
 0xa19   : > { %6844 = vst.msk [vmem:[#allocation3 + $0x90] sm:$0xff] %vm6825_vm5, %v6766_v38  ;;  %6593 = vrot.lane.b32.xlu1 %v14177_v23, %s10604_s15 }
 0xa1a   : > { %7169 = vrot.lane.b32.xlu0 %v7078_v7, %s15866_s12 }
 0xa1b   : > { %v6959_v49 = vpop.permute.xlu1 %6958 }
 0xa1c   : > { %7037 = vst.msk [vmem:[#allocation3 + $0x90] sm:$0xff] %vm7018_vm6, %v6959_v49  ;;  %v6768_v22 = vpop.permute.xlu0 %6767  ;;  %v7261_v44 = vld [vmem:[#allocation3 + $0x88] sm:$0xff] }
 0xa1d   : > { %6845 = vst.msk [vmem:[#allocation3 + $0x98] sm:$0xff] %vm6825_vm5, %v6768_v22  ;;  %6209 = vrot.lane.b32.xlu1 %v14186_v26, %s10602_s14  ;;  %10418 = vmatmul.mubr.msk.f32.gmra.mrb[46].mxu1 %vm7286_vm8, %v7261_v44 }
 0xa1e   : > { %6785 = vrot.lane.b32.xlu0 %v6693_v48, %s15912_s29 }
 0xa1f   : > { %v6383_v27 = vpop.permute.xlu1 %6382 }
 0xa20   : > { %6459 = vst.msk [vmem:[#allocation3 + $0xa0] sm:$0xff] %vm6438_vm3, %v6383_v27  ;;  %v6192_v32 = vpop.permute.xlu0 %6191 }
 0xa21   : > { %6267 = vst.msk [vmem:[#allocation3 + $0xa8] sm:$0xff] %vm6245_vm2, %v6192_v32  ;;  %6978 = vrot.lane.b32.xlu1 %v6886_v20, %s10605_s30 }
 0xa22   : > { %6787 = vrot.lane.b32.xlu0 %v6694_v29, %s15912_s29 }
 0xa23   : > { %v7152_v31 = vpop.permute.xlu1 %7151 }
 0xa24   : > { %7230 = vst.msk [vmem:[#allocation3 + $0x90] sm:$0xff] %vm7211_vm7, %v7152_v31  ;;  %v6961_v28 = vpop.permute.xlu0 %6960 }
 0xa25   : > { %7038 = vst.msk [vmem:[#allocation3 + $0x98] sm:$0xff] %vm7018_vm6, %v6961_v28  ;;  %6342 = vrot.lane.b32.xlu1 %v6278_v56, %s15911_s22 }
 0xa26   : > { %6211 = vrot.lane.b32.xlu0 %v14196_v1, %s10602_s14 }
 0xa27   : > { %v6576_v16 = vpop.permute.xlu1 %6575 }
 0xa28   : > { %6652 = vst.msk [vmem:[#allocation3 + $0xa0] sm:$0xff] %vm6631_vm4, %v6576_v16  ;;  %v6385_v54 = vpop.permute.xlu0 %6384 }
 0xa29   : > { %6460 = vst.msk [vmem:[#allocation3 + $0xa8] sm:$0xff] %vm6438_vm3, %v6385_v54  ;;  %6980 = vrot.lane.b32.xlu1 %v6887_v30, %s10605_s30 }
 0xa2a   : > { %6402 = vrot.lane.b32.xlu0 %v14191_v17, %s15911_s22 }
 0xa2b   : > { %v6578_v2 = vpop.permute.xlu1 %6577  ;;  %v7262_v5 = vld [vmem:[#allocation3 + $0x90] sm:$0xff] }
 0xa2c   : > { %6653 = vst.msk [vmem:[#allocation3 + $0xa8] sm:$0xff] %vm6631_vm4, %v6578_v2  ;;  %10420 = vmatprep.mubr.msk.f32.mxu1 %vm7286_vm8, %v7262_v5  ;;  %v7154_v12 = vpop.permute.xlu0 %7153 }
 0xa2d   : > { %7231 = vst.msk [vmem:[#allocation3 + $0x98] sm:$0xff] %vm7211_vm7, %v7154_v12  ;;  %6344 = vrot.lane.b32.xlu1 %v6279_v37, %s15911_s22 }
 0xa2e   : > { %7171 = vrot.lane.b32.xlu0 %v7079_v55, %s15866_s12 }
 0xa2f   : > { %v6194_v53 = vpop.permute.xlu1 %6193 }
 0xa30   : > { %6268 = vst.msk [vmem:[#allocation3 + $0xb0] sm:$0xff] %vm6245_vm2, %v6194_v53  ;;  %v6770_v34 = vpop.permute.xlu0 %6769 }
 0xa31   : > { %6846 = vst.msk [vmem:[#allocation3 + $0xa0] sm:$0xff] %vm6825_vm5, %v6770_v34  ;;  %6535 = vrot.lane.b32.xlu1 %v6471_v35, %s10604_s15 }
 0xa32   : > { %6404 = vrot.lane.b32.xlu0 %v14212_v62, %s15911_s22  ;;  %v6888_v62 = vld [vmem:[#allocation2 + $0x1fb] sm:$0xff] }
 0xa33   : > { %v6963_v23 = vpop.permute.xlu1 %6962 }
 0xa34   : > { %7039 = vst.msk [vmem:[#allocation3 + $0xa0] sm:$0xff] %vm7018_vm6, %v6963_v23  ;;  %v6772_v9 = vpop.permute.xlu0 %6771  ;;  %v7263_v18 = vld [vmem:[#allocation3 + $0x98] sm:$0xff] }
 0xa35   : > { %6847 = vst.msk [vmem:[#allocation3 + $0xa8] sm:$0xff] %vm6825_vm5, %v6772_v9  ;;  %7173 = vrot.lane.b32.xlu1 %v7080_v24, %s15866_s12  ;;  %10421 = vmatmul.mubr.msk.f32.gmra.mrb[48].mxu1 %vm7286_vm8, %v7263_v18 }
 0xa36   : > { %6595 = vrot.lane.b32.xlu0 %v14207_v6, %s10604_s15  ;;  %v6666_v6 = vld [vmem:[#allocation2 + $0x98] sm:$0xff] }
 0xa37   : > { %v6387_v0 = vpop.permute.xlu1 %6386 }
 0xa38   : > { %6461 = vst.msk [vmem:[#allocation3 + $0xb0] sm:$0xff] %vm6438_vm3, %v6387_v0  ;;  %v6196_v26 = vpop.permute.xlu0 %6195 }
 0xa39   : > { %6269 = vst.msk [vmem:[#allocation3 + $0xb8] sm:$0xff] %vm6245_vm2, %v6196_v26  ;;  %6597 = vrot.lane.b32.xlu1 %v14227_v39, %s10604_s15 }
 0xa3a   : > { %6537 = vrot.lane.b32.xlu0 %v6472_v36, %s10604_s15 }
 0xa3b   : > { %v7156_v17 = vpop.permute.xlu1 %7155 }
 0xa3c   : > { %7232 = vst.msk [vmem:[#allocation3 + $0xa0] sm:$0xff] %vm7211_vm7, %v7156_v17  ;;  %v6965_v1 = vpop.permute.xlu0 %6964 }
 0xa3d   : > { %7040 = vst.msk [vmem:[#allocation3 + $0xa8] sm:$0xff] %vm7018_vm6, %v6965_v1  ;;  %6789 = vrot.lane.b32.xlu1 %v6695_v58, %s15912_s29 }
 0xa3e   : > { %6729 = vrot.lane.b32.xlu0 %v6665_v51, %s15912_s29 }
 0xa3f   : > { %v6580_v50 = vpop.permute.xlu1 %6579 }
 0xa40   : > { %6654 = vst.msk [vmem:[#allocation3 + $0xb0] sm:$0xff] %vm6631_vm4, %v6580_v50  ;;  %v6389_v47 = vpop.permute.xlu0 %6388 }
 0xa41   : > { %6462 = vst.msk [vmem:[#allocation3 + $0xb8] sm:$0xff] %vm6438_vm3, %v6389_v47  ;;  %6791 = vrot.lane.b32.xlu1 %v6696_v21, %s15912_s29 }
 0xa42   : > { %6731 = vrot.lane.b32.xlu0 %v6666_v6, %s15912_s29 }
 0xa43   : > { %v6582_v60 = vpop.permute.xlu1 %6581  ;;  %v7264_v33 = vld [vmem:[#allocation3 + $0xa0] sm:$0xff] }
 0xa44   : > { %6655 = vst.msk [vmem:[#allocation3 + $0xb8] sm:$0xff] %vm6631_vm4, %v6582_v60  ;;  %10423 = vmatprep.mubr.msk.f32.mxu1 %vm7286_vm8, %v7264_v33  ;;  %v7158_v61 = vpop.permute.xlu0 %7157 }
 0xa45   : > { %7233 = vst.msk [vmem:[#allocation3 + $0xa8] sm:$0xff] %vm7211_vm7, %v7158_v61  ;;  %6982 = vrot.lane.b32.xlu1 %v6888_v62, %s10605_s30 }
 0xa46   : > { %6922 = vrot.lane.b32.xlu0 %v6858_v43, %s10605_s30 }
 0xa47   : > { %v6198_v39 = vpop.permute.xlu1 %6197 }
 0xa48   : > { %6270 = vst.msk [vmem:[#allocation3 + $0xc0] sm:$0xff] %vm6245_vm2, %v6198_v39  ;;  %v14318_v52 = vpop.f32.mrb[32].mxu1  ;;  %v6774_v3 = vpop.permute.xlu0 %6773 }
 0xa49   : > { %6848 = vst.msk [vmem:[#allocation3 + $0xb0] sm:$0xff] %vm6825_vm5, %v6774_v3  ;;  %6984 = vrot.lane.b32.xlu1 %v6889_v59, %s10605_s30  ;;  %v7463_v57 = vpop.f32.mrb[33].mxu1 }
 0xa4a   : > { %6924 = vrot.lane.b32.xlu0 %v6859_v41, %s10605_s30  ;;  %v7464_v40 = vadd.f32 %v14326_v11, %v7463_v57  ;;  %s15633_s30 = scalar_lea.sflag [#allocation6], %s377_s25 }
 0xa4b   : > { %v6967_v15 = vpop.permute.xlu1 %6966 }
 0xa4c   : > { %7041 = vst.msk [vmem:[#allocation3 + $0xb0] sm:$0xff] %vm7018_vm6, %v6967_v15  ;;  %v6776_v10 = vpop.permute.xlu0 %6775  ;;  %v7265_v13 = vld [vmem:[#allocation3 + $0xa8] sm:$0xff]  ;;  %v7614_v25 = vmax.f32 %v7464_v40, 0.0 }
 0xa4d   : > { %6849 = vst.msk [vmem:[#allocation3 + $0xb8] sm:$0xff] %vm6825_vm5, %v6776_v10  ;;  %7175 = vrot.lane.b32.xlu1 %v7081_v42, %s15866_s12  ;;  %10424 = vmatmul.mubr.msk.f32.gmra.mrb[50].mxu1 %vm7286_vm8, %v7265_v13 }
 0xa4e   : > { %7115 = vrot.lane.b32.xlu0 %v7051_v46, %s15866_s12 }
 0xa4f   : > { %v6391_v45 = vpop.permute.xlu1 %6390 }
 0xa50   : > { %6463 = vst.msk [vmem:[#allocation3 + $0xc0] sm:$0xff] %vm6438_vm3, %v6391_v45  ;;  %v6200_v19 = vpop.permute.xlu0 %6199 }
 0xa51   : > { %6271 = vst.msk [vmem:[#allocation3 + $0xc8] sm:$0xff] %vm6245_vm2, %v6200_v19  ;;  %7177 = vrot.lane.b32.xlu1 %v7082_v14, %s15866_s12 }
 0xa52   : > { %7117 = vrot.lane.b32.xlu0 %v7052_v8, %s15866_s12  ;;  %s15591_s12 = scalar_lea.hbm %s15686_s11, %s10078_s16 }
 0xa53   : > { %v7160_v4 = vpop.permute.xlu1 %7159 }
 0xa54   : > { %7234 = vst.msk [vmem:[#allocation3 + $0xb0] sm:$0xff] %vm7211_vm7, %v7160_v4  ;;  %v6969_v63 = vpop.permute.xlu0 %6968 }
 0xa55   : > { %7042 = vst.msk [vmem:[#allocation3 + $0xb8] sm:$0xff] %vm7018_vm6, %v6969_v63  ;;  %7680 = vrot.lane.b32.xlu1 %v7614_v25, %s10604_s15 }
 0xa57   : > { %v6584_v7 = vpop.permute.xlu1 %6583 }
 0xa58   : > { %6656 = vst.msk [vmem:[#allocation3 + $0xc0] sm:$0xff] %vm6631_vm4, %v6584_v7  ;;  %v6393_v38 = vpop.permute.xlu0 %6392 }
 0xa59   : > { %6464 = vst.msk [vmem:[#allocation3 + $0xc8] sm:$0xff] %vm6438_vm3, %v6393_v38 }
 0xa5b   : > { %v6586_v49 = vpop.permute.xlu1 %6585  ;;  %v7266_v48 = vld [vmem:[#allocation3 + $0xb0] sm:$0xff] }
 0xa5c   : > { %6657 = vst.msk [vmem:[#allocation3 + $0xc8] sm:$0xff] %vm6631_vm4, %v6586_v49  ;;  %10426 = vmatprep.mubr.msk.f32.mxu1 %vm7286_vm8, %v7266_v48  ;;  %v7162_v22 = vpop.permute.xlu0 %7161 }
 0xa5d   : > { %7235 = vst.msk [vmem:[#allocation3 + $0xb8] sm:$0xff] %vm7211_vm7, %v7162_v22 }
 0xa5f   : > { %v6202_v44 = vpop.permute.xlu1 %6201 }
 0xa60   : > { %6272 = vst.msk [vmem:[#allocation3 + $0xd0] sm:$0xff] %vm6245_vm2, %v6202_v44  ;;  %v14347_v20 = vpop.f32.mrb[34].mxu1  ;;  %v6778_v27 = vpop.permute.xlu0 %6777 }
 0xa61   : > { %6850 = vst.msk [vmem:[#allocation3 + $0xc0] sm:$0xff] %vm6825_vm5, %v6778_v27  ;;  %v14350_v29 = vpop.f32.mrb[35].mxu1 }
 0xa63   : > { %v6971_v32 = vpop.permute.xlu1 %6970 }
 0xa64   : > { %7043 = vst.msk [vmem:[#allocation3 + $0xc0] sm:$0xff] %vm7018_vm6, %v6971_v32  ;;  %v6780_v31 = vpop.permute.xlu0 %6779  ;;  %v7267_v28 = vld [vmem:[#allocation3 + $0xb8] sm:$0xff] }
 0xa65   : > { %6851 = vst.msk [vmem:[#allocation3 + $0xc8] sm:$0xff] %vm6825_vm5, %v6780_v31  ;;  %10427 = vmatmul.mubr.msk.f32.gmra.mrb[52].mxu1 %vm7286_vm8, %v7267_v28 }
 0xa67   : > { %v6395_v56 = vpop.permute.xlu1 %6394 }
 0xa68   : > { %6465 = vst.msk [vmem:[#allocation3 + $0xd0] sm:$0xff] %vm6438_vm3, %v6395_v56  ;;  %v6204_v30 = vpop.permute.xlu0 %6203 }
 0xa69   : > { %6273 = vst.msk [vmem:[#allocation3 + $0xd8] sm:$0xff] %vm6245_vm2, %v6204_v30 }
 0xa6b   : > { %v7164_v16 = vpop.permute.xlu1 %7163 }
 0xa6c   : > { %7236 = vst.msk [vmem:[#allocation3 + $0xc0] sm:$0xff] %vm7211_vm7, %v7164_v16  ;;  %v6973_v54 = vpop.permute.xlu0 %6972 }
 0xa6d   : > { %7044 = vst.msk [vmem:[#allocation3 + $0xc8] sm:$0xff] %vm7018_vm6, %v6973_v54 }
 0xa6f   : > { %v6588_v2 = vpop.permute.xlu1 %6587 }
 0xa70   : > { %6658 = vst.msk [vmem:[#allocation3 + $0xd0] sm:$0xff] %vm6631_vm4, %v6588_v2  ;;  %v6397_v5 = vpop.permute.xlu0 %6396 }
 0xa71   : > { %6466 = vst.msk [vmem:[#allocation3 + $0xd8] sm:$0xff] %vm6438_vm3, %v6397_v5 }
 0xa73   : > { %v6590_v55 = vpop.permute.xlu1 %6589  ;;  %v7268_v12 = vld [vmem:[#allocation3 + $0xc0] sm:$0xff] }
 0xa74   : > { %6659 = vst.msk [vmem:[#allocation3 + $0xd8] sm:$0xff] %vm6631_vm4, %v6590_v55  ;;  %10429 = vmatprep.mubr.msk.f32.mxu1 %vm7286_vm8, %v7268_v12  ;;  %v7166_v37 = vpop.permute.xlu0 %7165 }
 0xa75   : > { %7237 = vst.msk [vmem:[#allocation3 + $0xc8] sm:$0xff] %vm7211_vm7, %v7166_v37 }
 0xa77   : > { %v6206_v53 = vpop.permute.xlu1 %6205 }
 0xa78   : > { %6274 = vst.msk [vmem:[#allocation3 + $0xe0] sm:$0xff] %vm6245_vm2, %v6206_v53  ;;  %v14365_v34 = vpop.f32.mrb[36].mxu1  ;;  %v6782_v35 = vpop.permute.xlu0 %6781 }
 0xa79   : > { %6852 = vst.msk [vmem:[#allocation3 + $0xd0] sm:$0xff] %vm6825_vm5, %v6782_v35  ;;  %v7483_v24 = vpop.f32.mrb[37].mxu1 }
 0xa7a   : > { %v7484_v23 = vadd.f32 %v14326_v11, %v7483_v24 }
 0xa7b   : > { %v6975_v9 = vpop.permute.xlu1 %6974 }
 0xa7c   : > { %v7618_v18 = vmax.f32 %v7484_v23, 0.0  ;;  %7045 = vst.msk [vmem:[#allocation3 + $0xd0] sm:$0xff] %vm7018_vm6, %v6975_v9  ;;  %v6784_v0 = vpop.permute.xlu0 %6783  ;;  %v7269_v26 = vld [vmem:[#allocation3 + $0xc8] sm:$0xff] }
 0xa7d   : > { %6853 = vst.msk [vmem:[#allocation3 + $0xd8] sm:$0xff] %vm6825_vm5, %v6784_v0  ;;  %10430 = vmatmul.mubr.msk.f32.gmra.mrb[54].mxu1 %vm7286_vm8, %v7269_v26 }
 0xa7e   : > { %7688 = vrot.lane.b32.xlu1 %v7618_v18, %s10604_s15 }
 0xa7f   : > { %v6399_v36 = vpop.permute.xlu1 %6398 }
 0xa80   : > { %6467 = vst.msk [vmem:[#allocation3 + $0xe0] sm:$0xff] %vm6438_vm3, %v6399_v36  ;;  %v6208_v58 = vpop.permute.xlu0 %6207 }
 0xa81   : > { %6275 = vst.msk [vmem:[#allocation3 + $0xe8] sm:$0xff] %vm6245_vm2, %v6208_v58 }
 0xa83   : > { %v7168_v17 = vpop.permute.xlu1 %7167 }
 0xa84   : > { %7238 = vst.msk [vmem:[#allocation3 + $0xd0] sm:$0xff] %vm7211_vm7, %v7168_v17  ;;  %v6977_v1 = vpop.permute.xlu0 %6976 }
 0xa85   : > { %7046 = vst.msk [vmem:[#allocation3 + $0xd8] sm:$0xff] %vm7018_vm6, %v6977_v1 }
 0xa87   : > { %v6592_v51 = vpop.permute.xlu1 %6591 }
 0xa88   : > { %6660 = vst.msk [vmem:[#allocation3 + $0xe0] sm:$0xff] %vm6631_vm4, %v6592_v51  ;;  %v6401_v21 = vpop.permute.xlu0 %6400 }
 0xa89   : > { %6468 = vst.msk [vmem:[#allocation3 + $0xe8] sm:$0xff] %vm6438_vm3, %v6401_v21 }
 0xa8b   : > { %v6594_v50 = vpop.permute.xlu1 %6593  ;;  %v7270_v47 = vld [vmem:[#allocation3 + $0xd0] sm:$0xff] }
 0xa8c   : > { %6661 = vst.msk [vmem:[#allocation3 + $0xe8] sm:$0xff] %vm6631_vm4, %v6594_v50  ;;  %v7170_v6 = vpop.permute.xlu0 %7169  ;;  %10432 = vmatprep.mubr.msk.f32.mxu1 %vm7286_vm8, %v7270_v47 }
 0xa8d   : > { %7239 = vst.msk [vmem:[#allocation3 + $0xd8] sm:$0xff] %vm7211_vm7, %v7170_v6 }
 0xa8f   : > { %v6210_v62 = vpop.permute.xlu1 %6209 }
 0xa90   : > { %6276 = vst.msk [vmem:[#allocation3 + $0xf0] sm:$0xff] %vm6245_vm2, %v6210_v62  ;;  %v14383_v60 = vpop.f32.mrb[38].mxu1  ;;  %v6786_v33 = vpop.permute.xlu0 %6785 }
 0xa91   : > { %6854 = vst.msk [vmem:[#allocation3 + $0xe0] sm:$0xff] %vm6825_vm5, %v6786_v33  ;;  %v14386_v61 = vpop.f32.mrb[39].mxu1 }
 0xa93   : > { %v6979_v43 = vpop.permute.xlu1 %6978 }
 0xa94   : > { %7047 = vst.msk [vmem:[#allocation3 + $0xe0] sm:$0xff] %vm7018_vm6, %v6979_v43  ;;  %v6788_v59 = vpop.permute.xlu0 %6787  ;;  %v7271_v39 = vld [vmem:[#allocation3 + $0xd8] sm:$0xff] }
 0xa95   : > { %6855 = vst.msk [vmem:[#allocation3 + $0xe8] sm:$0xff] %vm6825_vm5, %v6788_v59  ;;  %10433 = vmatmul.mubr.msk.f32.gmra.mrb[56].mxu1 %vm7286_vm8, %v7271_v39 }
 0xa97   : > { %v6343_v3 = vpop.permute.xlu1 %6342 }
 0xa98   : > { %6439 = vst.msk [vmem:[#allocation3] sm:$0xff] %vm6438_vm3, %v6343_v3  ;;  %v6212_v57 = vpop.permute.xlu0 %6211 }
 0xa99   : > { %6277 = vst.msk [vmem:[#allocation3 + $0xf8] sm:$0xff] %vm6245_vm2, %v6212_v57 }
 0xa9b   : > { %v6981_v41 = vpop.permute.xlu1 %6980 }
 0xa9c   : > { %7048 = vst.msk [vmem:[#allocation3 + $0xe8] sm:$0xff] %vm7018_vm6, %v6981_v41  ;;  %v6403_v42 = vpop.permute.xlu0 %6402 }
 0xa9d   : > { %6469 = vst.msk [vmem:[#allocation3 + $0xf0] sm:$0xff] %vm6438_vm3, %v6403_v42 }
 0xa9f   : > { %v6345_v15 = vpop.permute.xlu1 %6344 }
 0xaa0   : > { %6440 = vst.msk [vmem:[#allocation3 + $0x8] sm:$0xff] %vm6438_vm3, %v6345_v15  ;;  %v7172_v10 = vpop.permute.xlu0 %7171 }
 0xaa1   : > { %7240 = vst.msk [vmem:[#allocation3 + $0xe0] sm:$0xff] %vm7211_vm7, %v7172_v10 }
 0xaa3   : > { %v6536_v13 = vpop.permute.xlu1 %6535 }
 0xaa4   : > { %6632 = vst.msk [vmem:[#allocation3] sm:$0xff] %vm6631_vm4, %v6536_v13  ;;  %v6405_v46 = vpop.permute.xlu0 %6404 }
 0xaa5   : > { %6470 = vst.msk [vmem:[#allocation3 + $0xf8] sm:$0xff] %vm6438_vm3, %v6405_v46 }
 0xaa7   : > { %v7174_v14 = vpop.permute.xlu1 %7173 }
 0xaa8   : > { %7241 = vst.msk [vmem:[#allocation3 + $0xe8] sm:$0xff] %vm7211_vm7, %v7174_v14  ;;  %v14400_v40 = vpop.f32.mrb[40].mxu1  ;;  %v6596_v45 = vpop.permute.xlu0 %6595  ;;  %v7272_v19 = vld [vmem:[#allocation3 + $0xe0] sm:$0xff] }
 0xaa9   : > { %6662 = vst.msk [vmem:[#allocation3 + $0xf0] sm:$0xff] %vm6631_vm4, %v6596_v45  ;;  %v7503_v8 = vpop.f32.mrb[41].mxu1  ;;  %10435 = vmatprep.mubr.msk.f32.mxu1 %vm7286_vm8, %v7272_v19 }
 0xaaa   : > { %v7504_v25 = vadd.f32 %v14326_v11, %v7503_v8 }
 0xaab   : > { %v6598_v4 = vpop.permute.xlu1 %6597 }
 0xaac   : > { %v7622_v63 = vmax.f32 %v7504_v25, 0.0  ;;  %6663 = vst.msk [vmem:[#allocation3 + $0xf8] sm:$0xff] %vm6631_vm4, %v6598_v4  ;;  %v6538_v7 = vpop.permute.xlu0 %6537 }
 0xaad   : > { %6633 = vst.msk [vmem:[#allocation3 + $0x8] sm:$0xff] %vm6631_vm4, %v6538_v7 }
 0xaae   : > { %7696 = vrot.lane.b32.xlu1 %v7622_v63, %s10604_s15  ;;  %v7469_v63 = vadd.f32 %v14318_v52, %v14326_v11 }
 0xaaf   : > { %v6790_v38 = vpop.permute.xlu1 %6789  ;;  %v7273_v49 = vld [vmem:[#allocation3 + $0xe8] sm:$0xff] }
 0xab0   : > { %6856 = vst.msk [vmem:[#allocation3 + $0xf0] sm:$0xff] %vm6825_vm5, %v6790_v38  ;;  %v6730_v48 = vpop.permute.xlu0 %6729  ;;  %10436 = vmatmul.mubr.msk.f32.gmra.mrb[58].mxu1 %vm7286_vm8, %v7273_v49  ;;  %v7474_v38 = vadd.f32 %v14326_v11, %v14350_v29  ;;  %v7509_v29 = vadd.f32 %v14400_v40, %v14326_v11 }
 0xab1   : > { %6826 = vst.msk [vmem:[#allocation3] sm:$0xff] %vm6825_vm5, %v6730_v48  ;;  %v7615_v48 = vmax.f32 %v7469_v63, 0.0 }
 0xab3   : > { %v6792_v22 = vpop.permute.xlu1 %6791 }
 0xab4   : > { %6857 = vst.msk [vmem:[#allocation3 + $0xf8] sm:$0xff] %vm6825_vm5, %v6792_v22  ;;  %v6732_v44 = vpop.permute.xlu0 %6731  ;;  %v7489_v22 = vadd.f32 %v14365_v34, %v14326_v11  ;;  %v7623_v34 = vmax.f32 %v7509_v29, 0.0 }
 0xab5   : > { %6827 = vst.msk [vmem:[#allocation3 + $0x8] sm:$0xff] %vm6825_vm5, %v6732_v44  ;;  %v7616_v44 = vmax.f32 %v7474_v38, 0.0 }
 0xab6   : > { %v7619_v52 = vmax.f32 %v7489_v22, 0.0 }
 0xab7   : > { %v6983_v27 = vpop.permute.xlu1 %6982 }
 0xab8   : > { %7049 = vst.msk [vmem:[#allocation3 + $0xf0] sm:$0xff] %vm7018_vm6, %v6983_v27  ;;  %v6923_v32 = vpop.permute.xlu0 %6922  ;;  %v7494_v27 = vadd.f32 %v14326_v11, %v14386_v61 }
 0xab9   : > { %7019 = vst.msk [vmem:[#allocation3] sm:$0xff] %vm7018_vm6, %v6923_v32 }
 0xaba   : > { %v7620_v32 = vmax.f32 %v7494_v27, 0.0 }
 0xabb   : > { %v6985_v31 = vpop.permute.xlu1 %6984 }
 0xabc   : > { %7050 = vst.msk [vmem:[#allocation3 + $0xf8] sm:$0xff] %vm7018_vm6, %v6985_v31  ;;  %v6925_v28 = vpop.permute.xlu0 %6924 }
 0xabd   : > { %7020 = vst.msk [vmem:[#allocation3 + $0x8] sm:$0xff] %vm7018_vm6, %v6925_v28 }
 0xabf   : > { %v7176_v56 = vpop.permute.xlu1 %7175 }
 0xac0   : > { %7242 = vst.msk [vmem:[#allocation3 + $0xf0] sm:$0xff] %vm7211_vm7, %v7176_v56  ;;  %v14418_v30 = vpop.f32.mrb[42].mxu1  ;;  %v7116_v16 = vpop.permute.xlu0 %7115 }
 0xac1   : > { %7212 = vst.msk [vmem:[#allocation3] sm:$0xff] %vm7211_vm7, %v7116_v16  ;;  %v14421_v54 = vpop.f32.mrb[43].mxu1 }
 0xac2   : > { %v7514_v31 = vadd.f32 %v14326_v11, %v14421_v54 }
 0xac3   : > { %v7178_v2 = vpop.permute.xlu1 %7177 }
 0xac4   : > { %7243 = vst.msk [vmem:[#allocation3 + $0xf8] sm:$0xff] %vm7211_vm7, %v7178_v2  ;;  %v7118_v5 = vpop.permute.xlu0 %7117  ;;  %v7624_v61 = vmax.f32 %v7514_v31, 0.0 }
 0xac5   : > { %7213 = vst.msk [vmem:[#allocation3 + $0x8] sm:$0xff] %vm7211_vm7, %v7118_v5 }
 0xac7   : > { %v7681_v55 = vpop.permute.xlu1 %7680  ;;  %v7274_v12 = vld [vmem:[#allocation3 + $0xf0] sm:$0xff] }
 0xac8   : > { %7774 = vst.msk [vmem:[#allocation4 + $0x10] sm:$0xff] %vm6631_vm4, %v7681_v55  ;;  %v7244_v37 = vld [vmem:[#allocation3] sm:$0xff]  ;;  %10438 = vmatprep.mubr.msk.f32.mxu1 %vm7286_vm8, %v7274_v12 }
 0xac9   : > { %10393 = vmatprep.mubr.msk.f32.mxu0 %vm7286_vm8, %v7244_v37 }
 0xacb   : > { %v7275_v53 = vld [vmem:[#allocation3 + $0xf8] sm:$0xff] }
 0xacc   : > { %10439 = vmatmul.mubr.msk.f32.gmra.mrb[60].mxu1 %vm7286_vm8, %v7275_v53  ;;  %v7245_v35 = vld [vmem:[#allocation3 + $0x8] sm:$0xff] }
 0xacd   : > { %10394 = vmatmul.mubr.msk.f32.vlgmr.msra.gmra.mrb[64].mxu0 %vm7286_vm8, %v7245_v35 }
 0xad8   : > { %v10416_v24 = vpop.f32.mrb[44].mxu1 }
 0xad9   : > { %v7523_v23 = vpop.f32.mrb[45].mxu1  ;;  %v7529_v28 = vadd.f32 %v10416_v24, %v14326_v11 }
 0xada   : > { %v7524_v9 = vadd.f32 %v14326_v11, %v7523_v23 }
 0xadb   : > { %v7627_v40 = vmax.f32 %v7529_v28, 0.0 }
 0xadc   : > { %v7626_v18 = vmax.f32 %v7524_v9, 0.0 }
 0xade   : > { %7704 = vrot.lane.b32.xlu1 %v7626_v18, %s10604_s15 }
 0xaf0   : > { %v7689_v0 = vpop.permute.xlu1 %7688  ;;  %v14432_v26 = vpop.f32.mrb[46].mxu1 }
 0xaf1   : > { %7778 = vst.msk [vmem:[#allocation4 + $0x30] sm:$0xff] %vm6631_vm4, %v7689_v0  ;;  %v7533_v36 = vpop.f32.mrb[47].mxu1 }
 0xaf2   : > { %v7534_v56 = vadd.f32 %v14326_v11, %v7533_v36 }
 0xaf4   : > { %v7628_v2 = vmax.f32 %v7534_v56, 0.0 }
 0xb08   : > { %v10422_v58 = vpop.f32.mrb[48].mxu1 }
 0xb09   : > { %v7543_v17 = vpop.f32.mrb[49].mxu1  ;;  %v7549_v54 = vadd.f32 %v10422_v58, %v14326_v11 }
 0xb0a   : > { %v7544_v1 = vadd.f32 %v14326_v11, %v7543_v17 }
 0xb0b   : > { %v7631_v55 = vmax.f32 %v7549_v54, 0.0 }
 0xb0c   : > { %v7630_v51 = vmax.f32 %v7544_v1, 0.0  ;;  %v7479_v1 = vadd.f32 %v14347_v20, %v14326_v11 }
 0xb0e   : > { %7712 = vrot.lane.b32.xlu1 %v7630_v51, %s10604_s15 }
 0xb20   : > { %v7697_v21 = vpop.permute.xlu1 %7696  ;;  %v14437_v50 = vpop.f32.mrb[50].mxu1 }
 0xb21   : > { %7782 = vst.msk [vmem:[#allocation4 + $0x50] sm:$0xff] %vm6631_vm4, %v7697_v21  ;;  %v7553_v47 = vpop.f32.mrb[51].mxu1  ;;  %v7617_v21 = vmax.f32 %v7479_v1, 0.0  ;;  %v7559_v63 = vadd.f32 %v14437_v50, %v14326_v11 }
 0xb22   : > { %v7554_v5 = vadd.f32 %v14326_v11, %v7553_v47  ;;  %v7499_v47 = vadd.f32 %v14383_v60, %v14326_v11  ;;  %v14509_v60 = vld [vmem:[%s15685_s10] ss:$0 sm:$0xff] }
 0xb24   : > { %v7632_v37 = vmax.f32 %v7554_v5, 0.0 }
 0xb38   : > { %v10428_v6 = vpop.f32.mrb[52].mxu1 }
 0xb39   : > { %v7563_v62 = vpop.f32.mrb[53].mxu1  ;;  %v7569_v12 = vadd.f32 %v10428_v6, %v14326_v11  ;;  %v14500_v6 = vld [vmem:[%s15684_s9] ss:$0 sm:$0xff] }
 0xb3a   : > { %v7564_v33 = vadd.f32 %v14326_v11, %v7563_v62  ;;  %v10606_v62 = vmov 1983009808  }
 0xb3b   : > { %v7635_v35 = vmax.f32 %v7569_v12, 0.0 }
 0xb3c   : > { %v7634_v43 = vmax.f32 %v7564_v33, 0.0  ;;  %v7948_v33 = vunpack.c.l.s4 %v10606_v62 }
 0xb3e   : > { %7720 = vrot.lane.b32.xlu1 %v7634_v43, %s10604_s15  ;;  %v7950_v43 = vlaneseq }
 0xb50   : > { %v7705_v59 = vpop.permute.xlu1 %7704  ;;  %v14442_v39 = vpop.f32.mrb[54].mxu1 }
 0xb51   : > { %7786 = vst.msk [vmem:[#allocation4 + $0x70] sm:$0xff] %vm6631_vm4, %v7705_v59  ;;  %v7573_v3 = vpop.f32.mrb[55].mxu1  ;;  %v7806_v59 = vld [vmem:[#allocation4 + $0x10] sm:$0xff]  ;;  %v7579_v22 = vadd.f32 %v14442_v39, %v14326_v11 }
 0xb52   : > { %v7574_v53 = vadd.f32 %v14326_v11, %v7573_v3  ;;  %v7845_v20 = vmul.f32 %v14500_v6, %v7806_v59  ;;  %v7621_v3 = vmax.f32 %v7499_v47, 0.0 }
 0xb54   : > { %v7636_v23 = vmax.f32 %v7574_v53, 0.0 }
 0xb68   : > { %v10434_v57 = vpop.f32.mrb[56].mxu1 }
 0xb69   : > { %v7583_v41 = vpop.f32.mrb[57].mxu1  ;;  %v7589_v24 = vadd.f32 %v10434_v57, %v14326_v11  ;;  %v7519_v57 = vadd.f32 %v14418_v30, %v14326_v11 }
 0xb6a   : > { %v7584_v42 = vadd.f32 %v14326_v11, %v7583_v41  ;;  %v7949_v41 = vunpack.c.0.s8 %v7948_v33 }
 0xb6b   : > { %v7639_v18 = vmax.f32 %v7589_v24, 0.0 }
 0xb6c   : > { %v7638_v15 = vmax.f32 %v7584_v42, 0.0  ;;  %v7951_v42 = vshrl.u32 %v7950_v43, 7 }
 0xb6e   : > { %7728 = vrot.lane.b32.xlu1 %v7638_v15, %s10604_s15  ;;  %v7884_v15 = vadd.f32 %v14509_v60, %v7845_v20 }
 0xb80   : > { %v7713_v10 = vpop.permute.xlu1 %7712 }
 0xb81   : > { %7790 = vst.msk [vmem:[#allocation4 + $0x90] sm:$0xff] %vm6631_vm4, %v7713_v10  ;;  %v7810_v10 = vld [vmem:[#allocation4 + $0x30] sm:$0xff] }
 0xb82   : > { %v7849_v30 = vmul.f32 %v14500_v6, %v7810_v10 }
 0xb83   : > { %v14448_v13 = vpop.f32.mrb[58].mxu1 }
 0xb84   : > { %v7593_v46 = vpop.f32.mrb[59].mxu1  ;;  %v7888_v38 = vadd.f32 %v14509_v60, %v7849_v30  ;;  %v7599_v28 = vadd.f32 %v14448_v13, %v14326_v11 }
 0xb85   : > { %v7594_v9 = vadd.f32 %v14326_v11, %v7593_v46  ;;  %v7625_v46 = vmax.f32 %v7519_v57, 0.0 }
 0xb86   : > { %v8048_v27 = vcombine.high %v7888_v38, %v7888_v38 }
 0xb87   : > { %v7640_v36 = vmax.f32 %v7594_v9, 0.0 }
 0xb9f   : > { %v10440_v14 = vpop.f32.mrb[60].mxu1 }
 0xba0   : > { %v10395_v45 = vpop.f32.mrb[64].mxu0  ;;  %v7603_v19 = vpop.f32.mrb[61].mxu1  ;;  %v7609_v0 = vadd.f32 %v10440_v14, %v14326_v11  ;;  %v14513_v14 = vsub.s32 %v7949_v41, %v7951_v42 }
 0xba1   : > { %v7604_v8 = vadd.f32 %v14326_v11, %v7603_v19  ;;  %v7453_v25 = vpop.f32.mrb[65].mxu0  ;;  %v7459_v58 = vadd.f32 %v10395_v45, %v14326_v11  ;;  %v7539_v45 = vadd.f32 %v14432_v26, %v14326_v11  ;;  %v7814_v19 = vld [vmem:[#allocation4 + $0x50] sm:$0xff] }
 0xba2   : > { %v7454_v4 = vadd.f32 %v14326_v11, %v7453_v25  ;;  %v7643_v17 = vmax.f32 %v7609_v0, 0.0  ;;  %v7987_v25 = vrot.slane %v7884_v15, %v14513_v14  ;;  %v8062_v56 = vrot.slane %v8048_v27, %v14513_v14 }
 0xba3   : > { %v7642_v7 = vmax.f32 %v7604_v8, 0.0  ;;  %v7613_v51 = vmax.f32 %v7459_v58, 0.0  ;;  %v7980_v8 = vcombine.high %v7884_v15, %v7884_v15 }
 0xba4   : > { %v7612_v49 = vmax.f32 %v7454_v4, 0.0  ;;  %v7629_v4 = vmax.f32 %v7539_v45, 0.0  ;;  %v8675_v29 = vsel %vm8618_vm9, %v7987_v25, -inf  ;;  %v8064_v13 = vcombine.high %v8062_v56, %v8062_v56 }
 0xba5   : > { %7736 = vrot.lane.b32.xlu1 %v7642_v7, %s10604_s15  ;;  %v7853_v7 = vmul.f32 %v14500_v6, %v7814_v19  ;;  %v7994_v26 = vrot.slane %v7980_v8, %v14513_v14  ;;  %v8676_v39 = vrot.slane %v8675_v29, 4  ;;  %v8801_v58 = vsel %vm8618_vm9, %v8062_v56, -inf  ;;  %v7818_v8 = vld [vmem:[#allocation4 + $0x70] sm:$0xff] }
 0xba6   : > { %7676 = vrot.lane.b32.xlu0 %v7612_v49, %s10604_s15  ;;  %v7995_v49 = vcombine.high %v7987_v25, %v7987_v25  ;;  %v8802_v59 = vrot.slane %v8801_v58, 4 }
 0xba7   : > { %v7996_v50 = vcombine.high %v7994_v26, %v7994_v26  ;;  %v8689_v31 = vsel %vm8618_vm9, %v7994_v26, -inf  ;;  %v8677_v11 = vmax.f32 %v8675_v29, %v8676_v39  ;;  %v7822_v29 = vld [vmem:[#allocation4 + $0x90] sm:$0xff] }
 0xba8   : > { %v8690_v54 = vrot.slane %v8689_v31, 4 }
 0xba9   : > { %7682 = vrot.lane.b32.xlu1 %v7615_v48, %s10604_s15  ;;  %v7633_v48 = vmax.f32 %v7559_v63, 0.0  ;;  %v8678_v1 = vrot.slane %v8677_v11, 2 }
 0xbaa   : > { %7684 = vrot.lane.b32.xlu0 %v7616_v44, %s10604_s15  ;;  %v7892_v44 = vadd.f32 %v14509_v60, %v7853_v7 }
 0xbab   : > { %v8679_v10 = vmax.f32 %v8677_v11, %v8678_v1 }
 0xbac   : > { %v8123_v5 = vrot.slane %v7892_v44, %v14513_v14 }
 0xbad   : > { %7690 = vrot.lane.b32.xlu1 %v7619_v52, %s10604_s15  ;;  %v8055_v52 = vrot.slane %v7888_v38, %v14513_v14 }
 0xbae   : > { %7692 = vrot.lane.b32.xlu0 %v7620_v32, %s10604_s15  ;;  %v8682_v32 = vsel %vm8618_vm9, %v7995_v49, -inf  ;;  %v8131_v0 = vcombine.high %v8123_v5, %v8123_v5 }
 0xbaf   : > { %v8787_v12 = vsel %vm8618_vm9, %v8055_v52, -inf }
 0xbb0   : > { %v7721_v16 = vpop.permute.xlu1 %7720  ;;  %v8906_v20 = vsel %vm8618_vm9, %v8131_v0, -inf }
 0xbb1   : > { %7698 = vrot.lane.b32.xlu1 %v7623_v34, %s10604_s15  ;;  %7794 = vst.msk [vmem:[#allocation4 + $0xb0] sm:$0xff] %vm6631_vm4, %v7721_v16  ;;  %v7637_v34 = vmax.f32 %v7579_v22, 0.0  ;;  %v8063_v16 = vcombine.high %v8055_v52, %v8055_v52  ;;  %v8907_v30 = vrot.slane %v8906_v20, 4  ;;  %v7857_v22 = vmul.f32 %v14500_v6, %v7818_v8 }
 0xbb2   : > { %7700 = vrot.lane.b32.xlu0 %v7624_v61, %s10604_s15  ;;  %v8116_v61 = vcombine.high %v7892_v44, %v7892_v44 }
 0xbb3   : > { %v8908_v52 = vmax.f32 %v8906_v20, %v8907_v30 }
 0xbb5   : > { %7706 = vrot.lane.b32.xlu1 %v7627_v40, %s10604_s15  ;;  %v8683_v40 = vrot.slane %v8682_v32, 4 }
 0xbb6   : > { %7708 = vrot.lane.b32.xlu0 %v7628_v2, %s10604_s15  ;;  %v8696_v2 = vsel %vm8618_vm9, %v7996_v50, -inf }
 0xbb7   : > { %v8684_v24 = vmax.f32 %v8682_v32, %v8683_v40  ;;  %v8697_v9 = vrot.slane %v8696_v2, 4 }
 0xbb9   : > { %7714 = vrot.lane.b32.xlu1 %v7631_v55, %s10604_s15  ;;  %v7641_v55 = vmax.f32 %v7599_v28, 0.0  ;;  %v8685_v47 = vrot.slane %v8684_v24, 2  ;;  %v8698_v33 = vmax.f32 %v8696_v2, %v8697_v9  ;;  %v7861_v2 = vmul.f32 %v14500_v6, %v7822_v29 }
 0xbba   : > { %7716 = vrot.lane.b32.xlu0 %v7632_v37, %s10604_s15  ;;  %v8130_v37 = vrot.slane %v8116_v61, %v14513_v14 }
 0xbbb   : > { %v8699_v45 = vrot.slane %v8698_v33, 2 }
 0xbbd   : > { %7722 = vrot.lane.b32.xlu1 %v7635_v35, %s10604_s15  ;;  %v8794_v35 = vsel %vm8618_vm9, %v8063_v16, -inf  ;;  %v8700_v27 = vmax.f32 %v8698_v33, %v8699_v45  ;;  %v7826_v16 = vld [vmem:[#allocation4 + $0xb0] sm:$0xff] }
 0xbbe   : > { %7724 = vrot.lane.b32.xlu0 %v7636_v23, %s10604_s15  ;;  %v8691_v23 = vmax.f32 %v8689_v31, %v8690_v54  ;;  %v7896_v54 = vadd.f32 %v14509_v60, %v7857_v22 }
 0xbc0   : > { %v8692_v62 = vrot.slane %v8691_v23, 2 }
 0xbc1   : > { %7730 = vrot.lane.b32.xlu1 %v7639_v18, %s10604_s15  ;;  %v8788_v18 = vrot.slane %v8787_v12, 4 }
 0xbc2   : > { %7732 = vrot.lane.b32.xlu0 %v7640_v36, %s10604_s15  ;;  %v8795_v36 = vrot.slane %v8794_v35, 4  ;;  %v8693_v7 = vmax.f32 %v8691_v23, %v8692_v62  ;;  %v8184_v62 = vcombine.high %v7896_v54, %v7896_v54 }
 0xbc3   : > { %v8789_v43 = vmax.f32 %v8787_v12, %v8788_v18  ;;  %v8909_v12 = vrot.slane %v8908_v52, 2 }
 0xbc4   : > { %v8796_v57 = vmax.f32 %v8794_v35, %v8795_v36  ;;  %v8694_v28 = vrot.slane %v8693_v7, 1 }
 0xbc5   : > { %7738 = vrot.lane.b32.xlu1 %v7643_v17, %s10604_s15  ;;  %v8132_v17 = vcombine.high %v8130_v37, %v8130_v37  ;;  %v8790_v25 = vrot.slane %v8789_v43, 2 }
 0xbc6   : > { %7678 = vrot.lane.b32.xlu0 %v7613_v51, %s10604_s15  ;;  %v8808_v51 = vsel %vm8618_vm9, %v8064_v13, -inf  ;;  %v8797_v38 = vrot.slane %v8796_v57, 2  ;;  %v8695_v23 = vmax.f32 %v8693_v7, %v8694_v28 }
 0xbc7   : > { %v8809_v41 = vrot.slane %v8808_v51, 4  ;;  %v8920_v15 = vsel %vm8618_vm9, %v8132_v17, -inf  ;;  %v8791_v32 = vmax.f32 %v8789_v43, %v8790_v25  ;;  %v7900_v17 = vadd.f32 %v14509_v60, %v7861_v2 }
 0xbc8   : > { %v8921_v63 = vrot.slane %v8920_v15, 4  ;;  %v8798_v61 = vmax.f32 %v8796_v57, %v8797_v38  ;;  %v8198_v25 = vrot.slane %v8184_v62, %v14513_v14 }
 0xbc9   : > { %v8810_v26 = vmax.f32 %v8808_v51, %v8809_v41  ;;  %v8792_v11 = vrot.slane %v8791_v32, 1  ;;  %v8259_v22 = vrot.slane %v7900_v17, %v14513_v14 }
 0xbca   : > { %7686 = vrot.lane.b32.xlu0 %v7617_v21, %s10604_s15  ;;  %v8899_v21 = vsel %vm8618_vm9, %v8123_v5, -inf  ;;  %v8799_v9 = vrot.slane %v8798_v61, 1 }
 0xbcb   : > { %v8900_v42 = vrot.slane %v8899_v21, 4  ;;  %v8811_v39 = vrot.slane %v8810_v26, 2  ;;  %v8793_v33 = vmax.f32 %v8791_v32, %v8792_v11  ;;  %v8267_v2 = vcombine.high %v8259_v22, %v8259_v22 }
 0xbcc   : > { %v8800_v57 = vmax.f32 %v8798_v61, %v8799_v9 }
 0xbcd   : > { %v8901_v49 = vmax.f32 %v8899_v21, %v8900_v42  ;;  %v8812_v18 = vmax.f32 %v8810_v26, %v8811_v39  ;;  %v8910_v21 = vmax.f32 %v8908_v52, %v8909_v12 }
 0xbce   : > { %7694 = vrot.lane.b32.xlu0 %v7621_v3, %s10604_s15  ;;  %v8913_v3 = vsel %vm8618_vm9, %v8130_v37, -inf }
 0xbcf   : > { %v8914_v19 = vrot.slane %v8913_v3, 4  ;;  %v8902_v56 = vrot.slane %v8901_v49, 2  ;;  %v8813_v41 = vrot.slane %v8812_v18, 1 }
 0xbd1   : > { %v8915_v50 = vmax.f32 %v8913_v3, %v8914_v19  ;;  %v8903_v0 = vmax.f32 %v8901_v49, %v8902_v56  ;;  %v8911_v19 = vrot.slane %v8910_v21, 1  ;;  %v8814_v26 = vmax.f32 %v8812_v18, %v8813_v41 }
 0xbd2   : > { %7702 = vrot.lane.b32.xlu0 %v7625_v46, %s10604_s15  ;;  %v8686_v46 = vmax.f32 %v8684_v24, %v8685_v47  ;;  %v7865_v24 = vmul.f32 %v14500_v6, %v7826_v16  ;;  %v14577_v49 = vsel %vm9515_vm10, %v8800_v57, -inf }
 0xbd3   : > { %v8916_v37 = vrot.slane %v8915_v50, 2  ;;  %v8904_v42 = vrot.slane %v8903_v0, 1  ;;  %v8912_v29 = vmax.f32 %v8910_v21, %v8911_v19  ;;  %v14590_v16 = vsel %vm9515_vm10, %v8814_v26, -inf }
 0xbd4   : > { %v8687_v44 = vrot.slane %v8686_v46, 1  ;;  %v7904_v20 = vadd.f32 %v14509_v60, %v7865_v24  ;;  %15924 = vst [vmem:[#allocation17_spill] sm:$0xff] %v14590_v16 }
 0xbd5   : > { %v8917_v47 = vmax.f32 %v8915_v50, %v8916_v37 }
 0xbd6   : > { %7710 = vrot.lane.b32.xlu0 %v7629_v4, %s10604_s15  ;;  %v8803_v4 = vmax.f32 %v8801_v58, %v8802_v59  ;;  %v8688_v5 = vmax.f32 %v8686_v46, %v8687_v44  ;;  %v8191_v58 = vrot.slane %v7896_v54, %v14513_v14  ;;  %v8252_v46 = vcombine.high %v7900_v17, %v7900_v17 }
 0xbd7   : > { %v8918_v8 = vrot.slane %v8917_v47, 1  ;;  %v8320_v38 = vcombine.high %v7904_v20, %v7904_v20 }
 0xbd8   : > { %v8804_v31 = vrot.slane %v8803_v4, 2  ;;  %v14563_v3 = vsel %vm9515_vm10, %v8688_v5, -inf  ;;  %v9011_v44 = vsel %vm8618_vm9, %v8191_v58, -inf  ;;  %v8266_v52 = vrot.slane %v8252_v46, %v14513_v14 }
 0xbd9   : > { %v8919_v32 = vmax.f32 %v8917_v47, %v8918_v8  ;;  %v8334_v39 = vrot.slane %v8320_v38, %v14513_v14 }
 0xbda   : > { %7718 = vrot.lane.b32.xlu0 %v7633_v48, %s10604_s15  ;;  %v8680_v48 = vrot.slane %v8679_v10, 1  ;;  %v8805_v13 = vmax.f32 %v8803_v4, %v8804_v31  ;;  %v8200_v31 = vcombine.high %v8198_v25, %v8198_v25  ;;  %v8268_v12 = vcombine.high %v8266_v52, %v8266_v52 }
 0xbdb   : > { %v14601_v11 = vsel %vm9515_vm10, %v8919_v32, -inf  ;;  %v8336_v9 = vcombine.high %v8334_v39, %v8334_v39  ;;  %v9137_v21 = vsel %vm8618_vm9, %v8266_v52, -inf }
 0xbdc   : > { %v8681_v40 = vmax.f32 %v8679_v10, %v8680_v48  ;;  %v8806_v43 = vrot.slane %v8805_v13, 1  ;;  %v8199_v10 = vcombine.high %v8191_v58, %v8191_v58  ;;  %v8905_v48 = vmax.f32 %v8903_v0, %v8904_v42  ;;  %15925 = vst [vmem:[#allocation18_spill] sm:$0xff] %v14601_v11 }
 0xbdd   : > { %v9144_v47 = vsel %vm8618_vm9, %v8268_v12, -inf  ;;  %v9256_v41 = vsel %vm8618_vm9, %v8336_v9, -inf }
 0xbde   : > { %7726 = vrot.lane.b32.xlu0 %v7637_v34, %s10604_s15  ;;  %v8922_v34 = vmax.f32 %v8920_v15, %v8921_v63  ;;  %v14556_v36 = vsel %vm9515_vm10, %v8681_v40, -inf  ;;  %v14566_v15 = vsel %vm9515_vm10, %v8695_v23, -inf  ;;  %v8807_v4 = vmax.f32 %v8805_v13, %v8806_v43 }
 0xbdf   : > { %15921 = vst [vmem:[#allocation14_spill] sm:$0xff] %v14566_v15  ;;  %v14574_v63 = vsel %vm9515_vm10, %v8793_v33, -inf  ;;  %v9012_v40 = vrot.slane %v9011_v44, 4  ;;  %v14593_v5 = vsel %vm9515_vm10, %v8905_v48, -inf  ;;  %v9032_v13 = vsel %vm8618_vm9, %v8200_v31, -inf }
 0xbe0   : > { %v7729_v53 = vpop.permute.xlu1 %7728  ;;  %v8923_v35 = vrot.slane %v8922_v34, 2  ;;  %v14585_v28 = vsel %vm9515_vm10, %v8807_v4, -inf  ;;  %v9123_v23 = vsel %vm8618_vm9, %v8259_v22, -inf  ;;  %v9145_v19 = vrot.slane %v9144_v47, 4 }
 0xbe1   : > { %7798 = vst.msk [vmem:[#allocation4 + $0xd0] sm:$0xff] %vm6631_vm4, %v7729_v53  ;;  %15923 = vst [vmem:[#allocation16_spill] sm:$0xff] %v14585_v28  ;;  %v9013_v0 = vmax.f32 %v9011_v44, %v9012_v40  ;;  %v9124_v33 = vrot.slane %v9123_v23, 4  ;;  %v9257_v48 = vrot.slane %v9256_v41, 4 }
 0xbe2   : > { %7734 = vrot.lane.b32.xlu0 %v7641_v55, %s10604_s15  ;;  %v8701_v55 = vrot.slane %v8700_v27, 1  ;;  %v8924_v59 = vmax.f32 %v8922_v34, %v8923_v35  ;;  %v8327_v34 = vrot.slane %v7904_v20, %v14513_v14  ;;  %v9249_v20 = vsel %vm8618_vm9, %v8334_v39, -inf  ;;  %s9931_s15 = sshll.u32 %s377_s25, 6 }
 0xbe3   : > { %v9125_v52 = vmax.f32 %v9123_v23, %v9124_v33  ;;  %s15515_s24 = scalar_lea.vmem [#allocation5], %s9931_s15  ;;  %s10607_s15 = smov [#allocation5]  }
 0xbe4   : > { %v8702_v51 = vmax.f32 %v8700_v27, %v8701_v55  ;;  %v8925_v7 = vrot.slane %v8924_v59, 1  ;;  %v9018_v27 = vsel %vm8618_vm9, %v8199_v10, -inf  ;;  %v9025_v55 = vsel %vm8618_vm9, %v8198_v25, -inf  ;;  %s9865_s21 = sshll.u32 %s15515_s24, 4  ;;  %s10530_s16 = sshll.u32 %s10607_s15, 4  ;;  %s15609_s21 = int_to_ptr.vmem [resolvable:$true] %s9865_s21  ;;  %s10531_s16 = int_to_ptr.vmem [resolvable:$false] %s10530_s16 }
 0xbe5   : > { %v9019_v54 = vrot.slane %v9018_v27, 4  ;;  %v8335_v35 = vcombine.high %v8327_v34, %v8327_v34  ;;  %v9026_v17 = vrot.slane %v9025_v55, 4  ;;  %v9235_v43 = vsel %vm8618_vm9, %v8327_v34, -inf  ;;  %s10526_s13 = scalar_lea.vmem %s15609_s21, 1024  ;;  %s10532_s14 = scalar_lea.vmem %s10531_s16, 2048 }
 0xbe6   : > { %v14570_v30 = vsel %vm9515_vm10, %v8702_v51, -inf  ;;  %v8926_v61 = vmax.f32 %v8924_v59, %v8925_v7  ;;  %v9033_v51 = vrot.slane %v9032_v13, 4  ;;  %v9236_v25 = vrot.slane %v9235_v43, 4  ;;  %p10527_p11 = scmp.ne.s32.totalorder %s15609_s21, %s10526_s13  ;;  %p10533_p0 = scmp.lt.s32.totalorder %s15609_s21, %s10531_s16 }
 0xbe7   : > { %15922 = vst [vmem:[#allocation15_spill] sm:$0xff] %v14570_v30  ;;  %v9020_v58 = vmax.f32 %v9018_v27, %v9019_v54  ;;  %v9242_v59 = vsel %vm8618_vm9, %v8335_v35, -inf  ;;  %v9027_v46 = vmax.f32 %v9025_v55, %v9026_v17  ;;  %v9250_v7 = vrot.slane %v9249_v20, 4  ;;  %p10534_p1 = scmp.lt.s32.totalorder %s10532_s14, %s10526_s13 }
 0xbe8   : > { %v7830_v53 = vld [vmem:[#allocation4 + $0xd0] sm:$0xff]  ;;  %v14605_v24 = vsel %vm9515_vm10, %v8926_v61, -inf  ;;  %v9243_v4 = vrot.slane %v9242_v59, 4  ;;  %v9034_v26 = vmax.f32 %v9032_v13, %v9033_v51  ;;  %v9014_v27 = vrot.slane %v9013_v0, 2  ;;  %p10528_p12 = pnand %p10527_p11, %p10707_p5 }
 0xbe9   : > { %v7869_v1 = vmul.f32 %v14500_v6, %v7830_v53  ;;  %v14598_v53 = vsel %vm9515_vm10, %v8912_v29, -inf  ;;  %15926 = vst [vmem:[#allocation19_spill] sm:$0xff] %v14605_v24  ;;  %v9021_v32 = vrot.slane %v9020_v58, 2  ;;  %v9146_v34 = vmax.f32 %v9144_v47, %v9145_v19  ;;  %p10535_p2 = por %p10534_p1, %p10533_p0 }
 0xbea   : > { %v9028_v39 = vrot.slane %v9027_v46, 2  ;;  %v9244_v40 = vmax.f32 %v9242_v59, %v9243_v4  ;;  %v9251_v54 = vmax.f32 %v9249_v20, %v9250_v7  ;;  %v9258_v55 = vmax.f32 %v9256_v41, %v9257_v48  ;;  %p10529_p13 = pneg %p10528_p12 }
 0xbeb   : > { %v7908_v45 = vadd.f32 %v14509_v60, %v7869_v1  ;;  %v9130_v1 = vsel %vm8618_vm9, %v8267_v2, -inf  ;;  %v9035_v2 = vrot.slane %v9034_v26, 2  ;;  %v9015_v13 = vmax.f32 %v9013_v0, %v9014_v27 }
 0xbec   : > { %v9131_v57 = vrot.slane %v9130_v1, 4  ;;  %v9126_v35 = vrot.slane %v9125_v52, 2  ;;  %v9022_v17 = vmax.f32 %v9020_v58, %v9021_v32  ;;  %v9245_v47 = vrot.slane %v9244_v40, 2  ;;  %p10536_p3 = pnand %p10535_p2, %p10529_p13 }
 0xbed   : > { %v8388_v50 = vcombine.high %v7908_v45, %v7908_v45  ;;  %v8395_v56 = vrot.slane %v7908_v45, %v14513_v14  ;;  %v9138_v45 = vrot.slane %v9137_v21, 4  ;;  %v9252_v33 = vrot.slane %v9251_v54, 2 }
 0xbee   : > { %v9127_v41 = vmax.f32 %v9125_v52, %v9126_v35  ;;  %v9023_v0 = vrot.slane %v9022_v17, 1  ;;  %v9246_v7 = vmax.f32 %v9244_v40, %v9245_v47 }
 0xbef   : > { %v8402_v37 = vrot.slane %v8388_v50, %v14513_v14  ;;  %v8403_v18 = vcombine.high %v8395_v56, %v8395_v56  ;;  %v9347_v42 = vsel %vm8618_vm9, %v8395_v56, -inf  ;;  %v9132_v50 = vmax.f32 %v9130_v1, %v9131_v57 }
 0xbf0   : > { %v9348_v22 = vrot.slane %v9347_v42, 4  ;;  %v9139_v31 = vmax.f32 %v9137_v21, %v9138_v45  ;;  %v9237_v56 = vmax.f32 %v9235_v43, %v9236_v25  ;;  %v9147_v1 = vrot.slane %v9146_v34, 2 }
 0xbf1   : > { %v8404_v62 = vcombine.high %v8402_v37, %v8402_v37  ;;  %v9354_v10 = vsel %vm8618_vm9, %v8403_v18, -inf  ;;  %v9361_v8 = vsel %vm8618_vm9, %v8402_v37, -inf  ;;  %v9133_v9 = vrot.slane %v9132_v50, 2 }
 0xbf2   : > { %v9355_v44 = vrot.slane %v9354_v10, 4  ;;  %v9362_v29 = vrot.slane %v9361_v8, 4  ;;  %v9349_v12 = vmax.f32 %v9347_v42, %v9348_v22  ;;  %v9140_v23 = vrot.slane %v9139_v31, 2 }
 0xbf3   : > { %v9368_v38 = vsel %vm8618_vm9, %v8404_v62, -inf  ;;  %v9029_v62 = vmax.f32 %v9027_v46, %v9028_v39  ;;  %v9238_v21 = vrot.slane %v9237_v56, 2  ;;  %v9036_v57 = vmax.f32 %v9034_v26, %v9035_v2 }
 0xbf4   : > { %v9369_v61 = vrot.slane %v9368_v38, 4  ;;  %v9356_v37 = vmax.f32 %v9354_v10, %v9355_v44  ;;  %v9363_v18 = vmax.f32 %v9361_v8, %v9362_v29  ;;  %v9259_v43 = vrot.slane %v9258_v55, 2 }
 0xbf5   : > { %v9350_v59 = vrot.slane %v9349_v12, 2  ;;  %v9016_v45 = vrot.slane %v9015_v13, 1  ;;  %v9134_v42 = vmax.f32 %v9132_v50, %v9133_v9  ;;  %v9141_v19 = vmax.f32 %v9139_v31, %v9140_v23 }
 0xbf6   : > { %v9370_v51 = vmax.f32 %v9368_v38, %v9369_v61  ;;  %v9357_v20 = vrot.slane %v9356_v37, 2  ;;  %v9364_v10 = vrot.slane %v9363_v18, 2  ;;  %v9148_v25 = vmax.f32 %v9146_v34, %v9147_v1 }
 0xbf7   : > { %v9030_v58 = vrot.slane %v9029_v62, 1  ;;  %v9239_v4 = vmax.f32 %v9237_v56, %v9238_v21  ;;  %v9253_v38 = vmax.f32 %v9251_v54, %v9252_v33  ;;  %v9037_v46 = vrot.slane %v9036_v57, 1 }
 0xbf8   : > { %v9371_v8 = vrot.slane %v9370_v51, 2  ;;  %v9260_v48 = vmax.f32 %v9258_v55, %v9259_v43  ;;  %v9351_v22 = vmax.f32 %v9349_v12, %v9350_v59  ;;  %v9358_v44 = vmax.f32 %v9356_v37, %v9357_v20 }
 0xbf9   : > { %v9017_v27 = vmax.f32 %v9015_v13, %v9016_v45  ;;  %v9128_v29 = vrot.slane %v9127_v41, 1  ;;  %v9135_v32 = vrot.slane %v9134_v42, 1  ;;  %v9365_v61 = vmax.f32 %v9363_v18, %v9364_v10 }
 0xbfa   : > { %v9024_v50 = vmax.f32 %v9022_v17, %v9023_v0  ;;  %v9142_v31 = vrot.slane %v9141_v19, 1  ;;  %v9149_v34 = vrot.slane %v9148_v25, 1  ;;  %v9372_v39 = vmax.f32 %v9370_v51, %v9371_v8 }
 0xbfb   : > { %v9031_v56 = vmax.f32 %v9029_v62, %v9030_v58  ;;  %v9240_v40 = vrot.slane %v9239_v4, 1  ;;  %v9247_v54 = vrot.slane %v9246_v7, 1  ;;  %v9254_v2 = vrot.slane %v9253_v38, 1 }
 0xbfc   : > { %v9038_v55 = vmax.f32 %v9036_v57, %v9037_v46  ;;  %v9261_v12 = vrot.slane %v9260_v48, 1  ;;  %v9352_v37 = vrot.slane %v9351_v22, 1  ;;  %v9359_v13 = vrot.slane %v9358_v44, 1 }
 0xbfd   : > { %v14622_v9 = vsel %vm9515_vm10, %v9017_v27, -inf  ;;  %v9129_v18 = vmax.f32 %v9127_v41, %v9128_v29  ;;  %v9136_v23 = vmax.f32 %v9134_v42, %v9135_v32  ;;  %v9366_v17 = vrot.slane %v9365_v61, 1 }
 0xbfe   : > { %v14626_v51 = vsel %vm9515_vm10, %v9024_v50, -inf  ;;  %v9143_v62 = vmax.f32 %v9141_v19, %v9142_v31  ;;  %v9150_v21 = vmax.f32 %v9148_v25, %v9149_v34  ;;  %v9373_v47 = vrot.slane %v9372_v39, 1 }
 0xbff   : > { %v14630_v33 = vsel %vm9515_vm10, %v9031_v56, -inf  ;;  %v9241_v57 = vmax.f32 %v9239_v4, %v9240_v40  ;;  %v9248_v43 = vmax.f32 %v9246_v7, %v9247_v54  ;;  %v9255_v59 = vmax.f32 %v9253_v38, %v9254_v2 }
 0xc00   : > { %15927 = vst [vmem:[#allocation20_spill] sm:$0xff] %v14630_v33  ;;  %v14633_v20 = vsel %vm9515_vm10, %v9038_v55, -inf  ;;  %v9262_v45 = vmax.f32 %v9260_v48, %v9261_v12  ;;  %v9353_v41 = vmax.f32 %v9351_v22, %v9352_v37  ;;  %v9360_v42 = vmax.f32 %v9358_v44, %v9359_v13 }
 0xc01   : > { %15928 = vst [vmem:[#allocation21_spill] sm:$0xff] %v14633_v20  ;;  %v14636_v19 = vsel %vm9515_vm10, %v9129_v18, -inf  ;;  %v14639_v25 = vsel %vm9515_vm10, %v9136_v23, -inf  ;;  %v9367_v8 = vmax.f32 %v9365_v61, %v9366_v17  ;;  %v14644_v38 = vsel %vm9515_vm10, %v9143_v62, -inf }
 0xc02   : > { %15929 = vst [vmem:[#allocation22_spill] sm:$0xff] %v14644_v38  ;;  %v14647_v46 = vsel %vm9515_vm10, %v9150_v21, -inf  ;;  %v9374_v48 = vmax.f32 %v9372_v39, %v9373_v47  ;;  %v14652_v44 = vsel %vm9515_vm10, %v9241_v57, -inf  ;;  %v14658_v27 = vsel %vm9515_vm10, %v9255_v59, -inf }
 0xc03   : > { %15930 = vst [vmem:[#allocation23_spill] sm:$0xff] %v14647_v46  ;;  %15931 = vst [vmem:[#allocation24_spill] sm:$0xff] %v14658_v27  ;;  %v14662_v32 = vsel %vm9515_vm10, %v9262_v45, -inf  ;;  %v14665_v61 = vsel %vm9515_vm10, %v9353_v41, -inf  ;;  %v14672_v39 = vsel %vm9515_vm10, %v9367_v8, -inf }
 0xc04   : > { %15932 = vst [vmem:[#allocation25_spill] sm:$0xff] %v14662_v32  ;;  %15933 = vst [vmem:[#allocation26_spill] sm:$0xff] %v14672_v39  ;;  %v14678_v12 = vsel %vm9515_vm10, %v9374_v48, -inf }
 0xc05   : > { %15934 = vst [vmem:[#allocation27_spill] sm:$0xff] %v14678_v12 }
 0xc17   : > { %v7737_v26 = vpop.permute.xlu1 %7736 }
 0xc18   : > { %7802 = vst.msk [vmem:[#allocation4 + $0xf0] sm:$0xff] %vm6631_vm4, %v7737_v26  ;;  %v7677_v52 = vpop.permute.xlu0 %7676  ;;  %v14655_v26 = vsel %vm9515_vm10, %v9248_v43, -inf }
 0xc19   : > { %7772 = vst.msk [vmem:[#allocation4] sm:$0xff] %vm6631_vm4, %v7677_v52  ;;  %v14668_v52 = vsel %vm9515_vm10, %v9360_v42, -inf }
 0xc1b   : > { %v7683_v35 = vpop.permute.xlu1 %7682 }
 0xc1c   : > { %7775 = vst.msk [vmem:[#allocation4 + $0x18] sm:$0xff] %vm6631_vm4, %v7683_v35  ;;  %v7685_v1 = vpop.permute.xlu0 %7684 }
 0xc1d   : > { %7776 = vst.msk [vmem:[#allocation4 + $0x20] sm:$0xff] %vm6631_vm4, %v7685_v1 }
 0xc1f   : > { %v7834_v10 = vld [vmem:[#allocation4 + $0xf0] sm:$0xff]  ;;  %v7691_v0 = vpop.permute.xlu1 %7690 }
 0xc20   : > { %v7873_v58 = vmul.f32 %v14500_v6, %v7834_v10  ;;  %v7804_v4 = vld [vmem:[#allocation4] sm:$0xff]  ;;  %7779 = vst.msk [vmem:[#allocation4 + $0x38] sm:$0xff] %vm6631_vm4, %v7691_v0  ;;  %v7693_v7 = vpop.permute.xlu0 %7692 }
 0xc21   : > { %v7843_v22 = vmul.f32 %v14500_v6, %v7804_v4  ;;  %7780 = vst.msk [vmem:[#allocation4 + $0x40] sm:$0xff] %vm6631_vm4, %v7693_v7 }
 0xc22   : > { %v7912_v29 = vadd.f32 %v14509_v60, %v7873_v58 }
 0xc23   : > { %v7882_v50 = vadd.f32 %v14509_v60, %v7843_v22  ;;  %v7807_v31 = vld [vmem:[#allocation4 + $0x18] sm:$0xff]  ;;  %v7699_v34 = vpop.permute.xlu1 %7698 }
 0xc24   : > { %v8456_v56 = vcombine.high %v7912_v29, %v7912_v29  ;;  %v8463_v40 = vrot.slane %v7912_v29, %v14513_v14  ;;  %v7846_v54 = vmul.f32 %v14500_v6, %v7807_v31  ;;  %v7808_v2 = vld [vmem:[#allocation4 + $0x20] sm:$0xff]  ;;  %7783 = vst.msk [vmem:[#allocation4 + $0x58] sm:$0xff] %vm6631_vm4, %v7699_v34  ;;  %v7701_v55 = vpop.permute.xlu0 %7700 }
 0xc25   : > { %v7946_v37 = vcombine.high %v7882_v50, %v7882_v50  ;;  %v7953_v13 = vrot.slane %v7882_v50, %v14513_v14  ;;  %v14682_v35 = vmul.f32 %v14500_v6, %v7808_v2  ;;  %7784 = vst.msk [vmem:[#allocation4 + $0x60] sm:$0xff] %vm6631_vm4, %v7701_v55 }
 0xc26   : > { %v8470_v18 = vrot.slane %v8456_v56, %v14513_v14  ;;  %v8471_v23 = vcombine.high %v8463_v40, %v8463_v40  ;;  %v9459_v17 = vsel %vm8618_vm9, %v8463_v40, -inf  ;;  %v14688_v1 = vadd.f32 %v14509_v60, %v7846_v54 }
 0xc27   : > { %v9460_v62 = vrot.slane %v9459_v17, 4  ;;  %v7960_v21 = vrot.slane %v7946_v37, %v14513_v14  ;;  %v7961_v47 = vcombine.high %v7953_v13, %v7953_v13  ;;  %v8619_v57 = vsel %vm8618_vm9, %v7953_v13, -inf  ;;  %v7707_v43 = vpop.permute.xlu1 %7706 }
 0xc28   : > { %v8472_v59 = vcombine.high %v8470_v18, %v8470_v18  ;;  %v9466_v45 = vsel %vm8618_vm9, %v8471_v23, -inf  ;;  %v9473_v41 = vsel %vm8618_vm9, %v8470_v18, -inf  ;;  %v8620_v42 = vrot.slane %v8619_v57, 4  ;;  %7787 = vst.msk [vmem:[#allocation4 + $0x78] sm:$0xff] %vm6631_vm4, %v7707_v43  ;;  %v7709_v10 = vpop.permute.xlu0 %7708 }
 0xc29   : > { %v9461_v0 = vmax.f32 %v9459_v17, %v9460_v62  ;;  %v9467_v8 = vrot.slane %v9466_v45, 4  ;;  %v9474_v58 = vrot.slane %v9473_v41, 4  ;;  %v7962_v4 = vcombine.high %v7960_v21, %v7960_v21  ;;  %7788 = vst.msk [vmem:[#allocation4 + $0x80] sm:$0xff] %vm6631_vm4, %v7709_v10 }
 0xc2a   : > { %v9480_v7 = vsel %vm8618_vm9, %v8472_v59, -inf  ;;  %v8621_v48 = vmax.f32 %v8619_v57, %v8620_v42  ;;  %v8626_v22 = vsel %vm8618_vm9, %v7961_v47, -inf  ;;  %v8633_v29 = vsel %vm8618_vm9, %v7960_v21, -inf }
 0xc2b   : > { %v9462_v50 = vrot.slane %v9461_v0, 2  ;;  %v9468_v31 = vmax.f32 %v9466_v45, %v9467_v8  ;;  %v9475_v34 = vmax.f32 %v9473_v41, %v9474_v58  ;;  %v9481_v56 = vrot.slane %v9480_v7, 4  ;;  %v7715_v40 = vpop.permute.xlu1 %7714 }
 0xc2c   : > { %v8622_v54 = vrot.slane %v8621_v48, 2  ;;  %v8627_v2 = vrot.slane %v8626_v22, 4  ;;  %v8634_v55 = vrot.slane %v8633_v29, 4  ;;  %v8640_v37 = vsel %vm8618_vm9, %v7962_v4, -inf  ;;  %7791 = vst.msk [vmem:[#allocation4 + $0x98] sm:$0xff] %vm6631_vm4, %v7715_v40  ;;  %v7717_v13 = vpop.permute.xlu0 %7716 }
 0xc2d   : > { %v9463_v18 = vmax.f32 %v9461_v0, %v9462_v50  ;;  %v9469_v23 = vrot.slane %v9468_v31, 2  ;;  %v9476_v17 = vrot.slane %v9475_v34, 2  ;;  %v9482_v62 = vmax.f32 %v9480_v7, %v9481_v56  ;;  %7792 = vst.msk [vmem:[#allocation4 + $0xa0] sm:$0xff] %vm6631_vm4, %v7717_v13 }
 0xc2e   : > { %v8623_v21 = vmax.f32 %v8621_v48, %v8622_v54  ;;  %v8628_v47 = vmax.f32 %v8626_v22, %v8627_v2  ;;  %v8635_v57 = vmax.f32 %v8633_v29, %v8634_v55  ;;  %v8641_v43 = vrot.slane %v8640_v37, 4 }
 0xc2f   : > { %v9464_v59 = vrot.slane %v9463_v18, 1  ;;  %v9470_v45 = vmax.f32 %v9468_v31, %v9469_v23  ;;  %v9477_v41 = vmax.f32 %v9475_v34, %v9476_v17  ;;  %v9483_v42 = vrot.slane %v9482_v62, 2  ;;  %v7723_v10 = vpop.permute.xlu1 %7722 }
 0xc30   : > { %v8624_v8 = vrot.slane %v8623_v21, 1  ;;  %v8629_v58 = vrot.slane %v8628_v47, 2  ;;  %v8636_v4 = vrot.slane %v8635_v57, 2  ;;  %v8642_v40 = vmax.f32 %v8640_v37, %v8641_v43  ;;  %7795 = vst.msk [vmem:[#allocation4 + $0xb8] sm:$0xff] %vm6631_vm4, %v7723_v10  ;;  %v7725_v0 = vpop.permute.xlu0 %7724 }
 0xc31   : > { %v9465_v7 = vmax.f32 %v9463_v18, %v9464_v59  ;;  %v9471_v50 = vrot.slane %v9470_v45, 1  ;;  %v9478_v56 = vrot.slane %v9477_v41, 1  ;;  %v9484_v48 = vmax.f32 %v9482_v62, %v9483_v42  ;;  %7796 = vst.msk [vmem:[#allocation4 + $0xc0] sm:$0xff] %vm6631_vm4, %v7725_v0  ;;  %v7811_v59 = vld [vmem:[#allocation4 + $0x38] sm:$0xff] }
 0xc32   : > { %v8625_v22 = vmax.f32 %v8623_v21, %v8624_v8  ;;  %v8630_v29 = vmax.f32 %v8628_v47, %v8629_v58  ;;  %v8637_v31 = vmax.f32 %v8635_v57, %v8636_v4  ;;  %v8643_v34 = vrot.slane %v8642_v40, 2 }
 0xc33   : > { %v9472_v54 = vmax.f32 %v9470_v45, %v9471_v50  ;;  %v9479_v2 = vmax.f32 %v9477_v41, %v9478_v56  ;;  %v9485_v55 = vrot.slane %v9484_v48, 1  ;;  %v14705_v13 = vsel %vm9515_vm10, %v9465_v7, -inf  ;;  %v7731_v37 = vpop.permute.xlu1 %7730 }
 0xc34   : > { %v8631_v23 = vrot.slane %v8630_v29, 1  ;;  %v8638_v17 = vrot.slane %v8637_v31, 1  ;;  %v8644_v43 = vmax.f32 %v8642_v40, %v8643_v34  ;;  %v9516_v18 = vsel %vm9515_vm10, %v8625_v22, -inf  ;;  %7799 = vst.msk [vmem:[#allocation4 + $0xd8] sm:$0xff] %vm6631_vm4, %v7731_v37  ;;  %v7733_v62 = vpop.permute.xlu0 %7732 }
 0xc35   : > { %v9486_v21 = vmax.f32 %v9484_v48, %v9485_v55  ;;  %v14710_v47 = vsel %vm9515_vm10, %v9472_v54, -inf  ;;  %v14713_v57 = vsel %vm9515_vm10, %v9479_v2, -inf  ;;  %v9518_v45 = vmax.f32 %v9516_v18, %v14556_v36  ;;  %7800 = vst.msk [vmem:[#allocation4 + $0xe0] sm:$0xff] %vm6631_vm4, %v7733_v62 }
 0xc36   : > { %15935 = vst [vmem:[#allocation28_spill] sm:$0xff] %v14713_v57  ;;  %v8632_v41 = vmax.f32 %v8630_v29, %v8631_v23  ;;  %v8639_v42 = vmax.f32 %v8637_v31, %v8638_v17  ;;  %v8645_v10 = vrot.slane %v8644_v43, 1  ;;  %v7997_v8 = vcombine.high %v14688_v1, %v14688_v1  ;;  %v7812_v17 = vld [vmem:[#allocation4 + $0x40] sm:$0xff] }
 0xc37   : > { %v14720_v58 = vsel %vm9515_vm10, %v9486_v21, -inf  ;;  %v8004_v4 = vrot.slane %v14688_v1, %v14513_v14  ;;  %v7886_v40 = vadd.f32 %v14509_v60, %v14682_v35  ;;  %v7850_v0 = vmul.f32 %v14500_v6, %v7811_v59  ;;  %v7739_v36 = vpop.permute.xlu1 %7738 }
 0xc38   : > { %15936 = vst [vmem:[#allocation29_spill] sm:$0xff] %v14720_v58  ;;  %v8646_v7 = vmax.f32 %v8644_v43, %v8645_v10  ;;  %v9519_v50 = vsel %vm9515_vm10, %v8632_v41, -inf  ;;  %v14729_v56 = vsel %vm9515_vm10, %v8639_v42, -inf  ;;  %v8011_v48 = vrot.slane %v7997_v8, %v14513_v14  ;;  %7803 = vst.msk [vmem:[#allocation4 + $0xf8] sm:$0xff] %vm6631_vm4, %v7739_v36  ;;  %v7679_v43 = vpop.permute.xlu0 %7678 }
 0xc39   : > { %15937 = vst [vmem:[#allocation30_spill] sm:$0xff] %v14729_v56  ;;  %v9521_v22 = vmax.f32 %v9519_v50, %v14563_v3  ;;  %v8012_v29 = vcombine.high %v8004_v4, %v8004_v4  ;;  %v8703_v35 = vsel %vm8618_vm9, %v8004_v4, -inf  ;;  %v8014_v21 = vcombine.high %v7886_v40, %v7886_v40  ;;  %7773 = vst.msk [vmem:[#allocation4 + $0x8] sm:$0xff] %vm6631_vm4, %v7679_v43 }
 0xc3a   : > { %v14738_v31 = vsel %vm9515_vm10, %v8646_v7, -inf  ;;  %v8013_v34 = vcombine.high %v8011_v48, %v8011_v48  ;;  %v8704_v54 = vrot.slane %v8703_v35, 4  ;;  %v8717_v2 = vsel %vm8618_vm9, %v8011_v48, -inf }
 0xc3b   : > { %15938 = vst [vmem:[#allocation31_spill] sm:$0xff] %v14738_v31  ;;  %v14744_v37 = vsel %vm9772_vm11, %v9521_v22, %v9518_v45  ;;  %v8710_v3 = vsel %vm8618_vm9, %v8012_v29, -inf  ;;  %v8718_v23 = vrot.slane %v8717_v2, 4  ;;  %v8021_v10 = vrot.slane %v7886_v40, %v14513_v14 }
 0xc3c   : > { %15939 = vst [vmem:[#allocation32_spill] sm:$0xff] %v14744_v37  ;;  %v8705_v18 = vmax.f32 %v8703_v35, %v8704_v54  ;;  %v8711_v59 = vrot.slane %v8710_v3, 4  ;;  %v8724_v62 = vsel %vm8618_vm9, %v8013_v34, -inf  ;;  %v7889_v8 = vadd.f32 %v14509_v60, %v7850_v0 }
 0xc3d   : > { %v8719_v41 = vmax.f32 %v8717_v2, %v8718_v23  ;;  %v8725_v42 = vrot.slane %v8724_v62, 4  ;;  %v8028_v36 = vrot.slane %v8014_v21, %v14513_v14  ;;  %v7851_v7 = vmul.f32 %v14500_v6, %v7812_v17 }
 0xc3e   : > { %v8706_v45 = vrot.slane %v8705_v18, 2  ;;  %v8712_v4 = vmax.f32 %v8710_v3, %v8711_v59  ;;  %v8029_v22 = vcombine.high %v8021_v10, %v8021_v10  ;;  %v8731_v29 = vsel %vm8618_vm9, %v8021_v10, -inf }
 0xc3f   : > { %v8720_v50 = vrot.slane %v8719_v41, 2  ;;  %v8726_v48 = vmax.f32 %v8724_v62, %v8725_v42  ;;  %v8030_v54 = vcombine.high %v8028_v36, %v8028_v36  ;;  %v8732_v2 = vrot.slane %v8731_v29, 4 }
 0xc40   : > { %v8707_v35 = vmax.f32 %v8705_v18, %v8706_v45  ;;  %v8713_v34 = vrot.slane %v8712_v4, 2  ;;  %v8738_v40 = vsel %vm8618_vm9, %v8029_v22, -inf  ;;  %v8745_v0 = vsel %vm8618_vm9, %v8028_v36, -inf }
 0xc41   : > { %v8721_v23 = vmax.f32 %v8719_v41, %v8720_v50  ;;  %v8727_v43 = vrot.slane %v8726_v48, 2  ;;  %v8733_v21 = vmax.f32 %v8731_v29, %v8732_v2  ;;  %v8739_v55 = vrot.slane %v8738_v40, 4 }
 0xc42   : > { %v8708_v3 = vrot.slane %v8707_v35, 1  ;;  %v8714_v59 = vmax.f32 %v8712_v4, %v8713_v34  ;;  %v8746_v62 = vrot.slane %v8745_v0, 4  ;;  %v8752_v42 = vsel %vm8618_vm9, %v8030_v54, -inf  ;;  %v7687_v34 = vpop.permute.xlu0 %7686 }
 0xc43   : > { %v8722_v6 = vrot.slane %v8721_v23, 1  ;;  %v8728_v17 = vmax.f32 %v8726_v48, %v8727_v43  ;;  %v8734_v45 = vrot.slane %v8733_v21, 2  ;;  %v8740_v1 = vmax.f32 %v8738_v40, %v8739_v55  ;;  %v7815_v43 = vld [vmem:[#allocation4 + $0x58] sm:$0xff]  ;;  %7777 = vst.msk [vmem:[#allocation4 + $0x28] sm:$0xff] %vm6631_vm4, %v7687_v34 }
 0xc44   : > { %v8709_v10 = vmax.f32 %v8707_v35, %v8708_v3  ;;  %v8715_v18 = vrot.slane %v8714_v59, 1  ;;  %v8747_v50 = vmax.f32 %v8745_v0, %v8746_v62  ;;  %v8753_v31 = vrot.slane %v8752_v42, 4 }
 0xc45   : > { %v8723_v30 = vmax.f32 %v8721_v23, %v8722_v6  ;;  %v8729_v41 = vrot.slane %v8728_v17, 1  ;;  %v8735_v4 = vmax.f32 %v8733_v21, %v8734_v45  ;;  %v8741_v29 = vrot.slane %v8740_v1, 2 }
 0xc46   : > { %v8716_v22 = vmax.f32 %v8714_v59, %v8715_v18  ;;  %v14758_v36 = vsel %vm9515_vm10, %v8709_v10, -inf  ;;  %v8748_v35 = vrot.slane %v8747_v50, 2  ;;  %v8754_v54 = vmax.f32 %v8752_v42, %v8753_v31  ;;  %v14775_v31 = vld [vmem:[%s15684_s9] ss:$0 sm:$0xff] }
 0xc47   : > { %v14760_v2 = vmax.f32 %v8728_v17, %v8729_v41  ;;  %v14763_v48 = vsel %vm9515_vm10, %v8723_v30, -inf  ;;  %v8736_v23 = vrot.slane %v8735_v4, 1  ;;  %v8742_v40 = vmax.f32 %v8740_v1, %v8741_v29 }
 0xc48   : > { %15940 = vst [vmem:[#allocation33_spill] sm:$0xff] %v14763_v48  ;;  %v14767_v55 = vsel %vm9515_vm10, %v8716_v22, -inf  ;;  %v8065_v0 = vcombine.high %v7889_v8, %v7889_v8  ;;  %v8749_v3 = vmax.f32 %v8747_v50, %v8748_v35  ;;  %v8755_v59 = vrot.slane %v8754_v54, 2 }
 0xc49   : > { %15941 = vst [vmem:[#allocation34_spill] sm:$0xff] %v14767_v55  ;;  %v8072_v21 = vrot.slane %v7889_v8, %v14513_v14  ;;  %v7890_v6 = vadd.f32 %v14509_v60, %v7851_v7  ;;  %v8737_v17 = vmax.f32 %v8735_v4, %v8736_v23  ;;  %v8743_v30 = vrot.slane %v8742_v40, 1 }
 0xc4a   : > { %v8079_v62 = vrot.slane %v8065_v0, %v14513_v14  ;;  %v7854_v42 = vmul.f32 %v14775_v31, %v7815_v43  ;;  %v8750_v10 = vrot.slane %v8749_v3, 1  ;;  %v8756_v1 = vmax.f32 %v8754_v54, %v8755_v59 }
 0xc4b   : > { %v8080_v18 = vcombine.high %v8072_v21, %v8072_v21  ;;  %v8815_v45 = vsel %vm8618_vm9, %v8072_v21, -inf  ;;  %v8744_v41 = vmax.f32 %v8742_v40, %v8743_v30  ;;  %v9540_v8 = vsel %vm9515_vm10, %v8737_v17, -inf  ;;  %v7695_v21 = vpop.permute.xlu0 %7694 }
 0xc4c   : > { %v8081_v60 = vcombine.high %v8079_v62, %v8079_v62  ;;  %v8816_v7 = vrot.slane %v8815_v45, 4  ;;  %v8751_v50 = vmax.f32 %v8749_v3, %v8750_v10  ;;  %v8757_v22 = vrot.slane %v8756_v1, 1  ;;  %7781 = vst.msk [vmem:[#allocation4 + $0x48] sm:$0xff] %vm6631_vm4, %v7695_v21 }
 0xc4d   : > { %v9542_v4 = vmax.f32 %v9540_v8, %v14574_v63  ;;  %v8822_v29 = vsel %vm8618_vm9, %v8080_v18, -inf  ;;  %v9543_v34 = vsel %vm9515_vm10, %v8744_v41, -inf  ;;  %v8829_v54 = vsel %vm8618_vm9, %v8079_v62, -inf  ;;  %v7816_v18 = vld [vmem:[#allocation4 + $0x60] sm:$0xff] }
 0xc4e   : > { %v8817_v35 = vmax.f32 %v8815_v45, %v8816_v7  ;;  %v8823_v43 = vrot.slane %v8822_v29, 4  ;;  %v8758_v23 = vmax.f32 %v8756_v1, %v8757_v22  ;;  %v9545_v0 = vmax.f32 %v9543_v34, %v14577_v49 }
 0xc4f   : > { %v14786_v40 = vsel %vm9515_vm10, %v8751_v50, -inf  ;;  %v8830_v59 = vrot.slane %v8829_v54, 4  ;;  %v8836_v30 = vsel %vm8618_vm9, %v8081_v60, -inf  ;;  %v8082_v7 = vcombine.high %v7890_v6, %v7890_v6  ;;  %v7703_v28 = vpop.permute.xlu0 %7702 }
 0xc50   : > { %15942 = vst [vmem:[#allocation35_spill] sm:$0xff] %v14786_v40  ;;  %v8818_v63 = vrot.slane %v8817_v35, 2  ;;  %v8824_v17 = vmax.f32 %v8822_v29, %v8823_v43  ;;  %v14793_v10 = vsel %vm9515_vm10, %v8758_v23, -inf  ;;  %v14796_v62 = vsel %vm9772_vm11, %v9545_v0, %v9542_v4  ;;  %v14804_v29 = vld [vmem:[%s15685_s10] ss:$0 sm:$0xff]  ;;  %7785 = vst.msk [vmem:[#allocation4 + $0x68] sm:$0xff] %vm6631_vm4, %v7703_v28 }
 0xc51   : > { %15943 = vst [vmem:[#allocation36_spill] sm:$0xff] %v14793_v10  ;;  %15944 = vst [vmem:[#allocation37_spill] sm:$0xff] %v14796_v62  ;;  %v8831_v49 = vmax.f32 %v8829_v54, %v8830_v59  ;;  %v8837_v1 = vrot.slane %v8836_v30, 4  ;;  %v8089_v60 = vrot.slane %v7890_v6, %v14513_v14  ;;  %v7893_v4 = vadd.f32 %v14804_v29, %v7854_v42 }
 0xc52   : > { %v8819_v41 = vmax.f32 %v8817_v35, %v8818_v63  ;;  %v8825_v8 = vrot.slane %v8824_v17, 2  ;;  %v8096_v54 = vrot.slane %v8082_v7, %v14513_v14  ;;  %v7855_v23 = vmul.f32 %v14775_v31, %v7816_v18 }
 0xc53   : > { %v8832_v50 = vrot.slane %v8831_v49, 2  ;;  %v8838_v22 = vmax.f32 %v8836_v30, %v8837_v1  ;;  %v8097_v59 = vcombine.high %v8089_v60, %v8089_v60  ;;  %v8843_v21 = vsel %vm8618_vm9, %v8089_v60, -inf  ;;  %v7711_v37 = vpop.permute.xlu0 %7710 }
 0xc54   : > { %v8820_v34 = vrot.slane %v8819_v41, 1  ;;  %v8826_v43 = vmax.f32 %v8824_v17, %v8825_v8  ;;  %v8098_v30 = vcombine.high %v8096_v54, %v8096_v54  ;;  %v8844_v1 = vrot.slane %v8843_v21, 4  ;;  %7789 = vst.msk [vmem:[#allocation4 + $0x88] sm:$0xff] %vm6631_vm4, %v7711_v37 }
 0xc55   : > { %v8833_v35 = vmax.f32 %v8831_v49, %v8832_v50  ;;  %v8839_v0 = vrot.slane %v8838_v22, 2  ;;  %v8850_v16 = vsel %vm8618_vm9, %v8097_v59, -inf  ;;  %v8857_v42 = vsel %vm8618_vm9, %v8096_v54, -inf  ;;  %v7819_v59 = vld [vmem:[#allocation4 + $0x78] sm:$0xff] }
 0xc56   : > { %v8821_v63 = vmax.f32 %v8819_v41, %v8820_v34  ;;  %v8827_v6 = vrot.slane %v8826_v43, 1  ;;  %v8845_v18 = vmax.f32 %v8843_v21, %v8844_v1  ;;  %v8851_v49 = vrot.slane %v8850_v16, 4 }
 0xc57   : > { %v8834_v45 = vrot.slane %v8833_v35, 1  ;;  %v8840_v3 = vmax.f32 %v8838_v22, %v8839_v0  ;;  %v8858_v10 = vrot.slane %v8857_v42, 4  ;;  %v8864_v41 = vsel %vm8618_vm9, %v8098_v30, -inf }
 0xc58   : > { %v8828_v17 = vmax.f32 %v8826_v43, %v8827_v6  ;;  %v14813_v8 = vsel %vm9515_vm10, %v8821_v63, -inf  ;;  %v8846_v34 = vrot.slane %v8845_v18, 2  ;;  %v8852_v22 = vmax.f32 %v8850_v16, %v8851_v49 }
 0xc59   : > { %15945 = vst [vmem:[#allocation38_spill] sm:$0xff] %v14813_v8  ;;  %v8835_v7 = vmax.f32 %v8833_v35, %v8834_v45  ;;  %v8841_v50 = vrot.slane %v8840_v3, 1  ;;  %v8865_v0 = vrot.slane %v8864_v41, 4  ;;  %v8859_v21 = vmax.f32 %v8857_v42, %v8858_v10 }
 0xc5a   : > { %v14817_v60 = vsel %vm9515_vm10, %v8828_v17, -inf  ;;  %v8133_v63 = vcombine.high %v7893_v4, %v7893_v4  ;;  %v8847_v45 = vmax.f32 %v8845_v18, %v8846_v34  ;;  %v8853_v35 = vrot.slane %v8852_v22, 2 }
 0xc5b   : > { %15946 = vst [vmem:[#allocation39_spill] sm:$0xff] %v14817_v60  ;;  %v14819_v54 = vmax.f32 %v8840_v3, %v8841_v50  ;;  %v14822_v43 = vsel %vm9515_vm10, %v8835_v7, -inf  ;;  %v8866_v6 = vmax.f32 %v8864_v41, %v8865_v0  ;;  %v8140_v30 = vrot.slane %v7893_v4, %v14513_v14 }
 0xc5c   : > { %15948 = vst [vmem:[#allocation10_spill] sm:$0xff] %v14822_v43  ;;  %v8860_v1 = vrot.slane %v8859_v21, 2  ;;  %v8147_v16 = vrot.slane %v8133_v63, %v14513_v14  ;;  %v7894_v17 = vadd.f32 %v14804_v29, %v7855_v23  ;;  %v7858_v3 = vmul.f32 %v14775_v31, %v7819_v59 }
 0xc5d   : > { %15947 = vst [vmem:[#allocation11_spill] sm:$0xff] %v14819_v54  ;;  %v8848_v49 = vrot.slane %v8847_v45, 1  ;;  %v8854_v50 = vmax.f32 %v8852_v22, %v8853_v35  ;;  %v8867_v7 = vrot.slane %v8866_v6, 2  ;;  %v8148_v40 = vcombine.high %v8140_v30, %v8140_v30 }
 0xc5e   : > { %v8861_v10 = vmax.f32 %v8859_v21, %v8860_v1  ;;  %v8149_v42 = vcombine.high %v8147_v16, %v8147_v16  ;;  %v8927_v28 = vsel %vm8618_vm9, %v8140_v30, -inf  ;;  %v8941_v18 = vsel %vm8618_vm9, %v8147_v16, -inf }
 0xc5f   : > { %v8849_v41 = vmax.f32 %v8847_v45, %v8848_v49  ;;  %v8855_v34 = vrot.slane %v8854_v50, 1  ;;  %v8868_v4 = vmax.f32 %v8866_v6, %v8867_v7  ;;  %v8928_v0 = vrot.slane %v8927_v28, 4 }
 0xc60   : > { %v8862_v62 = vrot.slane %v8861_v10, 1  ;;  %v8934_v63 = vsel %vm8618_vm9, %v8148_v40, -inf  ;;  %v8942_v23 = vrot.slane %v8941_v18, 4  ;;  %v8948_v59 = vsel %vm8618_vm9, %v8149_v42, -inf }
 0xc61   : > { %v8856_v15 = vmax.f32 %v8854_v50, %v8855_v34  ;;  %v8869_v22 = vrot.slane %v8868_v4, 1  ;;  %v9564_v35 = vsel %vm9515_vm10, %v8849_v41, -inf  ;;  %v8929_v21 = vmax.f32 %v8927_v28, %v8928_v0  ;;  %v7820_v28 = vld [vmem:[#allocation4 + $0x80] sm:$0xff] }
 0xc62   : > { %v8863_v1 = vmax.f32 %v8861_v10, %v8862_v62  ;;  %v9566_v30 = vmax.f32 %v9564_v35, %v14593_v5  ;;  %v8935_v56 = vrot.slane %v8934_v63, 4  ;;  %v8943_v16 = vmax.f32 %v8941_v18, %v8942_v23 }
 0xc63   : > { %v8870_v45 = vmax.f32 %v8868_v4, %v8869_v22  ;;  %v9567_v6 = vsel %vm9515_vm10, %v8856_v15, -inf  ;;  %v8930_v49 = vrot.slane %v8929_v21, 2  ;;  %v8949_v7 = vrot.slane %v8948_v59, 4 }
 0xc64   : > { %v9569_v40 = vmax.f32 %v9567_v6, %v14598_v53  ;;  %v14838_v42 = vsel %vm9515_vm10, %v8863_v1, -inf  ;;  %v8936_v50 = vmax.f32 %v8934_v63, %v8935_v56  ;;  %v8944_v34 = vrot.slane %v8943_v16, 2 }
 0xc65   : > { %15949 = vst [vmem:[#allocation41_spill] sm:$0xff] %v14838_v42  ;;  %v14844_v62 = vsel %vm9515_vm10, %v8870_v45, -inf  ;;  %v8931_v10 = vmax.f32 %v8929_v21, %v8930_v49  ;;  %v8950_v15 = vmax.f32 %v8948_v59, %v8949_v7  ;;  %v8150_v37 = vcombine.high %v7894_v17, %v7894_v17 }
 0xc66   : > { %15950 = vst [vmem:[#allocation40_spill] sm:$0xff] %v14844_v62  ;;  %v14849_v53 = vsel %vm9772_vm11, %v9569_v40, %v9566_v30  ;;  %v8937_v41 = vrot.slane %v8936_v50, 2  ;;  %v8945_v56 = vmax.f32 %v8943_v16, %v8944_v34  ;;  %v8157_v63 = vrot.slane %v7894_v17, %v14513_v14 }
 0xc67   : > { %15951 = vst [vmem:[#allocation13_spill] sm:$0xff] %v14849_v53  ;;  %v8932_v4 = vrot.slane %v8931_v10, 1  ;;  %v8951_v0 = vrot.slane %v8950_v15, 2  ;;  %v7897_v35 = vadd.f32 %v14804_v29, %v7858_v3  ;;  %v14854_v59 = vmul.f32 %v14775_v31, %v7820_v28  ;;  %v7719_v3 = vpop.permute.xlu0 %7718 }
 0xc68   : > { %v8938_v23 = vmax.f32 %v8936_v50, %v8937_v41  ;;  %v8946_v22 = vrot.slane %v8945_v56, 1  ;;  %v8164_v45 = vrot.slane %v8150_v37, %v14513_v14  ;;  %v8165_v30 = vcombine.high %v8157_v63, %v8157_v63  ;;  %7793 = vst.msk [vmem:[#allocation4 + $0xa8] sm:$0xff] %vm6631_vm4, %v7719_v3 }
 0xc69   : > { %v8933_v21 = vmax.f32 %v8931_v10, %v8932_v4  ;;  %v8952_v1 = vmax.f32 %v8950_v15, %v8951_v0  ;;  %v8955_v16 = vsel %vm8618_vm9, %v8157_v63, -inf  ;;  %v8201_v7 = vcombine.high %v7897_v35, %v7897_v35 }
 0xc6a   : > { %v8939_v6 = vrot.slane %v8938_v23, 1  ;;  %v8947_v49 = vmax.f32 %v8945_v56, %v8946_v22  ;;  %v8166_v50 = vcombine.high %v8164_v45, %v8164_v45  ;;  %v8956_v34 = vrot.slane %v8955_v16, 4 }
 0xc6b   : > { %v8953_v40 = vrot.slane %v8952_v1, 1  ;;  %v14859_v17 = vsel %vm9515_vm10, %v8933_v21, -inf  ;;  %v8962_v10 = vsel %vm8618_vm9, %v8165_v30, -inf  ;;  %v8969_v15 = vsel %vm8618_vm9, %v8164_v45, -inf }
 0xc6c   : > { %15952 = vst [vmem:[#allocation12_spill] sm:$0xff] %v14859_v17  ;;  %v8940_v41 = vmax.f32 %v8938_v23, %v8939_v6  ;;  %v14862_v28 = vsel %vm9515_vm10, %v8947_v49, -inf  ;;  %v8957_v4 = vmax.f32 %v8955_v16, %v8956_v34  ;;  %v8963_v0 = vrot.slane %v8962_v10, 4 }
 0xc6d   : > { %15953 = vst [vmem:[#allocation9_spill] sm:$0xff] %v14862_v28  ;;  %v14867_v56 = vmax.f32 %v8952_v1, %v8953_v40  ;;  %v8970_v37 = vrot.slane %v8969_v15, 4  ;;  %v8976_v22 = vsel %vm8618_vm9, %v8166_v50, -inf  ;;  %v8208_v23 = vrot.slane %v7897_v35, %v14513_v14 }
 0xc6e   : > { %v14870_v63 = vsel %vm9515_vm10, %v8940_v41, -inf  ;;  %v8215_v21 = vrot.slane %v8201_v7, %v14513_v14  ;;  %v8958_v6 = vrot.slane %v8957_v4, 2  ;;  %v8964_v30 = vmax.f32 %v8962_v10, %v8963_v0 }
 0xc6f   : > { %15954 = vst [vmem:[#allocation8_spill] sm:$0xff] %v14867_v56  ;;  %15955 = vst [vmem:[#allocation42_spill] sm:$0xff] %v14870_v63  ;;  %v8971_v49 = vmax.f32 %v8969_v15, %v8970_v37  ;;  %v8977_v45 = vrot.slane %v8976_v22, 4  ;;  %v8216_v18 = vcombine.high %v8208_v23, %v8208_v23  ;;  %v9039_v1 = vsel %vm8618_vm9, %v8208_v23, -inf }
 0xc70   : > { %v8217_v3 = vcombine.high %v8215_v21, %v8215_v21  ;;  %v9053_v16 = vsel %vm8618_vm9, %v8215_v21, -inf  ;;  %v8959_v40 = vmax.f32 %v8957_v4, %v8958_v6  ;;  %v8965_v34 = vrot.slane %v8964_v30, 2 }
 0xc71   : > { %v8972_v41 = vrot.slane %v8971_v49, 2  ;;  %v8978_v5 = vmax.f32 %v8976_v22, %v8977_v45  ;;  %v9040_v24 = vrot.slane %v9039_v1, 4  ;;  %v9046_v50 = vsel %vm8618_vm9, %v8216_v18, -inf }
 0xc72   : > { %v9054_v35 = vrot.slane %v9053_v16, 4  ;;  %v9060_v7 = vsel %vm8618_vm9, %v8217_v3, -inf  ;;  %v8960_v62 = vrot.slane %v8959_v40, 1  ;;  %v8966_v10 = vmax.f32 %v8964_v30, %v8965_v34 }
 0xc73   : > { %v8973_v15 = vmax.f32 %v8971_v49, %v8972_v41  ;;  %v8979_v0 = vrot.slane %v8978_v5, 2  ;;  %v9041_v37 = vmax.f32 %v9039_v1, %v9040_v24  ;;  %v9047_v11 = vrot.slane %v9046_v50, 4 }
 0xc74   : > { %v9055_v42 = vmax.f32 %v9053_v16, %v9054_v35  ;;  %v9061_v23 = vrot.slane %v9060_v7, 4  ;;  %v8961_v53 = vmax.f32 %v8959_v40, %v8960_v62  ;;  %v8967_v21 = vrot.slane %v8966_v10, 1  ;;  %v7824_v35 = vld [vmem:[#allocation4 + $0xa0] sm:$0xff] }
 0xc75   : > { %v8974_v4 = vrot.slane %v8973_v15, 1  ;;  %v8980_v6 = vmax.f32 %v8978_v5, %v8979_v0  ;;  %v9042_v56 = vrot.slane %v9041_v37, 2  ;;  %v9048_v22 = vmax.f32 %v9046_v50, %v9047_v11  ;;  %v7727_v11 = vpop.permute.xlu0 %7726 }
 0xc76   : > { %v9056_v45 = vrot.slane %v9055_v42, 2  ;;  %v9062_v28 = vmax.f32 %v9060_v7, %v9061_v23  ;;  %v8968_v18 = vmax.f32 %v8966_v10, %v8967_v21  ;;  %v9588_v3 = vsel %vm9515_vm10, %v8961_v53, -inf  ;;  %7797 = vst.msk [vmem:[#allocation4 + $0xc8] sm:$0xff] %vm6631_vm4, %v7727_v11 }
 0xc77   : > { %v8975_v54 = vmax.f32 %v8973_v15, %v8974_v4  ;;  %v8981_v43 = vrot.slane %v8980_v6, 1  ;;  %v9590_v30 = vmax.f32 %v9588_v3, %v14622_v9  ;;  %v9043_v49 = vmax.f32 %v9041_v37, %v9042_v56  ;;  %v7823_v56 = vld [vmem:[#allocation4 + $0x98] sm:$0xff] }
 0xc78   : > { %v9049_v24 = vrot.slane %v9048_v22, 2  ;;  %v9057_v1 = vmax.f32 %v9055_v42, %v9056_v45  ;;  %v9591_v62 = vsel %vm9515_vm10, %v8968_v18, -inf  ;;  %v9063_v5 = vrot.slane %v9062_v28, 2 }
 0xc79   : > { %v8982_v16 = vmax.f32 %v8980_v6, %v8981_v43  ;;  %v14883_v40 = vsel %vm9515_vm10, %v8975_v54, -inf  ;;  %v9593_v34 = vmax.f32 %v9591_v62, %v14626_v51  ;;  %v9044_v50 = vrot.slane %v9043_v49, 1 }
 0xc7a   : > { %15956 = vst [vmem:[#allocation43_spill] sm:$0xff] %v14883_v40  ;;  %v9050_v53 = vmax.f32 %v9048_v22, %v9049_v24  ;;  %v9058_v43 = vrot.slane %v9057_v1, 1  ;;  %v9064_v42 = vmax.f32 %v9062_v28, %v9063_v5  ;;  %v7898_v54 = vadd.f32 %v14804_v29, %v14854_v59 }
 0xc7b   : > { %v14890_v9 = vsel %vm9515_vm10, %v8982_v16, -inf  ;;  %v14897_v7 = vsel %vm9772_vm11, %v9593_v34, %v9590_v30  ;;  %v9045_v10 = vmax.f32 %v9043_v49, %v9044_v50  ;;  %v7862_v59 = vmul.f32 %v14775_v31, %v7823_v56  ;;  %v7735_v30 = vpop.permute.xlu0 %7734 }
 0xc7c   : > { %15957 = vst [vmem:[#allocation44_spill] sm:$0xff] %v14890_v9  ;;  %15958 = vst [vmem:[#allocation45_spill] sm:$0xff] %v14897_v7  ;;  %v9051_v15 = vrot.slane %v9050_v53, 1  ;;  %v9059_v0 = vmax.f32 %v9057_v1, %v9058_v43  ;;  %v9065_v37 = vrot.slane %v9064_v42, 1  ;;  %v8218_v23 = vcombine.high %v7898_v54, %v7898_v54 }
 0xc7d   : > { %v8225_v21 = vrot.slane %v7898_v54, %v14513_v14  ;;  %v14901_v28 = vsel %vm9515_vm10, %v9045_v10, -inf  ;;  %v7863_v6 = vmul.f32 %v14775_v31, %v7824_v35  ;;  %v7901_v1 = vadd.f32 %v14804_v29, %v7862_v59  ;;  %7801 = vst.msk [vmem:[#allocation4 + $0xe8] sm:$0xff] %vm6631_vm4, %v7735_v30 }
 0xc7e   : > { %v9052_v4 = vmax.f32 %v9050_v53, %v9051_v15  ;;  %15959 = vst [vmem:[#allocation46_spill] sm:$0xff] %v14901_v28  ;;  %v14905_v22 = vmax.f32 %v9064_v42, %v9065_v37  ;;  %v14908_v45 = vsel %vm9515_vm10, %v9059_v0, -inf  ;;  %v8232_v18 = vrot.slane %v8218_v23, %v14513_v14 }
 0xc7f   : > { %v8233_v3 = vcombine.high %v8225_v21, %v8225_v21  ;;  %v9067_v24 = vsel %vm8618_vm9, %v8225_v21, -inf  ;;  %v7902_v16 = vadd.f32 %v14804_v29, %v7863_v6  ;;  %v8269_v43 = vcombine.high %v7901_v1, %v7901_v1 }
 0xc80   : > { %v14912_v49 = vsel %vm9515_vm10, %v9052_v4, -inf  ;;  %v8234_v62 = vcombine.high %v8232_v18, %v8232_v18  ;;  %v9068_v5 = vrot.slane %v9067_v24, 4  ;;  %v9081_v34 = vsel %vm8618_vm9, %v8232_v18, -inf }
 0xc81   : > { %15960 = vst [vmem:[#allocation47_spill] sm:$0xff] %v14912_v49  ;;  %v9074_v11 = vsel %vm8618_vm9, %v8233_v3, -inf  ;;  %v9082_v53 = vrot.slane %v9081_v34, 4  ;;  %v8276_v42 = vrot.slane %v7901_v1, %v14513_v14  ;;  %v8286_v35 = vcombine.high %v7902_v16, %v7902_v16 }
 0xc82   : > { %v9075_v50 = vrot.slane %v9074_v11, 4  ;;  %v9069_v54 = vmax.f32 %v9067_v24, %v9068_v5  ;;  %v9088_v56 = vsel %vm8618_vm9, %v8234_v62, -inf  ;;  %v14923_v10 = vrot.slane %v7902_v16, %v14513_v14 }
 0xc83   : > { %v9083_v0 = vmax.f32 %v9081_v34, %v9082_v53  ;;  %v9089_v37 = vrot.slane %v9088_v56, 4  ;;  %v8283_v23 = vrot.slane %v8269_v43, %v14513_v14  ;;  %v8284_v4 = vcombine.high %v8276_v42, %v8276_v42 }
 0xc84   : > { %v9076_v15 = vmax.f32 %v9074_v11, %v9075_v50  ;;  %v9070_v21 = vrot.slane %v9069_v54, 2  ;;  %v9151_v59 = vsel %vm8618_vm9, %v8276_v42, -inf  ;;  %v14928_v6 = vrot.slane %v8286_v35, %v14513_v14 }
 0xc85   : > { %v9084_v3 = vrot.slane %v9083_v0, 2  ;;  %v9090_v30 = vmax.f32 %v9088_v56, %v9089_v37  ;;  %v8285_v24 = vcombine.high %v8283_v23, %v8283_v23  ;;  %v9152_v62 = vrot.slane %v9151_v59, 4 }
 0xc86   : > { %v9077_v18 = vrot.slane %v9076_v15, 2  ;;  %v9071_v1 = vmax.f32 %v9069_v54, %v9070_v21  ;;  %v9158_v16 = vsel %vm8618_vm9, %v8284_v4, -inf  ;;  %v9165_v5 = vsel %vm8618_vm9, %v8283_v23, -inf }
 0xc87   : > { %v9085_v34 = vmax.f32 %v9083_v0, %v9084_v3  ;;  %v9091_v50 = vrot.slane %v9090_v30, 2  ;;  %v9159_v53 = vrot.slane %v9158_v16, 4  ;;  %v9153_v51 = vmax.f32 %v9151_v59, %v9152_v62 }
 0xc88   : > { %v9078_v11 = vmax.f32 %v9076_v15, %v9077_v18  ;;  %v9072_v43 = vrot.slane %v9071_v1, 1  ;;  %v9166_v42 = vrot.slane %v9165_v5, 4  ;;  %v9172_v35 = vsel %vm8618_vm9, %v8285_v24, -inf }
 0xc89   : > { %v9086_v20 = vrot.slane %v9085_v34, 1  ;;  %v9092_v9 = vmax.f32 %v9090_v30, %v9091_v50  ;;  %v9160_v56 = vmax.f32 %v9158_v16, %v9159_v53  ;;  %v9154_v54 = vrot.slane %v9153_v51, 2 }
 0xc8a   : > { %v9079_v41 = vrot.slane %v9078_v11, 1  ;;  %v9073_v37 = vmax.f32 %v9071_v1, %v9072_v43  ;;  %v9167_v21 = vmax.f32 %v9165_v5, %v9166_v42  ;;  %v9173_v33 = vrot.slane %v9172_v35, 4 }
 0xc8b   : > { %v9087_v40 = vmax.f32 %v9085_v34, %v9086_v20  ;;  %v9093_v23 = vrot.slane %v9092_v9, 1  ;;  %v9161_v15 = vrot.slane %v9160_v56, 2  ;;  %v9155_v18 = vmax.f32 %v9153_v51, %v9154_v54 }
 0xc8c   : > { %v9080_v4 = vmax.f32 %v9078_v11, %v9079_v41  ;;  %v9612_v0 = vsel %vm9515_vm10, %v9073_v37, -inf  ;;  %v9168_v3 = vrot.slane %v9167_v21, 2  ;;  %v9174_v59 = vmax.f32 %v9172_v35, %v9173_v33 }
 0xc8d   : > { %v9094_v62 = vmax.f32 %v9092_v9, %v9093_v23  ;;  %v9614_v24 = vmax.f32 %v9612_v0, %v14636_v19  ;;  %v14937_v30 = vsel %vm9515_vm10, %v9087_v40, -inf  ;;  %v9156_v41 = vrot.slane %v9155_v18, 1  ;;  %v7827_v23 = vld [vmem:[#allocation4 + $0xb8] sm:$0xff] }
 0xc8e   : > { %v9615_v7 = vsel %vm9515_vm10, %v9080_v4, -inf  ;;  %15961 = vst [vmem:[#allocation48_spill] sm:$0xff] %v14937_v30  ;;  %v9162_v16 = vmax.f32 %v9160_v56, %v9161_v15  ;;  %v9169_v51 = vmax.f32 %v9167_v21, %v9168_v3  ;;  %v9175_v33 = vrot.slane %v9174_v59, 2  ;;  %v7828_v15 = vld [vmem:[#allocation4 + $0xc0] sm:$0xff] }
 0xc8f   : > { %v9617_v1 = vmax.f32 %v9615_v7, %v14639_v25  ;;  %v14943_v5 = vsel %vm9515_vm10, %v9094_v62, -inf  ;;  %v8301_v19 = vcombine.high %v14923_v10, %v14923_v10  ;;  %v9157_v25 = vmax.f32 %v9155_v18, %v9156_v41  ;;  %v7832_v62 = vld [vmem:[#allocation4 + $0xe0] sm:$0xff] }
 0xc90   : > { %15962 = vst [vmem:[#allocation49_spill] sm:$0xff] %v14943_v5  ;;  %v9163_v7 = vrot.slane %v9162_v16, 1  ;;  %v9170_v11 = vrot.slane %v9169_v51, 1  ;;  %v9176_v34 = vmax.f32 %v9174_v59, %v9175_v33  ;;  %v8302_v50 = vcombine.high %v14928_v6, %v14928_v6  ;;  %v7831_v59 = vld [vmem:[#allocation4 + $0xd8] sm:$0xff] }
 0xc91   : > { %v14950_v40 = vsel %vm9772_vm11, %v9617_v1, %v9614_v24  ;;  %v9179_v53 = vsel %vm8618_vm9, %v14923_v10, -inf  ;;  %v14957_v42 = vsel %vm9515_vm10, %v9157_v25, -inf  ;;  %v9186_v56 = vsel %vm8618_vm9, %v8301_v19, -inf }
 0xc92   : > { %15963 = vst [vmem:[#allocation50_spill] sm:$0xff] %v14950_v40  ;;  %v9164_v43 = vmax.f32 %v9162_v16, %v9163_v7  ;;  %15964 = vst [vmem:[#allocation51_spill] sm:$0xff] %v14957_v42  ;;  %v9180_v35 = vrot.slane %v9179_v53, 4  ;;  %v9171_v37 = vmax.f32 %v9169_v51, %v9170_v11  ;;  %v9177_v54 = vrot.slane %v9176_v34, 1 }
 0xc93   : > { %v9187_v21 = vrot.slane %v9186_v56, 4  ;;  %v9193_v4 = vsel %vm8618_vm9, %v14928_v6, -inf  ;;  %v9200_v3 = vsel %vm8618_vm9, %v8302_v50, -inf  ;;  %v7866_v33 = vmul.f32 %v14775_v31, %v7827_v23 }
 0xc94   : > { %v14963_v0 = vsel %vm9515_vm10, %v9164_v43, -inf  ;;  %v9181_v18 = vmax.f32 %v9179_v53, %v9180_v35  ;;  %v9194_v10 = vrot.slane %v9193_v4, 4  ;;  %v14966_v24 = vmax.f32 %v9176_v34, %v9177_v54 }
 0xc95   : > { %15965 = vst [vmem:[#allocation52_spill] sm:$0xff] %v14963_v0  ;;  %v14969_v1 = vsel %vm9515_vm10, %v9171_v37, -inf  ;;  %v9188_v41 = vmax.f32 %v9186_v56, %v9187_v21  ;;  %v9201_v16 = vrot.slane %v9200_v3, 4  ;;  %v7867_v19 = vmul.f32 %v14775_v31, %v7828_v15 }
 0xc96   : > { %v9182_v51 = vrot.slane %v9181_v18, 2  ;;  %v9195_v6 = vmax.f32 %v9193_v4, %v9194_v10  ;;  %v7870_v11 = vmul.f32 %v14775_v31, %v7831_v59  ;;  %v7871_v50 = vmul.f32 %v14775_v31, %v7832_v62 }
 0xc97   : > { %v9189_v25 = vrot.slane %v9188_v41, 2  ;;  %v9202_v7 = vmax.f32 %v9200_v3, %v9201_v16  ;;  %v7905_v43 = vadd.f32 %v14804_v29, %v7866_v33  ;;  %v7906_v35 = vadd.f32 %v14804_v29, %v7867_v19 }
 0xc98   : > { %v9183_v53 = vmax.f32 %v9181_v18, %v9182_v51  ;;  %v9196_v34 = vrot.slane %v9195_v6, 2  ;;  %v14978_v54 = vadd.f32 %v14804_v29, %v7870_v11  ;;  %v14981_v21 = vadd.f32 %v14804_v29, %v7871_v50 }
 0xc99   : > { %v9190_v56 = vmax.f32 %v9188_v41, %v9189_v25  ;;  %v9203_v37 = vrot.slane %v9202_v7, 2  ;;  %v8337_v15 = vcombine.high %v7905_v43, %v7905_v43  ;;  %v8344_v10 = vrot.slane %v7905_v43, %v14513_v14 }
 0xc9a   : > { %v9184_v4 = vrot.slane %v9183_v53, 1  ;;  %v9197_v23 = vmax.f32 %v9195_v6, %v9196_v34  ;;  %v8354_v59 = vcombine.high %v7906_v35, %v7906_v35  ;;  %v8361_v62 = vrot.slane %v7906_v35, %v14513_v14 }
 0xc9b   : > { %v9191_v3 = vrot.slane %v9190_v56, 1  ;;  %v9204_v18 = vmax.f32 %v9202_v7, %v9203_v37  ;;  %v8351_v41 = vrot.slane %v8337_v15, %v14513_v14  ;;  %v8352_v33 = vcombine.high %v8344_v10, %v8344_v10 }
 0xc9c   : > { %v9185_v16 = vmax.f32 %v9183_v53, %v9184_v4  ;;  %v9198_v51 = vrot.slane %v9197_v23, 1  ;;  %v9263_v11 = vsel %vm8618_vm9, %v8344_v10, -inf  ;;  %v8368_v50 = vrot.slane %v8354_v59, %v14513_v14 }
 0xc9d   : > { %v9192_v19 = vmax.f32 %v9190_v56, %v9191_v3  ;;  %v9205_v25 = vrot.slane %v9204_v18, 1  ;;  %v8353_v43 = vcombine.high %v8351_v41, %v8351_v41  ;;  %v9264_v9 = vrot.slane %v9263_v11, 4 }
 0xc9e   : > { %v9199_v6 = vmax.f32 %v9197_v23, %v9198_v51  ;;  %v9636_v34 = vsel %vm9515_vm10, %v9185_v16, -inf  ;;  %v9270_v35 = vsel %vm8618_vm9, %v8352_v33, -inf }
 0xc9f   : > { %v9206_v7 = vmax.f32 %v9204_v18, %v9205_v25  ;;  %v9638_v37 = vmax.f32 %v9636_v34, %v14652_v44  ;;  %v9639_v53 = vsel %vm9515_vm10, %v9192_v19, -inf  ;;  %v9265_v15 = vmax.f32 %v9263_v11, %v9264_v9 }
 0xca0   : > { %v9641_v4 = vmax.f32 %v9639_v53, %v14655_v26  ;;  %v14994_v56 = vsel %vm9515_vm10, %v9199_v6, -inf  ;;  %v9271_v10 = vrot.slane %v9270_v35, 4  ;;  %v9277_v18 = vsel %vm8618_vm9, %v8351_v41, -inf }
 0xca1   : > { %15966 = vst [vmem:[#allocation53_spill] sm:$0xff] %v14994_v56  ;;  %v14999_v3 = vsel %vm9515_vm10, %v9206_v7, -inf  ;;  %v9284_v44 = vsel %vm8618_vm9, %v8353_v43, -inf  ;;  %v9266_v16 = vrot.slane %v9265_v15, 2  ;;  %v9278_v9 = vrot.slane %v9277_v18, 4 }
 0xca2   : > { %15967 = vst [vmem:[#allocation54_spill] sm:$0xff] %v14999_v3  ;;  %v15006_v26 = vsel %vm9772_vm11, %v9641_v4, %v9638_v37  ;;  %v9272_v51 = vmax.f32 %v9270_v35, %v9271_v10  ;;  %v9285_v33 = vrot.slane %v9284_v44, 4  ;;  %v8369_v19 = vcombine.high %v8361_v62, %v8361_v62 }
 0xca3   : > { %15968 = vst [vmem:[#allocation55_spill] sm:$0xff] %v15006_v26  ;;  %v8370_v25 = vcombine.high %v8368_v50, %v8368_v50  ;;  %v9267_v11 = vmax.f32 %v9265_v15, %v9266_v16  ;;  %v9291_v34 = vsel %vm8618_vm9, %v8361_v62, -inf  ;;  %v9305_v41 = vsel %vm8618_vm9, %v8368_v50, -inf }
 0xca4   : > { %v9273_v6 = vrot.slane %v9272_v51, 2  ;;  %v9279_v7 = vmax.f32 %v9277_v18, %v9278_v9  ;;  %v9286_v43 = vmax.f32 %v9284_v44, %v9285_v33  ;;  %v9292_v53 = vrot.slane %v9291_v34, 4 }
 0xca5   : > { %v9298_v59 = vsel %vm8618_vm9, %v8369_v19, -inf  ;;  %v9268_v23 = vrot.slane %v9267_v11, 1  ;;  %v9306_v20 = vrot.slane %v9305_v41, 4  ;;  %v9312_v3 = vsel %vm8618_vm9, %v8370_v25, -inf }
 0xca6   : > { %v9274_v37 = vmax.f32 %v9272_v51, %v9273_v6  ;;  %v9299_v4 = vrot.slane %v9298_v59, 4  ;;  %v9280_v35 = vrot.slane %v9279_v7, 2  ;;  %v9287_v10 = vrot.slane %v9286_v43, 2 }
 0xca7   : > { %v9293_v32 = vmax.f32 %v9291_v34, %v9292_v53  ;;  %v9269_v15 = vmax.f32 %v9267_v11, %v9268_v23  ;;  %v9307_v62 = vmax.f32 %v9305_v41, %v9306_v20  ;;  %v9313_v44 = vrot.slane %v9312_v3, 4 }
 0xca8   : > { %v9275_v16 = vrot.slane %v9274_v37, 1  ;;  %v9300_v27 = vmax.f32 %v9298_v59, %v9299_v4  ;;  %v9281_v56 = vmax.f32 %v9279_v7, %v9280_v35  ;;  %v9288_v50 = vmax.f32 %v9286_v43, %v9287_v10 }
 0xca9   : > { %v9294_v18 = vrot.slane %v9293_v32, 2  ;;  %v15013_v33 = vsel %vm9515_vm10, %v9269_v15, -inf  ;;  %v9308_v19 = vrot.slane %v9307_v62, 2  ;;  %v9314_v34 = vmax.f32 %v9312_v3, %v9313_v44 }
 0xcaa   : > { %v9276_v9 = vmax.f32 %v9274_v37, %v9275_v16  ;;  %v9301_v51 = vrot.slane %v9300_v27, 2  ;;  %v9282_v6 = vrot.slane %v9281_v56, 1  ;;  %v9289_v26 = vrot.slane %v9288_v50, 1 }
 0xcab   : > { %v9295_v46 = vmax.f32 %v9293_v32, %v9294_v18  ;;  %v9309_v59 = vmax.f32 %v9307_v62, %v9308_v19  ;;  %v8405_v20 = vcombine.high %v14978_v54, %v14978_v54  ;;  %v9315_v43 = vrot.slane %v9314_v34, 2 }
 0xcac   : > { %v15016_v25 = vsel %vm9515_vm10, %v9276_v9, -inf  ;;  %v9302_v23 = vmax.f32 %v9300_v27, %v9301_v51  ;;  %v9283_v11 = vmax.f32 %v9281_v56, %v9282_v6  ;;  %v15020_v41 = vmax.f32 %v9288_v50, %v9289_v26 }
 0xcad   : > { %v9296_v7 = vrot.slane %v9295_v46, 1  ;;  %v9310_v37 = vrot.slane %v9309_v59, 1  ;;  %v8412_v4 = vrot.slane %v14978_v54, %v14513_v14  ;;  %v8419_v32 = vrot.slane %v8405_v20, %v14513_v14 }
 0xcae   : > { %v9303_v53 = vrot.slane %v9302_v23, 1  ;;  %v15026_v3 = vsel %vm9515_vm10, %v9283_v11, -inf  ;;  %v9316_v35 = vmax.f32 %v9314_v34, %v9315_v43  ;;  %v8422_v10 = vcombine.high %v14981_v21, %v14981_v21 }
 0xcaf   : > { %v9297_v27 = vmax.f32 %v9295_v46, %v9296_v7  ;;  %v9311_v26 = vmax.f32 %v9309_v59, %v9310_v37  ;;  %v8420_v15 = vcombine.high %v8412_v4, %v8412_v4  ;;  %v8421_v16 = vcombine.high %v8419_v32, %v8419_v32 }
 0xcb0   : > { %v9304_v56 = vmax.f32 %v9302_v23, %v9303_v53  ;;  %v9317_v62 = vrot.slane %v9316_v35, 1  ;;  %v9375_v18 = vsel %vm8618_vm9, %v8412_v4, -inf  ;;  %v9389_v54 = vsel %vm8618_vm9, %v8419_v32, -inf }
 0xcb1   : > { %v9660_v50 = vsel %vm9515_vm10, %v9297_v27, -inf  ;;  %v15036_v46 = vsel %vm9515_vm10, %v9311_v26, -inf  ;;  %v9376_v51 = vrot.slane %v9375_v18, 4  ;;  %v9382_v23 = vsel %vm8618_vm9, %v8420_v15, -inf }
 0xcb2   : > { %v9662_v44 = vmax.f32 %v9660_v50, %v14665_v61  ;;  %v9663_v9 = vsel %vm9515_vm10, %v9304_v56, -inf  ;;  %15969 = vst [vmem:[#allocation56_spill] sm:$0xff] %v15036_v46  ;;  %v9318_v19 = vmax.f32 %v9316_v35, %v9317_v62  ;;  %v9383_v20 = vrot.slane %v9382_v23, 4 }
 0xcb3   : > { %v9665_v6 = vmax.f32 %v9663_v9, %v14668_v52  ;;  %v9377_v59 = vmax.f32 %v9375_v18, %v9376_v51  ;;  %v9390_v11 = vrot.slane %v9389_v54, 4  ;;  %v9396_v7 = vsel %vm8618_vm9, %v8421_v16, -inf }
 0xcb4   : > { %v15044_v61 = vsel %vm9515_vm10, %v9318_v19, -inf  ;;  %v9397_v53 = vrot.slane %v9396_v7, 4  ;;  %v8429_v52 = vrot.slane %v14981_v21, %v14513_v14  ;;  %v9384_v32 = vmax.f32 %v9382_v23, %v9383_v20 }
 0xcb5   : > { %15970 = vst [vmem:[#allocation57_spill] sm:$0xff] %v15044_v61  ;;  %v15047_v43 = vsel %vm9772_vm11, %v9665_v6, %v9662_v44  ;;  %v9378_v4 = vrot.slane %v9377_v59, 2  ;;  %v9391_v27 = vmax.f32 %v9389_v54, %v9390_v11  ;;  %v8436_v56 = vrot.slane %v8422_v10, %v14513_v14 }
 0xcb6   : > { %15971 = vst [vmem:[#allocation58_spill] sm:$0xff] %v15047_v43  ;;  %v9398_v35 = vmax.f32 %v9396_v7, %v9397_v53  ;;  %v8437_v26 = vcombine.high %v8429_v52, %v8429_v52  ;;  %v9403_v15 = vsel %vm8618_vm9, %v8429_v52, -inf  ;;  %v9385_v62 = vrot.slane %v9384_v32, 2 }
 0xcb7   : > { %v9379_v16 = vmax.f32 %v9377_v59, %v9378_v4  ;;  %v9392_v50 = vrot.slane %v9391_v27, 2  ;;  %v9404_v18 = vrot.slane %v9403_v15, 4  ;;  %v8438_v9 = vcombine.high %v8436_v56, %v8436_v56 }
 0xcb8   : > { %v9399_v44 = vrot.slane %v9398_v35, 2  ;;  %v9410_v21 = vsel %vm8618_vm9, %v8437_v26, -inf  ;;  %v9417_v51 = vsel %vm8618_vm9, %v8436_v56, -inf  ;;  %v9386_v6 = vmax.f32 %v9384_v32, %v9385_v62  ;;  %v7835_v26 = vld [vmem:[#allocation4 + $0xf8] sm:$0xff] }
 0xcb9   : > { %v9380_v19 = vrot.slane %v9379_v16, 1  ;;  %v9393_v23 = vmax.f32 %v9391_v27, %v9392_v50  ;;  %v9405_v54 = vmax.f32 %v9403_v15, %v9404_v18  ;;  %v9411_v11 = vrot.slane %v9410_v21, 4  ;;  %v7809_v18 = vld [vmem:[#allocation4 + $0x28] sm:$0xff] }
 0xcba   : > { %v9400_v20 = vmax.f32 %v9398_v35, %v9399_v44  ;;  %v9418_v10 = vrot.slane %v9417_v51, 4  ;;  %v9424_v7 = vsel %vm8618_vm9, %v8438_v9, -inf  ;;  %v9387_v59 = vrot.slane %v9386_v6, 1  ;;  %v7805_v35 = vld [vmem:[#allocation4 + $0x8] sm:$0xff] }
 0xcbb   : > { %v9381_v53 = vmax.f32 %v9379_v16, %v9380_v19  ;;  %v9394_v52 = vrot.slane %v9393_v23, 1  ;;  %v9406_v4 = vrot.slane %v9405_v54, 2  ;;  %v9412_v34 = vmax.f32 %v9410_v21, %v9411_v11  ;;  %v7813_v44 = vld [vmem:[#allocation4 + $0x48] sm:$0xff] }
 0xcbc   : > { %v9401_v37 = vrot.slane %v9400_v20, 1  ;;  %v9419_v12 = vmax.f32 %v9417_v51, %v9418_v10  ;;  %v9425_v61 = vrot.slane %v9424_v7, 4  ;;  %v9388_v39 = vmax.f32 %v9386_v6, %v9387_v59 }
 0xcbd   : > { %v9395_v56 = vmax.f32 %v9393_v23, %v9394_v52  ;;  %v15059_v32 = vsel %vm9515_vm10, %v9381_v53, -inf  ;;  %v9407_v27 = vmax.f32 %v9405_v54, %v9406_v4  ;;  %v9413_v62 = vrot.slane %v9412_v34, 2 }
 0xcbe   : > { %v15061_v15 = vmax.f32 %v9400_v20, %v9401_v37  ;;  %v9420_v50 = vrot.slane %v9419_v12, 2  ;;  %v9426_v16 = vmax.f32 %v9424_v7, %v9425_v61  ;;  %v15064_v9 = vsel %vm9515_vm10, %v9388_v39, -inf  ;;  %v15075_v61 = vld [vmem:[%s15684_s9] ss:$0 sm:$0xff] }
 0xcbf   : > { %v15067_v21 = vsel %vm9515_vm10, %v9395_v56, -inf  ;;  %v9408_v51 = vrot.slane %v9407_v27, 1  ;;  %v7874_v19 = vmul.f32 %v14775_v31, %v7835_v26  ;;  %v9414_v6 = vmax.f32 %v9412_v34, %v9413_v62 }
 0xcc0   : > { %v9421_v23 = vmax.f32 %v9419_v12, %v9420_v50  ;;  %v9427_v54 = vrot.slane %v9426_v16, 2  ;;  %v7844_v37 = vmul.f32 %v14775_v31, %v7805_v35  ;;  %v7848_v39 = vmul.f32 %v15075_v61, %v7809_v18 }
 0xcc1   : > { %v9409_v20 = vmax.f32 %v9407_v27, %v9408_v51  ;;  %v7913_v11 = vadd.f32 %v14804_v29, %v7874_v19  ;;  %v15079_v10 = vmul.f32 %v15075_v61, %v7813_v44  ;;  %v9415_v7 = vrot.slane %v9414_v6, 1 }
 0xcc2   : > { %v9422_v53 = vrot.slane %v9421_v23, 1  ;;  %v9428_v34 = vmax.f32 %v9426_v16, %v9427_v54  ;;  %v7883_v12 = vadd.f32 %v14804_v29, %v7844_v37  ;;  %v15085_v4 = vadd.f32 %v14804_v29, %v7848_v39 }
 0xcc3   : > { %v9684_v31 = vsel %vm9515_vm10, %v9409_v20, -inf  ;;  %v8473_v59 = vcombine.high %v7913_v11, %v7913_v11  ;;  %v8480_v52 = vrot.slane %v7913_v11, %v14513_v14  ;;  %v9416_v26 = vmax.f32 %v9414_v6, %v9415_v7 }
 0xcc4   : > { %v9423_v56 = vmax.f32 %v9421_v23, %v9422_v53  ;;  %v9429_v27 = vrot.slane %v9428_v34, 1  ;;  %v9686_v35 = vmax.f32 %v9684_v31, %v14705_v13  ;;  %v7963_v18 = vcombine.high %v7883_v12, %v7883_v12 }
 0xcc5   : > { %v8487_v62 = vrot.slane %v8473_v59, %v14513_v14  ;;  %v8488_v50 = vcombine.high %v8480_v52, %v8480_v52  ;;  %v9487_v16 = vsel %vm8618_vm9, %v8480_v52, -inf  ;;  %v9687_v51 = vsel %vm9515_vm10, %v9416_v26, -inf }
 0xcc6   : > { %v9430_v44 = vmax.f32 %v9428_v34, %v9429_v27  ;;  %v15092_v19 = vsel %vm9515_vm10, %v9423_v56, -inf  ;;  %v9488_v54 = vrot.slane %v9487_v16, 4  ;;  %v9689_v29 = vmax.f32 %v9687_v51, %v14710_v47 }
 0xcc7   : > { %15972 = vst [vmem:[#allocation59_spill] sm:$0xff] %v15092_v19  ;;  %v8489_v23 = vcombine.high %v8487_v62, %v8487_v62  ;;  %v9494_v13 = vsel %vm8618_vm9, %v8488_v50, -inf  ;;  %v9501_v39 = vsel %vm8618_vm9, %v8487_v62, -inf  ;;  %v7970_v26 = vrot.slane %v7883_v12, %v14513_v14 }
 0xcc8   : > { %v15099_v37 = vsel %vm9515_vm10, %v9430_v44, -inf  ;;  %v9489_v20 = vmax.f32 %v9487_v16, %v9488_v54  ;;  %v9495_v11 = vrot.slane %v9494_v13, 4  ;;  %v15105_v53 = vsel %vm9772_vm11, %v9689_v29, %v9686_v35 }
 0xcc9   : > { %15973 = vst [vmem:[#allocation60_spill] sm:$0xff] %v15099_v37  ;;  %15974 = vst [vmem:[#allocation61_spill] sm:$0xff] %v15105_v53  ;;  %v9502_v47 = vrot.slane %v9501_v39, 4  ;;  %v9508_v34 = vsel %vm8618_vm9, %v8489_v23, -inf  ;;  %v7977_v27 = vrot.slane %v7963_v18, %v14513_v14  ;;  %v8031_v62 = vcombine.high %v15085_v4, %v15085_v4 }
 0xcca   : > { %v9490_v31 = vrot.slane %v9489_v20, 2  ;;  %v9496_v59 = vmax.f32 %v9494_v13, %v9495_v11  ;;  %v9509_v52 = vrot.slane %v9508_v34, 4  ;;  %v8038_v50 = vrot.slane %v15085_v4, %v14513_v14 }
 0xccb   : > { %v9503_v56 = vmax.f32 %v9501_v39, %v9502_v47  ;;  %v7978_v51 = vcombine.high %v7970_v26, %v7970_v26  ;;  %v7979_v29 = vcombine.high %v7977_v27, %v7977_v27  ;;  %v8647_v23 = vsel %vm8618_vm9, %v7970_v26, -inf }
 0xccc   : > { %v9491_v16 = vmax.f32 %v9489_v20, %v9490_v31  ;;  %v9497_v35 = vrot.slane %v9496_v59, 2  ;;  %v9510_v44 = vmax.f32 %v9508_v34, %v9509_v52  ;;  %v8661_v13 = vsel %vm8618_vm9, %v7977_v27, -inf }
 0xccd   : > { %v9504_v54 = vrot.slane %v9503_v56, 2  ;;  %v8648_v18 = vrot.slane %v8647_v23, 4  ;;  %v8654_v7 = vsel %vm8618_vm9, %v7978_v51, -inf  ;;  %v8662_v6 = vrot.slane %v8661_v13, 4 }
 0xcce   : > { %v9492_v12 = vrot.slane %v9491_v16, 1  ;;  %v9498_v11 = vmax.f32 %v9496_v59, %v9497_v35  ;;  %v9511_v39 = vrot.slane %v9510_v44, 2  ;;  %v8668_v4 = vsel %vm8618_vm9, %v7979_v29, -inf }
 0xccf   : > { %v9505_v47 = vmax.f32 %v9503_v56, %v9504_v54  ;;  %v8649_v52 = vmax.f32 %v8647_v23, %v8648_v18  ;;  %v8655_v37 = vrot.slane %v8654_v7, 4  ;;  %v8663_v57 = vmax.f32 %v8661_v13, %v8662_v6 }
 0xcd0   : > { %v9493_v20 = vmax.f32 %v9491_v16, %v9492_v12  ;;  %v9499_v31 = vrot.slane %v9498_v11, 1  ;;  %v9512_v34 = vmax.f32 %v9510_v44, %v9511_v39  ;;  %v8669_v26 = vrot.slane %v8668_v4, 4 }
 0xcd1   : > { %v9506_v58 = vrot.slane %v9505_v47, 1  ;;  %v8650_v35 = vrot.slane %v8649_v52, 2  ;;  %v8656_v54 = vmax.f32 %v8654_v7, %v8655_v37  ;;  %v8664_v51 = vrot.slane %v8663_v57, 2 }
 0xcd2   : > { %v9500_v19 = vmax.f32 %v9498_v11, %v9499_v31  ;;  %v9513_v27 = vrot.slane %v9512_v34, 1  ;;  %v15119_v59 = vsel %vm9515_vm10, %v9493_v20, -inf  ;;  %v8670_v53 = vmax.f32 %v8668_v4, %v8669_v26 }
 0xcd3   : > { %v9507_v56 = vmax.f32 %v9505_v47, %v9506_v58  ;;  %v8651_v44 = vmax.f32 %v8649_v52, %v8650_v35  ;;  %v8045_v29 = vrot.slane %v8031_v62, %v14513_v14  ;;  %v8657_v23 = vrot.slane %v8656_v54, 2 }
 0xcd4   : > { %v15121_v46 = vmax.f32 %v9512_v34, %v9513_v27  ;;  %v15124_v16 = vsel %vm9515_vm10, %v9500_v19, -inf  ;;  %v8665_v13 = vmax.f32 %v8663_v57, %v8664_v51  ;;  %v8671_v12 = vrot.slane %v8670_v53, 2 }
 0xcd5   : > { %v15128_v6 = vsel %vm9515_vm10, %v9507_v56, -inf  ;;  %v8652_v11 = vrot.slane %v8651_v44, 1  ;;  %v8046_v39 = vcombine.high %v8038_v50, %v8038_v50  ;;  %v8047_v58 = vcombine.high %v8045_v29, %v8045_v29 }
 0xcd6   : > { %v8759_v37 = vsel %vm8618_vm9, %v8038_v50, -inf  ;;  %v8658_v7 = vmax.f32 %v8656_v54, %v8657_v23  ;;  %v8666_v18 = vrot.slane %v8665_v13, 1  ;;  %v8672_v47 = vmax.f32 %v8670_v53, %v8671_v12  ;;  %v7817_v54 = vld [vmem:[#allocation4 + $0x68] sm:$0xff] }
 0xcd7   : > { %v8760_v4 = vrot.slane %v8759_v37, 4  ;;  %v8653_v19 = vmax.f32 %v8651_v44, %v8652_v11  ;;  %v8766_v20 = vsel %vm8618_vm9, %v8046_v39, -inf  ;;  %v8773_v62 = vsel %vm8618_vm9, %v8045_v29, -inf  ;;  %v7821_v53 = vld [vmem:[#allocation4 + $0x88] sm:$0xff] }
 0xcd8   : > { %v8780_v31 = vsel %vm8618_vm9, %v8047_v58, -inf  ;;  %v8659_v34 = vrot.slane %v8658_v7, 1  ;;  %v8667_v52 = vmax.f32 %v8665_v13, %v8666_v18  ;;  %v8673_v57 = vrot.slane %v8672_v47, 1 }
 0xcd9   : > { %v8761_v26 = vmax.f32 %v8759_v37, %v8760_v4  ;;  %v15135_v27 = vsel %vm9515_vm10, %v8653_v19, -inf  ;;  %v8767_v35 = vrot.slane %v8766_v20, 4  ;;  %v8774_v50 = vrot.slane %v8773_v62, 4  ;;  %v15150_v37 = vld [vmem:[%s15685_s10] ss:$0 sm:$0xff] }
 0xcda   : > { %v8781_v56 = vrot.slane %v8780_v31, 4  ;;  %v8660_v51 = vmax.f32 %v8658_v7, %v8659_v34  ;;  %v15137_v44 = vmax.f32 %v8672_v47, %v8673_v57  ;;  %v15142_v23 = vsel %vm9515_vm10, %v8667_v52, -inf }
 0xcdb   : > { %15975 = vst [vmem:[#allocation62_spill] sm:$0xff] %v15142_v23  ;;  %v8762_v13 = vrot.slane %v8761_v26, 2  ;;  %v8768_v12 = vmax.f32 %v8766_v20, %v8767_v35  ;;  %v8775_v11 = vmax.f32 %v8773_v62, %v8774_v50  ;;  %v7891_v7 = vadd.f32 %v15150_v37, %v15079_v10 }
 0xcdc   : > { %v8782_v39 = vmax.f32 %v8780_v31, %v8781_v56  ;;  %v15145_v58 = vsel %vm9515_vm10, %v8660_v51, -inf  ;;  %v7856_v18 = vmul.f32 %v15075_v61, %v7817_v54  ;;  %v7860_v47 = vmul.f32 %v15075_v61, %v7821_v53 }
 0xcdd   : > { %v8763_v19 = vmax.f32 %v8761_v26, %v8762_v13  ;;  %v8769_v20 = vrot.slane %v8768_v12, 2  ;;  %v8776_v62 = vrot.slane %v8775_v11, 2  ;;  %v8099_v34 = vcombine.high %v7891_v7, %v7891_v7 }
 0xcde   : > { %v8783_v31 = vrot.slane %v8782_v39, 2  ;;  %v8106_v52 = vrot.slane %v7891_v7, %v14513_v14  ;;  %v7895_v57 = vadd.f32 %v15150_v37, %v7856_v18  ;;  %v15161_v10 = vadd.f32 %v15150_v37, %v7860_v47 }
 0xcdf   : > { %v8764_v35 = vrot.slane %v8763_v19, 1  ;;  %v8770_v50 = vmax.f32 %v8768_v12, %v8769_v20  ;;  %v8777_v56 = vmax.f32 %v8775_v11, %v8776_v62  ;;  %v8113_v53 = vrot.slane %v8099_v34, %v14513_v14 }
 0xce0   : > { %v8784_v54 = vmax.f32 %v8782_v39, %v8783_v31  ;;  %v8114_v51 = vcombine.high %v8106_v52, %v8106_v52  ;;  %v8871_v26 = vsel %vm8618_vm9, %v8106_v52, -inf }
 0xce1   : > { %v8765_v13 = vmax.f32 %v8763_v19, %v8764_v35  ;;  %v8771_v4 = vrot.slane %v8770_v50, 1  ;;  %v8778_v29 = vrot.slane %v8777_v56, 1  ;;  %v8872_v43 = vrot.slane %v8871_v26, 4 }
 0xce2   : > { %v8785_v5 = vrot.slane %v8784_v54, 1  ;;  %v8115_v7 = vcombine.high %v8113_v53, %v8113_v53  ;;  %v8878_v18 = vsel %vm8618_vm9, %v8114_v51, -inf  ;;  %v8885_v12 = vsel %vm8618_vm9, %v8113_v53, -inf }
 0xce3   : > { %v8772_v11 = vmax.f32 %v8770_v50, %v8771_v4  ;;  %v8779_v20 = vmax.f32 %v8777_v56, %v8778_v29  ;;  %v15168_v47 = vsel %vm9515_vm10, %v8765_v13, -inf  ;;  %v8873_v39 = vmax.f32 %v8871_v26, %v8872_v43 }
 0xce4   : > { %15976 = vst [vmem:[#allocation63_spill] sm:$0xff] %v15168_v47  ;;  %v15170_v62 = vmax.f32 %v8784_v54, %v8785_v5  ;;  %v8879_v31 = vrot.slane %v8878_v18, 4  ;;  %v8886_v34 = vrot.slane %v8885_v12, 4  ;;  %v8892_v29 = vsel %vm8618_vm9, %v8115_v7, -inf }
 0xce5   : > { %v15175_v52 = vsel %vm9515_vm10, %v8772_v11, -inf  ;;  %v15178_v35 = vsel %vm9515_vm10, %v8779_v20, -inf  ;;  %v8874_v53 = vrot.slane %v8873_v39, 2  ;;  %v8893_v50 = vrot.slane %v8892_v29, 4 }
 0xce6   : > { %15977 = vst [vmem:[#allocation64_spill] sm:$0xff] %v15175_v52  ;;  %v8880_v43 = vmax.f32 %v8878_v18, %v8879_v31  ;;  %v8887_v5 = vmax.f32 %v8885_v12, %v8886_v34  ;;  %v8167_v54 = vcombine.high %v7895_v57, %v7895_v57  ;;  %v8174_v51 = vrot.slane %v7895_v57, %v14513_v14 }
 0xce7   : > { %v8875_v56 = vmax.f32 %v8873_v39, %v8874_v53  ;;  %v8235_v26 = vcombine.high %v15161_v10, %v15161_v10  ;;  %v8894_v20 = vmax.f32 %v8892_v29, %v8893_v50  ;;  %v8242_v19 = vrot.slane %v15161_v10, %v14513_v14 }
 0xce8   : > { %v8881_v13 = vrot.slane %v8880_v43, 2  ;;  %v8888_v11 = vrot.slane %v8887_v5, 2  ;;  %v8181_v38 = vrot.slane %v8167_v54, %v14513_v14  ;;  %v8182_v4 = vcombine.high %v8174_v51, %v8174_v51 }
 0xce9   : > { %v8876_v7 = vrot.slane %v8875_v56, 1  ;;  %v8983_v18 = vsel %vm8618_vm9, %v8174_v51, -inf  ;;  %v8895_v31 = vrot.slane %v8894_v20, 2 }
 0xcea   : > { %v8882_v12 = vmax.f32 %v8880_v43, %v8881_v13  ;;  %v8889_v39 = vmax.f32 %v8887_v5, %v8888_v11  ;;  %v8984_v34 = vrot.slane %v8983_v18, 4  ;;  %v8183_v53 = vcombine.high %v8181_v38, %v8181_v38 }
 0xceb   : > { %v8877_v57 = vmax.f32 %v8875_v56, %v8876_v7  ;;  %v8990_v30 = vsel %vm8618_vm9, %v8182_v4, -inf  ;;  %v8997_v40 = vsel %vm8618_vm9, %v8181_v38, -inf  ;;  %v8896_v60 = vmax.f32 %v8894_v20, %v8895_v31 }
 0xcec   : > { %v8883_v29 = vrot.slane %v8882_v12, 1  ;;  %v8890_v50 = vrot.slane %v8889_v39, 1  ;;  %v8985_v10 = vmax.f32 %v8983_v18, %v8984_v34  ;;  %v8991_v54 = vrot.slane %v8990_v30, 4 }
 0xced   : > { %v15193_v52 = vsel %vm9515_vm10, %v8877_v57, -inf  ;;  %v8998_v8 = vrot.slane %v8997_v40, 4  ;;  %v9004_v43 = vsel %vm8618_vm9, %v8183_v53, -inf  ;;  %v8897_v13 = vrot.slane %v8896_v60, 1 }
 0xcee   : > { %15978 = vst [vmem:[#allocation65_spill] sm:$0xff] %v15193_v52  ;;  %v8884_v5 = vmax.f32 %v8882_v12, %v8883_v29  ;;  %v8891_v51 = vmax.f32 %v8889_v39, %v8890_v50  ;;  %v8986_v4 = vrot.slane %v8985_v10, 2  ;;  %v8992_v11 = vmax.f32 %v8990_v30, %v8991_v54 }
 0xcef   : > { %v8999_v38 = vmax.f32 %v8997_v40, %v8998_v8  ;;  %v9005_v7 = vrot.slane %v9004_v43, 4  ;;  %v15198_v47 = vmax.f32 %v8896_v60, %v8897_v13  ;;  %v8249_v31 = vrot.slane %v8235_v26, %v14513_v14 }
 0xcf0   : > { %v15201_v20 = vsel %vm9515_vm10, %v8884_v5, -inf  ;;  %v15204_v18 = vsel %vm9515_vm10, %v8891_v51, -inf  ;;  %v8987_v39 = vmax.f32 %v8985_v10, %v8986_v4  ;;  %v8993_v34 = vrot.slane %v8992_v11, 2 }
 0xcf1   : > { %15979 = vst [vmem:[#allocation66_spill] sm:$0xff] %v15201_v20  ;;  %v9000_v57 = vrot.slane %v8999_v38, 2  ;;  %v9006_v53 = vmax.f32 %v9004_v43, %v9005_v7  ;;  %v8250_v30 = vcombine.high %v8242_v19, %v8242_v19  ;;  %v8251_v8 = vcombine.high %v8249_v31, %v8249_v31 }
 0xcf2   : > { %v9095_v60 = vsel %vm8618_vm9, %v8242_v19, -inf  ;;  %v8988_v40 = vrot.slane %v8987_v39, 1  ;;  %v8994_v29 = vmax.f32 %v8992_v11, %v8993_v34  ;;  %v9109_v26 = vsel %vm8618_vm9, %v8249_v31, -inf }
 0xcf3   : > { %v9001_v50 = vmax.f32 %v8999_v38, %v9000_v57  ;;  %v9096_v54 = vrot.slane %v9095_v60, 4  ;;  %v9007_v5 = vrot.slane %v9006_v53, 2  ;;  %v9102_v51 = vsel %vm8618_vm9, %v8250_v30, -inf }
 0xcf4   : > { %v9116_v13 = vsel %vm8618_vm9, %v8251_v8, -inf  ;;  %v8989_v12 = vmax.f32 %v8987_v39, %v8988_v40  ;;  %v8995_v10 = vrot.slane %v8994_v29, 1  ;;  %v9103_v7 = vrot.slane %v9102_v51, 4  ;;  %v7825_v39 = vld [vmem:[#allocation4 + $0xa8] sm:$0xff] }
 0xcf5   : > { %v9002_v4 = vrot.slane %v9001_v50, 1  ;;  %v9097_v56 = vmax.f32 %v9095_v60, %v9096_v54  ;;  %v9008_v43 = vmax.f32 %v9006_v53, %v9007_v5  ;;  %v9110_v63 = vrot.slane %v9109_v26, 4  ;;  %v7829_v8 = vld [vmem:[#allocation4 + $0xc8] sm:$0xff] }
 0xcf6   : > { %v9117_v20 = vrot.slane %v9116_v13, 4  ;;  %v8996_v19 = vmax.f32 %v8994_v29, %v8995_v10  ;;  %v15214_v11 = vsel %vm9515_vm10, %v8989_v12, -inf  ;;  %v9104_v57 = vmax.f32 %v9102_v51, %v9103_v7 }
 0xcf7   : > { %v9003_v17 = vmax.f32 %v9001_v50, %v9002_v4  ;;  %15980 = vst [vmem:[#allocation67_spill] sm:$0xff] %v15214_v11  ;;  %v9098_v38 = vrot.slane %v9097_v56, 2  ;;  %v9009_v34 = vrot.slane %v9008_v43, 1  ;;  %v9111_v30 = vmax.f32 %v9109_v26, %v9110_v63  ;;  %v7833_v50 = vld [vmem:[#allocation4 + $0xe8] sm:$0xff] }
 0xcf8   : > { %v15219_v60 = vsel %vm9515_vm10, %v8996_v19, -inf  ;;  %v9118_v29 = vmax.f32 %v9116_v13, %v9117_v20  ;;  %v9105_v5 = vrot.slane %v9104_v57, 2  ;;  %v7864_v26 = vmul.f32 %v15075_v61, %v7825_v39 }
 0xcf9   : > { %15981 = vst [vmem:[#allocation68_spill] sm:$0xff] %v15219_v60  ;;  %v15222_v53 = vsel %vm9515_vm10, %v9003_v17, -inf  ;;  %v9099_v40 = vmax.f32 %v9097_v56, %v9098_v38  ;;  %v15224_v12 = vmax.f32 %v9008_v43, %v9009_v34  ;;  %v9112_v10 = vrot.slane %v9111_v30, 2 }
 0xcfa   : > { %v9119_v63 = vrot.slane %v9118_v29, 2  ;;  %v7868_v4 = vmul.f32 %v15075_v61, %v7829_v8  ;;  %v9106_v7 = vmax.f32 %v9104_v57, %v9105_v5  ;;  %v7872_v17 = vmul.f32 %v15075_v61, %v7833_v50 }
 0xcfb   : > { %v9100_v51 = vrot.slane %v9099_v40, 1  ;;  %v9113_v19 = vmax.f32 %v9111_v30, %v9112_v10  ;;  %v7903_v43 = vadd.f32 %v15150_v37, %v7864_v26  ;;  %v15240_v57 = vsel %vm9515_vm10, %v15137_v44, -inf }
 0xcfc   : > { %v9120_v13 = vmax.f32 %v9118_v29, %v9119_v63  ;;  %v7907_v38 = vadd.f32 %v15150_v37, %v7868_v4  ;;  %v9107_v34 = vrot.slane %v9106_v7, 1  ;;  %v15236_v31 = vadd.f32 %v15150_v37, %v7872_v17 }
 0xcfd   : > { %v9101_v20 = vmax.f32 %v9099_v40, %v9100_v51  ;;  %v9114_v54 = vrot.slane %v9113_v19, 1  ;;  %v8303_v39 = vcombine.high %v7903_v43, %v7903_v43  ;;  %v8310_v8 = vrot.slane %v7903_v43, %v14513_v14 }
 0xcfe   : > { %v9121_v30 = vrot.slane %v9120_v13, 1  ;;  %v9108_v40 = vmax.f32 %v9106_v7, %v9107_v34  ;;  %v8371_v5 = vcombine.high %v7907_v38, %v7907_v38 }
 0xcff   : > { %v15243_v61 = vsel %vm9515_vm10, %v9101_v20, -inf  ;;  %v9115_v29 = vmax.f32 %v9113_v19, %v9114_v54  ;;  %v8317_v37 = vrot.slane %v8303_v39, %v14513_v14  ;;  %v8318_v51 = vcombine.high %v8310_v8, %v8310_v8 }
 0xd00   : > { %15982 = vst [vmem:[#allocation69_spill] sm:$0xff] %v15243_v61  ;;  %v15248_v10 = vmax.f32 %v9120_v13, %v9121_v30  ;;  %v9207_v44 = vsel %vm8618_vm9, %v8310_v8, -inf  ;;  %v15253_v63 = vsel %vm9515_vm10, %v9108_v40, -inf  ;;  %v8378_v54 = vrot.slane %v7907_v38, %v14513_v14 }
 0xd01   : > { %15983 = vst [vmem:[#allocation70_spill] sm:$0xff] %v15253_v63  ;;  %v15256_v26 = vsel %vm9515_vm10, %v9115_v29, -inf  ;;  %v9208_v4 = vrot.slane %v9207_v44, 4  ;;  %v8319_v19 = vcombine.high %v8317_v37, %v8317_v37  ;;  %v9214_v17 = vsel %vm8618_vm9, %v8318_v51, -inf }
 0xd02   : > { %v9221_v20 = vsel %vm8618_vm9, %v8317_v37, -inf  ;;  %v9215_v43 = vrot.slane %v9214_v17, 4  ;;  %v8385_v30 = vrot.slane %v8371_v5, %v14513_v14  ;;  %v8386_v8 = vcombine.high %v8378_v54, %v8378_v54 }
 0xd03   : > { %v9209_v13 = vmax.f32 %v9207_v44, %v9208_v4  ;;  %v9222_v34 = vrot.slane %v9221_v20, 4  ;;  %v9228_v39 = vsel %vm8618_vm9, %v8319_v19, -inf  ;;  %v9319_v40 = vsel %vm8618_vm9, %v8378_v54, -inf }
 0xd04   : > { %v8439_v38 = vcombine.high %v15236_v31, %v15236_v31  ;;  %v9216_v7 = vmax.f32 %v9214_v17, %v9215_v43  ;;  %v9229_v56 = vrot.slane %v9228_v39, 4  ;;  %v8387_v51 = vcombine.high %v8385_v30, %v8385_v30 }
 0xd05   : > { %v9210_v29 = vrot.slane %v9209_v13, 2  ;;  %v9223_v50 = vmax.f32 %v9221_v20, %v9222_v34  ;;  %v9320_v0 = vrot.slane %v9319_v40, 4  ;;  %v9326_v37 = vsel %vm8618_vm9, %v8386_v8, -inf }
 0xd06   : > { %v9333_v44 = vsel %vm8618_vm9, %v8385_v30, -inf  ;;  %v9217_v5 = vrot.slane %v9216_v7, 2  ;;  %v9230_v19 = vmax.f32 %v9228_v39, %v9229_v56  ;;  %v9327_v61 = vrot.slane %v9326_v37, 4 }
 0xd07   : > { %v9211_v4 = vmax.f32 %v9209_v13, %v9210_v29  ;;  %v9224_v63 = vrot.slane %v9223_v50, 2  ;;  %v9321_v42 = vmax.f32 %v9319_v40, %v9320_v0  ;;  %v9334_v54 = vrot.slane %v9333_v44, 4 }
 0xd08   : > { %v9340_v49 = vsel %vm8618_vm9, %v8387_v51, -inf  ;;  %v9218_v48 = vmax.f32 %v9216_v7, %v9217_v5  ;;  %v9231_v20 = vrot.slane %v9230_v19, 2  ;;  %v9328_v34 = vmax.f32 %v9326_v37, %v9327_v61 }
 0xd09   : > { %v9212_v60 = vrot.slane %v9211_v4, 1  ;;  %v9225_v17 = vmax.f32 %v9223_v50, %v9224_v63  ;;  %v9322_v43 = vrot.slane %v9321_v42, 2  ;;  %v9335_v23 = vmax.f32 %v9333_v44, %v9334_v54 }
 0xd0a   : > { %v9341_v28 = vrot.slane %v9340_v49, 4  ;;  %v9219_v11 = vrot.slane %v9218_v48, 1  ;;  %v9232_v13 = vmax.f32 %v9230_v19, %v9231_v20  ;;  %v9329_v52 = vrot.slane %v9328_v34, 2 }
 0xd0b   : > { %v9213_v8 = vmax.f32 %v9211_v4, %v9212_v60  ;;  %v9226_v30 = vrot.slane %v9225_v17, 1  ;;  %v9323_v29 = vmax.f32 %v9321_v42, %v9322_v43  ;;  %v9336_v56 = vrot.slane %v9335_v23, 2 }
 0xd0c   : > { %v9342_v0 = vmax.f32 %v9340_v49, %v9341_v28  ;;  %v9220_v39 = vmax.f32 %v9218_v48, %v9219_v11  ;;  %v9233_v55 = vrot.slane %v9232_v13, 1  ;;  %v9330_v63 = vmax.f32 %v9328_v34, %v9329_v52  ;;  %v15997_v28 = vld [vmem:[#allocation16_spill] sm:$0xff] }
 0xd0d   : > { %v9227_v40 = vmax.f32 %v9225_v17, %v9226_v30  ;;  %v15272_v51 = vsel %vm9515_vm10, %v9213_v8, -inf  ;;  %v9324_v61 = vrot.slane %v9323_v29, 1  ;;  %v9337_v7 = vmax.f32 %v9335_v23, %v9336_v56 }
 0xd0e   : > { %v15276_v60 = vmax.f32 %v9232_v13, %v9233_v55  ;;  %v15279_v37 = vsel %vm9515_vm10, %v9220_v39, -inf  ;;  %v9343_v48 = vrot.slane %v9342_v0, 2  ;;  %v9331_v11 = vrot.slane %v9330_v63, 1  ;;  %v15999_v13 = vld [vmem:[#allocation13_spill] sm:$0xff] }
 0xd0f   : > { %v15282_v42 = vsel %vm9515_vm10, %v9227_v40, -inf  ;;  %v9325_v49 = vmax.f32 %v9323_v29, %v9324_v61  ;;  %v9338_v44 = vrot.slane %v9337_v7, 1  ;;  %v8446_v52 = vrot.slane %v15236_v31, %v14513_v14  ;;  %v15984_v61 = vld [vmem:[#allocation10_spill] sm:$0xff] }
 0xd10   : > { %v9344_v4 = vmax.f32 %v9342_v0, %v9343_v48  ;;  %v8453_v55 = vrot.slane %v8439_v38, %v14513_v14  ;;  %v15291_v23 = vsel %vm9515_vm10, %v14760_v2, -inf  ;;  %v9332_v5 = vmax.f32 %v9330_v63, %v9331_v11  ;;  %v15985_v11 = vld [vmem:[#allocation11_spill] sm:$0xff]  ;;  %v16015_v63 = vld [vmem:[#allocation21_spill] sm:$0xff] }
 0xd11   : > { %v9339_v19 = vmax.f32 %v9337_v7, %v9338_v44  ;;  %v15294_v54 = vsel %vm9515_vm10, %v9325_v49, -inf  ;;  %v9539_v17 = vmax.f32 %v15240_v57, %v15291_v23  ;;  %v8454_v34 = vcombine.high %v8446_v52, %v8446_v52 }
 0xd12   : > { %v9345_v20 = vrot.slane %v9344_v4, 1  ;;  %v8455_v31 = vcombine.high %v8453_v55, %v8453_v55  ;;  %v15301_v14 = vsel %vm9515_vm10, %v9332_v5, -inf  ;;  %v9431_v38 = vsel %vm8618_vm9, %v8446_v52, -inf  ;;  %v15986_v5 = vld [vmem:[#allocation9_spill] sm:$0xff] }
 0xd13   : > { %v15304_v2 = vsel %vm9515_vm10, %v9339_v19, -inf  ;;  %v9445_v8 = vsel %vm8618_vm9, %v8453_v55, -inf  ;;  %v9432_v29 = vrot.slane %v9431_v38, 4  ;;  %v9438_v56 = vsel %vm8618_vm9, %v8454_v34, -inf  ;;  %v16001_v55 = vld [vmem:[#allocation18_spill] sm:$0xff] }
 0xd14   : > { %v9346_v30 = vmax.f32 %v9344_v4, %v9345_v20  ;;  %v9439_v0 = vrot.slane %v9438_v56, 4  ;;  %v9446_v39 = vrot.slane %v9445_v8, 4  ;;  %v9452_v40 = vsel %vm8618_vm9, %v8455_v31, -inf }
 0xd15   : > { %v9433_v7 = vmax.f32 %v9431_v38, %v9432_v29  ;;  %v9453_v48 = vrot.slane %v9452_v40, 4  ;;  %v15316_v49 = vsel %vm9515_vm10, %v15170_v62, -inf  ;;  %v15320_v44 = vsel %vm9515_vm10, %v15985_v11, -inf  ;;  %v15987_v62 = vld [vmem:[#allocation8_spill] sm:$0xff] }
 0xd16   : > { %v9440_v4 = vmax.f32 %v9438_v56, %v9439_v0  ;;  %v9447_v52 = vmax.f32 %v9445_v8, %v9446_v39  ;;  %v15328_v31 = vsel %vm9515_vm10, %v15198_v47, -inf  ;;  %v15332_v38 = vsel %vm9515_vm10, %v15987_v62, -inf  ;;  %v16000_v8 = vld [vmem:[#allocation41_spill] sm:$0xff]  ;;  %v16005_v56 = vld [vmem:[#allocation20_spill] sm:$0xff] }
 0xd17   : > { %v9434_v20 = vrot.slane %v9433_v7, 2  ;;  %v9454_v34 = vmax.f32 %v9452_v40, %v9453_v48  ;;  %v15340_v40 = vsel %vm9515_vm10, %v15224_v12, -inf  ;;  %v15344_v47 = vsel %vm9515_vm10, %v14905_v22, -inf }
 0xd18   : > { %v9441_v29 = vrot.slane %v9440_v4, 2  ;;  %v9448_v11 = vrot.slane %v9447_v52, 2  ;;  %v15356_v12 = vsel %vm9515_vm10, %v14966_v24, -inf  ;;  %v16043_v57 = vmax.f32 %v15316_v49, %v15320_v44  ;;  %v16050_v49 = vld [vmem:[#allocation49_spill] sm:$0xff]  ;;  %v16051_v44 = vld [vmem:[#allocation23_spill] sm:$0xff] }
 0xd19   : > { %v9435_v0 = vmax.f32 %v9433_v7, %v9434_v20  ;;  %v9455_v39 = vrot.slane %v9454_v34, 2  ;;  %v15352_v7 = vsel %vm9515_vm10, %v15248_v10, -inf  ;;  %v15368_v10 = vsel %vm9515_vm10, %v15020_v41, -inf }
 0xd1a   : > { %v9442_v48 = vmax.f32 %v9440_v4, %v9441_v29  ;;  %v9449_v62 = vmax.f32 %v9447_v52, %v9448_v11  ;;  %v15382_v41 = vsel %vm9515_vm10, %v15061_v15, -inf }
 0xd1b   : > { %v9436_v43 = vrot.slane %v9435_v0, 1  ;;  %v9456_v50 = vmax.f32 %v9454_v34, %v9455_v39  ;;  %v15364_v34 = vsel %vm9515_vm10, %v15276_v60, -inf  ;;  %v15378_v60 = vsel %vm9515_vm10, %v9346_v30, -inf }
 0xd1c   : > { %v9443_v22 = vrot.slane %v9442_v48, 1  ;;  %v9450_v20 = vrot.slane %v9449_v62, 1 }
 0xd1d   : > { %v9437_v29 = vmax.f32 %v9435_v0, %v9436_v43  ;;  %v9457_v11 = vrot.slane %v9456_v50, 1 }
 0xd1e   : > { %v9444_v24 = vmax.f32 %v9442_v48, %v9443_v22  ;;  %v9451_v39 = vmax.f32 %v9449_v62, %v9450_v20  ;;  %v15995_v20 = vld [vmem:[#allocation37_spill] sm:$0xff] }
 0xd1f   : > { %v9458_v52 = vmax.f32 %v9456_v50, %v9457_v11  ;;  %v15375_v43 = vsel %vm9515_vm10, %v9437_v29, -inf  ;;  %v15988_v29 = vld [vmem:[#allocation32_spill] sm:$0xff]  ;;  %v15990_v11 = vld [vmem:[#allocation14_spill] sm:$0xff]  ;;  %v15996_v50 = vld [vmem:[#allocation35_spill] sm:$0xff] }
 0xd20   : > { %v9698_v0 = vmax.f32 %v15375_v43, %v15119_v59  ;;  %v15387_v48 = vsel %vm9515_vm10, %v9444_v24, -inf  ;;  %v15390_v62 = vsel %vm9515_vm10, %v9451_v39, -inf  ;;  %v15404_v59 = vsel %vm9515_vm10, %v15121_v46, -inf  ;;  %v15993_v46 = vld [vmem:[#allocation15_spill] sm:$0xff] }
 0xd21   : > { %v9701_v30 = vmax.f32 %v15387_v48, %v15124_v16  ;;  %v15400_v22 = vsel %vm9515_vm10, %v9458_v52, -inf  ;;  %v15989_v16 = vld [vmem:[#allocation30_spill] sm:$0xff]  ;;  %v15992_v52 = vld [vmem:[#allocation31_spill] sm:$0xff]  ;;  %v15998_v15 = vmax.f32 %v15996_v50, %v15997_v28  ;;  %v16008_v28 = vld [vmem:[#allocation36_spill] sm:$0xff] }
 0xd22   : > { %v15991_v24 = vmax.f32 %v15989_v16, %v15990_v11  ;;  %v15994_v43 = vmax.f32 %v15992_v52, %v15993_v46  ;;  %v16002_v16 = vmax.f32 %v16000_v8, %v16001_v55  ;;  %v16003_v11 = vld [vmem:[#allocation45_spill] sm:$0xff]  ;;  %v16012_v55 = vld [vmem:[#allocation19_spill] sm:$0xff] }
 0xd23   : > { %v9787_v4 = vsel %vm9774_vm12, %v15998_v15, %v15995_v20  ;;  %v16009_v50 = vld [vmem:[#allocation17_spill] sm:$0xff] }
 0xd24   : > { %v9775_v39 = vsel %vm9774_vm12, %v15991_v24, %v15988_v29  ;;  %v9794_v29 = vsel %vm9774_vm12, %v16002_v16, %v15999_v13  ;;  %v16004_v24 = vld [vmem:[#allocation43_spill] sm:$0xff]  ;;  %v16010_v15 = vmax.f32 %v16008_v28, %v16009_v50  ;;  %v16014_v16 = vld [vmem:[#allocation44_spill] sm:$0xff]  ;;  %v16022_v28 = vld [vmem:[#allocation65_spill] sm:$0xff] }
 0xd25   : > { %v9777_v48 = vsel %vm9776_vm13, %v15994_v43, %v9775_v39  ;;  %v16006_v19 = vmax.f32 %v16004_v24, %v16005_v56  ;;  %v16007_v39 = vmax.f32 %v15135_v27, %v14758_v36  ;;  %v16011_v43 = vld [vmem:[#allocation40_spill] sm:$0xff]  ;;  %v16016_v56 = vmax.f32 %v16014_v16, %v16015_v63  ;;  %v16020_v24 = vld [vmem:[#allocation38_spill] sm:$0xff]  ;;  %v16029_v16 = vld [vmem:[#allocation33_spill] sm:$0xff] }
 0xd26   : > { %v9788_v20 = vsel %vm9776_vm13, %v16010_v15, %v9787_v4  ;;  %v16013_v8 = vmax.f32 %v16011_v43, %v16012_v55  ;;  %v16023_v50 = vld [vmem:[#allocation12_spill] sm:$0xff]  ;;  %v16025_v43 = vld [vmem:[#allocation67_spill] sm:$0xff]  ;;  %v16026_v55 = vld [vmem:[#allocation46_spill] sm:$0xff] }
 0xd27   : > { %v9801_v52 = vsel %vm9774_vm12, %v16006_v19, %v16003_v11  ;;  %v9779_v46 = vsel %vm9778_vm14, %v16007_v39, %v9777_v48  ;;  %v16017_v11 = vld [vmem:[#allocation34_spill] sm:$0xff]  ;;  %v16019_v48 = vld [vmem:[#allocation63_spill] sm:$0xff]  ;;  %v16024_v15 = vmax.f32 %v16022_v28, %v16023_v50  ;;  %v16027_v63 = vmax.f32 %v16025_v43, %v16026_v55  ;;  %v16037_v28 = vld [vmem:[#allocation68_spill] sm:$0xff] }
 0xd28   : > { %v9795_v13 = vsel %vm9776_vm13, %v16013_v8, %v9794_v29  ;;  %v9802_v19 = vsel %vm9776_vm13, %v16016_v56, %v9801_v52  ;;  %v16018_v36 = vmax.f32 %v15145_v58, %v16017_v11  ;;  %v16021_v39 = vmax.f32 %v16019_v48, %v16020_v24  ;;  %v16028_v8 = vld [vmem:[#allocation62_spill] sm:$0xff]  ;;  %v16031_v56 = vld [vmem:[#allocation64_spill] sm:$0xff]  ;;  %v16032_v11 = vld [vmem:[#allocation39_spill] sm:$0xff] }
 0xd29   : > { %v9796_v29 = vsel %vm9778_vm14, %v16024_v15, %v9795_v13  ;;  %v9803_v52 = vsel %vm9778_vm14, %v16027_v63, %v9802_v19  ;;  %v16030_v58 = vmax.f32 %v16028_v8, %v16029_v16  ;;  %v16034_v48 = vld [vmem:[#allocation66_spill] sm:$0xff]  ;;  %v16038_v50 = vld [vmem:[#allocation47_spill] sm:$0xff]  ;;  %v16040_v43 = vmax.f32 %v15178_v35, %v15984_v61  ;;  %v16047_v8 = vld [vmem:[#allocation48_spill] sm:$0xff] }
 0xd2a   : > { %v9781_v27 = vsel %vm9780_vm15, %v16018_v36, %v9779_v46  ;;  %v9789_v4 = vsel %vm9778_vm14, %v16021_v39, %v9788_v20  ;;  %v16033_v36 = vmax.f32 %v16031_v56, %v16032_v11  ;;  %v16035_v24 = vld [vmem:[#allocation42_spill] sm:$0xff]  ;;  %v16039_v15 = vmax.f32 %v16037_v28, %v16038_v50  ;;  %v16063_v28 = vld [vmem:[#allocation28_spill] sm:$0xff] }
 0xd2b   : > { %v9783_v46 = vsel %vm9782_vm0, %v16030_v58, %v9781_v27  ;;  %v16036_v39 = vmax.f32 %v16034_v48, %v16035_v24  ;;  %v16041_v55 = vmax.f32 %v15204_v18, %v15986_v5  ;;  %v16042_v63 = vmax.f32 %v15222_v53, %v14908_v45  ;;  %v16046_v5 = vld [vmem:[#allocation50_spill] sm:$0xff]  ;;  %v16055_v58 = vld [vmem:[#allocation24_spill] sm:$0xff] }
 0xd2c   : > { %v9790_v20 = vsel %vm9780_vm15, %v16033_v36, %v9789_v4  ;;  %v9804_v19 = vsel %vm9780_vm15, %v16039_v15, %v9803_v52  ;;  %v9785_v27 = vsel %vm9784_vm1, %v9539_v17, %v9783_v46  ;;  %v16044_v35 = vmax.f32 %v15328_v31, %v15332_v38  ;;  %v16048_v45 = vld [vmem:[#allocation22_spill] sm:$0xff]  ;;  %v16058_v36 = vld [vmem:[#allocation56_spill] sm:$0xff] }
 0xd2d   : > { %v9797_v13 = vsel %vm9780_vm15, %v16036_v39, %v9796_v29  ;;  %v9791_v4 = vsel %vm9782_vm0, %v16040_v43, %v9790_v20  ;;  %v9805_v52 = vsel %vm9782_vm0, %v16042_v63, %v9804_v19  ;;  %v16045_v18 = vmax.f32 %v15340_v40, %v15344_v47  ;;  %9843 = vst.msk [vmem:[%s15515_s24] sm:$0xff] %vm9515_vm10, %v9785_v27  ;;  %v16053_v40 = vld [vmem:[#allocation55_spill] sm:$0xff]  ;;  %v16054_v47 = vld [vmem:[#allocation53_spill] sm:$0xff]  ;;  %v16057_v11 = vld [vmem:[#allocation58_spill] sm:$0xff] }
 0xd2e   : > { %v9798_v29 = vsel %vm9782_vm0, %v16041_v55, %v9797_v13  ;;  %v9792_v23 = vsel %vm9784_vm1, %v16043_v57, %v9791_v4  ;;  %v16049_v53 = vmax.f32 %v16047_v8, %v16048_v45  ;;  %v16052_v31 = vmax.f32 %v16050_v49, %v16051_v44  ;;  %v16059_v20 = vld [vmem:[#allocation26_spill] sm:$0xff]  ;;  %v16061_v39 = vld [vmem:[#allocation61_spill] sm:$0xff]  ;;  %v16062_v13 = vld [vmem:[#allocation59_spill] sm:$0xff] }
 0xd2f   : > { %v9799_v17 = vsel %vm9784_vm1, %v16044_v35, %v9798_v29  ;;  %v9806_v61 = vsel %vm9784_vm1, %v16045_v18, %v9805_v52  ;;  %v16056_v46 = vmax.f32 %v16054_v47, %v16055_v58  ;;  %v16060_v48 = vmax.f32 %v16058_v36, %v16059_v20  ;;  %9844 = vst.msk [vmem:[%s15515_s24 + $0x8] sm:$0xff] %vm9515_vm10, %v9792_v23  ;;  %v16065_v19 = vld [vmem:[#allocation69_spill] sm:$0xff]  ;;  %v16066_v27 = vld [vmem:[#allocation51_spill] sm:$0xff]  ;;  %v16068_v55 = vld [vmem:[#allocation54_spill] sm:$0xff] }
 0xd30   : > { %v9808_v16 = vsel %vm9774_vm12, %v16049_v53, %v16046_v5  ;;  %v16064_v50 = vmax.f32 %v16062_v13, %v16063_v28  ;;  %9845 = vst.msk [vmem:[%s15515_s24 + $0x10] sm:$0xff] %vm9515_vm10, %v9799_v17  ;;  %9846 = vst.msk [vmem:[%s15515_s24 + $0x18] sm:$0xff] %vm9515_vm10, %v9806_v61  ;;  %v16067_v43 = vmax.f32 %v16065_v19, %v16066_v27  ;;  %v16069_v29 = vld [vmem:[#allocation25_spill] sm:$0xff]  ;;  %v16072_v35 = vld [vmem:[#allocation27_spill] sm:$0xff] }
 0xd31   : > { %v9809_v38 = vsel %vm9776_vm13, %v16052_v31, %v9808_v16  ;;  %v9815_v56 = vsel %vm9774_vm12, %v16056_v46, %v16053_v40  ;;  %v9822_v24 = vsel %vm9774_vm12, %v16060_v48, %v16057_v11  ;;  %v16070_v63 = vmax.f32 %v16068_v55, %v16069_v29  ;;  %v16071_v57 = vld [vmem:[#allocation57_spill] sm:$0xff]  ;;  %v16074_v5 = vld [vmem:[#allocation60_spill] sm:$0xff]  ;;  %v16077_v45 = vld [vmem:[#allocation70_spill] sm:$0xff] }
 0xd32   : > { %v9829_v15 = vsel %vm9774_vm12, %v16064_v50, %v16061_v39  ;;  %v9810_v4 = vsel %vm9778_vm14, %v16067_v43, %v9809_v38  ;;  %v16073_v18 = vmax.f32 %v16071_v57, %v16072_v35  ;;  %v16075_v17 = vld [vmem:[#allocation29_spill] sm:$0xff]  ;;  %v16078_v53 = vld [vmem:[#allocation52_spill] sm:$0xff]  ;;  %v16080_v44 = vmax.f32 %v15272_v51, %v15013_v33 }
 0xd33   : > { %v9816_v52 = vsel %vm9776_vm13, %v16070_v63, %v9815_v56  ;;  %v16076_v8 = vmax.f32 %v16074_v5, %v16075_v17  ;;  %v16079_v16 = vmax.f32 %v16077_v45, %v16078_v53  ;;  %v16081_v38 = vmax.f32 %v15294_v54, %v15059_v32 }
 0xd34   : > { %v9823_v23 = vsel %vm9776_vm13, %v16073_v18, %v9822_v24  ;;  %v9817_v31 = vsel %vm9778_vm14, %v16080_v44, %v9816_v52  ;;  %v16082_v58 = vmax.f32 %v15256_v26, %v14969_v1  ;;  %v16083_v33 = vmax.f32 %v15279_v37, %v15016_v25 }
 0xd35   : > { %v9830_v61 = vsel %vm9776_vm13, %v16076_v8, %v9829_v15  ;;  %v9811_v49 = vsel %vm9780_vm15, %v16079_v16, %v9810_v4  ;;  %v9824_v40 = vsel %vm9778_vm14, %v16081_v38, %v9823_v23  ;;  %v16084_v32 = vmax.f32 %v15301_v14, %v15064_v9 }
 0xd36   : > { %v9831_v47 = vsel %vm9778_vm14, %v9698_v0, %v9830_v61  ;;  %v9812_v46 = vsel %vm9782_vm0, %v16082_v58, %v9811_v49  ;;  %v9818_v51 = vsel %vm9780_vm15, %v16083_v33, %v9817_v31  ;;  %v16085_v1 = vmax.f32 %v15352_v7, %v15356_v12 }
 0xd37   : > { %v9825_v54 = vsel %vm9780_vm15, %v16084_v32, %v9824_v40  ;;  %v9832_v0 = vsel %vm9780_vm15, %v9701_v30, %v9831_v47  ;;  %v16086_v26 = vmax.f32 %v15282_v42, %v15026_v3  ;;  %v16087_v37 = vmax.f32 %v15304_v2, %v15067_v21 }
 0xd38   : > { %v9813_v25 = vsel %vm9784_vm1, %v16085_v1, %v9812_v46  ;;  %v16088_v30 = vmax.f32 %v15390_v62, %v15128_v6  ;;  %v16089_v7 = vmax.f32 %v15364_v34, %v15368_v10  ;;  %v16090_v42 = vmax.f32 %v15378_v60, %v15382_v41 }
 0xd39   : > { %v9819_v9 = vsel %vm9782_vm0, %v16086_v26, %v9818_v51  ;;  %v9826_v14 = vsel %vm9782_vm0, %v16087_v37, %v9825_v54  ;;  %v16091_v6 = vmax.f32 %v15400_v22, %v15404_v59  ;;  %9847 = vst.msk [vmem:[%s15515_s24 + $0x20] sm:$0xff] %vm9515_vm10, %v9813_v25 }
 0xd3a   : > { %v9833_v56 = vsel %vm9782_vm0, %v16088_v30, %v9832_v0  ;;  %v9820_v3 = vsel %vm9784_vm1, %v16089_v7, %v9819_v9  ;;  %v9827_v21 = vsel %vm9784_vm1, %v16090_v42, %v9826_v14 }
 0xd3b   : > { %v9834_v2 = vsel %vm9784_vm1, %v16091_v6, %v9833_v56  ;;  %9848 = vst.msk [vmem:[%s15515_s24 + $0x28] sm:$0xff] %vm9515_vm10, %v9820_v3  ;;  %9849 = vst.msk [vmem:[%s15515_s24 + $0x30] sm:$0xff] %vm9515_vm10, %v9827_v21 }
 0xd3c   : > { %9850 = vst.msk [vmem:[%s15515_s24 + $0x38] sm:$0xff] %vm9515_vm10, %v9834_v2 }
 0xd3d   : > { %10539 = shalt.err (!%p10536_p3)
}
 0xd3e   : > { %s10540_s25 = scalar_lea.hbm %s15591_s12, 1024  ;;  %s10544_s15 = scalar_lea.hbm %s15686_s11, 2048 }
 0xd3f   : > { %p10541_p4 = scmp.ne.s32.totalorder %s15591_s12, %s10540_s25  ;;  %p10545_p9 = scmp.lt.u32.totalorder %s15591_s12, %s15686_s11 }
 0xd40   : > { %p10546_p10 = scmp.lt.u32.totalorder %s10544_s15, %s10540_s25  ;;  %p10548_p12 = scmp.lt.u32.totalorder %s10540_s25, %s15591_s12 }
 0xd41   : > { %p10542_p7 = pnand %p10541_p4, %p10707_p5 }
 0xd42   : > { %p10547_p11 = por %p10546_p10, %p10545_p9 }
 0xd43   : > { %p10543_p8 = pneg %p10542_p7 }
 0xd44   : > { %p10549_p13 = por %p10548_p12, %p10547_p11 }
 0xd46   : > { %p10550_p0 = pnand %p10549_p13, %p10543_p8 }
 0xd48   : > { %10553 = shalt.err (!%p10550_p0)
}
 0xd49   : > { %s10608_s13 = smov 128  }
 0xd4a   : > { %10465 = dma.vmem_to_hbm [thread:$0]  (%p10707_p5), %s15609_s21, 1024, %s15591_s12, %s15633_s30, %s10608_s13, %s10608_s13, %s15911_s22  }
 0xd4b PF: > { %p10471_p1 = scmp.ge.s32.totalorder %s10588_s20, 2  ;;  %s9880_s0 = sand.u32 1, %s10576_s17  }
 0xd4c   : > { %s9881_s14 = scalar_lea.sflag [#allocation6], %s9880_s0 }
 0xd4d   : > { %p10468_p2 = pnand %p10471_p1, %p10711_p6 }
 0xd4f   : > { %10571 = dma.done.wait (!%p10468_p2), %s9881_s14, 1024  }
 0xd50   : > { %10573 = vsyncadd (!%p10468_p2), %s9881_s14, 4294966272  ;;  %p21_p3 = scmp.ge.s32.totalorder %s10694_s23, 4   ;;  %s16092_s17 = smov %s10580_s18 }
 0xd51   : > { %s16093_s18 = smov %s10584_s19  ;;  %s16094_s19 = smov %s10705_s26 }
 0xd52   : > { %s16095_s20 = smov %s10694_s23  ;;  %23 = sbr.rel (!%p21_p3) target bundleno = 5 (0x5), region = 105 }
 0xd59   :  { %9886 = vsyncpa [#allocation6], 1 }
 0xd5a   :  { %9888 = vsyncpa [#allocation6 + $0x1], 1 }

</bundles_post_ra>
